<compile_context>
chip_gen: v7x
topology: tpu7x:2x2x1
jax: 0.10.0
libtpu: 0.0.40
codegen_flags: <defaults>
</compile_context>

<pallas_src>
import jax
import jax.numpy as jnp
from jax.experimental import pallas as pl
from jax.experimental.pallas import tpu as pltpu


D_IN = 28 * 28           # 784
D_IN_PAD = 896           # 7 * 128  (lane-aligned K for the first matmul)
D1, D2, D3 = 1024, 512, 256
D_OUT_PAD = 128          # last layer N padded 1 -> 128 for lane-dense stores


def _round_up(x, m):
    return ((x + m - 1) // m) * m


def _leaky_relu(x, slope=0.2):
    return jnp.where(x > 0, x, slope * x)


def mlp_kernel(x_ref,
               w1_ref, b1_ref,
               w2_ref, b2_ref,
               w3_ref, b3_ref,
               w4_ref, b4_ref,
               o_ref):
    # x_ref: (TB, 896) bf16; weights bf16; biases f32; o_ref: (TB, 128) f32
    x = x_ref[...]

    h = jnp.dot(x, w1_ref[...], preferred_element_type=jnp.float32)   # (TB, 1024)
    h = _leaky_relu(h + b1_ref[...])          # bias + activation in f32
    h = h.astype(jnp.bfloat16)                # dropout (eval mode) -> identity

    h = jnp.dot(h, w2_ref[...], preferred_element_type=jnp.float32)   # (TB, 512)
    h = _leaky_relu(h + b2_ref[...])
    h = h.astype(jnp.bfloat16)

    h = jnp.dot(h, w3_ref[...], preferred_element_type=jnp.float32)   # (TB, 256)
    h = _leaky_relu(h + b3_ref[...])
    h = h.astype(jnp.bfloat16)

    out = jnp.dot(h, w4_ref[...], preferred_element_type=jnp.float32)  # (TB, 128)
    o_ref[...] = (out + b4_ref[...]).astype(o_ref.dtype)


def discriminator_mnist_fc(x, params, tb=None):
    """x: (B, 1, 28, 28) float32.  Returns (B, 1) float32."""
    B = x.shape[0]
    x_flat = x.reshape((B, D_IN)).astype(jnp.float32)

    # Batch tile: at least 128 rows (MXU M-occupancy), at most 512.
    if tb is None:
        tb = min(512, _round_up(max(B, 1), 128))
    B_pad = _round_up(B, tb)
    n_tiles = B_pad // tb

    # Pad/cast input: (B_pad, 896) bf16, zero-padded rows/features.
    x_p = jnp.zeros((B_pad, D_IN_PAD), jnp.bfloat16)
    x_p = x_p.at[:B, :D_IN].set(x_flat.astype(jnp.bfloat16))

    (w1, b1), (w2, b2), (w3, b3), (w4, b4) = params

    # Weights in bf16; pad w1 rows 784->896 with zeros; pad w4 cols 1->128.
    w1p = jnp.zeros((D_IN_PAD, D1), jnp.bfloat16).at[:D_IN, :].set(w1.astype(jnp.bfloat16))
    w2p = w2.astype(jnp.bfloat16)
    w3p = w3.astype(jnp.bfloat16)
    w4p = jnp.zeros((D3, D_OUT_PAD), jnp.bfloat16).at[:, :1].set(w4.astype(jnp.bfloat16))

    b1f = b1.astype(jnp.float32)
    b2f = b2.astype(jnp.float32)
    b3f = b3.astype(jnp.float32)
    b4p = jnp.zeros((1, D_OUT_PAD), jnp.float32).at[:, :1].set(b4.astype(jnp.float32))

    def const_spec(shape):
        # Weight/bias blocks: full array, same block for every grid step
        # -> stays VMEM-resident across the whole grid.
        return pl.BlockSpec(shape, lambda i: (0, 0))

    fn = pl.pallas_call(
        mlp_kernel,
        out_shape=jax.ShapeDtypeStruct((B_pad, D_OUT_PAD), jnp.float32),
        grid=(n_tiles,),
        in_specs=[
            pl.BlockSpec((tb, D_IN_PAD), lambda i: (i, 0)),   # x tile
            const_spec((D_IN_PAD, D1)), const_spec((1, D1)),
            const_spec((D1, D2)),       const_spec((1, D2)),
            const_spec((D2, D3)),       const_spec((1, D3)),
            const_spec((D3, D_OUT_PAD)), const_spec((1, D_OUT_PAD)),
        ],
        out_specs=pl.BlockSpec((tb, D_OUT_PAD), lambda i: (i, 0)),
        compiler_params=pltpu.CompilerParams(
            dimension_semantics=("parallel",),
            vmem_limit_bytes=48 * 1024 * 1024,
        ),
    )
    out = fn(x_p, w1p, b1f, w2p, b2f, w3p, b3f, w4p, b4p)
    return out[:B, :1]


def init_params(key):
    """Weight layout: (in_features, out_features); bias layout: (1, out_features)."""
    dims = [(D_IN, D1), (D1, D2), (D2, D3), (D3, 1)]
    params = []
    for fan_in, fan_out in dims:
        kw, kb, key = jax.random.split(key, 3)
        bound = 1.0 / jnp.sqrt(fan_in)  # matches nn.Linear default init range
        w = jax.random.uniform(kw, (fan_in, fan_out), jnp.float32, -bound, bound)
        b = jax.random.uniform(kb, (1, fan_out), jnp.float32, -bound, bound)
        params.append((w, b))
    return params


def reference_forward_bf16(x, params):
    """Plain-JAX reference mirroring the kernel's bf16-in / f32-accumulate math."""
    B = x.shape[0]
    h = x.reshape((B, D_IN)).astype(jnp.bfloat16)
    for i, (w, b) in enumerate(params):
        h = jnp.dot(h, w.astype(jnp.bfloat16),
                    preferred_element_type=jnp.float32) + b.astype(jnp.float32)
        if i < 3:
            h = jnp.where(h > 0, h, 0.2 * h).astype(jnp.bfloat16)
    return h


if __name__ == "__main__":
    key = jax.random.PRNGKey(0)
    kx, kp = jax.random.split(key)

    batch = 2
    x = jax.random.normal(kx, (batch, 1, 28, 28), jnp.float32)
    params = init_params(kp)

    out = discriminator_mnist_fc(x, params)
    out = jax.block_until_ready(out)

    ref = reference_forward_bf16(x, params)
    assert out.shape == (batch, 1), out.shape
    assert jnp.allclose(out, ref, atol=1e-2, rtol=1e-2), (out, ref)

    print("KERNEL_OK")
</pallas_src>

<mosaic_0001>
module attributes {stable_mosaic.version = 11 : i64} {
  func.func @mlp_kernel(%arg0: i32, %arg1: memref<128x896xbf16, #tpu.memory_space<vmem>>, %arg2: memref<896x1024xbf16, #tpu.memory_space<vmem>>, %arg3: memref<1x1024xf32, #tpu.memory_space<vmem>>, %arg4: memref<1024x512xbf16, #tpu.memory_space<vmem>>, %arg5: memref<1x512xf32, #tpu.memory_space<vmem>>, %arg6: memref<512x256xbf16, #tpu.memory_space<vmem>>, %arg7: memref<1x256xf32, #tpu.memory_space<vmem>>, %arg8: memref<256x128xbf16, #tpu.memory_space<vmem>>, %arg9: memref<1x128xf32, #tpu.memory_space<vmem>>, %arg10: memref<128x128xf32, #tpu.memory_space<vmem>>) attributes {dimension_semantics = [#tpu.dimension_semantics<parallel>], iteration_bounds = array<i64: 1>, scalar_prefetch = 0 : i64, scratch_operands = 0 : i64, tpu.core_type = #tpu.core_type<tc>, window_params = [{transform_indices = @transform_0, window_bounds = array<i64: 128, 896>}, {pipeline_mode = #tpu.pipeline_mode<synchronous>, transform_indices = @transform_1, window_bounds = array<i64: 896, 1024>}, {pipeline_mode = #tpu.pipeline_mode<synchronous>, transform_indices = @transform_2, window_bounds = array<i64: 1, 1024>}, {pipeline_mode = #tpu.pipeline_mode<synchronous>, transform_indices = @transform_3, window_bounds = array<i64: 1024, 512>}, {pipeline_mode = #tpu.pipeline_mode<synchronous>, transform_indices = @transform_4, window_bounds = array<i64: 1, 512>}, {pipeline_mode = #tpu.pipeline_mode<synchronous>, transform_indices = @transform_5, window_bounds = array<i64: 512, 256>}, {pipeline_mode = #tpu.pipeline_mode<synchronous>, transform_indices = @transform_6, window_bounds = array<i64: 1, 256>}, {pipeline_mode = #tpu.pipeline_mode<synchronous>, transform_indices = @transform_7, window_bounds = array<i64: 256, 128>}, {pipeline_mode = #tpu.pipeline_mode<synchronous>, transform_indices = @transform_8, window_bounds = array<i64: 1, 128>}, {transform_indices = @transform_9, window_bounds = array<i64: 128, 128>}]} {
    %c0 = arith.constant 0 : index
    %c0_0 = arith.constant 0 : index
    %0 = vector.load %arg1[%c0, %c0_0] : memref<128x896xbf16, #tpu.memory_space<vmem>>, vector<128x896xbf16>
    %c0_1 = arith.constant 0 : index
    %c0_2 = arith.constant 0 : index
    %1 = vector.load %arg2[%c0_1, %c0_2] : memref<896x1024xbf16, #tpu.memory_space<vmem>>, vector<896x1024xbf16>
    %cst = arith.constant dense<0.000000e+00> : vector<128x1024xf32>
    %2 = tpu.matmul %0, %1, %cst {dimension_numbers = #tpu.dot_dimension_numbers<[1], [0], [0], [1], [0, 0, 1, 1], [], []>} : vector<128x896xbf16>, vector<896x1024xbf16>, vector<128x1024xf32> -> vector<128x1024xf32>
    %c0_3 = arith.constant 0 : index
    %c0_4 = arith.constant 0 : index
    %3 = vector.load %arg3[%c0_3, %c0_4] : memref<1x1024xf32, #tpu.memory_space<vmem>>, vector<1x1024xf32>
    %4 = vector.broadcast %3 : vector<1x1024xf32> to vector<128x1024xf32>
    %5 = arith.addf %2, %4 : vector<128x1024xf32>
    %cst_5 = arith.constant 0.000000e+00 : f32
    %6 = vector.broadcast %cst_5 : f32 to vector<128x1024xf32>
    %7 = arith.cmpf ogt, %5, %6 : vector<128x1024xf32>
    %cst_6 = arith.constant 2.000000e-01 : f32
    %8 = vector.broadcast %cst_6 : f32 to vector<128x1024xf32>
    %9 = arith.mulf %8, %5 : vector<128x1024xf32>
    %10 = arith.select %7, %5, %9 : vector<128x1024xi1>, vector<128x1024xf32>
    %11 = arith.truncf %10 : vector<128x1024xf32> to vector<128x1024xbf16>
    %c0_7 = arith.constant 0 : index
    %c0_8 = arith.constant 0 : index
    %12 = vector.load %arg4[%c0_7, %c0_8] : memref<1024x512xbf16, #tpu.memory_space<vmem>>, vector<1024x512xbf16>
    %cst_9 = arith.constant dense<0.000000e+00> : vector<128x512xf32>
    %13 = tpu.matmul %11, %12, %cst_9 {dimension_numbers = #tpu.dot_dimension_numbers<[1], [0], [0], [1], [0, 0, 1, 1], [], []>} : vector<128x1024xbf16>, vector<1024x512xbf16>, vector<128x512xf32> -> vector<128x512xf32>
    %c0_10 = arith.constant 0 : index
    %c0_11 = arith.constant 0 : index
    %14 = vector.load %arg5[%c0_10, %c0_11] : memref<1x512xf32, #tpu.memory_space<vmem>>, vector<1x512xf32>
    %15 = vector.broadcast %14 : vector<1x512xf32> to vector<128x512xf32>
    %16 = arith.addf %13, %15 : vector<128x512xf32>
    %cst_12 = arith.constant 0.000000e+00 : f32
    %17 = vector.broadcast %cst_12 : f32 to vector<128x512xf32>
    %18 = arith.cmpf ogt, %16, %17 : vector<128x512xf32>
    %cst_13 = arith.constant 2.000000e-01 : f32
    %19 = vector.broadcast %cst_13 : f32 to vector<128x512xf32>
    %20 = arith.mulf %19, %16 : vector<128x512xf32>
    %21 = arith.select %18, %16, %20 : vector<128x512xi1>, vector<128x512xf32>
    %22 = arith.truncf %21 : vector<128x512xf32> to vector<128x512xbf16>
    %c0_14 = arith.constant 0 : index
    %c0_15 = arith.constant 0 : index
    %23 = vector.load %arg6[%c0_14, %c0_15] : memref<512x256xbf16, #tpu.memory_space<vmem>>, vector<512x256xbf16>
    %cst_16 = arith.constant dense<0.000000e+00> : vector<128x256xf32>
    %24 = tpu.matmul %22, %23, %cst_16 {dimension_numbers = #tpu.dot_dimension_numbers<[1], [0], [0], [1], [0, 0, 1, 1], [], []>} : vector<128x512xbf16>, vector<512x256xbf16>, vector<128x256xf32> -> vector<128x256xf32>
    %c0_17 = arith.constant 0 : index
    %c0_18 = arith.constant 0 : index
    %25 = vector.load %arg7[%c0_17, %c0_18] : memref<1x256xf32, #tpu.memory_space<vmem>>, vector<1x256xf32>
    %26 = vector.broadcast %25 : vector<1x256xf32> to vector<128x256xf32>
    %27 = arith.addf %24, %26 : vector<128x256xf32>
    %cst_19 = arith.constant 0.000000e+00 : f32
    %28 = vector.broadcast %cst_19 : f32 to vector<128x256xf32>
    %29 = arith.cmpf ogt, %27, %28 : vector<128x256xf32>
    %cst_20 = arith.constant 2.000000e-01 : f32
    %30 = vector.broadcast %cst_20 : f32 to vector<128x256xf32>
    %31 = arith.mulf %30, %27 : vector<128x256xf32>
    %32 = arith.select %29, %27, %31 : vector<128x256xi1>, vector<128x256xf32>
    %33 = arith.truncf %32 : vector<128x256xf32> to vector<128x256xbf16>
    %c0_21 = arith.constant 0 : index
    %c0_22 = arith.constant 0 : index
    %34 = vector.load %arg8[%c0_21, %c0_22] : memref<256x128xbf16, #tpu.memory_space<vmem>>, vector<256x128xbf16>
    %cst_23 = arith.constant dense<0.000000e+00> : vector<128x128xf32>
    %35 = tpu.matmul %33, %34, %cst_23 {dimension_numbers = #tpu.dot_dimension_numbers<[1], [0], [0], [1], [0, 0, 1, 1], [], []>} : vector<128x256xbf16>, vector<256x128xbf16>, vector<128x128xf32> -> vector<128x128xf32>
    %c0_24 = arith.constant 0 : index
    %c0_25 = arith.constant 0 : index
    %36 = vector.load %arg9[%c0_24, %c0_25] : memref<1x128xf32, #tpu.memory_space<vmem>>, vector<1x128xf32>
    %37 = vector.broadcast %36 : vector<1x128xf32> to vector<128x128xf32>
    %38 = arith.addf %35, %37 : vector<128x128xf32>
    %c0_26 = arith.constant 0 : index
    %c0_27 = arith.constant 0 : index
    %39 = vector.load %arg10[%c0_26, %c0_27] : memref<128x128xf32, #tpu.memory_space<vmem>>, vector<128x128xf32>
    tpu.vector_store %arg10[%c0_26, %c0_27], %38 {strides = array<i32>} : memref<128x128xf32, #tpu.memory_space<vmem>>, vector<128x128xf32>,
    return
  }
  func.func @transform_0(%arg0: i32) -> (i32, i32) {
    %c0_i32 = arith.constant 0 : i32
    %c0_i32_0 = arith.constant 0 : i32
    return %arg0, %c0_i32 : i32, i32
  }
  func.func @transform_1(%arg0: i32) -> (i32, i32) {
    %c0_i32 = arith.constant 0 : i32
    %c0_i32_0 = arith.constant 0 : i32
    %c0_i32_1 = arith.constant 0 : i32
    return %c0_i32, %c0_i32_0 : i32, i32
  }
  func.func @transform_2(%arg0: i32) -> (i32, i32) {
    %c0_i32 = arith.constant 0 : i32
    %c0_i32_0 = arith.constant 0 : i32
    %c0_i32_1 = arith.constant 0 : i32
    return %c0_i32, %c0_i32_0 : i32, i32
  }
  func.func @transform_3(%arg0: i32) -> (i32, i32) {
    %c0_i32 = arith.constant 0 : i32
    %c0_i32_0 = arith.constant 0 : i32
    %c0_i32_1 = arith.constant 0 : i32
    return %c0_i32, %c0_i32_0 : i32, i32
  }
  func.func @transform_4(%arg0: i32) -> (i32, i32) {
    %c0_i32 = arith.constant 0 : i32
    %c0_i32_0 = arith.constant 0 : i32
    %c0_i32_1 = arith.constant 0 : i32
    return %c0_i32, %c0_i32_0 : i32, i32
  }
  func.func @transform_5(%arg0: i32) -> (i32, i32) {
    %c0_i32 = arith.constant 0 : i32
    %c0_i32_0 = arith.constant 0 : i32
    %c0_i32_1 = arith.constant 0 : i32
    return %c0_i32, %c0_i32_0 : i32, i32
  }
  func.func @transform_6(%arg0: i32) -> (i32, i32) {
    %c0_i32 = arith.constant 0 : i32
    %c0_i32_0 = arith.constant 0 : i32
    %c0_i32_1 = arith.constant 0 : i32
    return %c0_i32, %c0_i32_0 : i32, i32
  }
  func.func @transform_7(%arg0: i32) -> (i32, i32) {
    %c0_i32 = arith.constant 0 : i32
    %c0_i32_0 = arith.constant 0 : i32
    %c0_i32_1 = arith.constant 0 : i32
    return %c0_i32, %c0_i32_0 : i32, i32
  }
  func.func @transform_8(%arg0: i32) -> (i32, i32) {
    %c0_i32 = arith.constant 0 : i32
    %c0_i32_0 = arith.constant 0 : i32
    %c0_i32_1 = arith.constant 0 : i32
    return %c0_i32, %c0_i32_0 : i32, i32
  }
  func.func @transform_9(%arg0: i32) -> (i32, i32) {
    %c0_i32 = arith.constant 0 : i32
    %c0_i32_0 = arith.constant 0 : i32
    return %arg0, %c0_i32 : i32, i32
  }
}

</mosaic_0001>

<bundles_post_ra>
// kernel: tpu_custom_call.1
= control target key start
LH: loop header
LB: loop body
LE: loop exit
PB: predicated region body
PF: predicated region fallthrough
CT: control target
= control target key end

     0   :  { %14 = vsyncpa [#allocation3], 0  ;;  %s13452_s0 = inlined_call_operand.hbm [shape: bf16[128,896], index: 0, kind: input, shape index: {}]   ;;  %s13453_s1 = inlined_call_operand.hbm [shape: bf16[896,1024], index: 1, kind: input, shape index: {}]   ;;  %s13454_s2 = inlined_call_operand.hbm [shape: f32[1,1024], index: 2, kind: input, shape index: {}]   ;;  %s13455_s3 = inlined_call_operand.hbm [shape: bf16[1024,512], index: 3, kind: input, shape index: {}]   ;;  %s13456_s4 = inlined_call_operand.hbm [shape: f32[1,512], index: 4, kind: input, shape index: {}]   ;;  %s13457_s5 = inlined_call_operand.hbm [shape: bf16[512,256], index: 5, kind: input, shape index: {}]   ;;  %s13458_s6 = inlined_call_operand.hbm [shape: f32[1,256], index: 6, kind: input, shape index: {}]   ;;  %s13459_s7 = inlined_call_operand.hbm [shape: bf16[256,128], index: 7, kind: input, shape index: {}]   ;;  %s13460_s8 = inlined_call_operand.hbm [shape: f32[1,128], index: 8, kind: input, shape index: {}]   ;;  %s13461_s9 = inlined_call_operand.hbm [shape: f32[128,128], index: 9, kind: output, shape index: {}]  }
   0x1   :  { %15 = vsyncpa [#allocation6], 0 }
   0x2   :  { %16 = vsyncpa [#allocation9], 0 }
   0x3   :  { %17 = vsyncpa [#allocation12], 0 }
   0x4   :  { %18 = vsyncpa [#allocation15], 0 }
   0x5   :  { %19 = vsyncpa [#allocation4], 0  ;;  %s11822_s30 = smov [#allocation5]   ;;  %s11590_s13 = scalar_lea.hbm %s13453_s1, 57344 }
   0x6   :  { %s37_s10 = sshll.u32 %s11822_s30, 4  ;;  %p11591_p0 = scmp.ne.s32.totalorder %s13453_s1, %s11590_s13  ;;  %s38_s10 = int_to_ptr.vmem [resolvable:$true] %s37_s10 }
   0x7   :  { %p11594_p1 = scmp.lt.u32.totalorder %s11590_s13, %s13453_s1 }
   0x9   :  { %p11596_p2 = pnand %p11594_p1, %p11591_p0 }
   0xb   :  { %11599 = shalt.err (!%p11596_p2)
}
   0xc   :  { %s11600_s18 = scalar_lea.vmem %s38_s10, 57344  ;;  %p11605_p4 = scmp.lt.s32.totalorder %s38_s10, %s38_s10 }
   0xd   :  { %p11601_p3 = scmp.ne.s32.totalorder %s38_s10, %s11600_s18  ;;  %p11606_p5 = scmp.lt.s32.totalorder %s11600_s18, %s11600_s18 }
   0xf   :  { %p11607_p6 = por %p11606_p5, %p11605_p4 }
  0x11   :  { %p11608_p7 = pnand %p11607_p6, %p11601_p3 }
  0x13   :  { %11611 = shalt.err (!%p11608_p7)
}
  0x14   :  { %s11823_s19 = smov 512   ;;  %s11824_s20 = smov 32  }
  0x15   :  { %43 = dma.hbm_to_vmem [thread:$0]  %s13453_s1, 57344, %s38_s10, [#allocation6], %s11823_s19, %s11823_s19, %s11824_s20  }
  0x16   :  { %s11825_s23 = smov [#allocation8]   ;;  %s11612_s27 = scalar_lea.hbm %s13455_s3, 32768 }
  0x17   :  { %s59_s24 = sshll.u32 %s11825_s23, 4  ;;  %p11613_p8 = scmp.ne.s32.totalorder %s13455_s3, %s11612_s27  ;;  %s60_s24 = int_to_ptr.vmem [resolvable:$true] %s59_s24 }
  0x18   :  { %p11616_p9 = scmp.lt.u32.totalorder %s11612_s27, %s13455_s3 }
  0x1a   :  { %p11618_p10 = pnand %p11616_p9, %p11613_p8 }
  0x1c   :  { %11621 = shalt.err (!%p11618_p10)
}
  0x1d   :  { %s11622_s12 = scalar_lea.vmem %s60_s24, 32768  ;;  %p11627_p12 = scmp.lt.s32.totalorder %s60_s24, %s60_s24 }
  0x1e   :  { %p11623_p11 = scmp.ne.s32.totalorder %s60_s24, %s11622_s12  ;;  %p11628_p13 = scmp.lt.s32.totalorder %s11622_s12, %s11622_s12 }
  0x20   :  { %p11629_p0 = por %p11628_p13, %p11627_p12 }
  0x22   :  { %p11630_p1 = pnand %p11629_p0, %p11623_p11 }
  0x24   :  { %11633 = shalt.err (!%p11630_p1)
}
  0x25   :  { %s11826_s1 = smov 256   ;;  %s11827_s10 = smov 16  }
  0x26   :  { %65 = dma.hbm_to_vmem [thread:$0]  %s13455_s3, 32768, %s60_s24, [#allocation9], %s11826_s1, %s11826_s1, %s11827_s10  }
  0x27   :  { %s11828_s15 = smov [#allocation11]   ;;  %s11634_s19 = scalar_lea.hbm %s13457_s5, 8192 }
  0x28   :  { %s81_s16 = sshll.u32 %s11828_s15, 4  ;;  %p11635_p2 = scmp.ne.s32.totalorder %s13457_s5, %s11634_s19  ;;  %s82_s16 = int_to_ptr.vmem [resolvable:$true] %s81_s16 }
  0x29   :  { %p11638_p3 = scmp.lt.u32.totalorder %s11634_s19, %s13457_s5 }
  0x2b   :  { %p11640_p4 = pnand %p11638_p3, %p11635_p2 }
  0x2d   :  { %11643 = shalt.err (!%p11640_p4)
}
  0x2e   :  { %s11644_s25 = scalar_lea.vmem %s82_s16, 8192  ;;  %p11649_p6 = scmp.lt.s32.totalorder %s82_s16, %s82_s16 }
  0x2f   :  { %p11645_p5 = scmp.ne.s32.totalorder %s82_s16, %s11644_s25  ;;  %p11650_p7 = scmp.lt.s32.totalorder %s11644_s25, %s11644_s25 }
  0x31   :  { %p11651_p8 = por %p11650_p7, %p11649_p6 }
  0x33   :  { %p11652_p9 = pnand %p11651_p8, %p11645_p5 }
  0x35   :  { %11655 = shalt.err (!%p11652_p9)
}
  0x36   :  { %s11829_s3 = smov 128   ;;  %s11830_s24 = smov 8  }
  0x37   :  { %87 = dma.hbm_to_vmem [thread:$0]  %s13457_s5, 8192, %s82_s16, [#allocation12], %s11829_s3, %s11829_s3, %s11830_s24  }
  0x38   :  { %s11831_s28 = smov [#allocation14]   ;;  %s11656_s12 = scalar_lea.hbm %s13459_s7, 2048 }
  0x39   :  { %s103_s29 = sshll.u32 %s11831_s28, 4  ;;  %p11657_p10 = scmp.ne.s32.totalorder %s13459_s7, %s11656_s12  ;;  %s104_s29 = int_to_ptr.vmem [resolvable:$true] %s103_s29 }
  0x3a   :  { %p11660_p11 = scmp.lt.u32.totalorder %s11656_s12, %s13459_s7 }
  0x3c   :  { %p11662_p12 = pnand %p11660_p11, %p11657_p10 }
  0x3e   :  { %11665 = shalt.err (!%p11662_p12)
}
  0x3f   :  { %s11666_s15 = scalar_lea.vmem %s104_s29, 2048  ;;  %p11671_p0 = scmp.lt.s32.totalorder %s104_s29, %s104_s29 }
  0x40   :  { %p11667_p13 = scmp.ne.s32.totalorder %s104_s29, %s11666_s15  ;;  %p11672_p1 = scmp.lt.s32.totalorder %s11666_s15, %s11666_s15 }
  0x42   :  { %p11673_p2 = por %p11672_p1, %p11671_p0 }
  0x44   :  { %p11674_p3 = pnand %p11673_p2, %p11667_p13 }
  0x46   :  { %11677 = shalt.err (!%p11674_p3)
}
  0x47   :  { %s11832_s5 = smov 64   ;;  %s11833_s16 = smov 4  }
  0x48   :  { %109 = dma.hbm_to_vmem [thread:$0]  %s13459_s7, 2048, %s104_s29, [#allocation15], %s11832_s5, %s11832_s5, %s11833_s16  }
  0x49   :  { %s11834_s19 = smov [#allocation2]   ;;  %s11678_s23 = scalar_lea.hbm %s13452_s0, 7168 }
  0x4a   :  { %s25_s20 = sshll.u32 %s11834_s19, 4  ;;  %p11679_p4 = scmp.ne.s32.totalorder %s13452_s0, %s11678_s23  ;;  %s26_s20 = int_to_ptr.vmem [resolvable:$true] %s25_s20 }
  0x4b   :  { %p11682_p5 = scmp.lt.u32.totalorder %s11678_s23, %s13452_s0 }
  0x4d   :  { %p11684_p6 = pnand %p11682_p5, %p11679_p4 }
  0x4f   :  { %11687 = shalt.err (!%p11684_p6)
}
  0x50   :  { %s11688_s30 = scalar_lea.vmem %s26_s20, 7168  ;;  %p11693_p8 = scmp.lt.s32.totalorder %s26_s20, %s26_s20 }
  0x51   :  { %p11689_p7 = scmp.ne.s32.totalorder %s26_s20, %s11688_s30  ;;  %p11694_p9 = scmp.lt.s32.totalorder %s11688_s30, %s11688_s30 }
  0x53   :  { %p11695_p10 = por %p11694_p9, %p11693_p8 }
  0x55   :  { %p11696_p11 = pnand %p11695_p10, %p11689_p7 }
  0x57   :  { %11699 = shalt.err (!%p11696_p11)
}
  0x58   :  { %s11835_s7 = smov 448   ;;  %s11836_s29 = smov 28  }
  0x59   :  { %31 = dma.hbm_to_vmem [thread:$0]  %s13452_s0, 7168, %s26_s20, [#allocation3], %s11835_s7, %s11835_s7, %s11836_s29  }
  0x5a   :  { %s11837_s1 = smov [#allocation7]   ;;  %s11838_s13 = smov [#allocation10]  }
  0x5b   :  { %s50_s10 = sshll.u32 %s11837_s1, 4  ;;  %s72_s14 = sshll.u32 %s11838_s13, 4  ;;  %s51_s10 = int_to_ptr.vmem [resolvable:$true] %s50_s10  ;;  %s73_s14 = int_to_ptr.vmem [resolvable:$true] %s72_s14 }
  0x5c   :  { %s11700_s16 = scalar_lea.hbm %s13454_s2, 128 }
  0x5d   :  { %p11701_p12 = scmp.ne.s32.totalorder %s13454_s2, %s11700_s16  ;;  %p11704_p13 = scmp.lt.u32.totalorder %s11700_s16, %s13454_s2 }
  0x5f   :  { %p11706_p0 = pnand %p11704_p13, %p11701_p12 }
  0x61   :  { %11709 = shalt.err (!%p11706_p0)
}
  0x62   :  { %s11710_s0 = scalar_lea.vmem %s51_s10, 128  ;;  %p11715_p2 = scmp.lt.s32.totalorder %s51_s10, %s51_s10 }
  0x63   :  { %p11711_p1 = scmp.ne.s32.totalorder %s51_s10, %s11710_s0  ;;  %p11716_p3 = scmp.lt.s32.totalorder %s11710_s0, %s11710_s0 }
  0x65   :  { %p11717_p4 = por %p11716_p3, %p11715_p2 }
  0x67   :  { %p11718_p5 = pnand %p11717_p4, %p11711_p1 }
  0x69   :  { %11721 = shalt.err (!%p11718_p5)
}
  0x6a   :  { %53 = dma.hbm_to_vmem [thread:$0]  %s13454_s2, 128, %s51_s10, [#allocation6]  }
  0x6b   :  { %s11722_s26 = scalar_lea.hbm %s13456_s4, 64 }
  0x6c   :  { %p11723_p6 = scmp.ne.s32.totalorder %s13456_s4, %s11722_s26  ;;  %p11726_p7 = scmp.lt.u32.totalorder %s11722_s26, %s13456_s4 }
  0x6e   :  { %p11728_p8 = pnand %p11726_p7, %p11723_p6 }
  0x70   :  { %11731 = shalt.err (!%p11728_p8)
}
  0x71   :  { %s11732_s29 = scalar_lea.vmem %s73_s14, 64  ;;  %p11737_p10 = scmp.lt.s32.totalorder %s73_s14, %s73_s14 }
  0x72   :  { %p11733_p9 = scmp.ne.s32.totalorder %s73_s14, %s11732_s29  ;;  %p11738_p11 = scmp.lt.s32.totalorder %s11732_s29, %s11732_s29 }
  0x74   :  { %p11739_p12 = por %p11738_p11, %p11737_p10 }
  0x76   :  { %p11740_p13 = pnand %p11739_p12, %p11733_p9 }
  0x78   :  { %11743 = shalt.err (!%p11740_p13)
}
  0x79   :  { %75 = dma.hbm_to_vmem [thread:$0]  %s13456_s4, 64, %s73_s14, [#allocation9]  }
  0x7a   :  { %s11839_s12 = smov [#allocation13]   ;;  %s11840_s10 = smov [#allocation16]  }
  0x7b   :  { %s94_s1 = sshll.u32 %s11839_s12, 4  ;;  %s116_s13 = sshll.u32 %s11840_s10, 4  ;;  %s95_s1 = int_to_ptr.vmem [resolvable:$true] %s94_s1  ;;  %s117_s13 = int_to_ptr.vmem [resolvable:$true] %s116_s13 }
  0x7c   :  { %s11744_s16 = scalar_lea.hbm %s13458_s6, 32 }
  0x7d   :  { %p11745_p0 = scmp.ne.s32.totalorder %s13458_s6, %s11744_s16  ;;  %p11748_p1 = scmp.lt.u32.totalorder %s11744_s16, %s13458_s6 }
  0x7f   :  { %p11750_p2 = pnand %p11748_p1, %p11745_p0 }
  0x81   :  { %11753 = shalt.err (!%p11750_p2)
}
  0x82   :  { %s11754_s4 = scalar_lea.vmem %s95_s1, 32  ;;  %p11759_p4 = scmp.lt.s32.totalorder %s95_s1, %s95_s1 }
  0x83   :  { %p11755_p3 = scmp.ne.s32.totalorder %s95_s1, %s11754_s4  ;;  %p11760_p5 = scmp.lt.s32.totalorder %s11754_s4, %s11754_s4 }
  0x85   :  { %p11761_p6 = por %p11760_p5, %p11759_p4 }
  0x87   :  { %p11762_p7 = pnand %p11761_p6, %p11755_p3 }
  0x89   :  { %11765 = shalt.err (!%p11762_p7)
}
  0x8a   :  { %97 = dma.hbm_to_vmem [thread:$0]  %s13458_s6, 32, %s95_s1, [#allocation12]  }
  0x8b   :  { %s11766_s23 = scalar_lea.hbm %s13460_s8, 16 }
  0x8c   :  { %p11767_p8 = scmp.ne.s32.totalorder %s13460_s8, %s11766_s23  ;;  %p11770_p9 = scmp.lt.u32.totalorder %s11766_s23, %s13460_s8 }
  0x8e   :  { %p11772_p10 = pnand %p11770_p9, %p11767_p8 }
  0x90   :  { %11775 = shalt.err (!%p11772_p10)
}
  0x91   :  { %s11776_s30 = scalar_lea.vmem %s117_s13, 16  ;;  %s11780_s7 = scalar_lea.vmem %s117_s13, 32 }
  0x92   :  { %p11777_p11 = scmp.ne.s32.totalorder %s117_s13, %s11776_s30  ;;  %p11781_p12 = scmp.lt.s32.totalorder %s117_s13, %s117_s13 }
  0x93   :  { %p11782_p13 = scmp.lt.s32.totalorder %s11780_s7, %s11776_s30 }
  0x95   :  { %p11783_p0 = por %p11782_p13, %p11781_p12 }
  0x97   :  { %p11784_p1 = pnand %p11783_p0, %p11777_p11 }
  0x99   :  { %11787 = shalt.err (!%p11784_p1)
}
  0x9a   :  { %119 = dma.hbm_to_vmem [thread:$0]  %s13460_s8, 16, %s117_s13, [#allocation15]  }
  0x9b   :  { %11810 = dma.done.wait [#allocation3], 7168  }
  0x9c   :  { %11811 = vsyncadd [#allocation3], 4294960128 }
  0x9d   :  { %11812 = dma.done.wait [#allocation6], 57472  }
  0x9e   :  { %11813 = vsyncadd [#allocation6], 4294909824 }
  0x9f   :  { %11814 = dma.done.wait [#allocation9], 32832  }
  0xa0   :  { %11815 = vsyncadd [#allocation9], 4294934464 }
  0xa1   :  { %11816 = dma.done.wait [#allocation12], 8224  }
  0xa2   :  { %11817 = vsyncadd [#allocation12], 4294959072 }
  0xa3   :  { %11818 = dma.done.wait [#allocation15], 2064  }
  0xa4   :  { %11819 = vsyncadd [#allocation15], 4294965232  ;;  %v13462_v0 = vmov 0   ;;  %v212_v1 = vld [vmem:[#allocation5] sm:$0xff]  ;;  %s11842_s8 = smov [#allocation17]  }
  0xa5   :  { %3601 = vmatprep.mubr.bf16.mxu1 %v13462_v0  ;;  %v216_v2 = vld [vmem:[#allocation5 + $0x20] sm:$0xff]  ;;  %s9159_s2 = sshll.u32 %s11842_s8, 4  ;;  %s9160_s2 = int_to_ptr.vmem [resolvable:$true] %s9159_s2 }
  0xa6   :  { %v596_v3 = vld [vmem:[#allocation5 + $0xc00] sm:$0xff]  ;;  %v9232_v4 = vcombine.high %v212_v1, %v216_v2  ;;  %v9231_v6 = vcombine.low %v212_v1, %v216_v2  ;;  %v213_v2 = vld [vmem:[#allocation5 + $0x8] sm:$0xff]  ;;  %s11788_s11 = scalar_lea.vmem %s9160_s2, 2048  ;;  %p11793_p3 = scmp.lt.s32.totalorder %s9160_s2, %s9160_s2 }
  0xa7   :  { %v600_v5 = vld [vmem:[#allocation5 + $0xc20] sm:$0xff]  ;;  %p11789_p2 = scmp.ne.s32.totalorder %s9160_s2, %s11788_s11  ;;  %p11794_p4 = scmp.lt.s32.totalorder %s11788_s11, %s11788_s11 }
  0xa8   :  { %v220_v7 = vld [vmem:[#allocation5 + $0x40] sm:$0xff]  ;;  %v9616_v9 = vcombine.high %v596_v3, %v600_v5  ;;  %v9615_v10 = vcombine.low %v596_v3, %v600_v5  ;;  %3230 = vmatprep.subr.bf16.mxu0 %v9232_v4  ;;  %v217_v4 = vld [vmem:[#allocation5 + $0x28] sm:$0xff] }
  0xa9   :  { %v224_v8 = vld [vmem:[#allocation5 + $0x60] sm:$0xff]  ;;  %3231 = vmatpush1.bf16.msra.mxu0 %v9231_v6  ;;  %p11795_p5 = por %p11794_p4, %p11793_p3 }
  0xaa   :  { %v9240_v11 = vcombine.high %v220_v7, %v224_v8  ;;  %v604_v12 = vld [vmem:[#allocation5 + $0xc40] sm:$0xff]  ;;  %3569 = vmatprep.subr.bf16.mxu1 %v9616_v9  ;;  %v9239_v19 = vcombine.low %v220_v7, %v224_v8  ;;  %v9234_v9 = vcombine.high %v213_v2, %v217_v4 }
  0xab   :  { %v608_v13 = vld [vmem:[#allocation5 + $0xc60] sm:$0xff]  ;;  %3570 = vmatpush1.bf16.msra.mxu1 %v9615_v10  ;;  %p11796_p6 = pnand %p11795_p5, %p11789_p2 }
  0xac   :  { %v228_v14 = vld [vmem:[#allocation5 + $0x80] sm:$0xff]  ;;  %v9624_v15 = vcombine.high %v604_v12, %v608_v13  ;;  %3232 = vmatprep.subr.bf16.mxu0 %v9240_v11  ;;  %v9623_v20 = vcombine.low %v604_v12, %v608_v13  ;;  %v221_v11 = vld [vmem:[#allocation5 + $0x48] sm:$0xff]  ;;  %v10949_v13 = vld [vmem:[#allocation2 + $0x18] ss:$28 sps:$4 sm:$0xff]  }
  0xad   :  { %v232_v16 = vld [vmem:[#allocation5 + $0xa0] sm:$0xff]  ;;  %3233 = vmatpush1.bf16.msra.mxu0 %v9239_v19  ;;  %v225_v12 = vld [vmem:[#allocation5 + $0x68] sm:$0xff] }
  0xae   :  { %v612_v17 = vld [vmem:[#allocation5 + $0xc80] sm:$0xff]  ;;  %v9248_v21 = vcombine.high %v228_v14, %v232_v16  ;;  %3571 = vmatprep.subr.bf16.mxu1 %v9624_v15  ;;  %v9247_v27 = vcombine.low %v228_v14, %v232_v16  ;;  %v9233_v15 = vcombine.low %v213_v2, %v217_v4 }
  0xaf   :  { %v616_v18 = vld [vmem:[#allocation5 + $0xca0] sm:$0xff]  ;;  %3572 = vmatpush1.bf16.msra.mxu1 %v9623_v20  ;;  %v229_v20 = vld [vmem:[#allocation5 + $0x88] sm:$0xff] }
  0xb0   :  { %v9632_v22 = vcombine.high %v612_v17, %v616_v18  ;;  %v236_v23 = vld [vmem:[#allocation5 + $0xc0] sm:$0xff]  ;;  %3234 = vmatprep.subr.bf16.mxu0 %v9248_v21  ;;  %v9631_v28 = vcombine.low %v612_v17, %v616_v18  ;;  %v9242_v17 = vcombine.high %v221_v11, %v225_v12  ;;  %v233_v21 = vld [vmem:[#allocation5 + $0xa8] sm:$0xff] }
  0xb1   :  { %v240_v24 = vld [vmem:[#allocation5 + $0xe0] sm:$0xff]  ;;  %3235 = vmatpush1.bf16.msra.mxu0 %v9247_v27 }
  0xb2   :  { %v620_v25 = vld [vmem:[#allocation5 + $0xcc0] sm:$0xff]  ;;  %v9256_v29 = vcombine.high %v236_v23, %v240_v24  ;;  %3573 = vmatprep.subr.bf16.mxu1 %v9632_v22  ;;  %v9255_v35 = vcombine.low %v236_v23, %v240_v24  ;;  %v9241_v23 = vcombine.low %v221_v11, %v225_v12 }
  0xb3   :  { %v624_v26 = vld [vmem:[#allocation5 + $0xce0] sm:$0xff]  ;;  %3574 = vmatpush1.bf16.msra.mxu1 %v9631_v28  ;;  %v237_v28 = vld [vmem:[#allocation5 + $0xc8] sm:$0xff] }
  0xb4   :  { %v9640_v30 = vcombine.high %v620_v25, %v624_v26  ;;  %v244_v31 = vld [vmem:[#allocation5 + $0x100] sm:$0xff]  ;;  %3236 = vmatprep.subr.bf16.mxu0 %v9256_v29  ;;  %v9639_v36 = vcombine.low %v620_v25, %v624_v26  ;;  %v9250_v25 = vcombine.high %v229_v20, %v233_v21  ;;  %v241_v29 = vld [vmem:[#allocation5 + $0xe8] sm:$0xff] }
  0xb5   :  { %v248_v32 = vld [vmem:[#allocation5 + $0x120] sm:$0xff]  ;;  %3237 = vmatpush1.bf16.msra.mxu0 %v9255_v35  ;;  %v9258_v35 = vcombine.high %v237_v28, %v241_v29 }
  0xb6   :  { %v628_v33 = vld [vmem:[#allocation5 + $0xd00] sm:$0xff]  ;;  %v9264_v37 = vcombine.high %v244_v31, %v248_v32  ;;  %3575 = vmatprep.subr.bf16.mxu1 %v9640_v30  ;;  %v9263_v43 = vcombine.low %v244_v31, %v248_v32  ;;  %v10950_v30 = vld [vmem:[#allocation2 + $0x50] ss:$28 sps:$4 sm:$0xff]   ;;  %v9249_v32 = vcombine.low %v229_v20, %v233_v21  ;;  %v10956_v21 = vld [vmem:[#allocation2 + $0xf8] ss:$28 sps:$4 sm:$0xff]  }
  0xb7   :  { %v632_v34 = vld [vmem:[#allocation5 + $0xd20] sm:$0xff]  ;;  %3576 = vmatpush1.bf16.msra.mxu1 %v9639_v36 }
  0xb8   :  { %v9648_v38 = vcombine.high %v628_v33, %v632_v34  ;;  %v252_v39 = vld [vmem:[#allocation5 + $0x140] sm:$0xff]  ;;  %3238 = vmatprep.subr.bf16.mxu0 %v9264_v37  ;;  %v9647_v44 = vcombine.low %v628_v33, %v632_v34  ;;  %v245_v37 = vld [vmem:[#allocation5 + $0x108] sm:$0xff] }
  0xb9   :  { %v256_v40 = vld [vmem:[#allocation5 + $0x160] sm:$0xff]  ;;  %3239 = vmatpush1.bf16.msra.mxu0 %v9263_v43 }
  0xba   :  { %v636_v41 = vld [vmem:[#allocation5 + $0xd40] sm:$0xff]  ;;  %v9272_v45 = vcombine.high %v252_v39, %v256_v40  ;;  %3577 = vmatprep.subr.bf16.mxu1 %v9648_v38  ;;  %v9271_v51 = vcombine.low %v252_v39, %v256_v40  ;;  %v249_v38 = vld [vmem:[#allocation5 + $0x128] sm:$0xff]  ;;  %v9257_v40 = vcombine.low %v237_v28, %v241_v29 }
  0xbb   :  { %v640_v42 = vld [vmem:[#allocation5 + $0xd60] sm:$0xff]  ;;  %3578 = vmatpush1.bf16.msra.mxu1 %v9647_v44  ;;  %v293_v28 = vld [vmem:[#allocation5 + $0x288] sm:$0xff] }
  0xbc   :  { %v9656_v46 = vcombine.high %v636_v41, %v640_v42  ;;  %v260_v47 = vld [vmem:[#allocation5 + $0x180] sm:$0xff]  ;;  %3240 = vmatprep.subr.bf16.mxu0 %v9272_v45  ;;  %v9655_v52 = vcombine.low %v636_v41, %v640_v42  ;;  %v9266_v42 = vcombine.high %v245_v37, %v249_v38  ;;  %v253_v45 = vld [vmem:[#allocation5 + $0x148] sm:$0xff] }
  0xbd   :  { %v264_v48 = vld [vmem:[#allocation5 + $0x1a0] sm:$0xff]  ;;  %3241 = vmatpush1.bf16.msra.mxu0 %v9271_v51  ;;  %v297_v29 = vld [vmem:[#allocation5 + $0x2a8] sm:$0xff] }
  0xbe   :  { %v644_v49 = vld [vmem:[#allocation5 + $0xd80] sm:$0xff]  ;;  %v9280_v53 = vcombine.high %v260_v47, %v264_v48  ;;  %3579 = vmatprep.subr.bf16.mxu1 %v9656_v46  ;;  %v9279_v59 = vcombine.low %v260_v47, %v264_v48  ;;  %v257_v46 = vld [vmem:[#allocation5 + $0x168] sm:$0xff] }
  0xbf   :  { %v648_v50 = vld [vmem:[#allocation5 + $0xda0] sm:$0xff]  ;;  %3580 = vmatpush1.bf16.msra.mxu1 %v9655_v52  ;;  %v9274_v51 = vcombine.high %v253_v45, %v257_v46 }
  0xc0   :  { %v268_v54 = vld [vmem:[#allocation5 + $0x1c0] sm:$0xff]  ;;  %v9664_v55 = vcombine.high %v644_v49, %v648_v50  ;;  %3242 = vmatprep.subr.bf16.mxu0 %v9280_v53  ;;  %v9663_v60 = vcombine.low %v644_v49, %v648_v50  ;;  %v9265_v49 = vcombine.low %v245_v37, %v249_v38  ;;  %v301_v37 = vld [vmem:[#allocation5 + $0x2c8] sm:$0xff] }
  0xc1   :  { %v272_v56 = vld [vmem:[#allocation5 + $0x1e0] sm:$0xff]  ;;  %3243 = vmatpush1.bf16.msra.mxu0 %v9279_v59  ;;  %v305_v38 = vld [vmem:[#allocation5 + $0x2e8] sm:$0xff] }
  0xc2   :  { %v652_v57 = vld [vmem:[#allocation5 + $0xdc0] sm:$0xff]  ;;  %v9288_v61 = vcombine.high %v268_v54, %v272_v56  ;;  %3581 = vmatprep.subr.bf16.mxu1 %v9664_v55  ;;  %v9287_v5 = vcombine.low %v268_v54, %v272_v56  ;;  %v261_v54 = vld [vmem:[#allocation5 + $0x188] sm:$0xff] }
  0xc3   :  { %v656_v58 = vld [vmem:[#allocation5 + $0xde0] sm:$0xff]  ;;  %3582 = vmatpush1.bf16.msra.mxu1 %v9663_v60  ;;  %v265_v55 = vld [vmem:[#allocation5 + $0x1a8] sm:$0xff] }
  0xc4   :  { %v276_v62 = vld [vmem:[#allocation5 + $0x200] sm:$0xff]  ;;  %v9672_v63 = vcombine.high %v652_v57, %v656_v58  ;;  %3244 = vmatprep.subr.bf16.mxu0 %v9288_v61  ;;  %v9671_v6 = vcombine.low %v652_v57, %v656_v58  ;;  %v9273_v57 = vcombine.low %v253_v45, %v257_v46  ;;  %v9282_v59 = vcombine.high %v261_v54, %v265_v55 }
  0xc5   :  { %v280_v1 = vld [vmem:[#allocation5 + $0x220] sm:$0xff]  ;;  %3245 = vmatpush1.bf16.msra.mxu0 %v9287_v5  ;;  %v9281_v4 = vcombine.low %v261_v54, %v265_v55  ;;  %v12026_v55 = vld [vmem:[#allocation2 + $0x70] ss:$28 sps:$4 sm:$0xff]  }
  0xc6   :  { %v12005_v3 = vld [vmem:[#allocation2 + $0x4] ss:$28 sps:$4 sm:$0xff]   ;;  %v9296_v7 = vcombine.high %v276_v62, %v280_v1  ;;  %3583 = vmatprep.subr.bf16.mxu1 %v9672_v63  ;;  %v9295_v14 = vcombine.low %v276_v62, %v280_v1  ;;  %v269_v62 = vld [vmem:[#allocation5 + $0x1c8] sm:$0xff] }
  0xc7   :  { %3262 = vmatprep.mubr.bf16.mxu0 %v12005_v3  ;;  %v284_v8 = vld [vmem:[#allocation5 + $0x240] sm:$0xff]  ;;  %3584 = vmatpush1.bf16.msra.mxu1 %v9671_v6  ;;  %v273_v63 = vld [vmem:[#allocation5 + $0x1e8] sm:$0xff] }
  0xc8   :  { %v288_v10 = vld [vmem:[#allocation5 + $0x260] sm:$0xff]  ;;  %3246 = vmatprep.subr.bf16.mxu0 %v9296_v7  ;;  %3682 = vmatprep.subr.bf16.mxu1 %v9234_v9  ;;  %v9290_v6 = vcombine.high %v269_v62, %v273_v63  ;;  %v277_v9 = vld [vmem:[#allocation5 + $0x208] sm:$0xff]  ;;  %v9289_v12 = vcombine.low %v269_v62, %v273_v63 }
  0xc9   :  { %v9304_v16 = vcombine.high %v284_v8, %v288_v10  ;;  %v292_v18 = vld [vmem:[#allocation5 + $0x280] sm:$0xff]  ;;  %3247 = vmatpush1.bf16.msra.mxu0 %v9295_v14  ;;  %v9303_v22 = vcombine.low %v284_v8, %v288_v10  ;;  %v281_v10 = vld [vmem:[#allocation5 + $0x228] sm:$0xff] }
  0xca   :  { %v296_v19 = vld [vmem:[#allocation5 + $0x2a0] sm:$0xff]  ;;  %3602 = vmatmul.mubr.bf16.vlgmr.msra.gmra.mrb[0].mxu1 %v10949_v13  ;;  %v9298_v14 = vcombine.high %v277_v9, %v281_v10  ;;  %v12028_v63 = vld [vmem:[#allocation2 + $0xac] ss:$28 sps:$4 sm:$0xff]  }
  0xcb   :  { %3683 = vmatpush1.bf16.msra.mxu1 %v9233_v15  ;;  %3248 = vmatprep.subr.bf16.mxu0 %v9304_v16  ;;  %v9312_v24 = vcombine.high %v292_v18, %v296_v19  ;;  %v300_v26 = vld [vmem:[#allocation5 + $0x2c0] sm:$0xff]  ;;  %v9311_v31 = vcombine.low %v292_v18, %v296_v19  ;;  %v285_v18 = vld [vmem:[#allocation5 + $0x248] sm:$0xff] }
  0xcc   :  { %3684 = vmatprep.subr.bf16.mxu1 %v9242_v17  ;;  %3611 = vmatprep.mubr.bf16.mxu1 %v13462_v0  ;;  %v304_v27 = vld [vmem:[#allocation5 + $0x2e0] sm:$0xff]  ;;  %v289_v19 = vld [vmem:[#allocation5 + $0x268] sm:$0xff] }
  0xcd   :  { %3249 = vmatpush1.bf16.msra.mxu0 %v9303_v22  ;;  %v9320_v33 = vcombine.high %v300_v26, %v304_v27  ;;  %v308_v34 = vld [vmem:[#allocation5 + $0x300] sm:$0xff]  ;;  %v9319_v39 = vcombine.low %v300_v26, %v304_v27  ;;  %v9297_v22 = vcombine.low %v277_v9, %v281_v10 }
  0xce   :  { %3250 = vmatprep.subr.bf16.mxu0 %v9312_v24  ;;  %v312_v36 = vld [vmem:[#allocation5 + $0x320] sm:$0xff]  ;;  %v9306_v24 = vcombine.high %v285_v18, %v289_v19 }
  0xcf   :  { %3685 = vmatpush1.bf16.msra.mxu1 %v9241_v23  ;;  %v9328_v41 = vcombine.high %v308_v34, %v312_v36  ;;  %v316_v43 = vld [vmem:[#allocation5 + $0x340] sm:$0xff]  ;;  %v9327_v48 = vcombine.low %v308_v34, %v312_v36  ;;  %v12019_v36 = vld [vmem:[#allocation2 + $0x38] ss:$28 sps:$4 sm:$0xff]  }
  0xd0   :  { %3686 = vmatprep.subr.bf16.mxu1 %v9250_v25  ;;  %v320_v44 = vld [vmem:[#allocation5 + $0x360] sm:$0xff]  ;;  %v12014_v25 = vld [vmem:[#allocation2 + $0x3c] ss:$28 sps:$4 sm:$0xff]  }
  0xd1   :  { %3251 = vmatpush1.bf16.msra.mxu0 %v9311_v31  ;;  %v10951_v47 = vld [vmem:[#allocation2 + $0x88] ss:$28 sps:$4 sm:$0xff]   ;;  %v9336_v50 = vcombine.high %v316_v43, %v320_v44  ;;  %v9335_v56 = vcombine.low %v316_v43, %v320_v44  ;;  %v10952_v1 = vld [vmem:[#allocation2 + $0xc0] ss:$28 sps:$4 sm:$0xff]   ;;  %v9305_v31 = vcombine.low %v285_v18, %v289_v19  ;;  %v9322_v43 = vcombine.high %v301_v37, %v305_v38  ;;  %v12021_v44 = vld [vmem:[#allocation2 + $0x74] ss:$28 sps:$4 sm:$0xff]  }
  0xd2   :  { %3612 = vmatmul.mubr.bf16.gmra.mrb[4].mxu1 %v10950_v30  ;;  %3252 = vmatprep.subr.bf16.mxu0 %v9320_v33  ;;  %v324_v52 = vld [vmem:[#allocation5 + $0x380] sm:$0xff]  ;;  %v9314_v33 = vcombine.high %v293_v28, %v297_v29 }
  0xd3   :  { %3687 = vmatpush1.bf16.msra.mxu1 %v9249_v32  ;;  %3621 = vmatprep.mubr.bf16.mxu1 %v13462_v0  ;;  %v328_v53 = vld [vmem:[#allocation5 + $0x3a0] sm:$0xff] }
  0xd4   :  { %3688 = vmatprep.subr.bf16.mxu1 %v9258_v35  ;;  %v9344_v58 = vcombine.high %v324_v52, %v328_v53  ;;  %v332_v60 = vld [vmem:[#allocation5 + $0x3c0] sm:$0xff]  ;;  %v9343_v2 = vcombine.low %v324_v52, %v328_v53 }
  0xd5   :  { %3253 = vmatpush1.bf16.msra.mxu0 %v9319_v39  ;;  %v336_v61 = vld [vmem:[#allocation5 + $0x3e0] sm:$0xff] }
  0xd6   :  { %3254 = vmatprep.subr.bf16.mxu0 %v9328_v41  ;;  %v9352_v5 = vcombine.high %v332_v60, %v336_v61  ;;  %v340_v7 = vld [vmem:[#allocation5 + $0x400] sm:$0xff]  ;;  %v9351_v11 = vcombine.low %v332_v60, %v336_v61  ;;  %v9313_v41 = vcombine.low %v293_v28, %v297_v29 }
  0xd7   :  { %3689 = vmatpush1.bf16.msra.mxu1 %v9257_v40  ;;  %v344_v8 = vld [vmem:[#allocation5 + $0x420] sm:$0xff]  ;;  %v10960_v40 = vld [vmem:[#allocation2 + $0x130] ss:$28 sps:$4 sm:$0xff]  }
  0xd8   :  { %3690 = vmatprep.subr.bf16.mxu1 %v9266_v42  ;;  %v9360_v13 = vcombine.high %v340_v7, %v344_v8  ;;  %v348_v15 = vld [vmem:[#allocation5 + $0x440] sm:$0xff]  ;;  %v9359_v20 = vcombine.low %v340_v7, %v344_v8 }
  0xd9   :  { %3255 = vmatpush1.bf16.msra.mxu0 %v9327_v48  ;;  %v352_v16 = vld [vmem:[#allocation5 + $0x460] sm:$0xff]  ;;  %v313_v48 = vld [vmem:[#allocation5 + $0x328] sm:$0xff] }
  0xda   :  { %3622 = vmatmul.mubr.bf16.gmra.mrb[8].mxu1 %v10951_v47  ;;  %3256 = vmatprep.subr.bf16.mxu0 %v9336_v50  ;;  %v12012_v17 = vld [vmem:[#allocation2] ss:$28 sps:$4 sm:$0xff]   ;;  %v9368_v23 = vcombine.high %v348_v15, %v352_v16  ;;  %v9367_v30 = vcombine.low %v348_v15, %v352_v16  ;;  %v309_v47 = vld [vmem:[#allocation5 + $0x308] sm:$0xff]  ;;  %v9321_v50 = vcombine.low %v301_v37, %v305_v38 }
  0xdb   :  { %3691 = vmatpush1.bf16.msra.mxu1 %v9265_v49  ;;  %3631 = vmatprep.mubr.bf16.mxu1 %v13462_v0  ;;  %v356_v26 = vld [vmem:[#allocation5 + $0x480] sm:$0xff]  ;;  %v9330_v52 = vcombine.high %v309_v47, %v313_v48  ;;  %v9329_v60 = vcombine.low %v309_v47, %v313_v48 }
  0xdc   :  { %3692 = vmatprep.subr.bf16.mxu1 %v9274_v51  ;;  %v360_v27 = vld [vmem:[#allocation5 + $0x4a0] sm:$0xff] }
  0xdd   :  { %3257 = vmatpush1.bf16.msra.mxu0 %v9335_v56  ;;  %v9376_v32 = vcombine.high %v356_v26, %v360_v27  ;;  %v364_v34 = vld [vmem:[#allocation5 + $0x4c0] sm:$0xff]  ;;  %v9375_v39 = vcombine.low %v356_v26, %v360_v27  ;;  %v317_v56 = vld [vmem:[#allocation5 + $0x348] sm:$0xff] }
  0xde   :  { %3258 = vmatprep.subr.bf16.mxu0 %v9344_v58  ;;  %v368_v35 = vld [vmem:[#allocation5 + $0x4e0] sm:$0xff]  ;;  %v345_v26 = vld [vmem:[#allocation5 + $0x428] sm:$0xff] }
  0xdf   :  { %3693 = vmatpush1.bf16.msra.mxu1 %v9273_v57  ;;  %v9384_v42 = vcombine.high %v364_v34, %v368_v35  ;;  %v372_v45 = vld [vmem:[#allocation5 + $0x500] sm:$0xff]  ;;  %v9383_v49 = vcombine.low %v364_v34, %v368_v35  ;;  %v321_v57 = vld [vmem:[#allocation5 + $0x368] sm:$0xff] }
  0xe0   :  { %3694 = vmatprep.subr.bf16.mxu1 %v9282_v59  ;;  %v376_v46 = vld [vmem:[#allocation5 + $0x520] sm:$0xff]  ;;  %v9338_v62 = vcombine.high %v317_v56, %v321_v57  ;;  %v9337_v7 = vcombine.low %v317_v56, %v321_v57  ;;  %v349_v34 = vld [vmem:[#allocation5 + $0x448] sm:$0xff] }
  0xe1   :  { %3259 = vmatpush1.bf16.msra.mxu0 %v9343_v2  ;;  %v9392_v51 = vcombine.high %v372_v45, %v376_v46  ;;  %v380_v53 = vld [vmem:[#allocation5 + $0x540] sm:$0xff]  ;;  %v9391_v58 = vcombine.low %v372_v45, %v376_v46  ;;  %v353_v35 = vld [vmem:[#allocation5 + $0x468] sm:$0xff] }
  0xe2   :  { %3632 = vmatmul.mubr.bf16.gmra.mrb[12].mxu1 %v10952_v1  ;;  %3260 = vmatprep.subr.bf16.mxu0 %v9352_v5  ;;  %v384_v54 = vld [vmem:[#allocation5 + $0x560] sm:$0xff]  ;;  %v329_v5 = vld [vmem:[#allocation5 + $0x3a8] sm:$0xff]  ;;  %v9369_v47 = vcombine.low %v349_v34, %v353_v35 }
  0xe3   :  { %3695 = vmatpush1.bf16.msra.mxu1 %v9281_v4  ;;  %3641 = vmatprep.mubr.bf16.mxu1 %v13462_v0  ;;  %v10964_v59 = vld [vmem:[#allocation2 + $0x168] ss:$28 sps:$4 sm:$0xff]   ;;  %v9400_v61 = vcombine.high %v380_v53, %v384_v54  ;;  %v10968_v16 = vld [vmem:[#allocation2 + $0x1a0] ss:$28 sps:$4 sm:$0xff]  }
  0xe4   :  { %3696 = vmatprep.subr.bf16.mxu1 %v9290_v6  ;;  %v388_v1 = vld [vmem:[#allocation5 + $0x580] sm:$0xff]  ;;  %v325_v4 = vld [vmem:[#allocation5 + $0x388] sm:$0xff]  ;;  %v9399_v6 = vcombine.low %v380_v53, %v384_v54 }
  0xe5   :  { %3261 = vmatpush1.bf16.msra.mxu0 %v9351_v11  ;;  %v392_v2 = vld [vmem:[#allocation5 + $0x5a0] sm:$0xff]  ;;  %v9346_v9 = vcombine.high %v325_v4, %v329_v5  ;;  %v9345_v18 = vcombine.low %v325_v4, %v329_v5  ;;  %v357_v45 = vld [vmem:[#allocation5 + $0x488] sm:$0xff] }
  0xe6   :  { %3343 = vmatprep.subr.bf16.mxu0 %v9360_v13  ;;  %v9408_v8 = vcombine.high %v388_v1, %v392_v2  ;;  %v396_v10 = vld [vmem:[#allocation5 + $0x5c0] sm:$0xff]  ;;  %v333_v13 = vld [vmem:[#allocation5 + $0x3c8] sm:$0xff]  ;;  %v9407_v15 = vcombine.low %v388_v1, %v392_v2 }
  0xe7   :  { %3697 = vmatpush1.bf16.msra.mxu1 %v9289_v12  ;;  %v400_v11 = vld [vmem:[#allocation5 + $0x5e0] sm:$0xff]  ;;  %v365_v53 = vld [vmem:[#allocation5 + $0x4c8] sm:$0xff] }
  0xe8   :  { %3698 = vmatprep.subr.bf16.mxu1 %v9298_v14  ;;  %3263 = vmatmul.mubr.bf16.vlgmr.msra.gmra.mrb[0].mxu0 %v12012_v17  ;;  %v12033_v12 = vld [vmem:[#allocation2 + $0xa8] ss:$28 sps:$4 sm:$0xff]   ;;  %v9416_v19 = vcombine.high %v396_v10, %v400_v11  ;;  %v9415_v27 = vcombine.low %v396_v10, %v400_v11 }
  0xe9   :  { %3344 = vmatpush1.bf16.msra.mxu0 %v9359_v20  ;;  %3272 = vmatprep.mubr.bf16.mxu0 %v12014_v25  ;;  %v337_v14 = vld [vmem:[#allocation5 + $0x3e8] sm:$0xff] }
  0xea   :  { %3642 = vmatmul.mubr.bf16.gmra.mrb[16].mxu1 %v10956_v21  ;;  %3345 = vmatprep.subr.bf16.mxu0 %v9368_v23  ;;  %v9354_v20 = vcombine.high %v333_v13, %v337_v14  ;;  %v12035_v21 = vld [vmem:[#allocation2 + $0xe4] ss:$28 sps:$4 sm:$0xff]   ;;  %v9353_v28 = vcombine.low %v333_v13, %v337_v14  ;;  %v369_v54 = vld [vmem:[#allocation5 + $0x4e8] sm:$0xff] }
  0xeb   :  { %3699 = vmatpush1.bf16.msra.mxu1 %v9297_v22  ;;  %3651 = vmatprep.mubr.bf16.mxu1 %v13462_v0  ;;  %v404_v22 = vld [vmem:[#allocation5 + $0x600] sm:$0xff]  ;;  %v9385_v2 = vcombine.low %v365_v53, %v369_v54  ;;  %v385_v10 = vld [vmem:[#allocation5 + $0x568] sm:$0xff] }
  0xec   :  { %3700 = vmatprep.subr.bf16.mxu1 %v9306_v24  ;;  %v408_v23 = vld [vmem:[#allocation5 + $0x620] sm:$0xff]  ;;  %v341_v24 = vld [vmem:[#allocation5 + $0x408] sm:$0xff] }
  0xed   :  { %3346 = vmatpush1.bf16.msra.mxu0 %v9367_v30  ;;  %v9424_v29 = vcombine.high %v404_v22, %v408_v23  ;;  %v9362_v30 = vcombine.high %v341_v24, %v345_v26  ;;  %v9423_v37 = vcombine.low %v404_v22, %v408_v23  ;;  %v9361_v38 = vcombine.low %v341_v24, %v345_v26  ;;  %v12062_v23 = vld [vmem:[#allocation2 + $0x188] ss:$28 sps:$4 sm:$0xff]  }
  0xee   :  { %3347 = vmatprep.subr.bf16.mxu0 %v9376_v32  ;;  %v416_v32 = vld [vmem:[#allocation5 + $0x660] sm:$0xff] }
  0xef   :  { %3701 = vmatpush1.bf16.msra.mxu1 %v9305_v31  ;;  %v412_v31 = vld [vmem:[#allocation5 + $0x640] sm:$0xff] }
  0xf0   :  { %3702 = vmatprep.subr.bf16.mxu1 %v9314_v33  ;;  %3273 = vmatmul.mubr.bf16.gmra.mrb[4].mxu0 %v12019_v36  ;;  %v12040_v33 = vld [vmem:[#allocation2 + $0xe0] ss:$28 sps:$4 sm:$0xff]   ;;  %v9431_v46 = vcombine.low %v412_v31, %v416_v32 }
  0xf1   :  { %3348 = vmatpush1.bf16.msra.mxu0 %v9375_v39  ;;  %3282 = vmatprep.mubr.bf16.mxu0 %v12021_v44  ;;  %v9432_v39 = vcombine.high %v412_v31, %v416_v32  ;;  %v12066_v31 = vld [vmem:[#allocation2 + $0xc] ss:$28 sps:$4 sm:$0xff]  }
  0xf2   :  { %3652 = vmatmul.mubr.bf16.gmra.mrb[20].mxu1 %v10960_v40  ;;  %3349 = vmatprep.subr.bf16.mxu0 %v9384_v42  ;;  %v9370_v40 = vcombine.high %v349_v34, %v353_v35  ;;  %v420_v42 = vld [vmem:[#allocation5 + $0x680] sm:$0xff] }
  0xf3   :  { %3703 = vmatpush1.bf16.msra.mxu1 %v9313_v41  ;;  %3661 = vmatprep.mubr.bf16.mxu1 %v13462_v0  ;;  %v12042_v41 = vld [vmem:[#allocation2 + $0x11c] ss:$28 sps:$4 sm:$0xff]   ;;  %v468_v35 = vld [vmem:[#allocation5 + $0x800] sm:$0xff] }
  0xf4   :  { %3704 = vmatprep.subr.bf16.mxu1 %v9322_v43  ;;  %v424_v43 = vld [vmem:[#allocation5 + $0x6a0] sm:$0xff] }
  0xf5   :  { %3350 = vmatpush1.bf16.msra.mxu0 %v9383_v49  ;;  %v9440_v48 = vcombine.high %v420_v42, %v424_v43 }
  0xf6   :  { %3351 = vmatprep.subr.bf16.mxu0 %v9392_v51  ;;  %v432_v51 = vld [vmem:[#allocation5 + $0x6e0] sm:$0xff] }
  0xf7   :  { %3705 = vmatpush1.bf16.msra.mxu1 %v9321_v50  ;;  %v428_v50 = vld [vmem:[#allocation5 + $0x6c0] sm:$0xff] }
  0xf8   :  { %3706 = vmatprep.subr.bf16.mxu1 %v9330_v52  ;;  %3283 = vmatmul.mubr.bf16.gmra.mrb[8].mxu0 %v12026_v55  ;;  %v12048_v52 = vld [vmem:[#allocation2 + $0x118] ss:$28 sps:$4 sm:$0xff]   ;;  %v9448_v57 = vcombine.high %v428_v50, %v432_v51  ;;  %v9447_v1 = vcombine.low %v428_v50, %v432_v51  ;;  %v12074_v50 = vld [vmem:[#allocation2 + $0x44] ss:$28 sps:$4 sm:$0xff]  }
  0xf9   :  { %3352 = vmatpush1.bf16.msra.mxu0 %v9391_v58  ;;  %3292 = vmatprep.mubr.bf16.mxu0 %v12028_v63  ;;  %v9386_v58 = vcombine.high %v365_v53, %v369_v54  ;;  %v484_v51 = vld [vmem:[#allocation5 + $0x880] sm:$0xff] }
  0xfa   :  { %3662 = vmatmul.mubr.bf16.gmra.mrb[24].mxu1 %v10964_v59  ;;  %3353 = vmatprep.subr.bf16.mxu0 %v9400_v61  ;;  %v12050_v59 = vld [vmem:[#allocation2 + $0x154] ss:$28 sps:$4 sm:$0xff]   ;;  %v440_v61 = vld [vmem:[#allocation5 + $0x720] sm:$0xff] }
  0xfb   :  { %3707 = vmatpush1.bf16.msra.mxu1 %v9329_v60  ;;  %3671 = vmatprep.mubr.bf16.mxu1 %v13462_v0  ;;  %v436_v60 = vld [vmem:[#allocation5 + $0x700] sm:$0xff] }
  0xfc   :  { %3708 = vmatprep.subr.bf16.mxu1 %v9338_v62  ;;  %v373_v62 = vld [vmem:[#allocation5 + $0x508] sm:$0xff]  ;;  %v9456_v4 = vcombine.high %v436_v60, %v440_v61  ;;  %v488_v53 = vld [vmem:[#allocation5 + $0x8a0] sm:$0xff] }
  0xfd   :  { %3354 = vmatpush1.bf16.msra.mxu0 %v9399_v6  ;;  %v444_v6 = vld [vmem:[#allocation5 + $0x740] sm:$0xff] }
  0xfe   :  { %3355 = vmatprep.subr.bf16.mxu0 %v9408_v8  ;;  %v12056_v8 = vld [vmem:[#allocation2 + $0x150] ss:$28 sps:$4 sm:$0xff]  }
  0xff   :  { %3709 = vmatpush1.bf16.msra.mxu1 %v9337_v7  ;;  %v448_v7 = vld [vmem:[#allocation5 + $0x760] sm:$0xff] }
 0x100   :  { %3710 = vmatprep.subr.bf16.mxu1 %v9346_v9  ;;  %3293 = vmatmul.mubr.bf16.gmra.mrb[12].mxu0 %v12033_v12  ;;  %v381_v9 = vld [vmem:[#allocation5 + $0x548] sm:$0xff]  ;;  %v9464_v13 = vcombine.high %v444_v6, %v448_v7 }
 0x101   :  { %3356 = vmatpush1.bf16.msra.mxu0 %v9407_v15  ;;  %3302 = vmatprep.mubr.bf16.mxu0 %v12035_v21  ;;  %v9402_v14 = vcombine.high %v381_v9, %v385_v10  ;;  %v12058_v15 = vld [vmem:[#allocation2 + $0x18c] ss:$28 sps:$4 sm:$0xff]   ;;  %v9401_v22 = vcombine.low %v381_v9, %v385_v10  ;;  %v504_v9 = vld [vmem:[#allocation5 + $0x920] sm:$0xff] }
 0x102   :  { %3672 = vmatmul.mubr.bf16.gmra.mrb[28].mxu1 %v10968_v16  ;;  %3357 = vmatprep.subr.bf16.mxu0 %v9416_v19  ;;  %v452_v16 = vld [vmem:[#allocation5 + $0x780] sm:$0xff]  ;;  %v389_v19 = vld [vmem:[#allocation5 + $0x588] sm:$0xff] }
 0x103   :  { %3711 = vmatpush1.bf16.msra.mxu1 %v9345_v18  ;;  %3714 = vmatprep.mubr.bf16.mxu1 %v12005_v3  ;;  %v361_v3 = vld [vmem:[#allocation5 + $0x4a8] sm:$0xff]  ;;  %v456_v18 = vld [vmem:[#allocation5 + $0x7a0] sm:$0xff] }
 0x104   :  { %3712 = vmatprep.subr.bf16.mxu1 %v9354_v20  ;;  %v9378_v49 = vcombine.high %v357_v45, %v361_v3  ;;  %v9377_v56 = vcombine.low %v357_v45, %v361_v3  ;;  %v9463_v20 = vcombine.low %v444_v6, %v448_v7  ;;  %v9472_v24 = vcombine.high %v452_v16, %v456_v18  ;;  %v12070_v3 = vld [vmem:[#allocation2 + $0x8] ss:$28 sps:$4 sm:$0xff]   ;;  %v12082_v6 = vld [vmem:[#allocation2 + $0x7c] ss:$28 sps:$4 sm:$0xff]  }
 0x105   :  { %3358 = vmatpush1.bf16.msra.mxu0 %v9415_v27  ;;  %v460_v27 = vld [vmem:[#allocation5 + $0x7c0] sm:$0xff] }
 0x106   :  { %3359 = vmatprep.subr.bf16.mxu0 %v9424_v29  ;;  %v397_v29 = vld [vmem:[#allocation5 + $0x5c8] sm:$0xff]  ;;  %v500_v7 = vld [vmem:[#allocation5 + $0x900] sm:$0xff] }
 0x107   :  { %3713 = vmatpush1.bf16.msra.mxu1 %v9353_v28  ;;  %v464_v28 = vld [vmem:[#allocation5 + $0x7e0] sm:$0xff] }
 0x108   :  { %3795 = vmatprep.subr.bf16.mxu1 %v9362_v30  ;;  %3303 = vmatmul.mubr.bf16.gmra.mrb[16].mxu0 %v12040_v33  ;;  %v401_v30 = vld [vmem:[#allocation5 + $0x5e8] sm:$0xff]  ;;  %v9480_v34 = vcombine.high %v460_v27, %v464_v28 }
 0x109   :  { %3360 = vmatpush1.bf16.msra.mxu0 %v9423_v37  ;;  %3312 = vmatprep.mubr.bf16.mxu0 %v12042_v41  ;;  %v472_v37 = vld [vmem:[#allocation5 + $0x820] sm:$0xff]  ;;  %v9417_v45 = vcombine.low %v397_v29, %v401_v30 }
 0x10a   :  { %3715 = vmatmul.mubr.bf16.vlgmr.msra.gmra.mrb[32].mxu1 %v12012_v17  ;;  %3361 = vmatprep.subr.bf16.mxu0 %v9432_v39  ;;  %v9439_v17 = vcombine.low %v420_v42, %v424_v43  ;;  %v9418_v39 = vcombine.high %v397_v29, %v401_v30  ;;  %v476_v42 = vld [vmem:[#allocation5 + $0x840] sm:$0xff] }
 0x10b   :  { %3796 = vmatpush1.bf16.msra.mxu1 %v9361_v38  ;;  %3724 = vmatprep.mubr.bf16.mxu1 %v12014_v25  ;;  %v377_v25 = vld [vmem:[#allocation5 + $0x528] sm:$0xff]  ;;  %v480_v43 = vld [vmem:[#allocation5 + $0x860] sm:$0xff] }
 0x10c   :  { %3797 = vmatprep.subr.bf16.mxu1 %v9370_v40  ;;  %v9394_v5 = vcombine.high %v373_v62, %v377_v25  ;;  %v9393_v11 = vcombine.low %v373_v62, %v377_v25  ;;  %v405_v38 = vld [vmem:[#allocation5 + $0x608] sm:$0xff]  ;;  %v12078_v25 = vld [vmem:[#allocation2 + $0x40] ss:$28 sps:$4 sm:$0xff]  }
 0x10d   :  { %3362 = vmatpush1.bf16.msra.mxu0 %v9431_v46  ;;  %v409_v40 = vld [vmem:[#allocation5 + $0x628] sm:$0xff]  ;;  %v9488_v46 = vcombine.high %v468_v35, %v472_v37  ;;  %v520_v29 = vld [vmem:[#allocation5 + $0x9a0] sm:$0xff] }
 0x10e   :  { %3363 = vmatprep.subr.bf16.mxu0 %v9440_v48  ;;  %v417_v48 = vld [vmem:[#allocation5 + $0x668] sm:$0xff]  ;;  %v9425_v54 = vcombine.low %v405_v38, %v409_v40 }
 0x10f   :  { %3798 = vmatpush1.bf16.msra.mxu1 %v9369_v47  ;;  %v413_v47 = vld [vmem:[#allocation5 + $0x648] sm:$0xff] }
 0x110   :  { %3799 = vmatprep.subr.bf16.mxu1 %v9378_v49  ;;  %3313 = vmatmul.mubr.bf16.gmra.mrb[20].mxu0 %v12048_v52  ;;  %v9426_v49 = vcombine.high %v405_v38, %v409_v40  ;;  %v9433_v62 = vcombine.low %v413_v47, %v417_v48  ;;  %v528_v38 = vld [vmem:[#allocation5 + $0x9e0] sm:$0xff]  ;;  %v12094_v40 = vld [vmem:[#allocation2 + $0xb0] ss:$28 sps:$4 sm:$0xff]  }
 0x111   :  { %3364 = vmatpush1.bf16.msra.mxu0 %v9439_v17  ;;  %3322 = vmatprep.mubr.bf16.mxu0 %v12050_v59  ;;  %v9496_v17 = vcombine.high %v476_v42, %v480_v43 }
 0x112   :  { %3725 = vmatmul.mubr.bf16.gmra.mrb[36].mxu1 %v12019_v36  ;;  %3365 = vmatprep.subr.bf16.mxu0 %v9448_v57  ;;  %v9455_v36 = vcombine.low %v436_v60, %v440_v61  ;;  %v425_v57 = vld [vmem:[#allocation5 + $0x6a8] sm:$0xff]  ;;  %v492_v60 = vld [vmem:[#allocation5 + $0x8c0] sm:$0xff] }
 0x113   :  { %3800 = vmatpush1.bf16.msra.mxu1 %v9377_v56  ;;  %3734 = vmatprep.mubr.bf16.mxu1 %v12021_v44  ;;  %v393_v44 = vld [vmem:[#allocation5 + $0x5a8] sm:$0xff]  ;;  %v496_v61 = vld [vmem:[#allocation5 + $0x8e0] sm:$0xff] }
 0x114   :  { %3801 = vmatprep.subr.bf16.mxu1 %v9386_v58  ;;  %v9410_v26 = vcombine.high %v389_v19, %v393_v44  ;;  %v9409_v32 = vcombine.low %v389_v19, %v393_v44  ;;  %v421_v56 = vld [vmem:[#allocation5 + $0x688] sm:$0xff]  ;;  %v9434_v58 = vcombine.high %v413_v47, %v417_v48  ;;  %v12086_v44 = vld [vmem:[#allocation2 + $0x78] ss:$28 sps:$4 sm:$0xff]   ;;  %v532_v47 = vld [vmem:[#allocation5 + $0xa00] sm:$0xff] }
 0x115   :  { %3366 = vmatpush1.bf16.msra.mxu0 %v9447_v1  ;;  %v9504_v1 = vcombine.high %v484_v51, %v488_v53  ;;  %v9441_v10 = vcombine.low %v421_v56, %v425_v57  ;;  %v536_v48 = vld [vmem:[#allocation5 + $0xa20] sm:$0xff] }
 0x116   :  { %3367 = vmatprep.subr.bf16.mxu0 %v9456_v4  ;;  %v433_v4 = vld [vmem:[#allocation5 + $0x6e8] sm:$0xff] }
 0x117   :  { %3802 = vmatpush1.bf16.msra.mxu1 %v9385_v2  ;;  %v429_v2 = vld [vmem:[#allocation5 + $0x6c8] sm:$0xff] }
 0x118   :  { %3803 = vmatprep.subr.bf16.mxu1 %v9394_v5  ;;  %3323 = vmatmul.mubr.bf16.gmra.mrb[24].mxu0 %v12056_v8  ;;  %v9442_v5 = vcombine.high %v421_v56, %v425_v57  ;;  %v9449_v19 = vcombine.low %v429_v2, %v433_v4  ;;  %v544_v56 = vld [vmem:[#allocation5 + $0xa60] sm:$0xff] }
 0x119   :  { %3368 = vmatpush1.bf16.msra.mxu0 %v9455_v36  ;;  %3332 = vmatprep.mubr.bf16.mxu0 %v12058_v15  ;;  %v9512_v36 = vcombine.high %v492_v60, %v496_v61 }
 0x11a   :  { %3735 = vmatmul.mubr.bf16.gmra.mrb[40].mxu1 %v12026_v55  ;;  %3369 = vmatprep.subr.bf16.mxu0 %v9464_v13  ;;  %v9471_v55 = vcombine.low %v452_v16, %v456_v18  ;;  %v441_v13 = vld [vmem:[#allocation5 + $0x728] sm:$0xff]  ;;  %v508_v16 = vld [vmem:[#allocation5 + $0x940] sm:$0xff] }
 0x11b   :  { %3804 = vmatpush1.bf16.msra.mxu1 %v9393_v11  ;;  %3744 = vmatprep.mubr.bf16.mxu1 %v12028_v63  ;;  %v9479_v63 = vcombine.low %v460_v27, %v464_v28  ;;  %v437_v11 = vld [vmem:[#allocation5 + $0x708] sm:$0xff]  ;;  %v512_v18 = vld [vmem:[#allocation5 + $0x960] sm:$0xff]  ;;  %v12090_v27 = vld [vmem:[#allocation2 + $0xb4] ss:$28 sps:$4 sm:$0xff]  }
 0x11c   :  { %3805 = vmatprep.subr.bf16.mxu1 %v9402_v14  ;;  %v9450_v14 = vcombine.high %v429_v2, %v433_v4  ;;  %v516_v28 = vld [vmem:[#allocation5 + $0x980] sm:$0xff]  ;;  %v9457_v30 = vcombine.low %v437_v11, %v441_v13 }
 0x11d   :  { %3370 = vmatpush1.bf16.msra.mxu0 %v9463_v20  ;;  %v9520_v20 = vcombine.high %v500_v7, %v504_v9 }
 0x11e   :  { %3371 = vmatprep.subr.bf16.mxu0 %v9472_v24  ;;  %v449_v24 = vld [vmem:[#allocation5 + $0x768] sm:$0xff] }
 0x11f   :  { %3806 = vmatpush1.bf16.msra.mxu1 %v9401_v22  ;;  %v445_v22 = vld [vmem:[#allocation5 + $0x748] sm:$0xff] }
 0x120   :  { %3807 = vmatprep.subr.bf16.mxu1 %v9410_v26  ;;  %3333 = vmatmul.mubr.bf16.gmra.mrb[28].mxu0 %v12062_v23  ;;  %v9458_v26 = vcombine.high %v437_v11, %v441_v13  ;;  %v12110_v11 = vld [vmem:[#allocation2 + $0x120] ss:$28 sps:$4 sm:$0xff]  }
 0x121   :  { %3372 = vmatpush1.bf16.msra.mxu0 %v9471_v55  ;;  %3375 = vmatprep.mubr.bf16.mxu0 %v12066_v31  ;;  %v9528_v55 = vcombine.high %v508_v16, %v512_v18 }
 0x122   :  { %3745 = vmatmul.mubr.bf16.gmra.mrb[44].mxu1 %v12033_v12  ;;  %3373 = vmatprep.subr.bf16.mxu0 %v9480_v34  ;;  %v9487_v12 = vcombine.low %v468_v35, %v472_v37  ;;  %v457_v34 = vld [vmem:[#allocation5 + $0x7a8] sm:$0xff]  ;;  %v9466_v35 = vcombine.high %v445_v22, %v449_v24  ;;  %v524_v37 = vld [vmem:[#allocation5 + $0x9c0] sm:$0xff] }
 0x123   :  { %3808 = vmatpush1.bf16.msra.mxu1 %v9409_v32  ;;  %3754 = vmatprep.mubr.bf16.mxu1 %v12035_v21  ;;  %v9495_v21 = vcombine.low %v476_v42, %v480_v43  ;;  %v453_v32 = vld [vmem:[#allocation5 + $0x788] sm:$0xff] }
 0x124   :  { %3809 = vmatprep.subr.bf16.mxu1 %v9418_v39  ;;  %v9465_v39 = vcombine.low %v445_v22, %v449_v24  ;;  %v461_v42 = vld [vmem:[#allocation5 + $0x7c8] sm:$0xff] }
 0x125   :  { %3374 = vmatpush1.bf16.msra.mxu0 %v9479_v63  ;;  %v9536_v63 = vcombine.high %v516_v28, %v520_v29  ;;  %v465_v43 = vld [vmem:[#allocation5 + $0x7e8] sm:$0xff] }
 0x126   :  { %3456 = vmatprep.subr.bf16.mxu0 %v9488_v46  ;;  %v12098_v46 = vld [vmem:[#allocation2 + $0xec] ss:$28 sps:$4 sm:$0xff]   ;;  %v9481_v57 = vcombine.low %v461_v42, %v465_v43 }
 0x127   :  { %3810 = vmatpush1.bf16.msra.mxu1 %v9417_v45  ;;  %v9474_v45 = vcombine.high %v453_v32, %v457_v34 }
 0x128   :  { %3811 = vmatprep.subr.bf16.mxu1 %v9426_v49  ;;  %3376 = vmatmul.mubr.bf16.vlgmr.msra.gmra.mrb[0].mxu0 %v12070_v3  ;;  %v9473_v49 = vcombine.low %v453_v32, %v457_v34  ;;  %v12118_v32 = vld [vmem:[#allocation2 + $0x158] ss:$28 sps:$4 sm:$0xff]  }
 0x129   :  { %3457 = vmatpush1.bf16.msra.mxu0 %v9487_v12  ;;  %3385 = vmatprep.mubr.bf16.mxu0 %v12074_v50  ;;  %v9544_v12 = vcombine.high %v524_v37, %v528_v38 }
 0x12a   :  { %3755 = vmatmul.mubr.bf16.gmra.mrb[48].mxu1 %v12040_v33  ;;  %3458 = vmatprep.subr.bf16.mxu0 %v9496_v17  ;;  %v9503_v33 = vcombine.low %v484_v51, %v488_v53  ;;  %v469_v51 = vld [vmem:[#allocation5 + $0x808] sm:$0xff]  ;;  %v540_v17 = vld [vmem:[#allocation5 + $0xa40] sm:$0xff] }
 0x12b   :  { %3812 = vmatpush1.bf16.msra.mxu1 %v9425_v54  ;;  %3764 = vmatprep.mubr.bf16.mxu1 %v12042_v41  ;;  %v9511_v41 = vcombine.low %v492_v60, %v496_v61  ;;  %v473_v53 = vld [vmem:[#allocation5 + $0x828] sm:$0xff]  ;;  %v9482_v54 = vcombine.high %v461_v42, %v465_v43  ;;  %v9560_v4 = vcombine.high %v540_v17, %v544_v56 }
 0x12c   :  { %3813 = vmatprep.subr.bf16.mxu1 %v9434_v58  ;;  %v12102_v58 = vld [vmem:[#allocation2 + $0xe8] ss:$28 sps:$4 sm:$0xff]   ;;  %v9489_v2 = vcombine.low %v469_v51, %v473_v53 }
 0x12d   :  { %3459 = vmatpush1.bf16.msra.mxu0 %v9495_v21  ;;  %v9552_v21 = vcombine.high %v532_v47, %v536_v48  ;;  %v477_v60 = vld [vmem:[#allocation5 + $0x848] sm:$0xff] }
 0x12e   :  { %3460 = vmatprep.subr.bf16.mxu0 %v9504_v1  ;;  %v481_v61 = vld [vmem:[#allocation5 + $0x868] sm:$0xff]  ;;  %v12106_v1 = vld [vmem:[#allocation2 + $0x124] ss:$28 sps:$4 sm:$0xff]  }
 0x12f   :  { %3814 = vmatpush1.bf16.msra.mxu1 %v9433_v62  ;;  %v9490_v62 = vcombine.high %v469_v51, %v473_v53  ;;  %v12126_v51 = vld [vmem:[#allocation2 + $0x190] ss:$28 sps:$4 sm:$0xff]  }
 0x130   :  { %3815 = vmatprep.subr.bf16.mxu1 %v9442_v5  ;;  %3386 = vmatmul.mubr.bf16.gmra.mrb[4].mxu0 %v12078_v25  ;;  %v548_v5 = vld [vmem:[#allocation5 + $0xa80] sm:$0xff] }
 0x131   :  { %3461 = vmatpush1.bf16.msra.mxu0 %v9503_v33  ;;  %3395 = vmatprep.mubr.bf16.mxu0 %v12082_v6  ;;  %v552_v33 = vld [vmem:[#allocation5 + $0xaa0] sm:$0xff] }
 0x132   :  { %3765 = vmatmul.mubr.bf16.gmra.mrb[52].mxu1 %v12048_v52  ;;  %3462 = vmatprep.subr.bf16.mxu0 %v9512_v36  ;;  %v9519_v52 = vcombine.low %v500_v7, %v504_v9  ;;  %v485_v7 = vld [vmem:[#allocation5 + $0x888] sm:$0xff]  ;;  %v9498_v9 = vcombine.high %v477_v60, %v481_v61  ;;  %v9497_v36 = vcombine.low %v477_v60, %v481_v61 }
 0x133   :  { %3816 = vmatpush1.bf16.msra.mxu1 %v9441_v10  ;;  %3774 = vmatprep.mubr.bf16.mxu1 %v12050_v59  ;;  %v9527_v59 = vcombine.low %v508_v16, %v512_v18  ;;  %v489_v10 = vld [vmem:[#allocation5 + $0x8a8] sm:$0xff]  ;;  %v9568_v13 = vcombine.high %v548_v5, %v552_v33 }
 0x134   :  { %3817 = vmatprep.subr.bf16.mxu1 %v9450_v14  ;;  %v556_v14 = vld [vmem:[#allocation5 + $0xac0] sm:$0xff]  ;;  %v493_v16 = vld [vmem:[#allocation5 + $0x8c8] sm:$0xff]  ;;  %v9506_v18 = vcombine.high %v485_v7, %v489_v10  ;;  %v9505_v22 = vcombine.low %v485_v7, %v489_v10 }
 0x135   :  { %3463 = vmatpush1.bf16.msra.mxu0 %v9511_v41  ;;  %v560_v41 = vld [vmem:[#allocation5 + $0xae0] sm:$0xff]  ;;  %v12134_v7 = vld [vmem:[#allocation2 + $0x10] ss:$28 sps:$4 sm:$0xff]  }
 0x136   :  { %3464 = vmatprep.subr.bf16.mxu0 %v9520_v20  ;;  %v12114_v20 = vld [vmem:[#allocation2 + $0x15c] ss:$28 sps:$4 sm:$0xff]   ;;  %v9576_v24 = vcombine.high %v556_v14, %v560_v41  ;;  %v541_v10 = vld [vmem:[#allocation5 + $0xa48] sm:$0xff] }
 0x137   :  { %3818 = vmatpush1.bf16.msra.mxu1 %v9449_v19  ;;  %v497_v19 = vld [vmem:[#allocation5 + $0x8e8] sm:$0xff] }
 0x138   :  { %3819 = vmatprep.subr.bf16.mxu1 %v9458_v26  ;;  %3396 = vmatmul.mubr.bf16.gmra.mrb[8].mxu0 %v12086_v44  ;;  %v564_v26 = vld [vmem:[#allocation5 + $0xb00] sm:$0xff] }
 0x139   :  { %3465 = vmatpush1.bf16.msra.mxu0 %v9519_v52  ;;  %3405 = vmatprep.mubr.bf16.mxu0 %v12090_v27  ;;  %v568_v52 = vld [vmem:[#allocation5 + $0xb20] sm:$0xff] }
 0x13a   :  { %3775 = vmatmul.mubr.bf16.gmra.mrb[56].mxu1 %v12056_v8  ;;  %3466 = vmatprep.subr.bf16.mxu0 %v9528_v55  ;;  %v9535_v8 = vcombine.low %v516_v28, %v520_v29  ;;  %v501_v28 = vld [vmem:[#allocation5 + $0x908] sm:$0xff]  ;;  %v9514_v29 = vcombine.high %v493_v16, %v497_v19  ;;  %v9513_v55 = vcombine.low %v493_v16, %v497_v19 }
 0x13b   :  { %3820 = vmatpush1.bf16.msra.mxu1 %v9457_v30  ;;  %3784 = vmatprep.mubr.bf16.mxu1 %v12058_v15  ;;  %v9543_v15 = vcombine.low %v524_v37, %v528_v38  ;;  %v505_v30 = vld [vmem:[#allocation5 + $0x928] sm:$0xff]  ;;  %v9584_v34 = vcombine.high %v564_v26, %v568_v52 }
 0x13c   :  { %3821 = vmatprep.subr.bf16.mxu1 %v9466_v35  ;;  %v572_v35 = vld [vmem:[#allocation5 + $0xb40] sm:$0xff]  ;;  %v509_v37 = vld [vmem:[#allocation5 + $0x948] sm:$0xff]  ;;  %v9522_v38 = vcombine.high %v501_v28, %v505_v30  ;;  %v9521_v42 = vcombine.low %v501_v28, %v505_v30 }
 0x13d   :  { %3467 = vmatpush1.bf16.msra.mxu0 %v9527_v59  ;;  %v576_v59 = vld [vmem:[#allocation5 + $0xb60] sm:$0xff]  ;;  %v549_v19 = vld [vmem:[#allocation5 + $0xa88] sm:$0xff] }
 0x13e   :  { %3468 = vmatprep.subr.bf16.mxu0 %v9536_v63  ;;  %v12122_v63 = vld [vmem:[#allocation2 + $0x194] ss:$28 sps:$4 sm:$0xff]   ;;  %v9592_v43 = vcombine.high %v572_v35, %v576_v59  ;;  %v12142_v28 = vld [vmem:[#allocation2 + $0x48] ss:$28 sps:$4 sm:$0xff]  }
 0x13f   :  { %3822 = vmatpush1.bf16.msra.mxu1 %v9465_v39  ;;  %v513_v39 = vld [vmem:[#allocation5 + $0x968] sm:$0xff] }
 0x140   :  { %3823 = vmatprep.subr.bf16.mxu1 %v9474_v45  ;;  %3406 = vmatmul.mubr.bf16.gmra.mrb[12].mxu0 %v12094_v40  ;;  %v580_v45 = vld [vmem:[#allocation5 + $0xb80] sm:$0xff]  ;;  %v557_v30 = vld [vmem:[#allocation5 + $0xac8] sm:$0xff] }
 0x141   :  { %3469 = vmatpush1.bf16.msra.mxu0 %v9535_v8  ;;  %3415 = vmatprep.mubr.bf16.mxu0 %v12098_v46  ;;  %v584_v8 = vld [vmem:[#allocation5 + $0xba0] sm:$0xff] }
 0x142   :  { %3785 = vmatmul.mubr.bf16.gmra.mrb[60].mxu1 %v12062_v23  ;;  %3470 = vmatprep.subr.bf16.mxu0 %v9544_v12  ;;  %v9551_v23 = vcombine.low %v532_v47, %v536_v48  ;;  %v517_v47 = vld [vmem:[#allocation5 + $0x988] sm:$0xff]  ;;  %v9530_v48 = vcombine.high %v509_v37, %v513_v39  ;;  %v9529_v12 = vcombine.low %v509_v37, %v513_v39 }
 0x143   :  { %3824 = vmatpush1.bf16.msra.mxu1 %v9473_v49  ;;  %3827 = vmatprep.mubr.bf16.mxu1 %v12066_v31  ;;  %v9559_v31 = vcombine.low %v540_v17, %v544_v56  ;;  %v521_v49 = vld [vmem:[#allocation5 + $0x9a8] sm:$0xff]  ;;  %v9600_v53 = vcombine.high %v580_v45, %v584_v8 }
 0x144   :  { %3825 = vmatprep.subr.bf16.mxu1 %v9482_v54  ;;  %v588_v54 = vld [vmem:[#allocation5 + $0xbc0] sm:$0xff]  ;;  %v525_v17 = vld [vmem:[#allocation5 + $0x9c8] sm:$0xff]  ;;  %v9538_v56 = vcombine.high %v517_v47, %v521_v49  ;;  %v9537_v60 = vcombine.low %v517_v47, %v521_v49 }
 0x145   :  { %3471 = vmatpush1.bf16.msra.mxu0 %v9543_v15  ;;  %v592_v15 = vld [vmem:[#allocation5 + $0xbe0] sm:$0xff]  ;;  %v565_v39 = vld [vmem:[#allocation5 + $0xb08] sm:$0xff] }
 0x146   :  { %3472 = vmatprep.subr.bf16.mxu0 %v9552_v21  ;;  %v12130_v21 = vld [vmem:[#allocation2 + $0x14] ss:$28 sps:$4 sm:$0xff]   ;;  %v9608_v61 = vcombine.high %v588_v54, %v592_v15  ;;  %v12150_v47 = vld [vmem:[#allocation2 + $0x80] ss:$28 sps:$4 sm:$0xff]   ;;  %v573_v49 = vld [vmem:[#allocation5 + $0xb48] sm:$0xff] }
 0x147   :  { %3826 = vmatpush1.bf16.msra.mxu1 %v9481_v57  ;;  %v529_v57 = vld [vmem:[#allocation5 + $0x9e8] sm:$0xff] }
 0x148   :  { %3908 = vmatprep.subr.bf16.mxu1 %v9490_v62  ;;  %3416 = vmatmul.mubr.bf16.gmra.mrb[16].mxu0 %v12102_v58  ;;  %v533_v62 = vld [vmem:[#allocation5 + $0xa08] sm:$0xff] }
 0x149   :  { %3473 = vmatpush1.bf16.msra.mxu0 %v9551_v23  ;;  %3425 = vmatprep.mubr.bf16.mxu0 %v12106_v1  ;;  %v537_v23 = vld [vmem:[#allocation5 + $0xa28] sm:$0xff] }
 0x14a   :  { %3828 = vmatmul.mubr.bf16.vlgmr.msra.gmra.mrb[32].mxu1 %v12070_v3  ;;  %3474 = vmatprep.subr.bf16.mxu0 %v9560_v4  ;;  %v9567_v3 = vcombine.low %v548_v5, %v552_v33  ;;  %v9546_v4 = vcombine.high %v525_v17, %v529_v57  ;;  %v218_v5 = vld [vmem:[#allocation5 + $0x30] sm:$0xff]  ;;  %v9545_v33 = vcombine.low %v525_v17, %v529_v57  ;;  %v581_v57 = vld [vmem:[#allocation5 + $0xb88] sm:$0xff] }
 0x14b   :  { %3909 = vmatpush1.bf16.msra.mxu1 %v9489_v2  ;;  %3837 = vmatprep.mubr.bf16.mxu1 %v12074_v50  ;;  %v9575_v50 = vcombine.low %v556_v14, %v560_v41  ;;  %v214_v2 = vld [vmem:[#allocation5 + $0x10] sm:$0xff]  ;;  %v12138_v41 = vld [vmem:[#allocation2 + $0x4c] ss:$28 sps:$4 sm:$0xff]   ;;  %v9553_v16 = vcombine.low %v533_v62, %v537_v23 }
 0x14c   :  { %3910 = vmatprep.subr.bf16.mxu1 %v9498_v9  ;;  %v9236_v9 = vcombine.high %v214_v2, %v218_v5  ;;  %v226_v14 = vld [vmem:[#allocation5 + $0x70] sm:$0xff] }
 0x14d   :  { %3475 = vmatpush1.bf16.msra.mxu0 %v9559_v31  ;;  %v545_v31 = vld [vmem:[#allocation5 + $0xa68] sm:$0xff] }
 0x14e   :  { %3476 = vmatprep.subr.bf16.mxu0 %v9568_v13  ;;  %v9554_v13 = vcombine.high %v533_v62, %v537_v23  ;;  %v266_v62 = vld [vmem:[#allocation5 + $0x1b0] sm:$0xff] }
 0x14f   :  { %3911 = vmatpush1.bf16.msra.mxu1 %v9497_v36  ;;  %v222_v36 = vld [vmem:[#allocation5 + $0x50] sm:$0xff] }
 0x150   :  { %3912 = vmatprep.subr.bf16.mxu1 %v9506_v18  ;;  %3426 = vmatmul.mubr.bf16.gmra.mrb[20].mxu0 %v12110_v11  ;;  %v9244_v18 = vcombine.high %v222_v36, %v226_v14 }
 0x151   :  { %3477 = vmatpush1.bf16.msra.mxu0 %v9567_v3  ;;  %3435 = vmatprep.mubr.bf16.mxu0 %v12114_v20  ;;  %v553_v3 = vld [vmem:[#allocation5 + $0xaa8] sm:$0xff] }
 0x152   :  { %3838 = vmatmul.mubr.bf16.gmra.mrb[36].mxu1 %v12078_v25  ;;  %3478 = vmatprep.subr.bf16.mxu0 %v9576_v24  ;;  %v9583_v25 = vcombine.low %v564_v26, %v568_v52  ;;  %v9562_v24 = vcombine.high %v541_v10, %v545_v31  ;;  %v234_v26 = vld [vmem:[#allocation5 + $0xb0] sm:$0xff]  ;;  %v9561_v52 = vcombine.low %v541_v10, %v545_v31 }
 0x153   :  { %3913 = vmatpush1.bf16.msra.mxu1 %v9505_v22  ;;  %3847 = vmatprep.mubr.bf16.mxu1 %v12082_v6  ;;  %v9591_v6 = vcombine.low %v572_v35, %v576_v59  ;;  %v230_v22 = vld [vmem:[#allocation5 + $0x90] sm:$0xff]  ;;  %v12146_v59 = vld [vmem:[#allocation2 + $0x84] ss:$28 sps:$4 sm:$0xff]   ;;  %v9569_v37 = vcombine.low %v549_v19, %v553_v3 }
 0x154   :  { %3914 = vmatprep.subr.bf16.mxu1 %v9514_v29  ;;  %v9252_v29 = vcombine.high %v230_v22, %v234_v26  ;;  %v242_v35 = vld [vmem:[#allocation5 + $0xf0] sm:$0xff] }
 0x155   :  { %3479 = vmatpush1.bf16.msra.mxu0 %v9575_v50  ;;  %v561_v50 = vld [vmem:[#allocation5 + $0xae8] sm:$0xff]  ;;  %v274_v10 = vld [vmem:[#allocation5 + $0x1f0] sm:$0xff] }
 0x156   :  { %3480 = vmatprep.subr.bf16.mxu0 %v9584_v34  ;;  %v9570_v34 = vcombine.high %v549_v19, %v553_v3  ;;  %v12162_v31 = vld [vmem:[#allocation2 + $0xf4] ss:$28 sps:$4 sm:$0xff]  }
 0x157   :  { %3915 = vmatpush1.bf16.msra.mxu1 %v9513_v55  ;;  %v238_v55 = vld [vmem:[#allocation5 + $0xd0] sm:$0xff] }
 0x158   :  { %3916 = vmatprep.subr.bf16.mxu1 %v9522_v38  ;;  %3436 = vmatmul.mubr.bf16.gmra.mrb[24].mxu0 %v12118_v32  ;;  %v9260_v38 = vcombine.high %v238_v55, %v242_v35  ;;  %v282_v19 = vld [vmem:[#allocation5 + $0x230] sm:$0xff] }
 0x159   :  { %3481 = vmatpush1.bf16.msra.mxu0 %v9583_v25  ;;  %3445 = vmatprep.mubr.bf16.mxu0 %v12122_v63  ;;  %v569_v25 = vld [vmem:[#allocation5 + $0xb28] sm:$0xff] }
 0x15a   :  { %3848 = vmatmul.mubr.bf16.gmra.mrb[40].mxu1 %v12086_v44  ;;  %3482 = vmatprep.subr.bf16.mxu0 %v9592_v43  ;;  %v9599_v44 = vcombine.low %v580_v45, %v584_v8  ;;  %v9578_v43 = vcombine.high %v557_v30, %v561_v50  ;;  %v250_v45 = vld [vmem:[#allocation5 + $0x130] sm:$0xff]  ;;  %v9577_v8 = vcombine.low %v557_v30, %v561_v50  ;;  %v609_v30 = vld [vmem:[#allocation5 + $0xc68] sm:$0xff] }
 0x15b   :  { %3917 = vmatpush1.bf16.msra.mxu1 %v9521_v42  ;;  %3857 = vmatprep.mubr.bf16.mxu1 %v12090_v27  ;;  %v9607_v27 = vcombine.low %v588_v54, %v592_v15  ;;  %v246_v42 = vld [vmem:[#allocation5 + $0x110] sm:$0xff]  ;;  %v12154_v15 = vld [vmem:[#allocation2 + $0xbc] ss:$28 sps:$4 sm:$0xff]   ;;  %v9585_v17 = vcombine.low %v565_v39, %v569_v25  ;;  %v12170_v50 = vld [vmem:[#allocation2 + $0x12c] ss:$28 sps:$4 sm:$0xff]  }
 0x15c   :  { %3918 = vmatprep.subr.bf16.mxu1 %v9530_v48  ;;  %v9268_v48 = vcombine.high %v246_v42, %v250_v45  ;;  %v258_v54 = vld [vmem:[#allocation5 + $0x170] sm:$0xff] }
 0x15d   :  { %3483 = vmatpush1.bf16.msra.mxu0 %v9591_v6  ;;  %v577_v6 = vld [vmem:[#allocation5 + $0xb68] sm:$0xff] }
 0x15e   :  { %3484 = vmatprep.subr.bf16.mxu0 %v9600_v53  ;;  %v9586_v53 = vcombine.high %v565_v39, %v569_v25  ;;  %v9593_v23 = vcombine.low %v573_v49, %v577_v6  ;;  %v12174_v25 = vld [vmem:[#allocation2 + $0x128] ss:$28 sps:$4 sm:$0xff]  }
 0x15f   :  { %3919 = vmatpush1.bf16.msra.mxu1 %v9529_v12  ;;  %v254_v12 = vld [vmem:[#allocation5 + $0x150] sm:$0xff] }
 0x160   :  { %3920 = vmatprep.subr.bf16.mxu1 %v9538_v56  ;;  %3446 = vmatmul.mubr.bf16.gmra.mrb[28].mxu0 %v12126_v51  ;;  %v9276_v56 = vcombine.high %v254_v12, %v258_v54 }
 0x161   :  { %3485 = vmatpush1.bf16.msra.mxu0 %v9599_v44  ;;  %3488 = vmatprep.mubr.bf16.mxu0 %v12130_v21  ;;  %v585_v44 = vld [vmem:[#allocation5 + $0xba8] sm:$0xff] }
 0x162   :  { %3858 = vmatmul.mubr.bf16.gmra.mrb[44].mxu1 %v12094_v40  ;;  %3486 = vmatprep.subr.bf16.mxu0 %v9608_v61  ;;  %v9235_v40 = vcombine.low %v214_v2, %v218_v5  ;;  %v9594_v61 = vcombine.high %v573_v49, %v577_v6  ;;  %v12158_v2 = vld [vmem:[#allocation2 + $0xb8] ss:$28 sps:$4 sm:$0xff]   ;;  %v589_v5 = vld [vmem:[#allocation5 + $0xbc8] sm:$0xff] }
 0x163   :  { %3921 = vmatpush1.bf16.msra.mxu1 %v9537_v60  ;;  %3867 = vmatprep.mubr.bf16.mxu1 %v12098_v46  ;;  %v9243_v46 = vcombine.low %v222_v36, %v226_v14  ;;  %v262_v60 = vld [vmem:[#allocation5 + $0x190] sm:$0xff]  ;;  %v9601_v36 = vcombine.low %v581_v57, %v585_v44  ;;  %v597_v14 = vld [vmem:[#allocation5 + $0xc08] sm:$0xff] }
 0x164   :  { %3922 = vmatprep.subr.bf16.mxu1 %v9546_v4  ;;  %v9284_v4 = vcombine.high %v262_v60, %v266_v62  ;;  %v625_v49 = vld [vmem:[#allocation5 + $0xce8] sm:$0xff] }
 0x165   :  { %3487 = vmatpush1.bf16.msra.mxu0 %v9607_v27  ;;  %v593_v27 = vld [vmem:[#allocation5 + $0xbe8] sm:$0xff] }
 0x166   :  { %4134 = vmatprep.subr.bf16.mxu0 %v9236_v9  ;;  %v9602_v9 = vcombine.high %v581_v57, %v585_v44  ;;  %v9609_v3 = vcombine.low %v589_v5, %v593_v27  ;;  %v12183_v44 = vld [vmem:[#allocation2 + $0x160] ss:$28 sps:$4 sm:$0xff]  }
 0x167   :  { %3923 = vmatpush1.bf16.msra.mxu1 %v9545_v33  ;;  %v270_v33 = vld [vmem:[#allocation5 + $0x1d0] sm:$0xff] }
 0x168   :  { %3924 = vmatprep.subr.bf16.mxu1 %v9554_v13  ;;  %3489 = vmatmul.mubr.bf16.vlgmr.msra.gmra.mrb[0].mxu0 %v12134_v7  ;;  %v9292_v13 = vcombine.high %v270_v33, %v274_v10 }
 0x169   :  { %4135 = vmatpush1.bf16.msra.mxu0 %v9235_v40  ;;  %3498 = vmatprep.mubr.bf16.mxu0 %v12138_v41  ;;  %v601_v40 = vld [vmem:[#allocation5 + $0xc28] sm:$0xff] }
 0x16a   :  { %3868 = vmatmul.mubr.bf16.gmra.mrb[48].mxu1 %v12102_v58  ;;  %4136 = vmatprep.subr.bf16.mxu0 %v9244_v18  ;;  %v9251_v58 = vcombine.low %v230_v22, %v234_v26  ;;  %v9610_v18 = vcombine.high %v589_v5, %v593_v27  ;;  %v12166_v22 = vld [vmem:[#allocation2 + $0xf0] ss:$28 sps:$4 sm:$0xff]  }
 0x16b   :  { %3925 = vmatpush1.bf16.msra.mxu1 %v9553_v16  ;;  %3877 = vmatprep.mubr.bf16.mxu1 %v12106_v1  ;;  %v9259_v1 = vcombine.low %v238_v55, %v242_v35  ;;  %v278_v16 = vld [vmem:[#allocation5 + $0x210] sm:$0xff]  ;;  %v9617_v55 = vcombine.low %v597_v14, %v601_v40 }
 0x16c   :  { %3926 = vmatprep.subr.bf16.mxu1 %v9562_v24  ;;  %v9300_v24 = vcombine.high %v278_v16, %v282_v19  ;;  %v286_v26 = vld [vmem:[#allocation5 + $0x250] sm:$0xff] }
 0x16d   :  { %4137 = vmatpush1.bf16.msra.mxu0 %v9243_v46  ;;  %v290_v46 = vld [vmem:[#allocation5 + $0x270] sm:$0xff] }
 0x16e   :  { %4138 = vmatprep.subr.bf16.mxu0 %v9252_v29  ;;  %v605_v29 = vld [vmem:[#allocation5 + $0xc48] sm:$0xff]  ;;  %v294_v35 = vld [vmem:[#allocation5 + $0x290] sm:$0xff] }
 0x16f   :  { %3927 = vmatpush1.bf16.msra.mxu1 %v9561_v52  ;;  %v9618_v52 = vcombine.high %v597_v14, %v601_v40  ;;  %v9626_v39 = vcombine.high %v605_v29, %v609_v30  ;;  %v12191_v40 = vld [vmem:[#allocation2 + $0x198] ss:$28 sps:$4 sm:$0xff]  }
 0x170   :  { %3928 = vmatprep.subr.bf16.mxu1 %v9570_v34  ;;  %3499 = vmatmul.mubr.bf16.gmra.mrb[4].mxu0 %v12142_v28  ;;  %v9308_v34 = vcombine.high %v286_v26, %v290_v46 }
 0x171   :  { %4139 = vmatpush1.bf16.msra.mxu0 %v9251_v58  ;;  %3508 = vmatprep.mubr.bf16.mxu0 %v12146_v59  ;;  %v298_v58 = vld [vmem:[#allocation5 + $0x2b0] sm:$0xff] }
 0x172   :  { %3878 = vmatmul.mubr.bf16.gmra.mrb[52].mxu1 %v12110_v11  ;;  %4140 = vmatprep.subr.bf16.mxu0 %v9260_v38  ;;  %v9267_v11 = vcombine.low %v246_v42, %v250_v45  ;;  %v617_v38 = vld [vmem:[#allocation5 + $0xca8] sm:$0xff]  ;;  %v9625_v42 = vcombine.low %v605_v29, %v609_v30  ;;  %v302_v45 = vld [vmem:[#allocation5 + $0x2d0] sm:$0xff] }
 0x173   :  { %3929 = vmatpush1.bf16.msra.mxu1 %v9569_v37  ;;  %3887 = vmatprep.mubr.bf16.mxu1 %v12114_v20  ;;  %v9275_v20 = vcombine.low %v254_v12, %v258_v54  ;;  %v613_v37 = vld [vmem:[#allocation5 + $0xc88] sm:$0xff]  ;;  %v12178_v12 = vld [vmem:[#allocation2 + $0x164] ss:$28 sps:$4 sm:$0xff]   ;;  %v314_v54 = vld [vmem:[#allocation5 + $0x330] sm:$0xff] }
 0x174   :  { %3930 = vmatprep.subr.bf16.mxu1 %v9578_v43  ;;  %v9316_v43 = vcombine.high %v294_v35, %v298_v58 }
 0x175   :  { %4141 = vmatpush1.bf16.msra.mxu0 %v9259_v1  ;;  %v306_v1 = vld [vmem:[#allocation5 + $0x2f0] sm:$0xff] }
 0x176   :  { %4142 = vmatprep.subr.bf16.mxu0 %v9268_v48  ;;  %v621_v48 = vld [vmem:[#allocation5 + $0xcc8] sm:$0xff]  ;;  %v9324_v6 = vcombine.high %v302_v45, %v306_v1  ;;  %v9323_v57 = vcombine.low %v302_v45, %v306_v1 }
 0x177   :  { %3931 = vmatpush1.bf16.msra.mxu1 %v9577_v8  ;;  %v9634_v8 = vcombine.high %v613_v37, %v617_v38 }
 0x178   :  { %3932 = vmatprep.subr.bf16.mxu1 %v9586_v53  ;;  %3509 = vmatmul.mubr.bf16.gmra.mrb[8].mxu0 %v12150_v47  ;;  %v310_v53 = vld [vmem:[#allocation5 + $0x310] sm:$0xff] }
 0x179   :  { %4143 = vmatpush1.bf16.msra.mxu0 %v9267_v11  ;;  %3518 = vmatprep.mubr.bf16.mxu0 %v12154_v15  ;;  %v9633_v11 = vcombine.low %v613_v37, %v617_v38 }
 0x17a   :  { %3888 = vmatmul.mubr.bf16.gmra.mrb[56].mxu1 %v12118_v32  ;;  %4144 = vmatprep.subr.bf16.mxu0 %v9276_v56  ;;  %v9283_v32 = vcombine.low %v262_v60, %v266_v62  ;;  %v633_v56 = vld [vmem:[#allocation5 + $0xd28] sm:$0xff]  ;;  %v9332_v60 = vcombine.high %v310_v53, %v314_v54  ;;  %v322_v62 = vld [vmem:[#allocation5 + $0x370] sm:$0xff] }
 0x17b   :  { %3933 = vmatpush1.bf16.msra.mxu1 %v9585_v17  ;;  %3897 = vmatprep.mubr.bf16.mxu1 %v12122_v63  ;;  %v9291_v63 = vcombine.low %v270_v33, %v274_v10  ;;  %v629_v17 = vld [vmem:[#allocation5 + $0xd08] sm:$0xff]  ;;  %v12186_v33 = vld [vmem:[#allocation2 + $0x19c] ss:$28 sps:$4 sm:$0xff]   ;;  %v330_v10 = vld [vmem:[#allocation5 + $0x3b0] sm:$0xff] }
 0x17c   :  { %3934 = vmatprep.subr.bf16.mxu1 %v9594_v61  ;;  %v318_v61 = vld [vmem:[#allocation5 + $0x350] sm:$0xff]  ;;  %v9650_v5 = vcombine.high %v629_v17, %v633_v56 }
 0x17d   :  { %4145 = vmatpush1.bf16.msra.mxu0 %v9275_v20  ;;  %v9641_v20 = vcombine.low %v621_v48, %v625_v49  ;;  %v9340_v27 = vcombine.high %v318_v61, %v322_v62  ;;  %v9339_v14 = vcombine.low %v318_v61, %v322_v62 }
 0x17e   :  { %4146 = vmatprep.subr.bf16.mxu0 %v9284_v4  ;;  %v641_v4 = vld [vmem:[#allocation5 + $0xd68] sm:$0xff] }
 0x17f   :  { %3935 = vmatpush1.bf16.msra.mxu1 %v9593_v23  ;;  %v637_v23 = vld [vmem:[#allocation5 + $0xd48] sm:$0xff] }
 0x180   :  { %3936 = vmatprep.subr.bf16.mxu1 %v9602_v9  ;;  %3519 = vmatmul.mubr.bf16.gmra.mrb[12].mxu0 %v12158_v2  ;;  %v326_v9 = vld [vmem:[#allocation5 + $0x390] sm:$0xff] }
 0x181   :  { %4147 = vmatpush1.bf16.msra.mxu0 %v9283_v32  ;;  %3528 = vmatprep.mubr.bf16.mxu0 %v12162_v31  ;;  %v9649_v32 = vcombine.low %v629_v17, %v633_v56  ;;  %v366_v56 = vld [vmem:[#allocation5 + $0x4d0] sm:$0xff] }
 0x182   :  { %3898 = vmatmul.mubr.bf16.gmra.mrb[60].mxu1 %v12126_v51  ;;  %4148 = vmatprep.subr.bf16.mxu0 %v9292_v13  ;;  %v9299_v51 = vcombine.low %v278_v16, %v282_v19  ;;  %v649_v13 = vld [vmem:[#allocation5 + $0xda8] sm:$0xff]  ;;  %v9348_v16 = vcombine.high %v326_v9, %v330_v10  ;;  %v338_v19 = vld [vmem:[#allocation5 + $0x3f0] sm:$0xff] }
 0x183   :  { %3937 = vmatpush1.bf16.msra.mxu1 %v9601_v36  ;;  %3940 = vmatprep.mubr.bf16.mxu1 %v12130_v21  ;;  %v9307_v21 = vcombine.low %v286_v26, %v290_v46  ;;  %v645_v36 = vld [vmem:[#allocation5 + $0xd88] sm:$0xff] }
 0x184   :  { %3938 = vmatprep.subr.bf16.mxu1 %v9610_v18  ;;  %v334_v18 = vld [vmem:[#allocation5 + $0x3d0] sm:$0xff] }
 0x185   :  { %4149 = vmatpush1.bf16.msra.mxu0 %v9291_v63  ;;  %v9657_v63 = vcombine.low %v637_v23, %v641_v4  ;;  %v9356_v30 = vcombine.high %v334_v18, %v338_v19  ;;  %v9355_v38 = vcombine.low %v334_v18, %v338_v19  ;;  %v12254_v19 = vld [vmem:[#allocation2 + $0x70] ss:$28 sps:$4 sm:$0xff]  }
 0x186   :  { %4150 = vmatprep.subr.bf16.mxu0 %v9300_v24  ;;  %v657_v24 = vld [vmem:[#allocation5 + $0xde8] sm:$0xff] }
 0x187   :  { %3939 = vmatpush1.bf16.msra.mxu1 %v9609_v3  ;;  %v653_v3 = vld [vmem:[#allocation5 + $0xdc8] sm:$0xff] }
 0x188   :  { %4021 = vmatprep.subr.bf16.mxu1 %v9618_v52  ;;  %3529 = vmatmul.mubr.bf16.gmra.mrb[16].mxu0 %v12166_v22  ;;  %v9347_v52 = vcombine.low %v326_v9, %v330_v10  ;;  %v9674_v37 = vcombine.high %v653_v3, %v657_v24  ;;  %v9673_v45 = vcombine.low %v653_v3, %v657_v24  ;;  %v382_v9 = vld [vmem:[#allocation5 + $0x550] sm:$0xff] }
 0x189   :  { %4151 = vmatpush1.bf16.msra.mxu0 %v9299_v51  ;;  %3538 = vmatprep.mubr.bf16.mxu0 %v12170_v50  ;;  %v342_v51 = vld [vmem:[#allocation5 + $0x410] sm:$0xff] }
 0x18a   :  { %3941 = vmatmul.mubr.bf16.vlgmr.msra.gmra.mrb[32].mxu1 %v12134_v7  ;;  %4152 = vmatprep.subr.bf16.mxu0 %v9308_v34  ;;  %v9315_v7 = vcombine.low %v294_v35, %v298_v58  ;;  %v12202_v35 = vld [vmem:[#allocation5 + $0x18] sm:$0xff]  ;;  %v386_v10 = vld [vmem:[#allocation5 + $0x570] sm:$0xff] }
 0x18b   :  { %4022 = vmatpush1.bf16.msra.mxu1 %v9617_v55  ;;  %3950 = vmatprep.mubr.bf16.mxu1 %v12138_v41  ;;  %v9642_v41 = vcombine.high %v621_v48, %v625_v49  ;;  %v346_v55 = vld [vmem:[#allocation5 + $0x430] sm:$0xff]  ;;  %v12204_v58 = vld [vmem:[#allocation5 + $0x38] sm:$0xff] }
 0x18c   :  { %4023 = vmatprep.subr.bf16.mxu1 %v9626_v39  ;;  %v9364_v39 = vcombine.high %v342_v51, %v346_v55  ;;  %v9363_v48 = vcombine.low %v342_v51, %v346_v55  ;;  %v398_v24 = vld [vmem:[#allocation5 + $0x5d0] sm:$0xff] }
 0x18d   :  { %4153 = vmatpush1.bf16.msra.mxu0 %v9307_v21  ;;  %v350_v21 = vld [vmem:[#allocation5 + $0x450] sm:$0xff] }
 0x18e   :  { %4154 = vmatprep.subr.bf16.mxu0 %v9316_v43  ;;  %v354_v43 = vld [vmem:[#allocation5 + $0x470] sm:$0xff] }
 0x18f   :  { %4024 = vmatpush1.bf16.msra.mxu1 %v9625_v42  ;;  %v12209_v42 = vld [vmem:[#allocation2 + $0x4] ss:$28 sps:$4 sm:$0xff]   ;;  %v9372_v49 = vcombine.high %v350_v21, %v354_v43 }
 0x190   :  { %4025 = vmatprep.subr.bf16.mxu1 %v9634_v8  ;;  %3539 = vmatmul.mubr.bf16.gmra.mrb[20].mxu0 %v12174_v25 }
 0x191   :  { %4155 = vmatpush1.bf16.msra.mxu0 %v9315_v7  ;;  %3548 = vmatprep.mubr.bf16.mxu0 %v12178_v12  ;;  %v358_v7 = vld [vmem:[#allocation5 + $0x490] sm:$0xff] }
 0x192   :  { %3951 = vmatmul.mubr.bf16.gmra.mrb[36].mxu1 %v12142_v28  ;;  %4156 = vmatprep.subr.bf16.mxu0 %v9324_v6  ;;  %v9331_v28 = vcombine.low %v310_v53, %v314_v54  ;;  %v362_v6 = vld [vmem:[#allocation5 + $0x4b0] sm:$0xff]  ;;  %v12222_v54 = vld [vmem:[#allocation2] ss:$28 sps:$4 sm:$0xff]  }
 0x193   :  { %3960 = vmatprep.mubr.bf16.mxu1 %v12146_v59  ;;  %4026 = vmatpush1.bf16.msra.mxu1 %v9633_v11  ;;  %v9658_v59 = vcombine.high %v637_v23, %v641_v4  ;;  %v9371_v11 = vcombine.low %v350_v21, %v354_v43  ;;  %v9380_v17 = vcombine.high %v358_v7, %v362_v6  ;;  %v374_v23 = vld [vmem:[#allocation5 + $0x510] sm:$0xff] }
 0x194   :  { %4027 = vmatprep.subr.bf16.mxu1 %v9642_v41  ;;  %v370_v41 = vld [vmem:[#allocation5 + $0x4f0] sm:$0xff]  ;;  %v9379_v62 = vcombine.low %v358_v7, %v362_v6  ;;  %v227_v6 = vld [vmem:[#allocation5 + $0x78] sm:$0xff] }
 0x195   :  { %4157 = vmatpush1.bf16.msra.mxu0 %v9323_v57  ;;  %v12227_v57 = vld [vmem:[#allocation2 + $0x3c] ss:$28 sps:$4 sm:$0xff]   ;;  %v378_v4 = vld [vmem:[#allocation5 + $0x530] sm:$0xff] }
 0x196   :  { %4158 = vmatprep.subr.bf16.mxu0 %v9332_v60  ;;  %v414_v43 = vld [vmem:[#allocation5 + $0x650] sm:$0xff] }
 0x197   :  { %4028 = vmatpush1.bf16.msra.mxu1 %v9641_v20 }
 0x198   :  { %3549 = vmatmul.mubr.bf16.gmra.mrb[24].mxu0 %v12183_v44  ;;  %4029 = vmatprep.subr.bf16.mxu1 %v9650_v5  ;;  %v12238_v5 = vld [vmem:[#allocation2 + $0x38] ss:$28 sps:$4 sm:$0xff]  }
 0x199   :  { %4159 = vmatpush1.bf16.msra.mxu0 %v9331_v28  ;;  %3558 = vmatprep.mubr.bf16.mxu0 %v12186_v33  ;;  %v9387_v28 = vcombine.low %v366_v56, %v370_v41 }
 0x19a   :  { %3961 = vmatmul.mubr.bf16.gmra.mrb[40].mxu1 %v12150_v47  ;;  %4160 = vmatprep.subr.bf16.mxu0 %v9340_v27  ;;  %v9666_v47 = vcombine.high %v645_v36, %v649_v13  ;;  %v9396_v27 = vcombine.high %v374_v23, %v378_v4 }
 0x19b   :  { %3970 = vmatprep.mubr.bf16.mxu1 %v12154_v15  ;;  %4030 = vmatpush1.bf16.msra.mxu1 %v9649_v32  ;;  %v9665_v15 = vcombine.low %v645_v36, %v649_v13  ;;  %v12243_v32 = vld [vmem:[#allocation2 + $0x74] ss:$28 sps:$4 sm:$0xff]  }
 0x19c   :  { %4031 = vmatprep.subr.bf16.mxu1 %v9658_v59  ;;  %v9395_v59 = vcombine.low %v374_v23, %v378_v4  ;;  %v422_v23 = vld [vmem:[#allocation5 + $0x690] sm:$0xff] }
 0x19d   :  { %v12194_v26 = vpop.f32.mrb[0].mxu1  ;;  %4161 = vmatpush1.bf16.msra.mxu0 %v9339_v14  ;;  %v426_v4 = vld [vmem:[#allocation5 + $0x6b0] sm:$0xff] }
 0x19e   :  { %v12196_v46 = vpop.f32.mrb[1].mxu1  ;;  %4162 = vmatprep.subr.bf16.mxu0 %v9348_v16  ;;  %v390_v16 = vld [vmem:[#allocation5 + $0x590] sm:$0xff] }
 0x19f   :  { %v12198_v29 = vpop.f32.mrb[2].mxu1  ;;  %4032 = vmatpush1.bf16.msra.mxu1 %v9657_v63  ;;  %v9403_v63 = vcombine.low %v382_v9, %v386_v10 }
 0x1a0   :  { %v12200_v34 = vpop.f32.mrb[3].mxu1  ;;  %3559 = vmatmul.mubr.bf16.gmra.mrb[28].mxu0 %v12191_v40  ;;  %4033 = vmatprep.subr.bf16.mxu1 %v9666_v47  ;;  %v402_v47 = vld [vmem:[#allocation5 + $0x5f0] sm:$0xff] }
 0x1a1   :  { %4163 = vmatpush1.bf16.msra.mxu0 %v9347_v52  ;;  %4166 = vmatprep.mubr.bf16.mxu0 %v12209_v42  ;;  %v12259_v52 = vld [vmem:[#allocation2 + $0xac] ss:$28 sps:$4 sm:$0xff]   ;;  %v9419_v21 = vcombine.low %v398_v24, %v402_v47 }
 0x1a2   :  { %3971 = vmatmul.mubr.bf16.gmra.mrb[44].mxu1 %v12158_v2  ;;  %4164 = vmatprep.subr.bf16.mxu0 %v9356_v30  ;;  %v9238_v2 = vcombine.high %v12202_v35, %v12204_v58 }
 0x1a3   :  { %3980 = vmatprep.mubr.bf16.mxu1 %v12162_v31  ;;  %4034 = vmatpush1.bf16.msra.mxu1 %v9665_v15 }
 0x1a4   :  { %4035 = vmatprep.subr.bf16.mxu1 %v9674_v37  ;;  %v406_v37 = vld [vmem:[#allocation5 + $0x610] sm:$0xff] }
 0x1a5   :  { %v12212_v1 = vpop.f32.mrb[4].mxu1  ;;  %4165 = vmatpush1.bf16.msra.mxu0 %v9355_v38 }
 0x1a6   :  { %v12216_v8 = vpop.f32.mrb[5].mxu1  ;;  %4247 = vmatprep.subr.bf16.mxu0 %v9364_v39  ;;  %v12270_v39 = vld [vmem:[#allocation2 + $0xa8] ss:$28 sps:$4 sm:$0xff]  }
 0x1a7   :  { %v12218_v31 = vpop.f32.mrb[6].mxu1  ;;  %4036 = vmatpush1.bf16.msra.mxu1 %v9673_v45 }
 0x1a8   :  { %v12220_v53 = vpop.f32.mrb[7].mxu1  ;;  %4167 = vmatmul.mubr.bf16.vlgmr.msra.gmra.mrb[32].mxu0 %v12222_v54  ;;  %4586 = vmatprep.subr.bf16.mxu1 %v9238_v2  ;;  %v418_v2 = vld [vmem:[#allocation5 + $0x670] sm:$0xff] }
 0x1a9   :  { %4248 = vmatpush1.bf16.msra.mxu0 %v9363_v48  ;;  %4176 = vmatprep.mubr.bf16.mxu0 %v12227_v57  ;;  %v223_v48 = vld [vmem:[#allocation5 + $0x58] sm:$0xff] }
 0x1aa   :  { %3981 = vmatmul.mubr.bf16.gmra.mrb[48].mxu1 %v12166_v22  ;;  %4249 = vmatprep.subr.bf16.mxu0 %v9372_v49  ;;  %v9388_v22 = vcombine.high %v366_v56, %v370_v41  ;;  %v12275_v49 = vld [vmem:[#allocation2 + $0xe4] ss:$28 sps:$4 sm:$0xff]   ;;  %v9237_v56 = vcombine.low %v12202_v35, %v12204_v58  ;;  %v9436_v41 = vcombine.high %v414_v43, %v418_v2 }
 0x1ab   :  { %3990 = vmatprep.mubr.bf16.mxu1 %v12170_v50  ;;  %v9444_v35 = vcombine.high %v422_v23, %v426_v4 }
 0x1ad   :  { %v12230_v60 = vpop.f32.mrb[8].mxu1  ;;  %4250 = vmatpush1.bf16.msra.mxu0 %v9371_v11 }
 0x1ae   :  { %v12232_v61 = vpop.f32.mrb[9].mxu1  ;;  %4251 = vmatprep.subr.bf16.mxu0 %v9380_v17 }
 0x1af   :  { %v12234_v20 = vpop.f32.mrb[10].mxu1 }
 0x1b0   :  { %v12236_v50 = vpop.f32.mrb[11].mxu1  ;;  %4177 = vmatmul.mubr.bf16.gmra.mrb[36].mxu0 %v12238_v5 }
 0x1b1   :  { %4252 = vmatpush1.bf16.msra.mxu0 %v9379_v62  ;;  %4186 = vmatprep.mubr.bf16.mxu0 %v12243_v32 }
 0x1b2   :  { %3991 = vmatmul.mubr.bf16.gmra.mrb[52].mxu1 %v12174_v25  ;;  %4253 = vmatprep.subr.bf16.mxu0 %v9388_v22  ;;  %v9404_v25 = vcombine.high %v382_v9, %v386_v10  ;;  %v9246_v22 = vcombine.high %v223_v48, %v227_v6  ;;  %v235_v9 = vld [vmem:[#allocation5 + $0xb8] sm:$0xff] }
 0x1b3   :  { %4000 = vmatprep.mubr.bf16.mxu1 %v12178_v12  ;;  %v394_v12 = vld [vmem:[#allocation5 + $0x5b0] sm:$0xff] }
 0x1b4   :  { %v9412_v3 = vcombine.high %v390_v16, %v394_v12  ;;  %v9411_v55 = vcombine.low %v390_v16, %v394_v12  ;;  %v11535_v10 = vld [vmem:[#allocation2 + $0x18] ss:$28 sps:$4 sm:$0xff]  }
 0x1b5   :  { %v12246_v36 = vpop.f32.mrb[12].mxu1  ;;  %4254 = vmatpush1.bf16.msra.mxu0 %v9387_v28  ;;  %v12288_v28 = vld [vmem:[#allocation2 + $0xe0] ss:$28 sps:$4 sm:$0xff]   ;;  %v430_v16 = vld [vmem:[#allocation5 + $0x6d0] sm:$0xff] }
 0x1b6   :  { %v12248_v13 = vpop.f32.mrb[13].mxu1  ;;  %4255 = vmatprep.subr.bf16.mxu0 %v9396_v27  ;;  %v231_v27 = vld [vmem:[#allocation5 + $0x98] sm:$0xff]  ;;  %v434_v12 = vld [vmem:[#allocation5 + $0x6f0] sm:$0xff] }
 0x1b7   :  { %v12250_v14 = vpop.f32.mrb[14].mxu1  ;;  %v9254_v58 = vcombine.high %v231_v27, %v235_v9 }
 0x1b8   :  { %v12252_v18 = vpop.f32.mrb[15].mxu1  ;;  %4187 = vmatmul.mubr.bf16.gmra.mrb[40].mxu0 %v12254_v19 }
 0x1b9   :  { %4256 = vmatpush1.bf16.msra.mxu0 %v9395_v59  ;;  %4196 = vmatprep.mubr.bf16.mxu0 %v12259_v52  ;;  %v9435_v59 = vcombine.low %v414_v43, %v418_v2  ;;  %v438_v2 = vld [vmem:[#allocation5 + $0x710] sm:$0xff] }
 0x1ba   :  { %4001 = vmatmul.mubr.bf16.gmra.mrb[56].mxu1 %v12183_v44  ;;  %4257 = vmatprep.subr.bf16.mxu0 %v9404_v25  ;;  %v9420_v44 = vcombine.high %v398_v24, %v402_v47  ;;  %v9245_v25 = vcombine.low %v223_v48, %v227_v6  ;;  %v239_v24 = vld [vmem:[#allocation5 + $0xd8] sm:$0xff]  ;;  %v442_v48 = vld [vmem:[#allocation5 + $0x730] sm:$0xff] }
 0x1bb   :  { %4010 = vmatprep.mubr.bf16.mxu1 %v12186_v33  ;;  %v410_v33 = vld [vmem:[#allocation5 + $0x630] sm:$0xff]  ;;  %v243_v47 = vld [vmem:[#allocation5 + $0xf8] sm:$0xff] }
 0x1bc   :  { %v9428_v45 = vcombine.high %v406_v37, %v410_v33  ;;  %v12303_v6 = vld [vmem:[#allocation2 + $0x118] ss:$28 sps:$4 sm:$0xff]  }
 0x1bd   :  { %v12262_v30 = vpop.f32.mrb[16].mxu1  ;;  %4258 = vmatpush1.bf16.msra.mxu0 %v9403_v63 }
 0x1be   :  { %v12264_v51 = vpop.f32.mrb[17].mxu1  ;;  %4259 = vmatprep.subr.bf16.mxu0 %v9412_v3  ;;  %v12294_v3 = vld [vmem:[#allocation2 + $0x11c] ss:$28 sps:$4 sm:$0xff]  }
 0x1bf   :  { %v12266_v15 = vpop.f32.mrb[18].mxu1 }
 0x1c0   :  { %13479 = vst [vmem:[#allocation24_spill] sm:$0xff] %v12266_v15  ;;  %v12268_v38 = vpop.f32.mrb[19].mxu1  ;;  %4197 = vmatmul.mubr.bf16.gmra.mrb[44].mxu0 %v12270_v39 }
 0x1c1   :  { %13480 = vst [vmem:[#allocation25_spill] sm:$0xff] %v12268_v38  ;;  %4260 = vmatpush1.bf16.msra.mxu0 %v9411_v55  ;;  %4206 = vmatprep.mubr.bf16.mxu0 %v12275_v49 }
 0x1c2   :  { %4011 = vmatmul.mubr.bf16.gmra.mrb[60].mxu1 %v12191_v40  ;;  %4261 = vmatprep.subr.bf16.mxu0 %v9420_v44  ;;  %v9427_v40 = vcombine.low %v406_v37, %v410_v33  ;;  %v9443_v44 = vcombine.low %v422_v23, %v426_v4  ;;  %v9253_v33 = vcombine.low %v231_v27, %v235_v9  ;;  %v446_v9 = vld [vmem:[#allocation5 + $0x750] sm:$0xff] }
 0x1c3   :  { %4053 = vmatprep.mubr.bf16.mxu1 %v13462_v0  ;;  %v9261_v23 = vcombine.low %v239_v24, %v243_v47  ;;  %v9460_v4 = vcombine.high %v438_v2, %v442_v48 }
 0x1c5   :  { %v12278_v7 = vpop.f32.mrb[20].mxu1  ;;  %4262 = vmatpush1.bf16.msra.mxu0 %v9419_v21  ;;  %v9452_v21 = vcombine.high %v430_v16, %v434_v12 }
 0x1c6   :  { %13481 = vst [vmem:[#allocation26_spill] sm:$0xff] %v12278_v7  ;;  %v12280_v11 = vpop.f32.mrb[21].mxu1  ;;  %4263 = vmatprep.subr.bf16.mxu0 %v9428_v45  ;;  %v9262_v45 = vcombine.high %v239_v24, %v243_v47  ;;  %v11553_v7 = vld [vmem:[#allocation2 + $0x168] ss:$28 sps:$4 sm:$0xff]  }
 0x1c7   :  { %13482 = vst [vmem:[#allocation27_spill] sm:$0xff] %v12280_v11  ;;  %v12282_v17 = vpop.f32.mrb[22].mxu1 }
 0x1c8   :  { %13483 = vst [vmem:[#allocation28_spill] sm:$0xff] %v12282_v17  ;;  %v12286_v62 = vpop.f32.mrb[23].mxu1  ;;  %4207 = vmatmul.mubr.bf16.gmra.mrb[48].mxu0 %v12288_v28  ;;  %v11550_v17 = vld [vmem:[#allocation2 + $0x130] ss:$28 sps:$4 sm:$0xff]  }
 0x1c9   :  { %13484 = vst [vmem:[#allocation29_spill] sm:$0xff] %v12286_v62  ;;  %4264 = vmatpush1.bf16.msra.mxu0 %v9427_v40  ;;  %4216 = vmatprep.mubr.bf16.mxu0 %v12294_v3  ;;  %v247_v40 = vld [vmem:[#allocation5 + $0x118] sm:$0xff] }
 0x1ca   :  { %4054 = vmatmul.mubr.bf16.vlgmr.msra.gmra.mrb[32].mxu1 %v11535_v10  ;;  %4265 = vmatprep.subr.bf16.mxu0 %v9436_v41  ;;  %v11538_v41 = vld [vmem:[#allocation2 + $0x50] ss:$28 sps:$4 sm:$0xff]  }
 0x1cb   :  { %4587 = vmatpush1.bf16.msra.mxu1 %v9237_v56  ;;  %4063 = vmatprep.mubr.bf16.mxu1 %v13462_v0  ;;  %v251_v56 = vld [vmem:[#allocation5 + $0x138] sm:$0xff]  ;;  %v450_v10 = vld [vmem:[#allocation5 + $0x770] sm:$0xff] }
 0x1cc   :  { %4588 = vmatprep.subr.bf16.mxu1 %v9246_v22  ;;  %v9451_v22 = vcombine.low %v430_v16, %v434_v12  ;;  %v9270_v27 = vcombine.high %v247_v40, %v251_v56  ;;  %v9459_v16 = vcombine.low %v438_v2, %v442_v48  ;;  %v9269_v24 = vcombine.low %v247_v40, %v251_v56 }
 0x1cd   :  { %v12292_v63 = vpop.f32.mrb[24].mxu1  ;;  %4266 = vmatpush1.bf16.msra.mxu0 %v9435_v59  ;;  %v9468_v47 = vcombine.high %v446_v9, %v450_v10  ;;  %v9467_v2 = vcombine.low %v446_v9, %v450_v10  ;;  %v13493_v56 = vmov 0  }
 0x1ce   :  { %13485 = vst [vmem:[#allocation30_spill] sm:$0xff] %v12292_v63  ;;  %v12297_v55 = vpop.f32.mrb[25].mxu1  ;;  %4267 = vmatprep.subr.bf16.mxu0 %v9444_v35  ;;  %v255_v35 = vld [vmem:[#allocation5 + $0x158] sm:$0xff] }
 0x1cf   :  { %13486 = vst [vmem:[#allocation31_spill] sm:$0xff] %v12297_v55  ;;  %v12299_v37 = vpop.f32.mrb[26].mxu1  ;;  %4589 = vmatpush1.bf16.msra.mxu1 %v9245_v25  ;;  %v12309_v25 = vld [vmem:[#allocation2 + $0x154] ss:$28 sps:$4 sm:$0xff]  }
 0x1d0   :  { %13487 = vst [vmem:[#allocation32_spill] sm:$0xff] %v12299_v37  ;;  %v12301_v43 = vpop.f32.mrb[27].mxu1  ;;  %4590 = vmatprep.subr.bf16.mxu1 %v9254_v58  ;;  %4217 = vmatmul.mubr.bf16.gmra.mrb[52].mxu0 %v12303_v6  ;;  %v259_v58 = vld [vmem:[#allocation5 + $0x178] sm:$0xff] }
 0x1d1   :  { %13488 = vst [vmem:[#allocation33_spill] sm:$0xff] %v12301_v43  ;;  %4268 = vmatpush1.bf16.msra.mxu0 %v9443_v44  ;;  %4226 = vmatprep.mubr.bf16.mxu0 %v12309_v25  ;;  %v9277_v48 = vcombine.low %v255_v35, %v259_v58  ;;  %v275_v43 = vld [vmem:[#allocation5 + $0x1f8] sm:$0xff] }
 0x1d2   :  { %4064 = vmatmul.mubr.bf16.gmra.mrb[36].mxu1 %v11538_v41  ;;  %4269 = vmatprep.subr.bf16.mxu0 %v9452_v21  ;;  %v9278_v21 = vcombine.high %v255_v35, %v259_v58  ;;  %v458_v41 = vld [vmem:[#allocation5 + $0x7b0] sm:$0xff]  ;;  %v11544_v37 = vld [vmem:[#allocation2 + $0xc0] ss:$28 sps:$4 sm:$0xff]  }
 0x1d3   :  { %4591 = vmatpush1.bf16.msra.mxu1 %v9253_v33  ;;  %4073 = vmatprep.mubr.bf16.mxu1 %v13462_v0  ;;  %v12318_v0 = vld [vmem:[#allocation2 + $0x150] ss:$28 sps:$4 sm:$0xff]   ;;  %v11547_v63 = vld [vmem:[#allocation2 + $0xf8] ss:$28 sps:$4 sm:$0xff]  }
 0x1d4   :  { %4592 = vmatprep.subr.bf16.mxu1 %v9262_v45  ;;  %v454_v45 = vld [vmem:[#allocation5 + $0x790] sm:$0xff] }
 0x1d5   :  { %v12307_v59 = vpop.f32.mrb[28].mxu1  ;;  %4270 = vmatpush1.bf16.msra.mxu0 %v9451_v22  ;;  %v11541_v22 = vld [vmem:[#allocation2 + $0x88] ss:$28 sps:$4 sm:$0xff]   ;;  %v9476_v40 = vcombine.high %v454_v45, %v458_v41  ;;  %v470_v58 = vld [vmem:[#allocation5 + $0x810] sm:$0xff] }
 0x1d6   :  { %13489 = vst [vmem:[#allocation34_spill] sm:$0xff] %v12307_v59  ;;  %v12312_v44 = vpop.f32.mrb[29].mxu1  ;;  %4271 = vmatprep.subr.bf16.mxu0 %v9460_v4  ;;  %v263_v59 = vld [vmem:[#allocation5 + $0x198] sm:$0xff]  ;;  %v462_v4 = vld [vmem:[#allocation5 + $0x7d0] sm:$0xff] }
 0x1d7   :  { %13490 = vst [vmem:[#allocation35_spill] sm:$0xff] %v12312_v44  ;;  %v12314_v12 = vpop.f32.mrb[30].mxu1  ;;  %4593 = vmatpush1.bf16.msra.mxu1 %v9261_v23  ;;  %v267_v44 = vld [vmem:[#allocation5 + $0x1b8] sm:$0xff] }
 0x1d8   :  { %13491 = vst [vmem:[#allocation36_spill] sm:$0xff] %v12314_v12  ;;  %v12316_v33 = vpop.f32.mrb[31].mxu1  ;;  %4594 = vmatprep.subr.bf16.mxu1 %v9270_v27  ;;  %4227 = vmatmul.mubr.bf16.gmra.mrb[56].mxu0 %v12318_v0  ;;  %v9286_v23 = vcombine.high %v263_v59, %v267_v44  ;;  %v466_v27 = vld [vmem:[#allocation5 + $0x7f0] sm:$0xff]  ;;  %v271_v12 = vld [vmem:[#allocation5 + $0x1d8] sm:$0xff]  ;;  %v9285_v9 = vcombine.low %v263_v59, %v267_v44 }
 0x1d9   :  { %13492 = vst [vmem:[#allocation37_spill] sm:$0xff] %v12316_v33  ;;  %4272 = vmatpush1.bf16.msra.mxu0 %v9459_v16  ;;  %v12322_v33 = vld [vmem:[#allocation2 + $0x18c] ss:$28 sps:$4 sm:$0xff]   ;;  %v9484_v10 = vcombine.high %v462_v4, %v466_v27  ;;  %v9294_v35 = vcombine.high %v271_v12, %v275_v43  ;;  %v474_v16 = vld [vmem:[#allocation5 + $0x830] sm:$0xff]  ;;  %v9483_v55 = vcombine.low %v462_v4, %v466_v27 }
 0x1da   :  { %4074 = vmatmul.mubr.bf16.gmra.mrb[40].mxu1 %v11541_v22  ;;  %4273 = vmatprep.subr.bf16.mxu0 %v9468_v47  ;;  %v9475_v22 = vcombine.low %v454_v45, %v458_v41  ;;  %v279_v47 = vld [vmem:[#allocation5 + $0x218] sm:$0xff]  ;;  %v9293_v45 = vcombine.low %v271_v12, %v275_v43  ;;  %v9492_v41 = vcombine.high %v470_v58, %v474_v16  ;;  %v478_v44 = vld [vmem:[#allocation5 + $0x850] sm:$0xff] }
 0x1db   :  { %4595 = vmatpush1.bf16.msra.mxu1 %v9269_v24  ;;  %4083 = vmatprep.mubr.bf16.mxu1 %v13493_v56  ;;  %v12325_v24 = vld [vmem:[#allocation2 + $0x188] ss:$28 sps:$4 sm:$0xff]   ;;  %v486_v12 = vld [vmem:[#allocation5 + $0x890] sm:$0xff] }
 0x1dc   :  { %4596 = vmatprep.subr.bf16.mxu1 %v9278_v21  ;;  %4236 = vmatprep.mubr.bf16.mxu0 %v12322_v33  ;;  %v283_v21 = vld [vmem:[#allocation5 + $0x238] sm:$0xff] }
 0x1dd   :  { %4274 = vmatpush1.bf16.msra.mxu0 %v9467_v2  ;;  %v9302_v59 = vcombine.high %v279_v47, %v283_v21  ;;  %v482_v2 = vld [vmem:[#allocation5 + $0x870] sm:$0xff]  ;;  %v9301_v4 = vcombine.low %v279_v47, %v283_v21 }
 0x1de   :  { %4275 = vmatprep.subr.bf16.mxu0 %v9476_v40  ;;  %v287_v40 = vld [vmem:[#allocation5 + $0x258] sm:$0xff]  ;;  %v9500_v27 = vcombine.high %v478_v44, %v482_v2  ;;  %v9499_v62 = vcombine.low %v478_v44, %v482_v2  ;;  %v494_v47 = vld [vmem:[#allocation5 + $0x8d0] sm:$0xff] }
 0x1df   :  { %4597 = vmatpush1.bf16.msra.mxu1 %v9277_v48  ;;  %v12329_v48 = vld [vmem:[#allocation2 + $0xc] ss:$28 sps:$4 sm:$0xff]   ;;  %v498_v21 = vld [vmem:[#allocation5 + $0x8f0] sm:$0xff] }
 0x1e0   :  { %4598 = vmatprep.subr.bf16.mxu1 %v9286_v23  ;;  %4237 = vmatmul.mubr.bf16.gmra.mrb[60].mxu0 %v12325_v24  ;;  %v291_v23 = vld [vmem:[#allocation5 + $0x278] sm:$0xff]  ;;  %v9516_v2 = vcombine.high %v494_v47, %v498_v21  ;;  %v9515_v11 = vcombine.low %v494_v47, %v498_v21 }
 0x1e1   :  { %4276 = vmatpush1.bf16.msra.mxu0 %v9475_v22  ;;  %4279 = vmatprep.mubr.bf16.mxu0 %v12329_v48  ;;  %v9310_v43 = vcombine.high %v287_v40, %v291_v23  ;;  %v490_v22 = vld [vmem:[#allocation5 + $0x8b0] sm:$0xff] }
 0x1e2   :  { %4084 = vmatmul.mubr.bf16.gmra.mrb[44].mxu1 %v11544_v37  ;;  %4277 = vmatprep.subr.bf16.mxu0 %v9484_v10  ;;  %v9491_v37 = vcombine.low %v470_v58, %v474_v16  ;;  %v295_v10 = vld [vmem:[#allocation5 + $0x298] sm:$0xff]  ;;  %v9508_v58 = vcombine.high %v486_v12, %v490_v22 }
 0x1e3   :  { %4599 = vmatpush1.bf16.msra.mxu1 %v9285_v9  ;;  %4093 = vmatprep.mubr.bf16.mxu1 %v13493_v56  ;;  %v12332_v9 = vld [vmem:[#allocation2 + $0x8] ss:$28 sps:$4 sm:$0xff]  }
 0x1e4   :  { %4600 = vmatprep.subr.bf16.mxu1 %v9294_v35  ;;  %v299_v35 = vld [vmem:[#allocation5 + $0x2b8] sm:$0xff] }
 0x1e5   :  { %4278 = vmatpush1.bf16.msra.mxu0 %v9483_v55  ;;  %v9309_v55 = vcombine.low %v287_v40, %v291_v23  ;;  %v9318_v16 = vcombine.high %v295_v10, %v299_v35  ;;  %v9317_v44 = vcombine.low %v295_v10, %v299_v35  ;;  %v502_v23 = vld [vmem:[#allocation5 + $0x910] sm:$0xff] }
 0x1e6   :  { %4360 = vmatprep.subr.bf16.mxu0 %v9492_v41  ;;  %v303_v41 = vld [vmem:[#allocation5 + $0x2d8] sm:$0xff]  ;;  %v510_v10 = vld [vmem:[#allocation5 + $0x950] sm:$0xff] }
 0x1e7   :  { %4601 = vmatpush1.bf16.msra.mxu1 %v9293_v45  ;;  %v12336_v45 = vld [vmem:[#allocation2 + $0x44] ss:$28 sps:$4 sm:$0xff]   ;;  %v514_v35 = vld [vmem:[#allocation5 + $0x970] sm:$0xff] }
 0x1e8   :  { %4602 = vmatprep.subr.bf16.mxu1 %v9302_v59  ;;  %4280 = vmatmul.mubr.bf16.vlgmr.msra.gmra.mrb[32].mxu0 %v12332_v9  ;;  %v307_v59 = vld [vmem:[#allocation5 + $0x2f8] sm:$0xff]  ;;  %v9532_v21 = vcombine.high %v510_v10, %v514_v35  ;;  %v9531_v38 = vcombine.low %v510_v10, %v514_v35 }
 0x1e9   :  { %4361 = vmatpush1.bf16.msra.mxu0 %v9491_v37  ;;  %4289 = vmatprep.mubr.bf16.mxu0 %v12336_v45  ;;  %v9326_v40 = vcombine.high %v303_v41, %v307_v59  ;;  %v506_v37 = vld [vmem:[#allocation5 + $0x930] sm:$0xff] }
 0x1ea   :  { %4094 = vmatmul.mubr.bf16.gmra.mrb[48].mxu1 %v11547_v63  ;;  %4362 = vmatprep.subr.bf16.mxu0 %v9500_v27  ;;  %v9507_v63 = vcombine.low %v486_v12, %v490_v22  ;;  %v311_v27 = vld [vmem:[#allocation5 + $0x318] sm:$0xff]  ;;  %v9524_v12 = vcombine.high %v502_v23, %v506_v37 }
 0x1eb   :  { %4603 = vmatpush1.bf16.msra.mxu1 %v9301_v4  ;;  %4103 = vmatprep.mubr.bf16.mxu1 %v13493_v56  ;;  %v12339_v4 = vld [vmem:[#allocation2 + $0x40] ss:$28 sps:$4 sm:$0xff]  }
 0x1ec   :  { %4604 = vmatprep.subr.bf16.mxu1 %v9310_v43  ;;  %v315_v43 = vld [vmem:[#allocation5 + $0x338] sm:$0xff] }
 0x1ed   :  { %4363 = vmatpush1.bf16.msra.mxu0 %v9499_v62  ;;  %v9325_v62 = vcombine.low %v303_v41, %v307_v59  ;;  %v9334_v22 = vcombine.high %v311_v27, %v315_v43  ;;  %v9333_v47 = vcombine.low %v311_v27, %v315_v43  ;;  %v518_v59 = vld [vmem:[#allocation5 + $0x990] sm:$0xff] }
 0x1ee   :  { %4364 = vmatprep.subr.bf16.mxu0 %v9508_v58  ;;  %v319_v58 = vld [vmem:[#allocation5 + $0x358] sm:$0xff]  ;;  %v526_v27 = vld [vmem:[#allocation5 + $0x9d0] sm:$0xff] }
 0x1ef   :  { %4605 = vmatpush1.bf16.msra.mxu1 %v9309_v55  ;;  %v12343_v55 = vld [vmem:[#allocation2 + $0x7c] ss:$28 sps:$4 sm:$0xff]   ;;  %v530_v43 = vld [vmem:[#allocation5 + $0x9f0] sm:$0xff] }
 0x1f0   :  { %4606 = vmatprep.subr.bf16.mxu1 %v9318_v16  ;;  %4290 = vmatmul.mubr.bf16.gmra.mrb[36].mxu0 %v12339_v4  ;;  %v323_v16 = vld [vmem:[#allocation5 + $0x378] sm:$0xff]  ;;  %v9548_v35 = vcombine.high %v526_v27, %v530_v43  ;;  %v9547_v15 = vcombine.low %v526_v27, %v530_v43 }
 0x1f1   :  { %4365 = vmatpush1.bf16.msra.mxu0 %v9507_v63  ;;  %4299 = vmatprep.mubr.bf16.mxu0 %v12343_v55  ;;  %v9342_v41 = vcombine.high %v319_v58, %v323_v16  ;;  %v522_v63 = vld [vmem:[#allocation5 + $0x9b0] sm:$0xff] }
 0x1f2   :  { %4104 = vmatmul.mubr.bf16.gmra.mrb[52].mxu1 %v11550_v17  ;;  %4366 = vmatprep.subr.bf16.mxu0 %v9516_v2  ;;  %v9523_v17 = vcombine.low %v502_v23, %v506_v37  ;;  %v327_v2 = vld [vmem:[#allocation5 + $0x398] sm:$0xff]  ;;  %v9540_v23 = vcombine.high %v518_v59, %v522_v63 }
 0x1f3   :  { %4607 = vmatpush1.bf16.msra.mxu1 %v9317_v44  ;;  %4113 = vmatprep.mubr.bf16.mxu1 %v13493_v56  ;;  %v12346_v44 = vld [vmem:[#allocation2 + $0x78] ss:$28 sps:$4 sm:$0xff]  }
 0x1f4   :  { %4608 = vmatprep.subr.bf16.mxu1 %v9326_v40  ;;  %v331_v40 = vld [vmem:[#allocation5 + $0x3b8] sm:$0xff] }
 0x1f5   :  { %4367 = vmatpush1.bf16.msra.mxu0 %v9515_v11  ;;  %v9341_v11 = vcombine.low %v319_v58, %v323_v16  ;;  %v9350_v37 = vcombine.high %v327_v2, %v331_v40  ;;  %v9349_v10 = vcombine.low %v327_v2, %v331_v40  ;;  %v534_v16 = vld [vmem:[#allocation5 + $0xa10] sm:$0xff] }
 0x1f6   :  { %4368 = vmatprep.subr.bf16.mxu0 %v9524_v12  ;;  %v335_v12 = vld [vmem:[#allocation5 + $0x3d8] sm:$0xff]  ;;  %v542_v40 = vld [vmem:[#allocation5 + $0xa50] sm:$0xff] }
 0x1f7   :  { %4609 = vmatpush1.bf16.msra.mxu1 %v9325_v62  ;;  %v12350_v62 = vld [vmem:[#allocation2 + $0xb4] ss:$28 sps:$4 sm:$0xff]  }
 0x1f8   :  { %4610 = vmatprep.subr.bf16.mxu1 %v9334_v22  ;;  %4300 = vmatmul.mubr.bf16.gmra.mrb[40].mxu0 %v12346_v44  ;;  %v339_v22 = vld [vmem:[#allocation5 + $0x3f8] sm:$0xff] }
 0x1f9   :  { %4369 = vmatpush1.bf16.msra.mxu0 %v9523_v17  ;;  %4309 = vmatprep.mubr.bf16.mxu0 %v12350_v62  ;;  %v9358_v58 = vcombine.high %v335_v12, %v339_v22  ;;  %v538_v17 = vld [vmem:[#allocation5 + $0xa30] sm:$0xff] }
 0x1fa   :  { %4114 = vmatmul.mubr.bf16.gmra.mrb[56].mxu1 %v11553_v7  ;;  %4370 = vmatprep.subr.bf16.mxu0 %v9532_v21  ;;  %v9539_v7 = vcombine.low %v518_v59, %v522_v63  ;;  %v343_v21 = vld [vmem:[#allocation5 + $0x418] sm:$0xff]  ;;  %v9556_v59 = vcombine.high %v534_v16, %v538_v17  ;;  %v12356_v63 = vld [vmem:[#allocation2 + $0xec] ss:$28 sps:$4 sm:$0xff]  }
 0x1fb   :  { %4611 = vmatpush1.bf16.msra.mxu1 %v9333_v47  ;;  %4123 = vmatprep.mubr.bf16.mxu1 %v13493_v56  ;;  %v12353_v47 = vld [vmem:[#allocation2 + $0xb0] ss:$28 sps:$4 sm:$0xff]   ;;  %v11556_v56 = vld [vmem:[#allocation2 + $0x1a0] ss:$28 sps:$4 sm:$0xff]  }
 0x1fc   :  { %4612 = vmatprep.subr.bf16.mxu1 %v9342_v41  ;;  %v347_v41 = vld [vmem:[#allocation5 + $0x438] sm:$0xff] }
 0x1fd   :  { %4371 = vmatpush1.bf16.msra.mxu0 %v9531_v38  ;;  %v9357_v38 = vcombine.low %v335_v12, %v339_v22  ;;  %v9366_v2 = vcombine.high %v343_v21, %v347_v41  ;;  %v9365_v27 = vcombine.low %v343_v21, %v347_v41  ;;  %v550_v22 = vld [vmem:[#allocation5 + $0xa90] sm:$0xff] }
 0x1fe   :  { %4372 = vmatprep.subr.bf16.mxu0 %v9540_v23  ;;  %v351_v23 = vld [vmem:[#allocation5 + $0x458] sm:$0xff]  ;;  %v558_v41 = vld [vmem:[#allocation5 + $0xad0] sm:$0xff] }
 0x1ff   :  { %4613 = vmatpush1.bf16.msra.mxu1 %v9341_v11  ;;  %v546_v11 = vld [vmem:[#allocation5 + $0xa70] sm:$0xff] }
 0x200   :  { %4614 = vmatprep.subr.bf16.mxu1 %v9350_v37  ;;  %4310 = vmatmul.mubr.bf16.gmra.mrb[44].mxu0 %v12353_v47  ;;  %v355_v37 = vld [vmem:[#allocation5 + $0x478] sm:$0xff]  ;;  %v9564_v43 = vcombine.high %v542_v40, %v546_v11 }
 0x201   :  { %4373 = vmatpush1.bf16.msra.mxu0 %v9539_v7  ;;  %4319 = vmatprep.mubr.bf16.mxu0 %v12356_v63  ;;  %v9374_v12 = vcombine.high %v351_v23, %v355_v37  ;;  %v554_v7 = vld [vmem:[#allocation5 + $0xab0] sm:$0xff] }
 0x202   :  { %4124 = vmatmul.mubr.bf16.gmra.mrb[60].mxu1 %v11556_v56  ;;  %4374 = vmatprep.subr.bf16.mxu0 %v9548_v35  ;;  %v9555_v56 = vcombine.low %v534_v16, %v538_v17  ;;  %v359_v35 = vld [vmem:[#allocation5 + $0x498] sm:$0xff]  ;;  %v9572_v16 = vcombine.high %v550_v22, %v554_v7  ;;  %v12364_v17 = vld [vmem:[#allocation2 + $0x124] ss:$28 sps:$4 sm:$0xff]  }
 0x203   :  { %4615 = vmatpush1.bf16.msra.mxu1 %v9349_v10  ;;  %4618 = vmatprep.mubr.bf16.mxu1 %v12209_v42  ;;  %v12360_v10 = vld [vmem:[#allocation2 + $0xe8] ss:$28 sps:$4 sm:$0xff]   ;;  %v9563_v42 = vcombine.low %v542_v40, %v546_v11 }
 0x204   :  { %4616 = vmatprep.subr.bf16.mxu1 %v9358_v58  ;;  %v363_v58 = vld [vmem:[#allocation5 + $0x4b8] sm:$0xff] }
 0x205   :  { %4375 = vmatpush1.bf16.msra.mxu0 %v9547_v15  ;;  %v9373_v15 = vcombine.low %v351_v23, %v355_v37  ;;  %v9382_v21 = vcombine.high %v359_v35, %v363_v58  ;;  %v9381_v40 = vcombine.low %v359_v35, %v363_v58  ;;  %v566_v37 = vld [vmem:[#allocation5 + $0xb10] sm:$0xff]  ;;  %v12372_v35 = vld [vmem:[#allocation2 + $0x15c] ss:$28 sps:$4 sm:$0xff]  }
 0x206   :  { %4376 = vmatprep.subr.bf16.mxu0 %v9556_v59  ;;  %v367_v59 = vld [vmem:[#allocation5 + $0x4d8] sm:$0xff] }
 0x207   :  { %4617 = vmatpush1.bf16.msra.mxu1 %v9357_v38  ;;  %v562_v38 = vld [vmem:[#allocation5 + $0xaf0] sm:$0xff] }
 0x208   :  { %4699 = vmatprep.subr.bf16.mxu1 %v9366_v2  ;;  %4320 = vmatmul.mubr.bf16.gmra.mrb[48].mxu0 %v12360_v10  ;;  %v371_v2 = vld [vmem:[#allocation5 + $0x4f8] sm:$0xff]  ;;  %v9580_v11 = vcombine.high %v558_v41, %v562_v38 }
 0x209   :  { %4377 = vmatpush1.bf16.msra.mxu0 %v9555_v56  ;;  %4329 = vmatprep.mubr.bf16.mxu0 %v12364_v17  ;;  %v9390_v23 = vcombine.high %v367_v59, %v371_v2  ;;  %v570_v56 = vld [vmem:[#allocation5 + $0xb30] sm:$0xff] }
 0x20a   :  { %4619 = vmatmul.mubr.bf16.vlgmr.msra.gmra.mrb[64].mxu1 %v12222_v54  ;;  %4378 = vmatprep.subr.bf16.mxu0 %v9564_v43  ;;  %v9571_v54 = vcombine.low %v550_v22, %v554_v7  ;;  %v375_v43 = vld [vmem:[#allocation5 + $0x518] sm:$0xff]  ;;  %v9389_v22 = vcombine.low %v367_v59, %v371_v2  ;;  %v9588_v7 = vcombine.high %v566_v37, %v570_v56  ;;  %v582_v2 = vld [vmem:[#allocation5 + $0xb90] sm:$0xff] }
 0x20b   :  { %4700 = vmatpush1.bf16.msra.mxu1 %v9365_v27  ;;  %4628 = vmatprep.mubr.bf16.mxu1 %v12227_v57  ;;  %v12368_v27 = vld [vmem:[#allocation2 + $0x120] ss:$28 sps:$4 sm:$0xff]   ;;  %v9579_v57 = vcombine.low %v558_v41, %v562_v38 }
 0x20c   :  { %4701 = vmatprep.subr.bf16.mxu1 %v9374_v12  ;;  %v379_v12 = vld [vmem:[#allocation5 + $0x538] sm:$0xff] }
 0x20d   :  { %4379 = vmatpush1.bf16.msra.mxu0 %v9563_v42  ;;  %v9398_v58 = vcombine.high %v375_v43, %v379_v12  ;;  %v574_v42 = vld [vmem:[#allocation5 + $0xb50] sm:$0xff]  ;;  %v9397_v41 = vcombine.low %v375_v43, %v379_v12 }
 0x20e   :  { %4380 = vmatprep.subr.bf16.mxu0 %v9572_v16  ;;  %v383_v16 = vld [vmem:[#allocation5 + $0x558] sm:$0xff]  ;;  %v12380_v43 = vld [vmem:[#allocation2 + $0x194] ss:$28 sps:$4 sm:$0xff]  }
 0x20f   :  { %4702 = vmatpush1.bf16.msra.mxu1 %v9373_v15  ;;  %v578_v15 = vld [vmem:[#allocation5 + $0xb70] sm:$0xff] }
 0x210   :  { %4703 = vmatprep.subr.bf16.mxu1 %v9382_v21  ;;  %4330 = vmatmul.mubr.bf16.gmra.mrb[52].mxu0 %v12368_v27  ;;  %v387_v21 = vld [vmem:[#allocation5 + $0x578] sm:$0xff]  ;;  %v9596_v38 = vcombine.high %v574_v42, %v578_v15 }
 0x211   :  { %4381 = vmatpush1.bf16.msra.mxu0 %v9571_v54  ;;  %4339 = vmatprep.mubr.bf16.mxu0 %v12372_v35  ;;  %v9406_v59 = vcombine.high %v383_v16, %v387_v21  ;;  %v586_v54 = vld [vmem:[#allocation5 + $0xbb0] sm:$0xff] }
 0x212   :  { %4629 = vmatmul.mubr.bf16.gmra.mrb[68].mxu1 %v12238_v5  ;;  %4382 = vmatprep.subr.bf16.mxu0 %v9580_v11  ;;  %v9587_v5 = vcombine.low %v566_v37, %v570_v56  ;;  %v391_v11 = vld [vmem:[#allocation5 + $0x598] sm:$0xff]  ;;  %v9405_v37 = vcombine.low %v383_v16, %v387_v21  ;;  %v9604_v56 = vcombine.high %v582_v2, %v586_v54  ;;  %v598_v21 = vld [vmem:[#allocation5 + $0xc10] sm:$0xff] }
 0x213   :  { %4704 = vmatpush1.bf16.msra.mxu1 %v9381_v40  ;;  %4638 = vmatprep.mubr.bf16.mxu1 %v12243_v32  ;;  %v12376_v40 = vld [vmem:[#allocation2 + $0x158] ss:$28 sps:$4 sm:$0xff]   ;;  %v9595_v32 = vcombine.low %v574_v42, %v578_v15 }
 0x214   :  { %4705 = vmatprep.subr.bf16.mxu1 %v9390_v23  ;;  %v395_v23 = vld [vmem:[#allocation5 + $0x5b8] sm:$0xff] }
 0x215   :  { %4383 = vmatpush1.bf16.msra.mxu0 %v9579_v57  ;;  %v9414_v12 = vcombine.high %v391_v11, %v395_v23  ;;  %v590_v57 = vld [vmem:[#allocation5 + $0xbd0] sm:$0xff]  ;;  %v9413_v42 = vcombine.low %v391_v11, %v395_v23 }
 0x216   :  { %4384 = vmatprep.subr.bf16.mxu0 %v9588_v7  ;;  %v399_v7 = vld [vmem:[#allocation5 + $0x5d8] sm:$0xff]  ;;  %v12388_v11 = vld [vmem:[#allocation2 + $0x14] ss:$28 sps:$4 sm:$0xff]  }
 0x217   :  { %4706 = vmatpush1.bf16.msra.mxu1 %v9389_v22  ;;  %v594_v22 = vld [vmem:[#allocation5 + $0xbf0] sm:$0xff] }
 0x218   :  { %4707 = vmatprep.subr.bf16.mxu1 %v9398_v58  ;;  %4340 = vmatmul.mubr.bf16.gmra.mrb[56].mxu0 %v12376_v40  ;;  %v403_v58 = vld [vmem:[#allocation5 + $0x5f8] sm:$0xff]  ;;  %v9612_v15 = vcombine.high %v590_v57, %v594_v22 }
 0x219   :  { %4385 = vmatpush1.bf16.msra.mxu0 %v9587_v5  ;;  %4349 = vmatprep.mubr.bf16.mxu0 %v12380_v43  ;;  %v9422_v16 = vcombine.high %v399_v7, %v403_v58  ;;  %v602_v5 = vld [vmem:[#allocation5 + $0xc30] sm:$0xff] }
 0x21a   :  { %4639 = vmatmul.mubr.bf16.gmra.mrb[72].mxu1 %v12254_v19  ;;  %4386 = vmatprep.subr.bf16.mxu0 %v9596_v38  ;;  %v9603_v19 = vcombine.low %v582_v2, %v586_v54  ;;  %v407_v38 = vld [vmem:[#allocation5 + $0x618] sm:$0xff]  ;;  %v9421_v2 = vcombine.low %v399_v7, %v403_v58  ;;  %v9620_v54 = vcombine.high %v598_v21, %v602_v5  ;;  %v12392_v7 = vld [vmem:[#allocation2 + $0x10] ss:$28 sps:$4 sm:$0xff]  }
 0x21b   :  { %4708 = vmatpush1.bf16.msra.mxu1 %v9397_v41  ;;  %4648 = vmatprep.mubr.bf16.mxu1 %v12259_v52  ;;  %v12384_v41 = vld [vmem:[#allocation2 + $0x190] ss:$28 sps:$4 sm:$0xff]   ;;  %v9611_v52 = vcombine.low %v590_v57, %v594_v22  ;;  %v9619_v22 = vcombine.low %v598_v21, %v602_v5  ;;  %13494 = vst [vmem:[#allocation38_spill] sm:$0xff] %v12392_v7  ;;  %v423_v58 = vld [vmem:[#allocation5 + $0x698] sm:$0xff] }
 0x21c   :  { %4709 = vmatprep.subr.bf16.mxu1 %v9406_v59  ;;  %v411_v59 = vld [vmem:[#allocation5 + $0x638] sm:$0xff] }
 0x21d   :  { %4387 = vmatpush1.bf16.msra.mxu0 %v9595_v32  ;;  %v9430_v23 = vcombine.high %v407_v38, %v411_v59  ;;  %v415_v32 = vld [vmem:[#allocation5 + $0x658] sm:$0xff] }
 0x21e   :  { %4388 = vmatprep.subr.bf16.mxu0 %v9604_v56  ;;  %v606_v56 = vld [vmem:[#allocation5 + $0xc50] sm:$0xff] }
 0x21f   :  { %4710 = vmatpush1.bf16.msra.mxu1 %v9405_v37  ;;  %v419_v37 = vld [vmem:[#allocation5 + $0x678] sm:$0xff] }
 0x220   :  { %4711 = vmatprep.subr.bf16.mxu1 %v9414_v12  ;;  %4350 = vmatmul.mubr.bf16.gmra.mrb[60].mxu0 %v12384_v41  ;;  %v610_v12 = vld [vmem:[#allocation5 + $0xc70] sm:$0xff]  ;;  %v9438_v57 = vcombine.high %v415_v32, %v419_v37 }
 0x221   :  { %4389 = vmatpush1.bf16.msra.mxu0 %v9603_v19  ;;  %4392 = vmatprep.mubr.bf16.mxu0 %v12388_v11  ;;  %v427_v19 = vld [vmem:[#allocation5 + $0x6b8] sm:$0xff]  ;;  %v9627_v5 = vcombine.low %v606_v56, %v610_v12 }
 0x222   :  { %4649 = vmatmul.mubr.bf16.gmra.mrb[76].mxu1 %v12270_v39  ;;  %4390 = vmatprep.subr.bf16.mxu0 %v9612_v15  ;;  %v9429_v39 = vcombine.low %v407_v38, %v411_v59  ;;  %v614_v15 = vld [vmem:[#allocation5 + $0xc90] sm:$0xff]  ;;  %v9437_v38 = vcombine.low %v415_v32, %v419_v37  ;;  %v9446_v21 = vcombine.high %v423_v58, %v427_v19  ;;  %v431_v59 = vld [vmem:[#allocation5 + $0x6d8] sm:$0xff]  ;;  %v12400_v32 = vld [vmem:[#allocation2 + $0x48] ss:$28 sps:$4 sm:$0xff]  }
 0x223   :  { %4712 = vmatpush1.bf16.msra.mxu1 %v9413_v42  ;;  %4658 = vmatprep.mubr.bf16.mxu1 %v12275_v49  ;;  %v9628_v42 = vcombine.high %v606_v56, %v610_v12  ;;  %v12396_v49 = vld [vmem:[#allocation2 + $0x4c] ss:$28 sps:$4 sm:$0xff]   ;;  %13496 = vst [vmem:[#allocation40_spill] sm:$0xff] %v12400_v32  ;;  %v443_v37 = vld [vmem:[#allocation5 + $0x738] sm:$0xff] }
 0x224   :  { %4713 = vmatprep.subr.bf16.mxu1 %v9422_v16  ;;  %13495 = vst [vmem:[#allocation39_spill] sm:$0xff] %v12396_v49  ;;  %v618_v16 = vld [vmem:[#allocation5 + $0xcb0] sm:$0xff] }
 0x225   :  { %4391 = vmatpush1.bf16.msra.mxu0 %v9611_v52  ;;  %v435_v52 = vld [vmem:[#allocation5 + $0x6f8] sm:$0xff] }
 0x226   :  { %4473 = vmatprep.subr.bf16.mxu0 %v9620_v54  ;;  %v9636_v54 = vcombine.high %v614_v15, %v618_v16 }
 0x227   :  { %4714 = vmatpush1.bf16.msra.mxu1 %v9421_v2  ;;  %v662_v2 = vlaneseq }
 0x228   :  { %4715 = vmatprep.subr.bf16.mxu1 %v9430_v23  ;;  %4393 = vmatmul.mubr.bf16.vlgmr.msra.gmra.mrb[32].mxu0 %v12392_v7  ;;  %v626_v23 = vld [vmem:[#allocation5 + $0xcf0] sm:$0xff]  ;;  %v9445_v7 = vcombine.low %v423_v58, %v427_v19  ;;  %v9453_v19 = vcombine.low %v431_v59, %v435_v52 }
 0x229   :  { %4402 = vmatprep.mubr.bf16.mxu0 %v12396_v49  ;;  %4474 = vmatpush1.bf16.msra.mxu0 %v9619_v22  ;;  %v9454_v49 = vcombine.high %v431_v59, %v435_v52  ;;  %v12403_v56 = vshrl.u32 %v662_v2, 7  ;;  %v630_v22 = vld [vmem:[#allocation5 + $0xd10] sm:$0xff] }
 0x22a   :  { %4659 = vmatmul.mubr.bf16.gmra.mrb[80].mxu1 %v12288_v28  ;;  %4475 = vmatprep.subr.bf16.mxu0 %v9628_v42  ;;  %v622_v28 = vld [vmem:[#allocation5 + $0xcd0] sm:$0xff] }
 0x22b   :  { %4716 = vmatpush1.bf16.msra.mxu1 %v9429_v39  ;;  %4668 = vmatprep.mubr.bf16.mxu1 %v12294_v3  ;;  %v9635_v39 = vcombine.low %v614_v15, %v618_v16  ;;  %v439_v3 = vld [vmem:[#allocation5 + $0x718] sm:$0xff]  ;;  %13497 = vst [vmem:[#allocation41_spill] sm:$0xff] %v12403_v56  ;;  %v9644_v12 = vcombine.high %v622_v28, %v626_v23  ;;  %v634_v58 = vld [vmem:[#allocation5 + $0xd30] sm:$0xff]  ;;  %v12411_v16 = vsub.s32 0, %v12403_v56  ;;  %v12416_v2 = vsub.s32 1, %v12403_v56 }
 0x22c   :  { %4717 = vmatprep.subr.bf16.mxu1 %v9438_v57  ;;  %v12406_v57 = vld [vmem:[#allocation2 + $0x84] ss:$28 sps:$4 sm:$0xff]   ;;  %v9462_v42 = vcombine.high %v439_v3, %v443_v37  ;;  %v9643_v15 = vcombine.low %v622_v28, %v626_v23  ;;  %v642_v59 = vld [vmem:[#allocation5 + $0xd70] sm:$0xff]  ;;  %v9651_v52 = vcombine.low %v630_v22, %v634_v58  ;;  %v455_v23 = vld [vmem:[#allocation5 + $0x798] sm:$0xff] }
 0x22d   :  { %4476 = vmatpush1.bf16.msra.mxu0 %v9627_v5  ;;  %13498 = vst [vmem:[#allocation42_spill] sm:$0xff] %v12406_v57  ;;  %13499 = vst [vmem:[#allocation43_spill] sm:$0xff] %v12411_v16  ;;  %v12413_v5 = vld [vmem:[#allocation7] sm:$0xff] }
 0x22e   :  { %4477 = vmatprep.subr.bf16.mxu0 %v9636_v54  ;;  %13500 = vst [vmem:[#allocation44_spill] sm:$0xff] %v12413_v5  ;;  %13501 = vst [vmem:[#allocation45_spill] sm:$0xff] %v12416_v2  ;;  %v12418_v54 = vld [vmem:[#allocation2 + $0x80] ss:$28 sps:$4 sm:$0xff]   ;;  %v12423_v28 = vrot.slane %v12413_v5, %v12411_v16 }
 0x22f   :  { %4718 = vmatpush1.bf16.msra.mxu1 %v9437_v38  ;;  %v447_v38 = vld [vmem:[#allocation5 + $0x758] sm:$0xff]  ;;  %13502 = vst [vmem:[#allocation46_spill] sm:$0xff] %v12418_v54 }
 0x230   :  { %4719 = vmatprep.subr.bf16.mxu1 %v9446_v21  ;;  %4403 = vmatmul.mubr.bf16.gmra.mrb[36].mxu0 %v12400_v32  ;;  %v451_v21 = vld [vmem:[#allocation5 + $0x778] sm:$0xff] }
 0x231   :  { %4412 = vmatprep.mubr.bf16.mxu0 %v12406_v57  ;;  %4478 = vmatpush1.bf16.msra.mxu0 %v9635_v39  ;;  %v459_v39 = vld [vmem:[#allocation5 + $0x7b8] sm:$0xff] }
 0x232   :  { %4669 = vmatmul.mubr.bf16.gmra.mrb[84].mxu1 %v12303_v6  ;;  %4479 = vmatprep.subr.bf16.mxu0 %v9644_v12  ;;  %v9652_v6 = vcombine.high %v630_v22, %v634_v58  ;;  %v646_v22 = vld [vmem:[#allocation5 + $0xd90] sm:$0xff]  ;;  %v9477_v57 = vcombine.low %v455_v23, %v459_v39 }
 0x233   :  { %4720 = vmatpush1.bf16.msra.mxu1 %v9445_v7  ;;  %4678 = vmatprep.mubr.bf16.mxu1 %v12309_v25  ;;  %v638_v7 = vld [vmem:[#allocation5 + $0xd50] sm:$0xff]  ;;  %v9461_v25 = vcombine.low %v439_v3, %v443_v37  ;;  %v12428_v3 = vrot.slane %v12413_v5, %v12416_v2  ;;  %v12430_v37 = vld [vmem:[#allocation2 + $0xbc] ss:$28 sps:$4 sm:$0xff]  }
 0x234   :  { %4721 = vmatprep.subr.bf16.mxu1 %v9454_v49  ;;  %v9470_v49 = vcombine.high %v447_v38, %v451_v21  ;;  %v9660_v12 = vcombine.high %v638_v7, %v642_v59  ;;  %13503 = vst [vmem:[#allocation47_spill] sm:$0xff] %v12430_v37  ;;  %v650_v58 = vld [vmem:[#allocation5 + $0xdb0] sm:$0xff]  ;;  %v9659_v2 = vcombine.low %v638_v7, %v642_v59 }
 0x235   :  { %4480 = vmatpush1.bf16.msra.mxu0 %v9643_v15  ;;  %v9478_v15 = vcombine.high %v455_v23, %v459_v39  ;;  %v12449_v32 = vld [vmem:[#allocation2 + $0xb8] ss:$28 sps:$4 sm:$0xff]  }
 0x236   :  { %4481 = vmatprep.subr.bf16.mxu0 %v9652_v6  ;;  %v12434_v6 = vld [vmem:[#allocation5 + $0x7d8] sm:$0xff] }
 0x237   :  { %4722 = vmatpush1.bf16.msra.mxu1 %v9453_v19  ;;  %v9469_v19 = vcombine.low %v447_v38, %v451_v21  ;;  %v12440_v38 = vld [vmem:[#allocation5 + $0xdd0] sm:$0xff] }
 0x238   :  { %4723 = vmatprep.subr.bf16.mxu1 %v9462_v42  ;;  %4413 = vmatmul.mubr.bf16.gmra.mrb[40].mxu0 %v12418_v54 }
 0x239   :  { %4422 = vmatprep.mubr.bf16.mxu0 %v12430_v37  ;;  %4482 = vmatpush1.bf16.msra.mxu0 %v9651_v52  ;;  %v9668_v37 = vcombine.high %v646_v22, %v650_v58 }
 0x23a   :  { %4679 = vmatmul.mubr.bf16.gmra.mrb[88].mxu1 %v12318_v0  ;;  %v12436_v0 = vld [vmem:[#allocation5 + $0x7f8] sm:$0xff]  ;;  %4483 = vmatprep.subr.bf16.mxu0 %v9660_v12 }
 0x23b   :  { %4724 = vmatpush1.bf16.msra.mxu1 %v9461_v25  ;;  %4688 = vmatprep.mubr.bf16.mxu1 %v12322_v33  ;;  %v3490_v42 = vpop.f32.mrb[0].mxu0  ;;  %v658_v33 = vld [vmem:[#allocation5 + $0xdf0] sm:$0xff]  ;;  %v9486_v7 = vcombine.high %v12434_v6, %v12436_v0 }
 0x23c   :  { %4725 = vmatprep.subr.bf16.mxu1 %v9470_v49  ;;  %v10096_v16 = vadd.f32 %v3490_v42, %v12423_v28  ;;  %v3492_v5 = vpop.f32.mrb[1].mxu0  ;;  %v9676_v23 = vcombine.high %v12440_v38, %v658_v33 }
 0x23d   :  { %v10098_v54 = vadd.f32 %v3492_v5, %v12428_v3  ;;  %v3494_v25 = vpop.f32.mrb[2].mxu0  ;;  %4484 = vmatpush1.bf16.msra.mxu0 %v9659_v2  ;;  %v9667_v5 = vcombine.low %v646_v22, %v650_v58  ;;  %v12457_v2 = vld [vmem:[#allocation2 + $0xf4] ss:$28 sps:$4 sm:$0xff]  }
 0x23e   :  { %v10097_v21 = vadd.f32 %v10096_v16, %v12194_v26  ;;  %v10100_v49 = vadd.f32 %v3494_v25, %v12423_v28  ;;  %v3496_v56 = vpop.f32.mrb[3].mxu0  ;;  %v12452_v26 = vld [vmem:[#allocation5 + $0x818] sm:$0xff]  ;;  %4485 = vmatprep.subr.bf16.mxu0 %v9668_v37 }
 0x23f   :  { %4726 = vmatpush1.bf16.msra.mxu1 %v9469_v19  ;;  %v10099_v59 = vadd.f32 %v10098_v54, %v12196_v46  ;;  %v10102_v52 = vadd.f32 %v3496_v56, %v12428_v3  ;;  %v475_v16 = vld [vmem:[#allocation5 + $0x838] sm:$0xff]  ;;  %v9485_v54 = vcombine.low %v12434_v6, %v12436_v0 }
 0x240   :  { %4727 = vmatprep.subr.bf16.mxu1 %v9478_v15  ;;  %v5166_v12 = vmul.f32 0.2, %v10097_v21  ;;  %v10101_v42 = vadd.f32 %v10100_v49, %v12198_v29  ;;  %4423 = vmatmul.mubr.bf16.gmra.mrb[44].mxu0 %v12449_v32  ;;  %vm5038_vm0 = vcmp.gt.f32.partialorder %v10097_v21, 0.0  ;;  %v479_v15 = vld [vmem:[#allocation5 + $0x858] sm:$0xff] }
 0x241   :  { %v5167_v46 = vmul.f32 0.2, %v10099_v59  ;;  %v10103_v56 = vadd.f32 %v10102_v52, %v12200_v34  ;;  %4432 = vmatprep.mubr.bf16.mxu0 %v12457_v2  ;;  %vm5039_vm1 = vcmp.gt.f32.partialorder %v10099_v59, 0.0  ;;  %v9494_v34 = vcombine.high %v12452_v26, %v475_v16  ;;  %4486 = vmatpush1.bf16.msra.mxu0 %v9667_v5  ;;  %v483_v25 = vld [vmem:[#allocation5 + $0x878] sm:$0xff] }
 0x242   :  { %4689 = vmatmul.mubr.bf16.gmra.mrb[92].mxu1 %v12325_v24  ;;  %vm5046_vm2 = vcmp.gt.f32.partialorder %v10101_v42, 0.0  ;;  %v5174_v29 = vmul.f32 0.2, %v10101_v42  ;;  %v9675_v24 = vcombine.low %v12440_v38, %v658_v33  ;;  %v5294_v22 = vsel %vm5038_vm0, %v10097_v21, %v5166_v12  ;;  %4487 = vmatprep.subr.bf16.mxu0 %v9676_v23  ;;  %v11031_v6 = vld [vmem:[#allocation8 + $0x4] ss:$16 sps:$4 sm:$0xff]  }
 0x243   :  { %4728 = vmatpush1.bf16.msra.mxu1 %v9477_v57  ;;  %4731 = vmatprep.mubr.bf16.mxu1 %v12329_v48  ;;  %vm5047_vm3 = vcmp.gt.f32.partialorder %v10103_v56, 0.0  ;;  %v5175_v39 = vmul.f32 0.2, %v10103_v56  ;;  %v3500_v37 = vpop.f32.mrb[4].mxu0  ;;  %v9493_v5 = vcombine.low %v12452_v26, %v475_v16 }
 0x244   :  { %4729 = vmatprep.subr.bf16.mxu1 %v9486_v7  ;;  %v5302_v58 = vsel %vm5046_vm2, %v10101_v42, %v5174_v29  ;;  %v10104_v19 = vadd.f32 %v3500_v37, %v12423_v28  ;;  %v3502_v57 = vpop.f32.mrb[5].mxu0  ;;  %v5295_v7 = vsel %vm5039_vm1, %v10099_v59, %v5167_v46  ;;  %v9502_v29 = vcombine.high %v479_v15, %v483_v25 }
 0x245   :  { %v12467_v48 = vpack.c.bf16 %v5302_v58, %v5294_v22  ;;  %v10106_v0 = vadd.f32 %v3502_v57, %v12428_v3  ;;  %v3504_v49 = vpop.f32.mrb[6].mxu0  ;;  %v5303_v52 = vsel %vm5047_vm3, %v10103_v56, %v5175_v39  ;;  %4488 = vmatpush1.bf16.msra.mxu0 %v9675_v24  ;;  %v12480_v56 = vld [vmem:[#allocation2 + $0xf0] ss:$28 sps:$4 sm:$0xff]   ;;  %v9501_v39 = vcombine.low %v479_v15, %v483_v25  ;;  %v499_v58 = vld [vmem:[#allocation5 + $0x8f8] sm:$0xff] }
 0x246   :  { %v10105_v38 = vadd.f32 %v10104_v19, %v12212_v1  ;;  %v10108_v33 = vadd.f32 %v3504_v49, %v12423_v28  ;;  %v3506_v21 = vpop.f32.mrb[7].mxu0  ;;  %v12475_v12 = vpack.c.bf16 %v5303_v52, %v5295_v7  ;;  %v487_v1 = vld [vmem:[#allocation5 + $0x898] sm:$0xff]  ;;  %7044 = vmatprep.subr.bf16.mxu0 %v11031_v6 }
 0x247   :  { %4730 = vmatpush1.bf16.msra.mxu1 %v9485_v54  ;;  %v10107_v42 = vadd.f32 %v10106_v0, %v12216_v8  ;;  %v10110_v23 = vadd.f32 %v3506_v21, %v12428_v3  ;;  %v491_v54 = vld [vmem:[#allocation5 + $0x8b8] sm:$0xff]  ;;  %v12485_v8 = vld [vmem:[#allocation2 + $0x12c] ss:$28 sps:$4 sm:$0xff]  }
 0x248   :  { %4812 = vmatprep.subr.bf16.mxu1 %v9494_v34  ;;  %v5182_v59 = vmul.f32 0.2, %v10105_v38  ;;  %v10109_v46 = vadd.f32 %v10108_v33, %v12218_v31  ;;  %4433 = vmatmul.mubr.bf16.gmra.mrb[48].mxu0 %v12480_v56  ;;  %vm5054_vm4 = vcmp.gt.f32.partialorder %v10105_v38, 0.0  ;;  %v9510_v24 = vcombine.high %v487_v1, %v491_v54 }
 0x249   :  { %v5183_v26 = vmul.f32 0.2, %v10107_v42  ;;  %v10111_v16 = vadd.f32 %v10110_v23, %v12220_v53  ;;  %4442 = vmatprep.mubr.bf16.mxu0 %v12485_v8  ;;  %vm5055_vm5 = vcmp.gt.f32.partialorder %v10107_v42, 0.0  ;;  %v9509_v33 = vcombine.low %v487_v1, %v491_v54 }
 0x24a   :  { %4732 = vmatmul.mubr.bf16.vlgmr.msra.gmra.mrb[64].mxu1 %v12332_v9  ;;  %vm5062_vm6 = vcmp.gt.f32.partialorder %v10109_v46, 0.0  ;;  %v5190_v31 = vmul.f32 0.2, %v10109_v46  ;;  %v495_v9 = vld [vmem:[#allocation5 + $0x8d8] sm:$0xff]  ;;  %v5310_v19 = vsel %vm5054_vm4, %v10105_v38, %v5182_v59  ;;  %v12502_v59 = vld [vmem:[#allocation2 + $0x128] ss:$28 sps:$4 sm:$0xff]  }
 0x24b   :  { %4813 = vmatpush1.bf16.msra.mxu1 %v9493_v5  ;;  %4741 = vmatprep.mubr.bf16.mxu1 %v12336_v45  ;;  %vm5063_vm7 = vcmp.gt.f32.partialorder %v10111_v16, 0.0  ;;  %v5191_v37 = vmul.f32 0.2, %v10111_v16  ;;  %v3510_v34 = vpop.f32.mrb[8].mxu0  ;;  %v5311_v15 = vsel %vm5055_vm5, %v10107_v42, %v5183_v26  ;;  %v9518_v23 = vcombine.high %v495_v9, %v499_v58 }
 0x24c   :  { %4814 = vmatprep.subr.bf16.mxu1 %v9502_v29  ;;  %v10112_v53 = vadd.f32 %v3510_v34, %v12423_v28  ;;  %v3512_v22 = vpop.f32.mrb[9].mxu0  ;;  %v5318_v57 = vsel %vm5062_vm6, %v10109_v46, %v5190_v31  ;;  %v507_v46 = vld [vmem:[#allocation5 + $0x938] sm:$0xff] }
 0x24d   :  { %v10114_v6 = vadd.f32 %v3512_v22, %v12428_v3  ;;  %v3514_v0 = vpop.f32.mrb[10].mxu0  ;;  %v5319_v25 = vsel %vm5063_vm7, %v10111_v16, %v5191_v37  ;;  %v12493_v45 = vpack.c.bf16 %v5318_v57, %v5310_v19  ;;  %v515_v34 = vld [vmem:[#allocation5 + $0x978] sm:$0xff] }
 0x24e   :  { %v10113_v49 = vadd.f32 %v10112_v53, %v12230_v60  ;;  %v10116_v7 = vadd.f32 %v3514_v0, %v12423_v28  ;;  %v3516_v52 = vpop.f32.mrb[11].mxu0  ;;  %v12497_v21 = vpack.c.bf16 %v5319_v25, %v5311_v15  ;;  %v503_v60 = vld [vmem:[#allocation5 + $0x918] sm:$0xff] }
 0x24f   :  { %4815 = vmatpush1.bf16.msra.mxu1 %v9501_v39  ;;  %v10115_v38 = vadd.f32 %v10114_v6, %v12232_v61  ;;  %v10118_v5 = vadd.f32 %v3516_v52, %v12428_v3  ;;  %v12507_v61 = vld [vmem:[#allocation2 + $0x164] ss:$28 sps:$4 sm:$0xff]   ;;  %v9526_v39 = vcombine.high %v503_v60, %v507_v46  ;;  %v9525_v15 = vcombine.low %v503_v60, %v507_v46 }
 0x250   :  { %4816 = vmatprep.subr.bf16.mxu1 %v9510_v24  ;;  %v5198_v29 = vmul.f32 0.2, %v10113_v49  ;;  %v10117_v42 = vadd.f32 %v10116_v7, %v12234_v20  ;;  %4443 = vmatmul.mubr.bf16.gmra.mrb[52].mxu0 %v12502_v59  ;;  %vm5070_vm8 = vcmp.gt.f32.partialorder %v10113_v49, 0.0  ;;  %v9517_v20 = vcombine.low %v495_v9, %v499_v58 }
 0x251   :  { %v5199_v26 = vmul.f32 0.2, %v10115_v38  ;;  %v10119_v1 = vadd.f32 %v10118_v5, %v12236_v50  ;;  %4452 = vmatprep.mubr.bf16.mxu0 %v12507_v61  ;;  %vm5071_vm9 = vcmp.gt.f32.partialorder %v10115_v38, 0.0  ;;  %v12524_v5 = vld [vmem:[#allocation2 + $0x160] ss:$28 sps:$4 sm:$0xff]  }
 0x252   :  { %4742 = vmatmul.mubr.bf16.gmra.mrb[68].mxu1 %v12339_v4  ;;  %vm5078_vm10 = vcmp.gt.f32.partialorder %v10117_v42, 0.0  ;;  %v5206_v54 = vmul.f32 0.2, %v10117_v42  ;;  %v511_v4 = vld [vmem:[#allocation5 + $0x958] sm:$0xff]  ;;  %v5326_v24 = vsel %vm5070_vm8, %v10113_v49, %v5198_v29 }
 0x253   :  { %4817 = vmatpush1.bf16.msra.mxu1 %v9509_v33  ;;  %4751 = vmatprep.mubr.bf16.mxu1 %v12343_v55  ;;  %vm5079_vm11 = vcmp.gt.f32.partialorder %v10119_v1, 0.0  ;;  %v5207_v16 = vmul.f32 0.2, %v10119_v1  ;;  %v3520_v31 = vpop.f32.mrb[12].mxu0  ;;  %v5327_v9 = vsel %vm5071_vm9, %v10115_v38, %v5199_v26  ;;  %v9534_v52 = vcombine.high %v511_v4, %v515_v34 }
 0x254   :  { %4818 = vmatprep.subr.bf16.mxu1 %v9518_v23  ;;  %v10120_v50 = vadd.f32 %v3520_v31, %v12423_v28  ;;  %v3522_v37 = vpop.f32.mrb[13].mxu0  ;;  %v5334_v53 = vsel %vm5078_vm10, %v10117_v42, %v5206_v54  ;;  %v523_v23 = vld [vmem:[#allocation5 + $0x9b8] sm:$0xff] }
 0x255   :  { %v10122_v22 = vadd.f32 %v3522_v37, %v12428_v3  ;;  %v3524_v19 = vpop.f32.mrb[14].mxu0  ;;  %v5335_v58 = vsel %vm5079_vm11, %v10119_v1, %v5207_v16  ;;  %v12515_v55 = vpack.c.bf16 %v5334_v53, %v5326_v24 }
 0x256   :  { %v10121_v57 = vadd.f32 %v10120_v50, %v12246_v36  ;;  %v10124_v6 = vadd.f32 %v3524_v19, %v12423_v28  ;;  %v3526_v0 = vpop.f32.mrb[15].mxu0  ;;  %v12519_v25 = vpack.c.bf16 %v5335_v58, %v5327_v9  ;;  %v519_v36 = vld [vmem:[#allocation5 + $0x998] sm:$0xff] }
 0x257   :  { %4819 = vmatpush1.bf16.msra.mxu1 %v9517_v20  ;;  %v10123_v49 = vadd.f32 %v10122_v22, %v12248_v13  ;;  %v10126_v7 = vadd.f32 %v3526_v0, %v12428_v3  ;;  %v12529_v13 = vld [vmem:[#allocation2 + $0x19c] ss:$28 sps:$4 sm:$0xff]   ;;  %v9542_v1 = vcombine.high %v519_v36, %v523_v23  ;;  %v9541_v22 = vcombine.low %v519_v36, %v523_v23  ;;  %v13504_v0 = vld [vmem:[#allocation24_spill] sm:$0xff] }
 0x258   :  { %4820 = vmatprep.subr.bf16.mxu1 %v9526_v39  ;;  %v5214_v33 = vmul.f32 0.2, %v10121_v57  ;;  %v10125_v38 = vadd.f32 %v10124_v6, %v12250_v14  ;;  %4453 = vmatmul.mubr.bf16.gmra.mrb[56].mxu0 %v12524_v5  ;;  %vm5086_vm12 = vcmp.gt.f32.partialorder %v10121_v57, 0.0  ;;  %v9533_v14 = vcombine.low %v511_v4, %v515_v34  ;;  %v531_v20 = vld [vmem:[#allocation5 + $0x9f8] sm:$0xff] }
 0x259   :  { %v5215_v29 = vmul.f32 0.2, %v10123_v49  ;;  %v10127_v42 = vadd.f32 %v10126_v7, %v12252_v18  ;;  %4462 = vmatprep.mubr.bf16.mxu0 %v12529_v13  ;;  %vm5087_vm13 = vcmp.gt.f32.partialorder %v10123_v49, 0.0  ;;  %v539_v7 = vld [vmem:[#allocation5 + $0xa38] sm:$0xff] }
 0x25a   :  { %4752 = vmatmul.mubr.bf16.gmra.mrb[72].mxu1 %v12346_v44  ;;  %vm5094_vm14 = vcmp.gt.f32.partialorder %v10125_v38, 0.0  ;;  %v5222_v60 = vmul.f32 0.2, %v10125_v38  ;;  %v527_v44 = vld [vmem:[#allocation5 + $0x9d8] sm:$0xff]  ;;  %v5342_v16 = vsel %vm5086_vm12, %v10121_v57, %v5214_v33 }
 0x25b   :  { %4821 = vmatpush1.bf16.msra.mxu1 %v9525_v15  ;;  %4761 = vmatprep.mubr.bf16.mxu1 %v12350_v62  ;;  %vm5095_vm15 = vcmp.gt.f32.partialorder %v10127_v42, 0.0  ;;  %v5223_v46 = vmul.f32 0.2, %v10127_v42  ;;  %v3530_v26 = vpop.f32.mrb[16].mxu0  ;;  %v5343_v37 = vsel %vm5087_vm13, %v10123_v49, %v5215_v29  ;;  %v9550_v57 = vcombine.high %v527_v44, %v531_v20  ;;  %v12546_v49 = vld [vmem:[#allocation2 + $0x198] ss:$28 sps:$4 sm:$0xff]  }
 0x25c   :  { %4822 = vmatprep.subr.bf16.mxu1 %v9534_v52  ;;  %v10128_v18 = vadd.f32 %v3530_v26, %v12423_v28  ;;  %v3532_v54 = vpop.f32.mrb[17].mxu0  ;;  %v5350_v31 = vsel %vm5094_vm14, %v10125_v38, %v5222_v60  ;;  %v13505_v33 = vld [vmem:[#allocation25_spill] sm:$0xff]  ;;  %v9549_v23 = vcombine.low %v527_v44, %v531_v20 }
 0x25d   :  { %v10130_v39 = vadd.f32 %v3532_v54, %v12428_v3  ;;  %v3534_v50 = vpop.f32.mrb[18].mxu0  ;;  %v5351_v4 = vsel %vm5095_vm15, %v10127_v42, %v5223_v46  ;;  %v12537_v62 = vpack.c.bf16 %v5350_v31, %v5342_v16  ;;  %v12554_v26 = vld [vmem:[#allocation5 + $0xa58] sm:$0xff] }
 0x25e   :  { %v10129_v34 = vadd.f32 %v10128_v18, %v12262_v30  ;;  %v10132_v24 = vadd.f32 %v3534_v50, %v12423_v28  ;;  %v3536_v53 = vpop.f32.mrb[19].mxu0  ;;  %v12541_v19 = vpack.c.bf16 %v5351_v4, %v5343_v37  ;;  %v535_v30 = vld [vmem:[#allocation5 + $0xa18] sm:$0xff] }
 0x25f   :  { %4823 = vmatpush1.bf16.msra.mxu1 %v9533_v14  ;;  %v10131_v9 = vadd.f32 %v10130_v39, %v12264_v51  ;;  %v10134_v58 = vadd.f32 %v3536_v53, %v12428_v3  ;;  %v13506_v51 = vmov 0   ;;  %v9558_v60 = vcombine.high %v535_v30, %v539_v7  ;;  %v11029_v44 = vld [vmem:[#allocation8] ss:$16 sps:$4 sm:$0xff]   ;;  %v13507_v39 = vld [vmem:[#allocation26_spill] sm:$0xff]  ;;  %v11034_v53 = vld [vmem:[#allocation8 + $0x24] ss:$16 sps:$4 sm:$0xff]  }
 0x260   :  { %4824 = vmatprep.subr.bf16.mxu1 %v9542_v1  ;;  %v5230_v6 = vmul.f32 0.2, %v10129_v34  ;;  %v10133_v15 = vadd.f32 %v10132_v24, %v13504_v0  ;;  %4463 = vmatmul.mubr.bf16.gmra.mrb[60].mxu0 %v12546_v49  ;;  %vm5102_vm0 = vcmp.gt.f32.partialorder %v10129_v34, 0.0  ;;  %v9557_v24 = vcombine.low %v535_v30, %v539_v7  ;;  %v13509_v0 = vld [vmem:[#allocation28_spill] sm:$0xff]  ;;  %v13510_v7 = vld [vmem:[#allocation29_spill] sm:$0xff] }
 0x261   :  { %v5231_v52 = vmul.f32 0.2, %v10131_v9  ;;  %v10135_v38 = vadd.f32 %v10134_v58, %v13505_v33  ;;  %4505 = vmatprep.mubr.bf16.mxu0 %v13506_v51  ;;  %vm5103_vm1 = vcmp.gt.f32.partialorder %v10131_v9, 0.0  ;;  %v551_v33 = vld [vmem:[#allocation5 + $0xa98] sm:$0xff] }
 0x262   :  { %4762 = vmatmul.mubr.bf16.gmra.mrb[76].mxu1 %v12353_v47  ;;  %vm5110_vm2 = vcmp.gt.f32.partialorder %v10133_v15, 0.0  ;;  %v5238_v36 = vmul.f32 0.2, %v10133_v15  ;;  %v547_v47 = vld [vmem:[#allocation5 + $0xa78] sm:$0xff]  ;;  %v5358_v1 = vsel %vm5102_vm0, %v10129_v34, %v5230_v6  ;;  %v13508_v34 = vld [vmem:[#allocation27_spill] sm:$0xff] }
 0x263   :  { %4825 = vmatpush1.bf16.msra.mxu1 %v9541_v22  ;;  %4771 = vmatprep.mubr.bf16.mxu1 %v12356_v63  ;;  %vm5111_vm3 = vcmp.gt.f32.partialorder %v10135_v38, 0.0  ;;  %v5239_v29 = vmul.f32 0.2, %v10135_v38  ;;  %v3540_v42 = vpop.f32.mrb[20].mxu0  ;;  %v5359_v63 = vsel %vm5103_vm1, %v10131_v9, %v5231_v52  ;;  %v9566_v9 = vcombine.high %v12554_v26, %v547_v47  ;;  %v12569_v52 = vld [vmem:[#allocation2 + $0x18] ss:$28 sps:$4 sm:$0xff]  }
 0x264   :  { %4826 = vmatprep.subr.bf16.mxu1 %v9550_v57  ;;  %v10136_v14 = vadd.f32 %v3540_v42, %v12423_v28  ;;  %v3542_v46 = vpop.f32.mrb[21].mxu0  ;;  %v5366_v18 = vsel %vm5110_vm2, %v10133_v15, %v5238_v36  ;;  %v9565_v42 = vcombine.low %v12554_v26, %v547_v47 }
 0x265   :  { %v10138_v54 = vadd.f32 %v3542_v46, %v12428_v3  ;;  %v3544_v16 = vpop.f32.mrb[22].mxu0  ;;  %v5367_v20 = vsel %vm5111_vm3, %v10135_v38, %v5239_v29  ;;  %v12559_v31 = vpack.c.bf16 %v5366_v18, %v5358_v1  ;;  %v555_v38 = vld [vmem:[#allocation5 + $0xab8] sm:$0xff] }
 0x266   :  { %v10137_v50 = vadd.f32 %v10136_v14, %v13507_v39  ;;  %v10140_v37 = vadd.f32 %v3544_v16, %v12423_v28  ;;  %v3546_v4 = vpop.f32.mrb[23].mxu0  ;;  %v12563_v22 = vpack.c.bf16 %v5367_v20, %v5359_v63  ;;  %v9574_v1 = vcombine.high %v551_v33, %v555_v38  ;;  %v12578_v16 = vld [vmem:[#allocation5 + $0xad8] sm:$0xff] }
 0x267   :  { %4827 = vmatpush1.bf16.msra.mxu1 %v9549_v23  ;;  %v10139_v58 = vadd.f32 %v10138_v54, %v13508_v34  ;;  %v10142_v57 = vadd.f32 %v3546_v4, %v12428_v3  ;;  %v11032_v23 = vld [vmem:[#allocation8 + $0x20] ss:$16 sps:$4 sm:$0xff]   ;;  %v9573_v54 = vcombine.low %v551_v33, %v555_v38  ;;  %v13513_v38 = vld [vmem:[#allocation32_spill] sm:$0xff] }
 0x268   :  { %4828 = vmatprep.subr.bf16.mxu1 %v9558_v60  ;;  %v5246_v6 = vmul.f32 0.2, %v10137_v50  ;;  %v10141_v15 = vadd.f32 %v10140_v37, %v13509_v0  ;;  %4506 = vmatmul.mubr.bf16.vlgmr.msra.gmra.mrb[32].mxu0 %v12569_v52  ;;  %vm5118_vm4 = vcmp.gt.f32.partialorder %v10137_v50, 0.0  ;;  %v11037_v60 = vld [vmem:[#allocation8 + $0x44] ss:$16 sps:$4 sm:$0xff]  }
 0x269   :  { %v5247_v30 = vmul.f32 0.2, %v10139_v58  ;;  %v10143_v36 = vadd.f32 %v10142_v57, %v13510_v7  ;;  %7045 = vmatpush1.bf16.msra.mxu0 %v11029_v44  ;;  %vm5119_vm5 = vcmp.gt.f32.partialorder %v10139_v58, 0.0  ;;  %4515 = vmatprep.mubr.bf16.mxu0 %v13506_v51  ;;  %v12580_v44 = vld [vmem:[#allocation5 + $0xaf8] sm:$0xff]  ;;  %v12598_v7 = vld [vmem:[#allocation2 + $0x50] ss:$28 sps:$4 sm:$0xff]  }
 0x26a   :  { %4772 = vmatmul.mubr.bf16.gmra.mrb[80].mxu1 %v12360_v10  ;;  %vm5126_vm6 = vcmp.gt.f32.partialorder %v10141_v15, 0.0  ;;  %v5254_v29 = vmul.f32 0.2, %v10141_v15  ;;  %7046 = vmatprep.subr.bf16.mxu0 %v11034_v53  ;;  %v5374_v26 = vsel %vm5118_vm4, %v10137_v50, %v5246_v6  ;;  %v11035_v39 = vld [vmem:[#allocation8 + $0x40] ss:$16 sps:$4 sm:$0xff]  }
 0x26b   :  { %4829 = vmatpush1.bf16.msra.mxu1 %v9557_v24  ;;  %vm5127_vm7 = vcmp.gt.f32.partialorder %v10143_v36, 0.0  ;;  %v5255_v14 = vmul.f32 0.2, %v10143_v36  ;;  %v3550_v46 = vpop.f32.mrb[24].mxu0  ;;  %4781 = vmatprep.mubr.bf16.mxu1 %v12364_v17  ;;  %v5375_v37 = vsel %vm5119_vm5, %v10139_v58, %v5247_v30  ;;  %v13511_v17 = vld [vmem:[#allocation30_spill] sm:$0xff]  ;;  %v13512_v6 = vld [vmem:[#allocation31_spill] sm:$0xff]  ;;  %v9582_v58 = vcombine.high %v12578_v16, %v12580_v44 }
 0x26c   :  { %4830 = vmatprep.subr.bf16.mxu1 %v9566_v9  ;;  %v10144_v18 = vadd.f32 %v3550_v46, %v12423_v28  ;;  %v3552_v10 = vpop.f32.mrb[25].mxu0  ;;  %v5382_v47 = vsel %vm5126_vm6, %v10141_v15, %v5254_v29  ;;  %v11040_v50 = vld [vmem:[#allocation8 + $0x64] ss:$16 sps:$4 sm:$0xff]  }
 0x26d   :  { %v10146_v63 = vadd.f32 %v3552_v10, %v12428_v3  ;;  %v3554_v20 = vpop.f32.mrb[26].mxu0  ;;  %7047 = vmatpush1.bf16.msra.mxu0 %v11032_v23  ;;  %v5383_v4 = vsel %vm5127_vm7, %v10143_v36, %v5255_v14  ;;  %v12587_v24 = vpack.c.bf16 %v5382_v47, %v5374_v26  ;;  %v567_v36 = vld [vmem:[#allocation5 + $0xb18] sm:$0xff] }
 0x26e   :  { %v10145_v53 = vadd.f32 %v10144_v18, %v13511_v17  ;;  %v10148_v34 = vadd.f32 %v3554_v20, %v12423_v28  ;;  %v3556_v57 = vpop.f32.mrb[27].mxu0  ;;  %7048 = vmatprep.subr.bf16.mxu0 %v11037_v60  ;;  %v12591_v9 = vpack.c.bf16 %v5383_v4, %v5375_v37  ;;  %v571_v23 = vld [vmem:[#allocation5 + $0xb38] sm:$0xff] }
 0x26f   :  { %4831 = vmatpush1.bf16.msra.mxu1 %v9565_v42  ;;  %v10147_v0 = vadd.f32 %v10146_v63, %v13512_v6  ;;  %v10150_v15 = vadd.f32 %v3556_v57, %v12428_v3  ;;  %v13514_v42 = vld [vmem:[#allocation33_spill] sm:$0xff]  ;;  %v9590_v47 = vcombine.high %v567_v36, %v571_v23  ;;  %v9589_v20 = vcombine.low %v567_v36, %v571_v23  ;;  %v13515_v6 = vld [vmem:[#allocation34_spill] sm:$0xff] }
 0x270   :  { %4832 = vmatprep.subr.bf16.mxu1 %v9574_v1  ;;  %v5262_v33 = vmul.f32 0.2, %v10145_v53  ;;  %v10149_v30 = vadd.f32 %v10148_v34, %v13513_v38  ;;  %4516 = vmatmul.mubr.bf16.gmra.mrb[36].mxu0 %v12598_v7  ;;  %vm5134_vm8 = vcmp.gt.f32.partialorder %v10145_v53, 0.0  ;;  %v11038_v14 = vld [vmem:[#allocation8 + $0x60] ss:$16 sps:$4 sm:$0xff]   ;;  %v9581_v1 = vcombine.low %v12578_v16, %v12580_v44 }
 0x271   :  { %v5263_v29 = vmul.f32 0.2, %v10147_v0  ;;  %v10151_v60 = vadd.f32 %v10150_v15, %v13514_v42  ;;  %7049 = vmatpush1.bf16.msra.mxu0 %v11035_v39  ;;  %vm5135_vm9 = vcmp.gt.f32.partialorder %v10147_v0, 0.0  ;;  %v11043_v18 = vld [vmem:[#allocation8 + $0x84] ss:$16 sps:$4 sm:$0xff]   ;;  %4525 = vmatprep.mubr.bf16.mxu0 %v13506_v51 }
 0x272   :  { %4782 = vmatmul.mubr.bf16.gmra.mrb[84].mxu1 %v12368_v27  ;;  %vm5142_vm10 = vcmp.gt.f32.partialorder %v10149_v30, 0.0  ;;  %v5270_v46 = vmul.f32 0.2, %v10149_v30  ;;  %7050 = vmatprep.subr.bf16.mxu0 %v11040_v50  ;;  %v575_v39 = vld [vmem:[#allocation5 + $0xb58] sm:$0xff]  ;;  %v5390_v37 = vsel %vm5134_vm8, %v10145_v53, %v5262_v33  ;;  %v13516_v38 = vld [vmem:[#allocation35_spill] sm:$0xff] }
 0x273   :  { %4833 = vmatpush1.bf16.msra.mxu1 %v9573_v54  ;;  %vm5143_vm11 = vcmp.gt.f32.partialorder %v10151_v60, 0.0  ;;  %v5271_v10 = vmul.f32 0.2, %v10151_v60  ;;  %v3560_v26 = vpop.f32.mrb[28].mxu0  ;;  %4791 = vmatprep.mubr.bf16.mxu1 %v12372_v35  ;;  %v579_v54 = vld [vmem:[#allocation5 + $0xb78] sm:$0xff]  ;;  %v5391_v34 = vsel %vm5135_vm9, %v10147_v0, %v5263_v29  ;;  %v13517_v29 = vld [vmem:[#allocation36_spill] sm:$0xff] }
 0x274   :  { %4834 = vmatprep.subr.bf16.mxu1 %v9582_v58  ;;  %v10152_v27 = vadd.f32 %v3560_v26, %v12423_v28  ;;  %v3562_v63 = vpop.f32.mrb[29].mxu0  ;;  %v5398_v16 = vsel %vm5142_vm10, %v10149_v30, %v5270_v46  ;;  %v11041_v17 = vld [vmem:[#allocation8 + $0x80] ss:$16 sps:$4 sm:$0xff]   ;;  %v11046_v53 = vld [vmem:[#allocation8 + $0xa4] ss:$16 sps:$4 sm:$0xff]   ;;  %v9598_v0 = vcombine.high %v575_v39, %v579_v54  ;;  %v9597_v26 = vcombine.low %v575_v39, %v579_v54 }
 0x275   :  { %v10154_v44 = vadd.f32 %v3562_v63, %v12428_v3  ;;  %v3564_v4 = vpop.f32.mrb[30].mxu0  ;;  %7051 = vmatpush1.bf16.msra.mxu0 %v11038_v14  ;;  %v5399_v57 = vsel %vm5143_vm11, %v10151_v60, %v5271_v10  ;;  %v12613_v50 = vpack.c.bf16 %v5398_v16, %v5390_v37  ;;  %v12622_v60 = vld [vmem:[#allocation2 + $0x88] ss:$28 sps:$4 sm:$0xff]   ;;  %v587_v14 = vld [vmem:[#allocation5 + $0xbb8] sm:$0xff] }
 0x276   :  { %v10153_v35 = vadd.f32 %v10152_v27, %v13515_v6  ;;  %v10156_v15 = vadd.f32 %v3564_v4, %v12423_v28  ;;  %v3566_v58 = vpop.f32.mrb[31].mxu0  ;;  %7052 = vmatprep.subr.bf16.mxu0 %v11043_v18  ;;  %v12617_v33 = vpack.c.bf16 %v5399_v57, %v5391_v34  ;;  %v583_v28 = vld [vmem:[#allocation5 + $0xb98] sm:$0xff] }
 0x277   :  { %4835 = vmatpush1.bf16.msra.mxu1 %v9581_v1  ;;  %v10155_v30 = vadd.f32 %v10154_v44, %v13516_v38  ;;  %v10158_v36 = vadd.f32 %v3566_v58, %v12428_v3  ;;  %v13518_v1 = vld [vmem:[#allocation37_spill] sm:$0xff]  ;;  %v9606_v63 = vcombine.high %v583_v28, %v587_v14 }
 0x278   :  { %4836 = vmatprep.subr.bf16.mxu1 %v9590_v47  ;;  %v5278_v23 = vmul.f32 0.2, %v10153_v35  ;;  %v10157_v42 = vadd.f32 %v10156_v15, %v13517_v29  ;;  %4526 = vmatmul.mubr.bf16.gmra.mrb[40].mxu0 %v12622_v60  ;;  %vm5150_vm12 = vcmp.gt.f32.partialorder %v10153_v35, 0.0  ;;  %v11044_v10 = vld [vmem:[#allocation8 + $0xa0] ss:$16 sps:$4 sm:$0xff]  }
 0x279   :  { %v5279_v46 = vmul.f32 0.2, %v10155_v30  ;;  %v10159_v18 = vadd.f32 %v10158_v36, %v13518_v1  ;;  %7053 = vmatpush1.bf16.msra.mxu0 %v11041_v17  ;;  %vm5151_vm13 = vcmp.gt.f32.partialorder %v10155_v30, 0.0  ;;  %v11049_v47 = vld [vmem:[#allocation8 + $0xc4] ss:$16 sps:$4 sm:$0xff]   ;;  %4535 = vmatprep.mubr.bf16.mxu0 %v13506_v51  ;;  %v9605_v17 = vcombine.low %v583_v28, %v587_v14  ;;  %v13519_v1 = vld [vmem:[#allocation38_spill] sm:$0xff] }
 0x27a   :  { %4792 = vmatmul.mubr.bf16.gmra.mrb[88].mxu1 %v12376_v40  ;;  %vm5158_vm14 = vcmp.gt.f32.partialorder %v10157_v42, 0.0  ;;  %v5286_v3 = vmul.f32 0.2, %v10157_v42  ;;  %7054 = vmatprep.subr.bf16.mxu0 %v11046_v53  ;;  %v591_v37 = vld [vmem:[#allocation5 + $0xbd8] sm:$0xff]  ;;  %v5406_v40 = vsel %vm5150_vm12, %v10153_v35, %v5278_v23 }
 0x27b   :  { %4837 = vmatpush1.bf16.msra.mxu1 %v9589_v20  ;;  %vm5159_vm15 = vcmp.gt.f32.partialorder %v10159_v18, 0.0  ;;  %v5287_v27 = vmul.f32 0.2, %v10159_v18  ;;  %4801 = vmatprep.mubr.bf16.mxu1 %v12380_v43  ;;  %v595_v16 = vld [vmem:[#allocation5 + $0xbf8] sm:$0xff]  ;;  %v5407_v20 = vsel %vm5151_vm13, %v10155_v30, %v5279_v46 }
 0x27c   :  { %4838 = vmatprep.subr.bf16.mxu1 %v9598_v0  ;;  %v5414_v44 = vsel %vm5158_vm14, %v10157_v42, %v5286_v3  ;;  %v11047_v4 = vld [vmem:[#allocation8 + $0xc0] ss:$16 sps:$4 sm:$0xff]   ;;  %v11052_v34 = vld [vmem:[#allocation8 + $0xe4] ss:$16 sps:$4 sm:$0xff]   ;;  %v9614_v43 = vcombine.high %v591_v37, %v595_v16  ;;  %v9613_v53 = vcombine.low %v591_v37, %v595_v16 }
 0x27d   :  { %7055 = vmatpush1.bf16.msra.mxu0 %v11044_v10  ;;  %v5415_v39 = vsel %vm5159_vm15, %v10159_v18, %v5287_v27  ;;  %v12631_v54 = vpack.c.bf16 %v5414_v44, %v5406_v40  ;;  %v12635_v6 = vld [vmem:[#allocation2 + $0xc0] ss:$28 sps:$4 sm:$0xff]   ;;  %v11050_v58 = vld [vmem:[#allocation8 + $0xe0] ss:$16 sps:$4 sm:$0xff]   ;;  %v12647_v40 = vld [vmem:[#allocation2 + $0x130] ss:$28 sps:$4 sm:$0xff]  }
 0x27e   :  { %7056 = vmatprep.subr.bf16.mxu0 %v11049_v47  ;;  %v12633_v57 = vpack.c.bf16 %v5415_v39, %v5407_v20  ;;  %v599_v35 = vld [vmem:[#allocation5 + $0xc18] sm:$0xff]  ;;  %v13520_v3 = vld [vmem:[#allocation39_spill] sm:$0xff] }
 0x27f   :  { %4839 = vmatpush1.bf16.msra.mxu1 %v9597_v26  ;;  %v603_v15 = vld [vmem:[#allocation5 + $0xc38] sm:$0xff] }
 0x280   :  { %4840 = vmatprep.subr.bf16.mxu1 %v9606_v63  ;;  %4536 = vmatmul.mubr.bf16.gmra.mrb[44].mxu0 %v12635_v6  ;;  %v11055_v38 = vld [vmem:[#allocation8 + $0x104] ss:$16 sps:$4 sm:$0xff]   ;;  %v9622_v30 = vcombine.high %v599_v35, %v603_v15  ;;  %v11053_v36 = vld [vmem:[#allocation8 + $0x100] ss:$16 sps:$4 sm:$0xff]   ;;  %v9621_v29 = vcombine.low %v599_v35, %v603_v15 }
 0x281   :  { %7057 = vmatpush1.bf16.msra.mxu0 %v11047_v4  ;;  %4545 = vmatprep.mubr.bf16.mxu0 %v13506_v51  ;;  %v607_v0 = vld [vmem:[#allocation5 + $0xc58] sm:$0xff]  ;;  %v13521_v4 = vld [vmem:[#allocation40_spill] sm:$0xff] }
 0x282   :  { %4802 = vmatmul.mubr.bf16.gmra.mrb[92].mxu1 %v12384_v41  ;;  %7058 = vmatprep.subr.bf16.mxu0 %v11052_v34  ;;  %v611_v23 = vld [vmem:[#allocation5 + $0xc78] sm:$0xff] }
 0x283   :  { %4841 = vmatpush1.bf16.msra.mxu1 %v9605_v17  ;;  %4844 = vmatprep.mubr.bf16.mxu1 %v12388_v11  ;;  %v11058_v41 = vld [vmem:[#allocation8 + $0x124] ss:$16 sps:$4 sm:$0xff]   ;;  %v12641_v42 = vld [vmem:[#allocation2 + $0xf8] ss:$28 sps:$4 sm:$0xff]   ;;  %v9630_v28 = vcombine.high %v607_v0, %v611_v23  ;;  %v9629_v18 = vcombine.low %v607_v0, %v611_v23 }
 0x284   :  { %4842 = vmatprep.subr.bf16.mxu1 %v9614_v43  ;;  %v615_v14 = vld [vmem:[#allocation5 + $0xc98] sm:$0xff]  ;;  %v13522_v43 = vld [vmem:[#allocation42_spill] sm:$0xff] }
 0x285   :  { %7059 = vmatpush1.bf16.msra.mxu0 %v11050_v58  ;;  %v619_v46 = vld [vmem:[#allocation5 + $0xcb8] sm:$0xff] }
 0x286   :  { %7060 = vmatprep.subr.bf16.mxu0 %v11055_v38  ;;  %v11056_v11 = vld [vmem:[#allocation8 + $0x120] ss:$16 sps:$4 sm:$0xff]   ;;  %v11061_v10 = vld [vmem:[#allocation8 + $0x144] ss:$16 sps:$4 sm:$0xff]   ;;  %v9638_v26 = vcombine.high %v615_v14, %v619_v46  ;;  %v9637_v16 = vcombine.low %v615_v14, %v619_v46  ;;  %v13524_v14 = vld [vmem:[#allocation46_spill] sm:$0xff] }
 0x287   :  { %4843 = vmatpush1.bf16.msra.mxu1 %v9613_v53  ;;  %v11059_v47 = vld [vmem:[#allocation8 + $0x140] ss:$16 sps:$4 sm:$0xff]   ;;  %v11064_v37 = vld [vmem:[#allocation8 + $0x164] ss:$16 sps:$4 sm:$0xff]   ;;  %v13525_v46 = vld [vmem:[#allocation44_spill] sm:$0xff] }
 0x288   :  { %4925 = vmatprep.subr.bf16.mxu1 %v9622_v30  ;;  %4546 = vmatmul.mubr.bf16.gmra.mrb[48].mxu0 %v12641_v42  ;;  %v623_v27 = vld [vmem:[#allocation5 + $0xcd8] sm:$0xff] }
 0x289   :  { %7061 = vmatpush1.bf16.msra.mxu0 %v11053_v36  ;;  %4555 = vmatprep.mubr.bf16.mxu0 %v13506_v51  ;;  %v627_v63 = vld [vmem:[#allocation5 + $0xcf8] sm:$0xff] }
 0x28a   :  { %4845 = vmatmul.mubr.bf16.vlgmr.msra.gmra.mrb[64].mxu1 %v13519_v1  ;;  %7062 = vmatprep.subr.bf16.mxu0 %v11058_v41  ;;  %v9646_v44 = vcombine.high %v623_v27, %v627_v63  ;;  %v11062_v20 = vld [vmem:[#allocation8 + $0x160] ss:$16 sps:$4 sm:$0xff]   ;;  %v11067_v34 = vld [vmem:[#allocation8 + $0x184] ss:$16 sps:$4 sm:$0xff]   ;;  %v9645_v35 = vcombine.low %v623_v27, %v627_v63 }
 0x28b   :  { %4926 = vmatpush1.bf16.msra.mxu1 %v9621_v29  ;;  %4854 = vmatprep.mubr.bf16.mxu1 %v13520_v3  ;;  %v631_v39 = vld [vmem:[#allocation5 + $0xd18] sm:$0xff]  ;;  %v12655_v41 = vld [vmem:[#allocation2 + $0x168] ss:$28 sps:$4 sm:$0xff]  }
 0x28c   :  { %4927 = vmatprep.subr.bf16.mxu1 %v9630_v28  ;;  %v635_v17 = vld [vmem:[#allocation5 + $0xd38] sm:$0xff] }
 0x28d   :  { %7063 = vmatpush1.bf16.msra.mxu0 %v11056_v11  ;;  %v9654_v15 = vcombine.high %v631_v39, %v635_v17  ;;  %v11065_v58 = vld [vmem:[#allocation8 + $0x180] ss:$16 sps:$4 sm:$0xff]   ;;  %v11070_v23 = vld [vmem:[#allocation8 + $0x1a4] ss:$16 sps:$4 sm:$0xff]   ;;  %v9653_v29 = vcombine.low %v631_v39, %v635_v17 }
 0x28e   :  { %7064 = vmatprep.subr.bf16.mxu0 %v11061_v10  ;;  %v13523_v53 = vld [vmem:[#allocation41_spill] sm:$0xff] }
 0x28f   :  { %4928 = vmatpush1.bf16.msra.mxu1 %v9629_v18  ;;  %v672_v38 = vsub.s32 2, %v13523_v53  ;;  %v639_v30 = vld [vmem:[#allocation5 + $0xd58] sm:$0xff]  ;;  %v676_v0 = vsub.s32 3, %v13523_v53 }
 0x290   :  { %4929 = vmatprep.subr.bf16.mxu1 %v9638_v26  ;;  %4556 = vmatmul.mubr.bf16.gmra.mrb[52].mxu0 %v12647_v40  ;;  %v643_v36 = vld [vmem:[#allocation5 + $0xd78] sm:$0xff] }
 0x291   :  { %7065 = vmatpush1.bf16.msra.mxu0 %v11059_v47  ;;  %4565 = vmatprep.mubr.bf16.mxu0 %v13506_v51  ;;  %v9662_v28 = vcombine.high %v639_v30, %v643_v36  ;;  %v12662_v1 = vrot.slane %v13525_v46, %v672_v38  ;;  %v11068_v11 = vld [vmem:[#allocation8 + $0x1a0] ss:$16 sps:$4 sm:$0xff]   ;;  %v12667_v3 = vrot.slane %v13525_v46, %v676_v0  ;;  %v11073_v26 = vld [vmem:[#allocation8 + $0x1c4] ss:$16 sps:$4 sm:$0xff]  }
 0x292   :  { %4855 = vmatmul.mubr.bf16.gmra.mrb[68].mxu1 %v13521_v4  ;;  %7066 = vmatprep.subr.bf16.mxu0 %v11064_v37  ;;  %v647_v18 = vld [vmem:[#allocation5 + $0xd98] sm:$0xff]  ;;  %v13526_v47 = vld [vmem:[#allocation47_spill] sm:$0xff]  ;;  %v9661_v27 = vcombine.low %v639_v30, %v643_v36 }
 0x293   :  { %4864 = vmatprep.mubr.bf16.mxu1 %v13522_v43  ;;  %4930 = vmatpush1.bf16.msra.mxu1 %v9637_v16  ;;  %v651_v10 = vld [vmem:[#allocation5 + $0xdb8] sm:$0xff] }
 0x294   :  { %4931 = vmatprep.subr.bf16.mxu1 %v9646_v44  ;;  %v9670_v37 = vcombine.high %v647_v18, %v651_v10  ;;  %v11071_v4 = vld [vmem:[#allocation8 + $0x1c0] ss:$16 sps:$4 sm:$0xff]   ;;  %v11076_v43 = vld [vmem:[#allocation8 + $0x1e4] ss:$16 sps:$4 sm:$0xff]   ;;  %v9669_v30 = vcombine.low %v647_v18, %v651_v10 }
 0x295   :  { %7067 = vmatpush1.bf16.msra.mxu0 %v11062_v20  ;;  %v655_v20 = vld [vmem:[#allocation5 + $0xdd8] sm:$0xff] }
 0x296   :  { %7068 = vmatprep.subr.bf16.mxu0 %v11067_v34  ;;  %v659_v39 = vld [vmem:[#allocation5 + $0xdf8] sm:$0xff] }
 0x297   :  { %4932 = vmatpush1.bf16.msra.mxu1 %v9645_v35  ;;  %v11074_v46 = vld [vmem:[#allocation8 + $0x1e0] ss:$16 sps:$4 sm:$0xff]   ;;  %v11079_v18 = vld [vmem:[#allocation8 + $0x204] ss:$16 sps:$4 sm:$0xff]  }
 0x298   :  { %4566 = vmatmul.mubr.bf16.gmra.mrb[56].mxu0 %v12655_v41  ;;  %4933 = vmatprep.subr.bf16.mxu1 %v9654_v15 }
 0x299   :  { %7069 = vmatpush1.bf16.msra.mxu0 %v11065_v58  ;;  %4575 = vmatprep.mubr.bf16.mxu0 %v13506_v51 }
 0x29a   :  { %4865 = vmatmul.mubr.bf16.gmra.mrb[72].mxu1 %v13524_v14  ;;  %7070 = vmatprep.subr.bf16.mxu0 %v11070_v23 }
 0x29b   :  { %4874 = vmatprep.mubr.bf16.mxu1 %v13526_v47  ;;  %4934 = vmatpush1.bf16.msra.mxu1 %v9653_v29  ;;  %v12675_v29 = vld [vmem:[#allocation2 + $0x1a0] ss:$28 sps:$4 sm:$0xff]   ;;  %v9677_v47 = vcombine.low %v655_v20, %v659_v39 }
 0x29c   :  { %4935 = vmatprep.subr.bf16.mxu1 %v9662_v28  ;;  %v9678_v28 = vcombine.high %v655_v20, %v659_v39 }
 0x29d   :  { %v4055_v63 = vpop.f32.mrb[32].mxu1  ;;  %7071 = vmatpush1.bf16.msra.mxu0 %v11068_v11 }
 0x29e   :  { %v10160_v16 = vadd.f32 %v4055_v63, %v12662_v1  ;;  %v4057_v44 = vpop.f32.mrb[33].mxu1  ;;  %7072 = vmatprep.subr.bf16.mxu0 %v11073_v26 }
 0x29f   :  { %v10161_v17 = vadd.f32 %v4057_v44, %v12667_v3  ;;  %v4059_v34 = vpop.f32.mrb[34].mxu1  ;;  %4936 = vmatpush1.bf16.msra.mxu1 %v9661_v27 }
 0x2a0   :  { %v5168_v35 = vmul.f32 0.2, %v10160_v16  ;;  %v10162_v15 = vadd.f32 %v4059_v34, %v12662_v1  ;;  %v4061_v58 = vpop.f32.mrb[35].mxu1  ;;  %vm5040_vm0 = vcmp.gt.f32.partialorder %v10160_v16, 0.0  ;;  %4576 = vmatmul.mubr.bf16.gmra.mrb[60].mxu0 %v12675_v29  ;;  %4937 = vmatprep.subr.bf16.mxu1 %v9670_v37 }
 0x2a1   :  { %v5169_v36 = vmul.f32 0.2, %v10161_v17  ;;  %v10163_v23 = vadd.f32 %v4061_v58, %v12667_v3  ;;  %vm5041_vm1 = vcmp.gt.f32.partialorder %v10161_v17, 0.0  ;;  %7073 = vmatpush1.bf16.msra.mxu0 %v11071_v4  ;;  %7076 = vmatprep.mubr.bf16.mxu0 %v12475_v12  ;;  %v11082_v58 = vld [vmem:[#allocation8 + $0x224] ss:$16 sps:$4 sm:$0xff]  }
 0x2a2   :  { %vm5048_vm2 = vcmp.gt.f32.partialorder %v10162_v15, 0.0  ;;  %v5176_v14 = vmul.f32 0.2, %v10162_v15  ;;  %4875 = vmatmul.mubr.bf16.gmra.mrb[76].mxu1 %v12449_v32  ;;  %7074 = vmatprep.subr.bf16.mxu0 %v11076_v43  ;;  %v5296_v10 = vsel %vm5040_vm0, %v10160_v16, %v5168_v35  ;;  %v11106_v32 = vld [vmem:[#allocation8 + $0xc] ss:$16 sps:$4 sm:$0xff]  }
 0x2a3   :  { %vm5049_vm3 = vcmp.gt.f32.partialorder %v10163_v23, 0.0  ;;  %v5177_v11 = vmul.f32 0.2, %v10163_v23  ;;  %4884 = vmatprep.mubr.bf16.mxu1 %v12457_v2  ;;  %4938 = vmatpush1.bf16.msra.mxu1 %v9669_v30  ;;  %v5297_v37 = vsel %vm5041_vm1, %v10161_v17, %v5169_v36  ;;  %v11077_v2 = vld [vmem:[#allocation8 + $0x200] ss:$16 sps:$4 sm:$0xff]  }
 0x2a4   :  { %v5304_v26 = vsel %vm5048_vm2, %v10162_v15, %v5176_v14  ;;  %4939 = vmatprep.subr.bf16.mxu1 %v9678_v28  ;;  %v11080_v28 = vld [vmem:[#allocation8 + $0x220] ss:$16 sps:$4 sm:$0xff]   ;;  %v11085_v14 = vld [vmem:[#allocation8 + $0x244] ss:$16 sps:$4 sm:$0xff]  }
 0x2a5   :  { %v12682_v27 = vpack.c.bf16 %v5304_v26, %v5296_v10  ;;  %v4065_v63 = vpop.f32.mrb[36].mxu1  ;;  %v5305_v44 = vsel %vm5049_vm3, %v10163_v23, %v5177_v11  ;;  %7075 = vmatpush1.bf16.msra.mxu0 %v11074_v46 }
 0x2a6   :  { %v10164_v4 = vadd.f32 %v4065_v63, %v12662_v1  ;;  %v4067_v34 = vpop.f32.mrb[37].mxu1  ;;  %v12686_v43 = vpack.c.bf16 %v5305_v44, %v5297_v37  ;;  %7157 = vmatprep.subr.bf16.mxu0 %v11079_v18 }
 0x2a7   :  { %v10165_v16 = vadd.f32 %v4067_v34, %v12667_v3  ;;  %v4069_v35 = vpop.f32.mrb[38].mxu1  ;;  %4940 = vmatpush1.bf16.msra.mxu1 %v9677_v47 }
 0x2a8   :  { %v5184_v20 = vmul.f32 0.2, %v10164_v4  ;;  %v10166_v39 = vadd.f32 %v4069_v35, %v12662_v1  ;;  %v4071_v15 = vpop.f32.mrb[39].mxu1  ;;  %vm5056_vm4 = vcmp.gt.f32.partialorder %v10164_v4, 0.0  ;;  %7077 = vmatmul.mubr.bf16.vlgmr.msra.gmra.mrb[64].mxu0 %v12467_v48  ;;  %7496 = vmatprep.subr.bf16.mxu1 %v11106_v32 }
 0x2a9   :  { %v5185_v17 = vmul.f32 0.2, %v10165_v16  ;;  %v10167_v30 = vadd.f32 %v4071_v15, %v12667_v3  ;;  %vm5057_vm5 = vcmp.gt.f32.partialorder %v10165_v16, 0.0  ;;  %7086 = vmatprep.mubr.bf16.mxu0 %v12497_v21  ;;  %7158 = vmatpush1.bf16.msra.mxu0 %v11077_v2  ;;  %v11088_v2 = vld [vmem:[#allocation8 + $0x264] ss:$16 sps:$4 sm:$0xff]  }
 0x2aa   :  { %vm5064_vm6 = vcmp.gt.f32.partialorder %v10166_v39, 0.0  ;;  %v5192_v36 = vmul.f32 0.2, %v10166_v39  ;;  %4885 = vmatmul.mubr.bf16.gmra.mrb[80].mxu1 %v12480_v56  ;;  %7159 = vmatprep.subr.bf16.mxu0 %v11082_v58  ;;  %v5312_v46 = vsel %vm5056_vm4, %v10164_v4, %v5184_v20  ;;  %v11086_v58 = vld [vmem:[#allocation8 + $0x260] ss:$16 sps:$4 sm:$0xff]  }
 0x2ab   :  { %vm5065_vm7 = vcmp.gt.f32.partialorder %v10167_v30, 0.0  ;;  %v5193_v23 = vmul.f32 0.2, %v10167_v30  ;;  %4894 = vmatprep.mubr.bf16.mxu1 %v12485_v8  ;;  %v5313_v10 = vsel %vm5057_vm5, %v10165_v16, %v5185_v17  ;;  %v11083_v8 = vld [vmem:[#allocation8 + $0x240] ss:$16 sps:$4 sm:$0xff]  }
 0x2ac   :  { %v5320_v11 = vsel %vm5064_vm6, %v10166_v39, %v5192_v36  ;;  %v11091_v17 = vld [vmem:[#allocation8 + $0x284] ss:$16 sps:$4 sm:$0xff]  }
 0x2ad   :  { %v4075_v18 = vpop.f32.mrb[40].mxu1  ;;  %v5321_v26 = vsel %vm5065_vm7, %v10167_v30, %v5193_v23  ;;  %v12696_v47 = vpack.c.bf16 %v5320_v11, %v5312_v46  ;;  %7160 = vmatpush1.bf16.msra.mxu0 %v11080_v28 }
 0x2ae   :  { %v10168_v56 = vadd.f32 %v4075_v18, %v12662_v1  ;;  %v4077_v63 = vpop.f32.mrb[41].mxu1  ;;  %v12699_v32 = vpack.c.bf16 %v5321_v26, %v5313_v10  ;;  %7161 = vmatprep.subr.bf16.mxu0 %v11085_v14 }
 0x2af   :  { %v10169_v37 = vadd.f32 %v4077_v63, %v12667_v3  ;;  %v4079_v44 = vpop.f32.mrb[42].mxu1 }
 0x2b0   :  { %v5200_v34 = vmul.f32 0.2, %v10168_v56  ;;  %v10170_v35 = vadd.f32 %v4079_v44, %v12662_v1  ;;  %v4081_v4 = vpop.f32.mrb[43].mxu1  ;;  %vm5072_vm8 = vcmp.gt.f32.partialorder %v10168_v56, 0.0  ;;  %7087 = vmatmul.mubr.bf16.gmra.mrb[68].mxu0 %v12493_v45 }
 0x2b1   :  { %v5201_v16 = vmul.f32 0.2, %v10169_v37  ;;  %v10171_v20 = vadd.f32 %v4081_v4, %v12667_v3  ;;  %vm5073_vm9 = vcmp.gt.f32.partialorder %v10169_v37, 0.0  ;;  %7096 = vmatprep.mubr.bf16.mxu0 %v12519_v25  ;;  %7162 = vmatpush1.bf16.msra.mxu0 %v11083_v8  ;;  %v11094_v8 = vld [vmem:[#allocation8 + $0x2a4] ss:$16 sps:$4 sm:$0xff]  }
 0x2b2   :  { %vm5080_vm10 = vcmp.gt.f32.partialorder %v10170_v35, 0.0  ;;  %v5208_v39 = vmul.f32 0.2, %v10170_v35  ;;  %4895 = vmatmul.mubr.bf16.gmra.mrb[84].mxu1 %v12502_v59  ;;  %7163 = vmatprep.subr.bf16.mxu0 %v11088_v2  ;;  %v5328_v30 = vsel %vm5072_vm8, %v10168_v56, %v5200_v34  ;;  %v11092_v2 = vld [vmem:[#allocation8 + $0x2a0] ss:$16 sps:$4 sm:$0xff]  }
 0x2b3   :  { %vm5081_vm11 = vcmp.gt.f32.partialorder %v10171_v20, 0.0  ;;  %v5209_v15 = vmul.f32 0.2, %v10171_v20  ;;  %4904 = vmatprep.mubr.bf16.mxu1 %v12507_v61  ;;  %v5329_v28 = vsel %vm5073_vm9, %v10169_v37, %v5201_v16  ;;  %v11089_v61 = vld [vmem:[#allocation8 + $0x280] ss:$16 sps:$4 sm:$0xff]  }
 0x2b4   :  { %v5336_v36 = vsel %vm5080_vm10, %v10170_v35, %v5208_v39  ;;  %v11097_v16 = vld [vmem:[#allocation8 + $0x2c4] ss:$16 sps:$4 sm:$0xff]  }
 0x2b5   :  { %v4085_v23 = vpop.f32.mrb[44].mxu1  ;;  %v5337_v14 = vsel %vm5081_vm11, %v10171_v20, %v5209_v15  ;;  %v12709_v46 = vpack.c.bf16 %v5336_v36, %v5328_v30  ;;  %7164 = vmatpush1.bf16.msra.mxu0 %v11086_v58 }
 0x2b6   :  { %v10172_v59 = vadd.f32 %v4085_v23, %v12662_v1  ;;  %v4087_v11 = vpop.f32.mrb[45].mxu1  ;;  %v12712_v18 = vpack.c.bf16 %v5337_v14, %v5329_v28  ;;  %7165 = vmatprep.subr.bf16.mxu0 %v11091_v17 }
 0x2b7   :  { %v10173_v10 = vadd.f32 %v4087_v11, %v12667_v3  ;;  %v4089_v26 = vpop.f32.mrb[46].mxu1 }
 0x2b8   :  { %v5216_v63 = vmul.f32 0.2, %v10172_v59  ;;  %v10174_v44 = vadd.f32 %v4089_v26, %v12662_v1  ;;  %v4091_v56 = vpop.f32.mrb[47].mxu1  ;;  %vm5088_vm12 = vcmp.gt.f32.partialorder %v10172_v59, 0.0  ;;  %7097 = vmatmul.mubr.bf16.gmra.mrb[72].mxu0 %v12515_v55 }
 0x2b9   :  { %v5217_v37 = vmul.f32 0.2, %v10173_v10  ;;  %v10175_v34 = vadd.f32 %v4091_v56, %v12667_v3  ;;  %vm5089_vm13 = vcmp.gt.f32.partialorder %v10173_v10, 0.0  ;;  %7106 = vmatprep.mubr.bf16.mxu0 %v12541_v19  ;;  %7166 = vmatpush1.bf16.msra.mxu0 %v11089_v61  ;;  %v11100_v61 = vld [vmem:[#allocation8 + $0x2e4] ss:$16 sps:$4 sm:$0xff]  }
 0x2ba   :  { %vm5096_vm14 = vcmp.gt.f32.partialorder %v10174_v44, 0.0  ;;  %v5224_v35 = vmul.f32 0.2, %v10174_v44  ;;  %4905 = vmatmul.mubr.bf16.gmra.mrb[88].mxu1 %v12524_v5  ;;  %7167 = vmatprep.subr.bf16.mxu0 %v11094_v8  ;;  %v5344_v20 = vsel %vm5088_vm12, %v10172_v59, %v5216_v63  ;;  %v11098_v8 = vld [vmem:[#allocation8 + $0x2e0] ss:$16 sps:$4 sm:$0xff]  }
 0x2bb   :  { %vm5097_vm15 = vcmp.gt.f32.partialorder %v10175_v34, 0.0  ;;  %v5225_v4 = vmul.f32 0.2, %v10175_v34  ;;  %4914 = vmatprep.mubr.bf16.mxu1 %v12529_v13  ;;  %v5345_v58 = vsel %vm5089_vm13, %v10173_v10, %v5217_v37  ;;  %v11095_v13 = vld [vmem:[#allocation8 + $0x2c0] ss:$16 sps:$4 sm:$0xff]  }
 0x2bc   :  { %v5352_v39 = vsel %vm5096_vm14, %v10174_v44, %v5224_v35  ;;  %v11103_v37 = vld [vmem:[#allocation8 + $0x304] ss:$16 sps:$4 sm:$0xff]  }
 0x2bd   :  { %v4095_v15 = vpop.f32.mrb[48].mxu1  ;;  %v5353_v17 = vsel %vm5097_vm15, %v10175_v34, %v5225_v4  ;;  %v12722_v30 = vpack.c.bf16 %v5352_v39, %v5344_v20  ;;  %7168 = vmatpush1.bf16.msra.mxu0 %v11092_v2 }
 0x2be   :  { %v10176_v5 = vadd.f32 %v4095_v15, %v12662_v1  ;;  %v4097_v36 = vpop.f32.mrb[49].mxu1  ;;  %v12725_v23 = vpack.c.bf16 %v5353_v17, %v5345_v58  ;;  %7169 = vmatprep.subr.bf16.mxu0 %v11097_v16  ;;  %v11101_v15 = vld [vmem:[#allocation8 + $0x300] ss:$16 sps:$4 sm:$0xff]  }
 0x2bf   :  { %v10177_v28 = vadd.f32 %v4097_v36, %v12667_v3  ;;  %v4099_v14 = vpop.f32.mrb[50].mxu1 }
 0x2c0   :  { %v5232_v11 = vmul.f32 0.2, %v10176_v5  ;;  %v10178_v26 = vadd.f32 %v4099_v14, %v12662_v1  ;;  %v4101_v59 = vpop.f32.mrb[51].mxu1  ;;  %vm5104_vm0 = vcmp.gt.f32.partialorder %v10176_v5, 0.0  ;;  %7107 = vmatmul.mubr.bf16.gmra.mrb[76].mxu0 %v12537_v62  ;;  %v11104_v14 = vld [vmem:[#allocation8 + $0x8] ss:$16 sps:$4 sm:$0xff]  }
 0x2c1   :  { %v5233_v10 = vmul.f32 0.2, %v10177_v28  ;;  %v10179_v63 = vadd.f32 %v4101_v59, %v12667_v3  ;;  %vm5105_vm1 = vcmp.gt.f32.partialorder %v10177_v28, 0.0  ;;  %7116 = vmatprep.mubr.bf16.mxu0 %v12563_v22  ;;  %7170 = vmatpush1.bf16.msra.mxu0 %v11095_v13  ;;  %v11109_v13 = vld [vmem:[#allocation8 + $0x324] ss:$16 sps:$4 sm:$0xff]  }
 0x2c2   :  { %vm5112_vm2 = vcmp.gt.f32.partialorder %v10178_v26, 0.0  ;;  %v5240_v44 = vmul.f32 0.2, %v10178_v26  ;;  %4915 = vmatmul.mubr.bf16.gmra.mrb[92].mxu1 %v12546_v49  ;;  %7171 = vmatprep.subr.bf16.mxu0 %v11100_v61  ;;  %v5360_v34 = vsel %vm5104_vm0, %v10176_v5, %v5232_v11 }
 0x2c3   :  { %vm5113_vm3 = vcmp.gt.f32.partialorder %v10179_v63, 0.0  ;;  %v5241_v56 = vmul.f32 0.2, %v10179_v63  ;;  %4957 = vmatprep.mubr.bf16.mxu1 %v13506_v51  ;;  %v5361_v2 = vsel %vm5105_vm1, %v10177_v28, %v5233_v10  ;;  %v11112_v28 = vld [vmem:[#allocation8 + $0x2c] ss:$16 sps:$4 sm:$0xff]  }
 0x2c4   :  { %v5368_v35 = vsel %vm5112_vm2, %v10178_v26, %v5240_v44 }
 0x2c5   :  { %v4105_v4 = vpop.f32.mrb[52].mxu1  ;;  %v5369_v16 = vsel %vm5113_vm3, %v10179_v63, %v5241_v56  ;;  %v12735_v20 = vpack.c.bf16 %v5368_v35, %v5360_v34  ;;  %7172 = vmatpush1.bf16.msra.mxu0 %v11098_v8  ;;  %v11107_v63 = vld [vmem:[#allocation8 + $0x320] ss:$16 sps:$4 sm:$0xff]   ;;  %v11110_v56 = vld [vmem:[#allocation8 + $0x28] ss:$16 sps:$4 sm:$0xff]  }
 0x2c6   :  { %v10180_v49 = vadd.f32 %v4105_v4, %v12662_v1  ;;  %v4107_v39 = vpop.f32.mrb[53].mxu1  ;;  %v12738_v58 = vpack.c.bf16 %v5369_v16, %v5361_v2  ;;  %7173 = vmatprep.subr.bf16.mxu0 %v11103_v37  ;;  %v11115_v8 = vld [vmem:[#allocation8 + $0x344] ss:$16 sps:$4 sm:$0xff]   ;;  %v11118_v37 = vld [vmem:[#allocation8 + $0x4c] ss:$16 sps:$4 sm:$0xff]  }
 0x2c7   :  { %v10181_v17 = vadd.f32 %v4107_v39, %v12667_v3  ;;  %v4109_v36 = vpop.f32.mrb[54].mxu1 }
 0x2c8   :  { %v5248_v59 = vmul.f32 0.2, %v10180_v49  ;;  %v10182_v5 = vadd.f32 %v4109_v36, %v12662_v1  ;;  %v4111_v11 = vpop.f32.mrb[55].mxu1  ;;  %vm5120_vm4 = vcmp.gt.f32.partialorder %v10180_v49, 0.0  ;;  %7117 = vmatmul.mubr.bf16.gmra.mrb[80].mxu0 %v12559_v31  ;;  %v11113_v36 = vld [vmem:[#allocation8 + $0x340] ss:$16 sps:$4 sm:$0xff]  }
 0x2c9   :  { %v5249_v26 = vmul.f32 0.2, %v10181_v17  ;;  %v10183_v61 = vadd.f32 %v4111_v11, %v12667_v3  ;;  %vm5121_vm5 = vcmp.gt.f32.partialorder %v10181_v17, 0.0  ;;  %7126 = vmatprep.mubr.bf16.mxu0 %v12591_v9  ;;  %7174 = vmatpush1.bf16.msra.mxu0 %v11101_v15 }
 0x2ca   :  { %vm5128_vm6 = vcmp.gt.f32.partialorder %v10182_v5, 0.0  ;;  %v5256_v10 = vmul.f32 0.2, %v10182_v5  ;;  %4958 = vmatmul.mubr.bf16.vlgmr.msra.gmra.mrb[64].mxu1 %v12569_v52  ;;  %7175 = vmatprep.subr.bf16.mxu0 %v11109_v13  ;;  %v5376_v34 = vsel %vm5120_vm4, %v10180_v49, %v5248_v59  ;;  %v11116_v49 = vld [vmem:[#allocation8 + $0x48] ss:$16 sps:$4 sm:$0xff]  }
 0x2cb   :  { %vm5129_vm7 = vcmp.gt.f32.partialorder %v10183_v61, 0.0  ;;  %v5257_v44 = vmul.f32 0.2, %v10183_v61  ;;  %7497 = vmatpush1.bf16.msra.mxu1 %v11104_v14  ;;  %4967 = vmatprep.mubr.bf16.mxu1 %v13506_v51  ;;  %v5377_v52 = vsel %vm5121_vm5, %v10181_v17, %v5249_v26  ;;  %v11121_v59 = vld [vmem:[#allocation8 + $0x364] ss:$16 sps:$4 sm:$0xff]  }
 0x2cc   :  { %7498 = vmatprep.subr.bf16.mxu1 %v11112_v28  ;;  %v5384_v35 = vsel %vm5128_vm6, %v10182_v5, %v5256_v10  ;;  %v11124_v26 = vld [vmem:[#allocation8 + $0x6c] ss:$16 sps:$4 sm:$0xff]  }
 0x2cd   :  { %v4115_v4 = vpop.f32.mrb[56].mxu1  ;;  %v5385_v2 = vsel %vm5129_vm7, %v10183_v61, %v5257_v44  ;;  %v12749_v16 = vpack.c.bf16 %v5384_v35, %v5376_v34  ;;  %7176 = vmatpush1.bf16.msra.mxu0 %v11107_v63  ;;  %v11119_v63 = vld [vmem:[#allocation8 + $0x360] ss:$16 sps:$4 sm:$0xff]   ;;  %v11130_v34 = vld [vmem:[#allocation8 + $0x8c] ss:$16 sps:$4 sm:$0xff]  }
 0x2ce   :  { %v10184_v39 = vadd.f32 %v4115_v4, %v12662_v1  ;;  %v4117_v15 = vpop.f32.mrb[57].mxu1  ;;  %v12752_v14 = vpack.c.bf16 %v5385_v2, %v5377_v52  ;;  %7177 = vmatprep.subr.bf16.mxu0 %v11115_v8  ;;  %v11122_v8 = vld [vmem:[#allocation8 + $0x68] ss:$16 sps:$4 sm:$0xff]  }
 0x2cf   :  { %v10185_v13 = vadd.f32 %v4117_v15, %v12667_v3  ;;  %v4119_v11 = vpop.f32.mrb[58].mxu1  ;;  %7499 = vmatpush1.bf16.msra.mxu1 %v11110_v56 }
 0x2d0   :  { %v5264_v5 = vmul.f32 0.2, %v10184_v39  ;;  %v10186_v28 = vadd.f32 %v4119_v11, %v12662_v1  ;;  %v4121_v17 = vpop.f32.mrb[59].mxu1  ;;  %7500 = vmatprep.subr.bf16.mxu1 %v11118_v37  ;;  %vm5136_vm8 = vcmp.gt.f32.partialorder %v10184_v39, 0.0  ;;  %7127 = vmatmul.mubr.bf16.gmra.mrb[84].mxu0 %v12587_v24  ;;  %v11127_v37 = vld [vmem:[#allocation8 + $0x384] ss:$16 sps:$4 sm:$0xff]  }
 0x2d1   :  { %v5265_v61 = vmul.f32 0.2, %v10185_v13  ;;  %v10187_v10 = vadd.f32 %v4121_v17, %v12667_v3  ;;  %vm5137_vm9 = vcmp.gt.f32.partialorder %v10185_v13, 0.0  ;;  %7136 = vmatprep.mubr.bf16.mxu0 %v12617_v33  ;;  %7178 = vmatpush1.bf16.msra.mxu0 %v11113_v36 }
 0x2d2   :  { %vm5144_vm10 = vcmp.gt.f32.partialorder %v10186_v28, 0.0  ;;  %v5272_v44 = vmul.f32 0.2, %v10186_v28  ;;  %4968 = vmatmul.mubr.bf16.gmra.mrb[68].mxu1 %v12598_v7  ;;  %7179 = vmatprep.subr.bf16.mxu0 %v11121_v59  ;;  %v5392_v35 = vsel %vm5136_vm8, %v10184_v39, %v5264_v5  ;;  %v11128_v39 = vld [vmem:[#allocation8 + $0x88] ss:$16 sps:$4 sm:$0xff]  }
 0x2d3   :  { %vm5145_vm11 = vcmp.gt.f32.partialorder %v10187_v10, 0.0  ;;  %v5273_v56 = vmul.f32 0.2, %v10187_v10  ;;  %7501 = vmatpush1.bf16.msra.mxu1 %v11116_v49  ;;  %4977 = vmatprep.mubr.bf16.mxu1 %v13506_v51  ;;  %v5393_v7 = vsel %vm5137_vm9, %v10185_v13, %v5265_v61  ;;  %v11125_v49 = vld [vmem:[#allocation8 + $0x380] ss:$16 sps:$4 sm:$0xff]  }
 0x2d4   :  { %7502 = vmatprep.subr.bf16.mxu1 %v11124_v26  ;;  %v5400_v4 = vsel %vm5144_vm10, %v10186_v28, %v5272_v44  ;;  %v11133_v5 = vld [vmem:[#allocation8 + $0x3a4] ss:$16 sps:$4 sm:$0xff]   ;;  %v11136_v61 = vld [vmem:[#allocation8 + $0xac] ss:$16 sps:$4 sm:$0xff]  }
 0x2d5   :  { %v4125_v52 = vpop.f32.mrb[60].mxu1  ;;  %v5401_v2 = vsel %vm5145_vm11, %v10187_v10, %v5273_v56  ;;  %v12763_v15 = vpack.c.bf16 %v5400_v4, %v5392_v35  ;;  %7180 = vmatpush1.bf16.msra.mxu0 %v11119_v63  ;;  %v11131_v63 = vld [vmem:[#allocation8 + $0x3a0] ss:$16 sps:$4 sm:$0xff]  }
 0x2d6   :  { %v10188_v11 = vadd.f32 %v4125_v52, %v12662_v1  ;;  %v4127_v36 = vpop.f32.mrb[61].mxu1  ;;  %v12766_v17 = vpack.c.bf16 %v5401_v2, %v5393_v7  ;;  %7181 = vmatprep.subr.bf16.mxu0 %v11127_v37  ;;  %v11139_v37 = vld [vmem:[#allocation8 + $0x3c4] ss:$16 sps:$4 sm:$0xff]  }
 0x2d7   :  { %v10189_v59 = vadd.f32 %v4127_v36, %v12667_v3  ;;  %v4129_v26 = vpop.f32.mrb[62].mxu1  ;;  %7503 = vmatpush1.bf16.msra.mxu1 %v11122_v8  ;;  %v11134_v8 = vld [vmem:[#allocation8 + $0xa8] ss:$16 sps:$4 sm:$0xff]   ;;  %v11137_v36 = vld [vmem:[#allocation8 + $0x3c0] ss:$16 sps:$4 sm:$0xff]  }
 0x2d8   :  { %v5280_v28 = vmul.f32 0.2, %v10188_v11  ;;  %v10190_v44 = vadd.f32 %v4129_v26, %v12662_v1  ;;  %v4131_v13 = vpop.f32.mrb[63].mxu1  ;;  %7504 = vmatprep.subr.bf16.mxu1 %v11130_v34  ;;  %vm5152_vm12 = vcmp.gt.f32.partialorder %v10188_v11, 0.0  ;;  %7137 = vmatmul.mubr.bf16.gmra.mrb[88].mxu0 %v12613_v50  ;;  %v11142_v34 = vld [vmem:[#allocation8 + $0xcc] ss:$16 sps:$4 sm:$0xff]  }
 0x2d9   :  { %v5281_v10 = vmul.f32 0.2, %v10189_v59  ;;  %v10191_v56 = vadd.f32 %v4131_v13, %v12667_v3  ;;  %vm5153_vm13 = vcmp.gt.f32.partialorder %v10189_v59, 0.0  ;;  %7146 = vmatprep.mubr.bf16.mxu0 %v12633_v57  ;;  %7182 = vmatpush1.bf16.msra.mxu0 %v11125_v49  ;;  %v11140_v49 = vld [vmem:[#allocation8 + $0xc8] ss:$16 sps:$4 sm:$0xff]  }
 0x2da   :  { %vm5160_vm14 = vcmp.gt.f32.partialorder %v10190_v44, 0.0  ;;  %v5288_v35 = vmul.f32 0.2, %v10190_v44  ;;  %4978 = vmatmul.mubr.bf16.gmra.mrb[72].mxu1 %v12622_v60  ;;  %7183 = vmatprep.subr.bf16.mxu0 %v11133_v5  ;;  %v5408_v3 = vsel %vm5152_vm12, %v10188_v11, %v5280_v28  ;;  %v11145_v26 = vld [vmem:[#allocation8 + $0x3e4] ss:$16 sps:$4 sm:$0xff]  }
 0x2db   :  { %vm5161_vm15 = vcmp.gt.f32.partialorder %v10191_v56, 0.0  ;;  %v5289_v1 = vmul.f32 0.2, %v10191_v56  ;;  %7505 = vmatpush1.bf16.msra.mxu1 %v11128_v39  ;;  %4987 = vmatprep.mubr.bf16.mxu1 %v13506_v51  ;;  %v5409_v52 = vsel %vm5153_vm13, %v10189_v59, %v5281_v10  ;;  %v11148_v39 = vld [vmem:[#allocation8 + $0xec] ss:$16 sps:$4 sm:$0xff]  }
 0x2dc   :  { %7506 = vmatprep.subr.bf16.mxu1 %v11136_v61  ;;  %v5416_v4 = vsel %vm5160_vm14, %v10190_v44, %v5288_v35  ;;  %v11143_v11 = vld [vmem:[#allocation8 + $0x3e0] ss:$16 sps:$4 sm:$0xff]   ;;  %v11146_v59 = vld [vmem:[#allocation8 + $0xe8] ss:$16 sps:$4 sm:$0xff]   ;;  %v11151_v5 = vld [vmem:[#allocation8 + $0x10c] ss:$16 sps:$4 sm:$0xff]  }
 0x2dd   :  { %v5417_v60 = vsel %vm5161_vm15, %v10191_v56, %v5289_v1  ;;  %v12777_v7 = vpack.c.bf16 %v5416_v4, %v5408_v3  ;;  %7184 = vmatpush1.bf16.msra.mxu0 %v11131_v63  ;;  %v11175_v28 = vld [vmem:[#allocation8 + $0x404] ss:$16 sps:$4 sm:$0xff]   ;;  %v11149_v44 = vld [vmem:[#allocation8 + $0x108] ss:$16 sps:$4 sm:$0xff]   ;;  %v11154_v13 = vld [vmem:[#allocation8 + $0x12c] ss:$16 sps:$4 sm:$0xff]  }
 0x2de   :  { %v12779_v2 = vpack.c.bf16 %v5417_v60, %v5409_v52  ;;  %7185 = vmatprep.subr.bf16.mxu0 %v11139_v37  ;;  %v11173_v61 = vld [vmem:[#allocation8 + $0x400] ss:$16 sps:$4 sm:$0xff]   ;;  %v11152_v10 = vld [vmem:[#allocation8 + $0x128] ss:$16 sps:$4 sm:$0xff]   ;;  %v11157_v56 = vld [vmem:[#allocation8 + $0x14c] ss:$16 sps:$4 sm:$0xff]  }
 0x2df   :  { %7507 = vmatpush1.bf16.msra.mxu1 %v11134_v8  ;;  %v11179_v35 = vld [vmem:[#allocation8 + $0x420] ss:$16 sps:$4 sm:$0xff]   ;;  %v11155_v63 = vld [vmem:[#allocation8 + $0x148] ss:$16 sps:$4 sm:$0xff]   ;;  %v11160_v1 = vld [vmem:[#allocation8 + $0x16c] ss:$16 sps:$4 sm:$0xff]  }
 0x2e0   :  { %7508 = vmatprep.subr.bf16.mxu1 %v11142_v34  ;;  %7147 = vmatmul.mubr.bf16.gmra.mrb[92].mxu0 %v12631_v54  ;;  %v11185_v8 = vld [vmem:[#allocation8 + $0x440] ss:$16 sps:$4 sm:$0xff]   ;;  %v11158_v37 = vld [vmem:[#allocation8 + $0x168] ss:$16 sps:$4 sm:$0xff]   ;;  %v11193_v34 = vld [vmem:[#allocation8 + $0x464] ss:$16 sps:$4 sm:$0xff]  }
 0x2e1   :  { %7189 = vmatprep.mubr.bf16.mxu0 %v12686_v43  ;;  %7186 = vmatpush1.bf16.msra.mxu0 %v11137_v36  ;;  %v11163_v3 = vld [vmem:[#allocation8 + $0x18c] ss:$16 sps:$4 sm:$0xff]   ;;  %v11161_v4 = vld [vmem:[#allocation8 + $0x188] ss:$16 sps:$4 sm:$0xff]   ;;  %v11199_v60 = vld [vmem:[#allocation8 + $0x484] ss:$16 sps:$4 sm:$0xff]  }
 0x2e2   :  { %4988 = vmatmul.mubr.bf16.gmra.mrb[76].mxu1 %v12635_v6  ;;  %7187 = vmatprep.subr.bf16.mxu0 %v11145_v26  ;;  %v11181_v6 = vld [vmem:[#allocation8 + $0x424] ss:$16 sps:$4 sm:$0xff]   ;;  %v11166_v52 = vld [vmem:[#allocation8 + $0x1ac] ss:$16 sps:$4 sm:$0xff]   ;;  %v11164_v36 = vld [vmem:[#allocation8 + $0x1a8] ss:$16 sps:$4 sm:$0xff]  }
 0x2e3   :  { %7509 = vmatpush1.bf16.msra.mxu1 %v11140_v49  ;;  %4997 = vmatprep.mubr.bf16.mxu1 %v13506_v51  ;;  %v11169_v49 = vld [vmem:[#allocation8 + $0x1cc] ss:$16 sps:$4 sm:$0xff]   ;;  %v11197_v26 = vld [vmem:[#allocation8 + $0x480] ss:$16 sps:$4 sm:$0xff]  }
 0x2e4   :  { %7510 = vmatprep.subr.bf16.mxu1 %v11148_v39  ;;  %v11167_v39 = vld [vmem:[#allocation8 + $0x1c8] ss:$16 sps:$4 sm:$0xff]  }
 0x2e5   :  { %7188 = vmatpush1.bf16.msra.mxu0 %v11143_v11  ;;  %v11172_v11 = vld [vmem:[#allocation8 + $0x1ec] ss:$16 sps:$4 sm:$0xff]  }
 0x2e6   :  { %7270 = vmatprep.subr.bf16.mxu0 %v11175_v28  ;;  %v11178_v28 = vld [vmem:[#allocation8 + $0x20c] ss:$16 sps:$4 sm:$0xff]  }
 0x2e7   :  { %7511 = vmatpush1.bf16.msra.mxu1 %v11146_v59  ;;  %v11203_v59 = vld [vmem:[#allocation8 + $0x4a0] ss:$16 sps:$4 sm:$0xff]  }
 0x2e8   :  { %7512 = vmatprep.subr.bf16.mxu1 %v11151_v5  ;;  %7190 = vmatmul.mubr.bf16.vlgmr.msra.gmra.mrb[64].mxu0 %v12682_v27  ;;  %v11170_v5 = vld [vmem:[#allocation8 + $0x1e8] ss:$16 sps:$4 sm:$0xff]  }
 0x2e9   :  { %7199 = vmatprep.mubr.bf16.mxu0 %v12699_v32  ;;  %7271 = vmatpush1.bf16.msra.mxu0 %v11173_v61  ;;  %v11217_v61 = vld [vmem:[#allocation8 + $0x4e4] ss:$16 sps:$4 sm:$0xff]  }
 0x2ea   :  { %4998 = vmatmul.mubr.bf16.gmra.mrb[80].mxu1 %v12641_v42  ;;  %7272 = vmatprep.subr.bf16.mxu0 %v11181_v6  ;;  %v11187_v42 = vld [vmem:[#allocation8 + $0x444] ss:$16 sps:$4 sm:$0xff]   ;;  %v11215_v6 = vld [vmem:[#allocation8 + $0x4e0] ss:$16 sps:$4 sm:$0xff]  }
 0x2eb   :  { %7513 = vmatpush1.bf16.msra.mxu1 %v11149_v44  ;;  %5007 = vmatprep.mubr.bf16.mxu1 %v13506_v51  ;;  %v11176_v44 = vld [vmem:[#allocation8 + $0x208] ss:$16 sps:$4 sm:$0xff]  }
 0x2ec   :  { %7514 = vmatprep.subr.bf16.mxu1 %v11154_v13  ;;  %v11209_v13 = vld [vmem:[#allocation8 + $0x4c0] ss:$16 sps:$4 sm:$0xff]  }
 0x2ed   :  { %7273 = vmatpush1.bf16.msra.mxu0 %v11179_v35  ;;  %v11188_v35 = vld [vmem:[#allocation8 + $0x248] ss:$16 sps:$4 sm:$0xff]  }
 0x2ee   :  { %7274 = vmatprep.subr.bf16.mxu0 %v11187_v42  ;;  %v11227_v42 = vld [vmem:[#allocation8 + $0x520] ss:$16 sps:$4 sm:$0xff]  }
 0x2ef   :  { %7515 = vmatpush1.bf16.msra.mxu1 %v11152_v10  ;;  %v11190_v10 = vld [vmem:[#allocation8 + $0x24c] ss:$16 sps:$4 sm:$0xff]  }
 0x2f0   :  { %7516 = vmatprep.subr.bf16.mxu1 %v11157_v56  ;;  %7200 = vmatmul.mubr.bf16.gmra.mrb[68].mxu0 %v12696_v47  ;;  %v11223_v56 = vld [vmem:[#allocation8 + $0x504] ss:$16 sps:$4 sm:$0xff]  }
 0x2f1   :  { %7209 = vmatprep.mubr.bf16.mxu0 %v12712_v18  ;;  %7275 = vmatpush1.bf16.msra.mxu0 %v11185_v8  ;;  %v11202_v8 = vld [vmem:[#allocation8 + $0x28c] ss:$16 sps:$4 sm:$0xff]  }
 0x2f2   :  { %5008 = vmatmul.mubr.bf16.gmra.mrb[84].mxu1 %v12647_v40  ;;  %7276 = vmatprep.subr.bf16.mxu0 %v11193_v34  ;;  %v11191_v40 = vld [vmem:[#allocation8 + $0x460] ss:$16 sps:$4 sm:$0xff]   ;;  %v11200_v34 = vld [vmem:[#allocation8 + $0x288] ss:$16 sps:$4 sm:$0xff]  }
 0x2f3   :  { %7517 = vmatpush1.bf16.msra.mxu1 %v11155_v63  ;;  %5017 = vmatprep.mubr.bf16.mxu1 %v13506_v51  ;;  %v11221_v63 = vld [vmem:[#allocation8 + $0x500] ss:$16 sps:$4 sm:$0xff]  }
 0x2f4   :  { %7518 = vmatprep.subr.bf16.mxu1 %v11160_v1  ;;  %v11196_v1 = vld [vmem:[#allocation8 + $0x26c] ss:$16 sps:$4 sm:$0xff]  }
 0x2f5   :  { %7277 = vmatpush1.bf16.msra.mxu0 %v11191_v40  ;;  %v11214_v40 = vld [vmem:[#allocation8 + $0x2cc] ss:$16 sps:$4 sm:$0xff]  }
 0x2f6   :  { %7278 = vmatprep.subr.bf16.mxu0 %v11199_v60  ;;  %v11247_v60 = vld [vmem:[#allocation8 + $0x584] ss:$16 sps:$4 sm:$0xff]  }
 0x2f7   :  { %7519 = vmatpush1.bf16.msra.mxu1 %v11158_v37  ;;  %v11235_v37 = vld [vmem:[#allocation8 + $0x544] ss:$16 sps:$4 sm:$0xff]  }
 0x2f8   :  { %7520 = vmatprep.subr.bf16.mxu1 %v11163_v3  ;;  %7210 = vmatmul.mubr.bf16.gmra.mrb[72].mxu0 %v12709_v46  ;;  %v11233_v3 = vld [vmem:[#allocation8 + $0x540] ss:$16 sps:$4 sm:$0xff]  }
 0x2f9   :  { %7219 = vmatprep.mubr.bf16.mxu0 %v12725_v23  ;;  %7279 = vmatpush1.bf16.msra.mxu0 %v11197_v26  ;;  %v11220_v26 = vld [vmem:[#allocation8 + $0x2ec] ss:$16 sps:$4 sm:$0xff]  }
 0x2fa   :  { %5018 = vmatmul.mubr.bf16.gmra.mrb[88].mxu1 %v12655_v41  ;;  %v11205_v41 = vld [vmem:[#allocation8 + $0x4a4] ss:$16 sps:$4 sm:$0xff]  }
 0x2fb   :  { %7521 = vmatpush1.bf16.msra.mxu1 %v11161_v4  ;;  %5027 = vmatprep.mubr.bf16.mxu1 %v13506_v51  ;;  %v11211_v51 = vld [vmem:[#allocation8 + $0x4c4] ss:$16 sps:$4 sm:$0xff]   ;;  %v11208_v4 = vld [vmem:[#allocation8 + $0x2ac] ss:$16 sps:$4 sm:$0xff]  }
 0x2fc   :  { %7522 = vmatprep.subr.bf16.mxu1 %v11166_v52  ;;  %7280 = vmatprep.subr.bf16.mxu0 %v11205_v41  ;;  %v11239_v52 = vld [vmem:[#allocation8 + $0x560] ss:$16 sps:$4 sm:$0xff]   ;;  %v11259_v41 = vld [vmem:[#allocation8 + $0x5c4] ss:$16 sps:$4 sm:$0xff]  }
 0x2fd   :  { %7281 = vmatpush1.bf16.msra.mxu0 %v11203_v59  ;;  %v11224_v59 = vld [vmem:[#allocation8 + $0x308] ss:$16 sps:$4 sm:$0xff]  }
 0x2fe   :  { %7282 = vmatprep.subr.bf16.mxu0 %v11211_v51  ;;  %v11232_v51 = vld [vmem:[#allocation8 + $0x32c] ss:$16 sps:$4 sm:$0xff]  }
 0x2ff   :  { %7523 = vmatpush1.bf16.msra.mxu1 %v11164_v36  ;;  %v11212_v36 = vld [vmem:[#allocation8 + $0x2c8] ss:$16 sps:$4 sm:$0xff]  }
 0x300   :  { %7524 = vmatprep.subr.bf16.mxu1 %v11169_v49  ;;  %7220 = vmatmul.mubr.bf16.gmra.mrb[76].mxu0 %v12722_v30  ;;  %v11245_v49 = vld [vmem:[#allocation8 + $0x580] ss:$16 sps:$4 sm:$0xff]  }
 0x301   :  { %7229 = vmatprep.mubr.bf16.mxu0 %v12738_v58  ;;  %7283 = vmatpush1.bf16.msra.mxu0 %v11209_v13  ;;  %v11295_v13 = vld [vmem:[#allocation8 + $0x604] ss:$16 sps:$4 sm:$0xff]  }
 0x302   :  { %5028 = vmatmul.mubr.bf16.gmra.mrb[92].mxu1 %v12675_v29  ;;  %v11184_v29 = vld [vmem:[#allocation8 + $0x22c] ss:$16 sps:$4 sm:$0xff]   ;;  %7284 = vmatprep.subr.bf16.mxu0 %v11217_v61 }
 0x303   :  { %7525 = vmatpush1.bf16.msra.mxu1 %v11167_v39  ;;  %7528 = vmatprep.mubr.bf16.mxu1 %v12475_v12  ;;  %v11182_v12 = vld [vmem:[#allocation8 + $0x228] ss:$16 sps:$4 sm:$0xff]   ;;  %v11251_v39 = vld [vmem:[#allocation8 + $0x5a0] ss:$16 sps:$4 sm:$0xff]   ;;  %v11244_v61 = vld [vmem:[#allocation8 + $0x36c] ss:$16 sps:$4 sm:$0xff]  }
 0x304   :  { %7526 = vmatprep.subr.bf16.mxu1 %v11172_v11  ;;  %v11226_v11 = vld [vmem:[#allocation8 + $0x30c] ss:$16 sps:$4 sm:$0xff]  }
 0x305   :  { %7285 = vmatpush1.bf16.msra.mxu0 %v11215_v6  ;;  %v684_v6 = vsub.s32 5, %v13523_v53 }
 0x306   :  { %7286 = vmatprep.subr.bf16.mxu0 %v11223_v56  ;;  %v12822_v56 = vld [vmem:[#allocation7] sm:$0xff] }
 0x307   :  { %7527 = vmatpush1.bf16.msra.mxu1 %v11170_v5  ;;  %v11257_v5 = vld [vmem:[#allocation8 + $0x5c0] ss:$16 sps:$4 sm:$0xff]  }
 0x308   :  { %7609 = vmatprep.subr.bf16.mxu1 %v11178_v28  ;;  %7230 = vmatmul.mubr.bf16.gmra.mrb[80].mxu0 %v12735_v20  ;;  %v11265_v28 = vld [vmem:[#allocation8 + $0x5e4] ss:$16 sps:$4 sm:$0xff]  }
 0x309   :  { %7239 = vmatprep.mubr.bf16.mxu0 %v12752_v14  ;;  %7287 = vmatpush1.bf16.msra.mxu0 %v11221_v63  ;;  %v11256_v63 = vld [vmem:[#allocation8 + $0x3ac] ss:$16 sps:$4 sm:$0xff]  }
 0x30a   :  { %7529 = vmatmul.mubr.bf16.vlgmr.msra.gmra.mrb[96].mxu1 %v12467_v48  ;;  %v11229_v48 = vld [vmem:[#allocation8 + $0x524] ss:$16 sps:$4 sm:$0xff]  }
 0x30b   :  { %7538 = vmatprep.mubr.bf16.mxu1 %v12497_v21  ;;  %7610 = vmatpush1.bf16.msra.mxu1 %v11176_v44  ;;  %v11194_v21 = vld [vmem:[#allocation8 + $0x268] ss:$16 sps:$4 sm:$0xff]   ;;  %v11238_v44 = vld [vmem:[#allocation8 + $0x34c] ss:$16 sps:$4 sm:$0xff]  }
 0x30c   :  { %7611 = vmatprep.subr.bf16.mxu1 %v11184_v29  ;;  %7288 = vmatprep.subr.bf16.mxu0 %v11229_v48  ;;  %v11236_v29 = vld [vmem:[#allocation8 + $0x348] ss:$16 sps:$4 sm:$0xff]  }
 0x30d   :  { %7289 = vmatpush1.bf16.msra.mxu0 %v11227_v42  ;;  %v11262_v42 = vld [vmem:[#allocation8 + $0x3cc] ss:$16 sps:$4 sm:$0xff]  }
 0x30e   :  { %7290 = vmatprep.subr.bf16.mxu0 %v11235_v37 }
 0x30f   :  { %7612 = vmatpush1.bf16.msra.mxu1 %v11182_v12  ;;  %v680_v12 = vsub.s32 4, %v13523_v53 }
 0x310   :  { %7613 = vmatprep.subr.bf16.mxu1 %v11190_v10  ;;  %7240 = vmatmul.mubr.bf16.gmra.mrb[84].mxu0 %v12749_v16  ;;  %v11248_v10 = vld [vmem:[#allocation8 + $0x388] ss:$16 sps:$4 sm:$0xff]  }
 0x311   :  { %7249 = vmatprep.mubr.bf16.mxu0 %v12766_v17  ;;  %7291 = vmatpush1.bf16.msra.mxu0 %v11233_v3 }
 0x312   :  { %7539 = vmatmul.mubr.bf16.gmra.mrb[100].mxu1 %v12493_v45  ;;  %v11241_v45 = vld [vmem:[#allocation8 + $0x564] ss:$16 sps:$4 sm:$0xff]  }
 0x313   :  { %7548 = vmatprep.mubr.bf16.mxu1 %v12519_v25  ;;  %7614 = vmatpush1.bf16.msra.mxu1 %v11188_v35  ;;  %v11206_v25 = vld [vmem:[#allocation8 + $0x2a8] ss:$16 sps:$4 sm:$0xff]   ;;  %v12825_v35 = vrot.slane %v12822_v56, %v680_v12  ;;  %v11299_v12 = vld [vmem:[#allocation8 + $0x620] ss:$16 sps:$4 sm:$0xff]  }
 0x314   :  { %7615 = vmatprep.subr.bf16.mxu1 %v11196_v1  ;;  %7292 = vmatprep.subr.bf16.mxu0 %v11241_v45  ;;  %v11254_v1 = vld [vmem:[#allocation8 + $0x3a8] ss:$16 sps:$4 sm:$0xff]  }
 0x315   :  { %7293 = vmatpush1.bf16.msra.mxu0 %v11239_v52  ;;  %v11260_v45 = vld [vmem:[#allocation8 + $0x3c8] ss:$16 sps:$4 sm:$0xff]   ;;  %v11268_v52 = vld [vmem:[#allocation8 + $0x3ec] ss:$16 sps:$4 sm:$0xff]  }
 0x316   :  { %7294 = vmatprep.subr.bf16.mxu0 %v11247_v60 }
 0x317   :  { %7616 = vmatpush1.bf16.msra.mxu1 %v11194_v21 }
 0x318   :  { %7617 = vmatprep.subr.bf16.mxu1 %v11202_v8  ;;  %7250 = vmatmul.mubr.bf16.gmra.mrb[88].mxu0 %v12763_v15 }
 0x319   :  { %7259 = vmatprep.mubr.bf16.mxu0 %v12779_v2  ;;  %7295 = vmatpush1.bf16.msra.mxu0 %v11245_v49 }
 0x31a   :  { %7549 = vmatmul.mubr.bf16.gmra.mrb[104].mxu1 %v12515_v55  ;;  %v11253_v55 = vld [vmem:[#allocation8 + $0x5a4] ss:$16 sps:$4 sm:$0xff]  }
 0x31b   :  { %7558 = vmatprep.mubr.bf16.mxu1 %v12541_v19  ;;  %7618 = vmatpush1.bf16.msra.mxu1 %v11200_v34  ;;  %v11218_v19 = vld [vmem:[#allocation8 + $0x2e8] ss:$16 sps:$4 sm:$0xff]  }
 0x31c   :  { %7619 = vmatprep.subr.bf16.mxu1 %v11208_v4  ;;  %7296 = vmatprep.subr.bf16.mxu0 %v11253_v55  ;;  %v11266_v55 = vld [vmem:[#allocation8 + $0x3e8] ss:$16 sps:$4 sm:$0xff]  }
 0x31d   :  { %7297 = vmatpush1.bf16.msra.mxu0 %v11251_v39 }
 0x31e   :  { %7298 = vmatprep.subr.bf16.mxu0 %v11259_v41 }
 0x31f   :  { %7620 = vmatpush1.bf16.msra.mxu1 %v11206_v25 }
 0x320   :  { %7621 = vmatprep.subr.bf16.mxu1 %v11214_v40  ;;  %7260 = vmatmul.mubr.bf16.gmra.mrb[92].mxu0 %v12777_v7 }
 0x321   :  { %7299 = vmatpush1.bf16.msra.mxu0 %v11257_v5  ;;  %v11271_v5 = vld [vmem:[#allocation8 + $0x40c] ss:$16 sps:$4 sm:$0xff]  }
 0x322   :  { %7559 = vmatmul.mubr.bf16.gmra.mrb[108].mxu1 %v12537_v62  ;;  %v11230_v62 = vld [vmem:[#allocation8 + $0x328] ss:$16 sps:$4 sm:$0xff]   ;;  %7300 = vmatprep.subr.bf16.mxu0 %v11265_v28 }
 0x323   :  { %7568 = vmatprep.mubr.bf16.mxu1 %v12563_v22  ;;  %7622 = vmatpush1.bf16.msra.mxu1 %v11212_v36  ;;  %v11263_v22 = vld [vmem:[#allocation8 + $0x5e0] ss:$16 sps:$4 sm:$0xff]  }
 0x324   :  { %7623 = vmatprep.subr.bf16.mxu1 %v11220_v26 }
 0x325   :  { %7301 = vmatpush1.bf16.msra.mxu0 %v11263_v22 }
 0x326   :  { %7383 = vmatprep.subr.bf16.mxu0 %v11295_v13  ;;  %v11269_v13 = vld [vmem:[#allocation8 + $0x408] ss:$16 sps:$4 sm:$0xff]  }
 0x327   :  { %7624 = vmatpush1.bf16.msra.mxu1 %v11218_v19 }
 0x328   :  { %7625 = vmatprep.subr.bf16.mxu1 %v11226_v11 }
 0x32a   :  { %7569 = vmatmul.mubr.bf16.gmra.mrb[112].mxu1 %v12559_v31  ;;  %v11242_v31 = vld [vmem:[#allocation8 + $0x368] ss:$16 sps:$4 sm:$0xff]  }
 0x32b   :  { %7578 = vmatprep.mubr.bf16.mxu1 %v12591_v9  ;;  %7626 = vmatpush1.bf16.msra.mxu1 %v11224_v59  ;;  %v11250_v9 = vld [vmem:[#allocation8 + $0x38c] ss:$16 sps:$4 sm:$0xff]  }
 0x32c   :  { %7627 = vmatprep.subr.bf16.mxu1 %v11232_v51  ;;  %v11293_v51 = vld [vmem:[#allocation8 + $0x600] ss:$16 sps:$4 sm:$0xff]  }
 0x32f   :  { %7628 = vmatpush1.bf16.msra.mxu1 %v11230_v62  ;;  %v11301_v62 = vld [vmem:[#allocation8 + $0x624] ss:$16 sps:$4 sm:$0xff]  }
 0x330   :  { %7629 = vmatprep.subr.bf16.mxu1 %v11238_v44 }
 0x332   :  { %7579 = vmatmul.mubr.bf16.gmra.mrb[116].mxu1 %v12587_v24  ;;  %v12829_v24 = vrot.slane %v12822_v56, %v684_v6 }
 0x333   :  { %7588 = vmatprep.mubr.bf16.mxu1 %v12617_v33  ;;  %7630 = vmatpush1.bf16.msra.mxu1 %v11236_v29 }
 0x334   :  { %7631 = vmatprep.subr.bf16.mxu1 %v11244_v61 }
 0x337   :  { %7632 = vmatpush1.bf16.msra.mxu1 %v11242_v31  ;;  %v11274_v31 = vld [vmem:[#allocation8 + $0x42c] ss:$16 sps:$4 sm:$0xff]  }
 0x338   :  { %7633 = vmatprep.subr.bf16.mxu1 %v11250_v9 }
 0x33a   :  { %7589 = vmatmul.mubr.bf16.gmra.mrb[120].mxu1 %v12613_v50 }
 0x33b   :  { %7598 = vmatprep.mubr.bf16.mxu1 %v12633_v57  ;;  %7634 = vmatpush1.bf16.msra.mxu1 %v11248_v10  ;;  %v4507_v33 = vpop.f32.mrb[32].mxu0  ;;  %v11307_v10 = vld [vmem:[#allocation8 + $0x644] ss:$16 sps:$4 sm:$0xff]  }
 0x33c   :  { %v10192_v48 = vadd.f32 %v4507_v33, %v12825_v35  ;;  %v4509_v21 = vpop.f32.mrb[33].mxu0  ;;  %7635 = vmatprep.subr.bf16.mxu1 %v11256_v63 }
 0x33d   :  { %v10193_v8 = vadd.f32 %v4509_v21, %v12829_v24  ;;  %v4511_v37 = vpop.f32.mrb[34].mxu0 }
 0x33e   :  { %v5170_v34 = vmul.f32 0.2, %v10192_v48  ;;  %v10194_v3 = vadd.f32 %v4511_v37, %v12825_v35  ;;  %v4513_v50 = vpop.f32.mrb[35].mxu0  ;;  %vm5042_vm0 = vcmp.gt.f32.partialorder %v10192_v48, 0.0 }
 0x33f   :  { %v5171_v4 = vmul.f32 0.2, %v10193_v8  ;;  %7636 = vmatpush1.bf16.msra.mxu1 %v11254_v1  ;;  %v10195_v57 = vadd.f32 %v4513_v50, %v12829_v24  ;;  %vm5043_vm1 = vcmp.gt.f32.partialorder %v10193_v8, 0.0  ;;  %v11305_v50 = vld [vmem:[#allocation8 + $0x640] ss:$16 sps:$4 sm:$0xff]  }
 0x340   :  { %vm5050_vm2 = vcmp.gt.f32.partialorder %v10194_v3, 0.0  ;;  %v5178_v25 = vmul.f32 0.2, %v10194_v3  ;;  %7637 = vmatprep.subr.bf16.mxu1 %v11262_v42  ;;  %v5298_v60 = vsel %vm5042_vm0, %v10192_v48, %v5170_v34  ;;  %v11272_v48 = vld [vmem:[#allocation8 + $0x428] ss:$16 sps:$4 sm:$0xff]  }
 0x341   :  { %vm5051_vm3 = vcmp.gt.f32.partialorder %v10195_v57, 0.0  ;;  %v5179_v40 = vmul.f32 0.2, %v10195_v57  ;;  %v5299_v19 = vsel %vm5043_vm1, %v10193_v8, %v5171_v4 }
 0x342   :  { %7599 = vmatmul.mubr.bf16.gmra.mrb[124].mxu1 %v12631_v54  ;;  %v5306_v36 = vsel %vm5050_vm2, %v10194_v3, %v5178_v25 }
 0x343   :  { %7641 = vmatprep.mubr.bf16.mxu1 %v12686_v43  ;;  %v12838_v49 = vpack.c.bf16 %v5306_v36, %v5298_v60  ;;  %7638 = vmatpush1.bf16.msra.mxu1 %v11260_v45  ;;  %v4517_v26 = vpop.f32.mrb[36].mxu0  ;;  %v5307_v39 = vsel %vm5051_vm3, %v10195_v57, %v5179_v40  ;;  %v11313_v57 = vld [vmem:[#allocation8 + $0x664] ss:$16 sps:$4 sm:$0xff]   ;;  %v11275_v40 = vld [vmem:[#allocation8 + $0x448] ss:$16 sps:$4 sm:$0xff]  }
 0x344   :  { %v10196_v11 = vadd.f32 %v4517_v26, %v12825_v35  ;;  %v4519_v41 = vpop.f32.mrb[37].mxu0  ;;  %7639 = vmatprep.subr.bf16.mxu1 %v11268_v52  ;;  %v12841_v59 = vpack.c.bf16 %v5307_v39, %v5299_v19  ;;  %v11280_v26 = vld [vmem:[#allocation8 + $0x46c] ss:$16 sps:$4 sm:$0xff]   ;;  %v11311_v19 = vld [vmem:[#allocation8 + $0x660] ss:$16 sps:$4 sm:$0xff]  }
 0x345   :  { %v10197_v54 = vadd.f32 %v4519_v41, %v12829_v24  ;;  %v4521_v28 = vpop.f32.mrb[38].mxu0 }
 0x346   :  { %v5186_v43 = vmul.f32 0.2, %v10196_v11  ;;  %v10198_v22 = vadd.f32 %v4521_v28, %v12825_v35  ;;  %v4523_v44 = vpop.f32.mrb[39].mxu0  ;;  %7302 = vmatprep.mubr.bf16.mxu0 %v12841_v59  ;;  %vm5058_vm4 = vcmp.gt.f32.partialorder %v10196_v11, 0.0 }
 0x347   :  { %v5187_v29 = vmul.f32 0.2, %v10197_v54  ;;  %7640 = vmatpush1.bf16.msra.mxu1 %v11266_v55  ;;  %v10199_v61 = vadd.f32 %v4523_v44, %v12829_v24  ;;  %7303 = vmatmul.mubr.bf16.vlgmr.msra.gmra.mrb[64].mxu0 %v12838_v49  ;;  %vm5059_vm5 = vcmp.gt.f32.partialorder %v10197_v54, 0.0 }
 0x348   :  { %vm5066_vm6 = vcmp.gt.f32.partialorder %v10198_v22, 0.0  ;;  %v5194_v9 = vmul.f32 0.2, %v10198_v22  ;;  %7722 = vmatprep.subr.bf16.mxu1 %v11271_v5  ;;  %7384 = vmatpush1.bf16.msra.mxu0 %v11293_v51  ;;  %v5314_v63 = vsel %vm5058_vm4, %v10196_v11, %v5186_v43  ;;  %v11319_v11 = vld [vmem:[#allocation8 + $0x684] ss:$16 sps:$4 sm:$0xff]  }
 0x349   :  { %vm5067_vm7 = vcmp.gt.f32.partialorder %v10199_v61, 0.0  ;;  %v5195_v6 = vmul.f32 0.2, %v10199_v61  ;;  %7385 = vmatprep.subr.bf16.mxu0 %v11301_v62  ;;  %v5315_v21 = vsel %vm5059_vm5, %v10197_v54, %v5187_v29  ;;  %v11278_v54 = vld [vmem:[#allocation8 + $0x468] ss:$16 sps:$4 sm:$0xff]  }
 0x34a   :  { %7642 = vmatmul.mubr.bf16.vlgmr.msra.gmra.mrb[96].mxu1 %v12682_v27  ;;  %v5322_v33 = vsel %vm5066_vm6, %v10198_v22, %v5194_v9  ;;  %v11277_v27 = vld [vmem:[#allocation8 + $0x44c] ss:$16 sps:$4 sm:$0xff]   ;;  %v11317_v29 = vld [vmem:[#allocation8 + $0x680] ss:$16 sps:$4 sm:$0xff]  }
 0x34b   :  { %7651 = vmatprep.mubr.bf16.mxu1 %v12699_v32  ;;  %7723 = vmatpush1.bf16.msra.mxu1 %v11269_v13  ;;  %v4527_v1 = vpop.f32.mrb[40].mxu0  ;;  %v5323_v42 = vsel %vm5067_vm7, %v10199_v61, %v5195_v6  ;;  %v12852_v8 = vpack.c.bf16 %v5322_v33, %v5314_v63 }
 0x34c   :  { %v10200_v37 = vadd.f32 %v4527_v1, %v12825_v35  ;;  %v4529_v34 = vpop.f32.mrb[41].mxu0  ;;  %7724 = vmatprep.subr.bf16.mxu1 %v11274_v31  ;;  %v12855_v3 = vpack.c.bf16 %v5323_v42, %v5315_v21  ;;  %7386 = vmatpush1.bf16.msra.mxu0 %v11299_v12  ;;  %v11325_v31 = vld [vmem:[#allocation8 + $0x6a4] ss:$16 sps:$4 sm:$0xff]   ;;  %v11286_v1 = vld [vmem:[#allocation8 + $0x4ac] ss:$16 sps:$4 sm:$0xff]  }
 0x34d   :  { %v10201_v4 = vadd.f32 %v4529_v34, %v12829_v24  ;;  %v4531_v32 = vpop.f32.mrb[42].mxu0  ;;  %7387 = vmatprep.subr.bf16.mxu0 %v11307_v10  ;;  %v11281_v10 = vld [vmem:[#allocation8 + $0x488] ss:$16 sps:$4 sm:$0xff]   ;;  %v11323_v21 = vld [vmem:[#allocation8 + $0x6a0] ss:$16 sps:$4 sm:$0xff]  }
 0x34e   :  { %v5202_v45 = vmul.f32 0.2, %v10200_v37  ;;  %v10202_v25 = vadd.f32 %v4531_v32, %v12825_v35  ;;  %v4533_v52 = vpop.f32.mrb[43].mxu0  ;;  %7312 = vmatprep.mubr.bf16.mxu0 %v12855_v3  ;;  %vm5074_vm8 = vcmp.gt.f32.partialorder %v10200_v37, 0.0 }
 0x34f   :  { %v5203_v60 = vmul.f32 0.2, %v10201_v4  ;;  %7725 = vmatpush1.bf16.msra.mxu1 %v11272_v48  ;;  %v10203_v36 = vadd.f32 %v4533_v52, %v12829_v24  ;;  %7313 = vmatmul.mubr.bf16.gmra.mrb[68].mxu0 %v12852_v8  ;;  %vm5075_vm9 = vcmp.gt.f32.partialorder %v10201_v4, 0.0 }
 0x350   :  { %vm5082_vm10 = vcmp.gt.f32.partialorder %v10202_v25, 0.0  ;;  %v5210_v55 = vmul.f32 0.2, %v10202_v25  ;;  %7726 = vmatprep.subr.bf16.mxu1 %v11277_v27  ;;  %7388 = vmatpush1.bf16.msra.mxu0 %v11305_v50  ;;  %v5330_v41 = vsel %vm5074_vm8, %v10200_v37, %v5202_v45  ;;  %v11331_v37 = vld [vmem:[#allocation8 + $0x6c4] ss:$16 sps:$4 sm:$0xff]  }
 0x351   :  { %vm5083_vm11 = vcmp.gt.f32.partialorder %v10203_v36, 0.0  ;;  %v5211_v39 = vmul.f32 0.2, %v10203_v36  ;;  %7389 = vmatprep.subr.bf16.mxu0 %v11313_v57  ;;  %v5331_v28 = vsel %vm5075_vm9, %v10201_v4, %v5203_v60  ;;  %v11284_v4 = vld [vmem:[#allocation8 + $0x4a8] ss:$16 sps:$4 sm:$0xff]  }
 0x352   :  { %7652 = vmatmul.mubr.bf16.gmra.mrb[100].mxu1 %v12696_v47  ;;  %v5338_v5 = vsel %vm5082_vm10, %v10202_v25, %v5210_v55  ;;  %v11283_v47 = vld [vmem:[#allocation8 + $0x48c] ss:$16 sps:$4 sm:$0xff]   ;;  %v11329_v60 = vld [vmem:[#allocation8 + $0x6c0] ss:$16 sps:$4 sm:$0xff]  }
 0x353   :  { %7661 = vmatprep.mubr.bf16.mxu1 %v12712_v18  ;;  %7727 = vmatpush1.bf16.msra.mxu1 %v11275_v40  ;;  %v4537_v51 = vpop.f32.mrb[44].mxu0  ;;  %v5339_v62 = vsel %vm5083_vm11, %v10203_v36, %v5211_v39  ;;  %v12866_v43 = vpack.c.bf16 %v5338_v5, %v5330_v41 }
 0x354   :  { %v10204_v22 = vadd.f32 %v4537_v51, %v12825_v35  ;;  %v4539_v44 = vpop.f32.mrb[45].mxu0  ;;  %7728 = vmatprep.subr.bf16.mxu1 %v11280_v26  ;;  %v12869_v13 = vpack.c.bf16 %v5339_v62, %v5331_v28  ;;  %7390 = vmatpush1.bf16.msra.mxu0 %v11311_v19  ;;  %v11337_v26 = vld [vmem:[#allocation8 + $0x6e4] ss:$16 sps:$4 sm:$0xff]   ;;  %v11292_v51 = vld [vmem:[#allocation8 + $0x4ec] ss:$16 sps:$4 sm:$0xff]  }
 0x355   :  { %v10205_v61 = vadd.f32 %v4539_v44, %v12829_v24  ;;  %v4541_v18 = vpop.f32.mrb[46].mxu0  ;;  %7391 = vmatprep.subr.bf16.mxu0 %v11319_v11  ;;  %v11287_v11 = vld [vmem:[#allocation8 + $0x4c8] ss:$16 sps:$4 sm:$0xff]   ;;  %v11335_v28 = vld [vmem:[#allocation8 + $0x6e0] ss:$16 sps:$4 sm:$0xff]  }
 0x356   :  { %v5218_v9 = vmul.f32 0.2, %v10204_v22  ;;  %v10206_v12 = vadd.f32 %v4541_v18, %v12825_v35  ;;  %v4543_v6 = vpop.f32.mrb[47].mxu0  ;;  %7322 = vmatprep.mubr.bf16.mxu0 %v12869_v13  ;;  %vm5090_vm12 = vcmp.gt.f32.partialorder %v10204_v22, 0.0 }
 0x357   :  { %v5219_v63 = vmul.f32 0.2, %v10205_v61  ;;  %7729 = vmatpush1.bf16.msra.mxu1 %v11278_v54  ;;  %v10207_v33 = vadd.f32 %v4543_v6, %v12829_v24  ;;  %7323 = vmatmul.mubr.bf16.gmra.mrb[72].mxu0 %v12866_v43  ;;  %vm5091_vm13 = vcmp.gt.f32.partialorder %v10205_v61, 0.0 }
 0x358   :  { %vm5098_vm14 = vcmp.gt.f32.partialorder %v10206_v12, 0.0  ;;  %v5226_v48 = vmul.f32 0.2, %v10206_v12  ;;  %7730 = vmatprep.subr.bf16.mxu1 %v11283_v47  ;;  %7392 = vmatpush1.bf16.msra.mxu0 %v11317_v29  ;;  %v5346_v34 = vsel %vm5090_vm12, %v10204_v22, %v5218_v9  ;;  %v11343_v22 = vld [vmem:[#allocation8 + $0x704] ss:$16 sps:$4 sm:$0xff]  }
 0x359   :  { %vm5099_vm15 = vcmp.gt.f32.partialorder %v10207_v33, 0.0  ;;  %v5227_v42 = vmul.f32 0.2, %v10207_v33  ;;  %7393 = vmatprep.subr.bf16.mxu0 %v11325_v31  ;;  %v5347_v32 = vsel %vm5091_vm13, %v10205_v61, %v5219_v63  ;;  %v11290_v61 = vld [vmem:[#allocation8 + $0x4e8] ss:$16 sps:$4 sm:$0xff]  }
 0x35a   :  { %7662 = vmatmul.mubr.bf16.gmra.mrb[104].mxu1 %v12709_v46  ;;  %v5354_v27 = vsel %vm5098_vm14, %v10206_v12, %v5226_v48  ;;  %v11289_v46 = vld [vmem:[#allocation8 + $0x4cc] ss:$16 sps:$4 sm:$0xff]   ;;  %v11341_v63 = vld [vmem:[#allocation8 + $0x700] ss:$16 sps:$4 sm:$0xff]  }
 0x35b   :  { %7671 = vmatprep.mubr.bf16.mxu1 %v12725_v23  ;;  %7731 = vmatpush1.bf16.msra.mxu1 %v11281_v10  ;;  %v4547_v50 = vpop.f32.mrb[48].mxu0  ;;  %v5355_v57 = vsel %vm5099_vm15, %v10207_v33, %v5227_v42  ;;  %v12880_v45 = vpack.c.bf16 %v5354_v27, %v5346_v34 }
 0x35c   :  { %v10208_v25 = vadd.f32 %v4547_v50, %v12825_v35  ;;  %v4549_v52 = vpop.f32.mrb[49].mxu0  ;;  %7732 = vmatprep.subr.bf16.mxu1 %v11286_v1  ;;  %v12883_v40 = vpack.c.bf16 %v5355_v57, %v5347_v32  ;;  %7394 = vmatpush1.bf16.msra.mxu0 %v11323_v21  ;;  %v11349_v1 = vld [vmem:[#allocation8 + $0x724] ss:$16 sps:$4 sm:$0xff]   ;;  %v11304_v50 = vld [vmem:[#allocation8 + $0x52c] ss:$16 sps:$4 sm:$0xff]  }
 0x35d   :  { %v10209_v36 = vadd.f32 %v4549_v52, %v12829_v24  ;;  %v4551_v23 = vpop.f32.mrb[50].mxu0  ;;  %7395 = vmatprep.subr.bf16.mxu0 %v11331_v37  ;;  %v11296_v37 = vld [vmem:[#allocation8 + $0x508] ss:$16 sps:$4 sm:$0xff]   ;;  %v11347_v32 = vld [vmem:[#allocation8 + $0x720] ss:$16 sps:$4 sm:$0xff]  }
 0x35e   :  { %v5234_v55 = vmul.f32 0.2, %v10208_v25  ;;  %v10210_v19 = vadd.f32 %v4551_v23, %v12825_v35  ;;  %v4553_v39 = vpop.f32.mrb[51].mxu0  ;;  %7332 = vmatprep.mubr.bf16.mxu0 %v12883_v40  ;;  %vm5106_vm0 = vcmp.gt.f32.partialorder %v10208_v25, 0.0 }
 0x35f   :  { %v5235_v41 = vmul.f32 0.2, %v10209_v36  ;;  %7733 = vmatpush1.bf16.msra.mxu1 %v11284_v4  ;;  %v10211_v5 = vadd.f32 %v4553_v39, %v12829_v24  ;;  %7333 = vmatmul.mubr.bf16.gmra.mrb[76].mxu0 %v12880_v45  ;;  %vm5107_vm1 = vcmp.gt.f32.partialorder %v10209_v36, 0.0 }
 0x360   :  { %vm5114_vm2 = vcmp.gt.f32.partialorder %v10210_v19, 0.0  ;;  %v5242_v54 = vmul.f32 0.2, %v10210_v19  ;;  %7734 = vmatprep.subr.bf16.mxu1 %v11289_v46  ;;  %7396 = vmatpush1.bf16.msra.mxu0 %v11329_v60  ;;  %v5362_v44 = vsel %vm5106_vm0, %v10208_v25, %v5234_v55  ;;  %v11355_v25 = vld [vmem:[#allocation8 + $0x744] ss:$16 sps:$4 sm:$0xff]  }
 0x361   :  { %vm5115_vm3 = vcmp.gt.f32.partialorder %v10211_v5, 0.0  ;;  %v5243_v62 = vmul.f32 0.2, %v10211_v5  ;;  %7397 = vmatprep.subr.bf16.mxu0 %v11337_v26  ;;  %v5363_v18 = vsel %vm5107_vm1, %v10209_v36, %v5235_v41  ;;  %v11302_v36 = vld [vmem:[#allocation8 + $0x528] ss:$16 sps:$4 sm:$0xff]  }
 0x362   :  { %7672 = vmatmul.mubr.bf16.gmra.mrb[108].mxu1 %v12722_v30  ;;  %v5370_v47 = vsel %vm5114_vm2, %v10210_v19, %v5242_v54  ;;  %v11298_v30 = vld [vmem:[#allocation8 + $0x50c] ss:$16 sps:$4 sm:$0xff]   ;;  %v11353_v41 = vld [vmem:[#allocation8 + $0x740] ss:$16 sps:$4 sm:$0xff]  }
 0x363   :  { %7681 = vmatprep.mubr.bf16.mxu1 %v12738_v58  ;;  %7735 = vmatpush1.bf16.msra.mxu1 %v11287_v11  ;;  %v4557_v29 = vpop.f32.mrb[52].mxu0  ;;  %v5371_v31 = vsel %vm5115_vm3, %v10211_v5, %v5243_v62  ;;  %v12894_v9 = vpack.c.bf16 %v5370_v47, %v5362_v44 }
 0x364   :  { %v10212_v12 = vadd.f32 %v4557_v29, %v12825_v35  ;;  %v4559_v6 = vpop.f32.mrb[53].mxu0  ;;  %7736 = vmatprep.subr.bf16.mxu1 %v11292_v51  ;;  %v12897_v10 = vpack.c.bf16 %v5371_v31, %v5363_v18  ;;  %7398 = vmatpush1.bf16.msra.mxu0 %v11335_v28  ;;  %v11361_v51 = vld [vmem:[#allocation8 + $0x764] ss:$16 sps:$4 sm:$0xff]   ;;  %v11316_v29 = vld [vmem:[#allocation8 + $0x56c] ss:$16 sps:$4 sm:$0xff]  }
 0x365   :  { %v10213_v33 = vadd.f32 %v4559_v6, %v12829_v24  ;;  %v4561_v58 = vpop.f32.mrb[54].mxu0  ;;  %7399 = vmatprep.subr.bf16.mxu0 %v11343_v22  ;;  %v11308_v22 = vld [vmem:[#allocation8 + $0x548] ss:$16 sps:$4 sm:$0xff]   ;;  %v11359_v18 = vld [vmem:[#allocation8 + $0x760] ss:$16 sps:$4 sm:$0xff]  }
 0x366   :  { %v5250_v48 = vmul.f32 0.2, %v10212_v12  ;;  %v10214_v21 = vadd.f32 %v4561_v58, %v12825_v35  ;;  %v4563_v42 = vpop.f32.mrb[55].mxu0  ;;  %7342 = vmatprep.mubr.bf16.mxu0 %v12897_v10  ;;  %vm5122_vm4 = vcmp.gt.f32.partialorder %v10212_v12, 0.0 }
 0x367   :  { %v5251_v34 = vmul.f32 0.2, %v10213_v33  ;;  %7737 = vmatpush1.bf16.msra.mxu1 %v11290_v61  ;;  %v10215_v27 = vadd.f32 %v4563_v42, %v12829_v24  ;;  %7343 = vmatmul.mubr.bf16.gmra.mrb[80].mxu0 %v12894_v9  ;;  %vm5123_vm5 = vcmp.gt.f32.partialorder %v10213_v33, 0.0 }
 0x368   :  { %vm5130_vm6 = vcmp.gt.f32.partialorder %v10214_v21, 0.0  ;;  %v5258_v4 = vmul.f32 0.2, %v10214_v21  ;;  %7738 = vmatprep.subr.bf16.mxu1 %v11298_v30  ;;  %7400 = vmatpush1.bf16.msra.mxu0 %v11341_v63  ;;  %v5378_v52 = vsel %vm5122_vm4, %v10212_v12, %v5250_v48  ;;  %v11367_v12 = vld [vmem:[#allocation8 + $0x784] ss:$16 sps:$4 sm:$0xff]  }
 0x369   :  { %vm5131_vm7 = vcmp.gt.f32.partialorder %v10215_v27, 0.0  ;;  %v5259_v57 = vmul.f32 0.2, %v10215_v27  ;;  %7401 = vmatprep.subr.bf16.mxu0 %v11349_v1  ;;  %v5379_v23 = vsel %vm5123_vm5, %v10213_v33, %v5251_v34  ;;  %v11314_v33 = vld [vmem:[#allocation8 + $0x568] ss:$16 sps:$4 sm:$0xff]  }
 0x36a   :  { %7682 = vmatmul.mubr.bf16.gmra.mrb[112].mxu1 %v12735_v20  ;;  %v5386_v46 = vsel %vm5130_vm6, %v10214_v21, %v5258_v4  ;;  %v11310_v20 = vld [vmem:[#allocation8 + $0x54c] ss:$16 sps:$4 sm:$0xff]   ;;  %v11365_v34 = vld [vmem:[#allocation8 + $0x780] ss:$16 sps:$4 sm:$0xff]  }
 0x36b   :  { %7691 = vmatprep.mubr.bf16.mxu1 %v12752_v14  ;;  %7739 = vmatpush1.bf16.msra.mxu1 %v11296_v37  ;;  %v4567_v60 = vpop.f32.mrb[56].mxu0  ;;  %v5387_v26 = vsel %vm5131_vm7, %v10215_v27, %v5259_v57  ;;  %v12908_v55 = vpack.c.bf16 %v5386_v46, %v5378_v52 }
 0x36c   :  { %v10216_v19 = vadd.f32 %v4567_v60, %v12825_v35  ;;  %v4569_v39 = vpop.f32.mrb[57].mxu0  ;;  %7740 = vmatprep.subr.bf16.mxu1 %v11304_v50  ;;  %v12911_v11 = vpack.c.bf16 %v5387_v26, %v5379_v23  ;;  %7402 = vmatpush1.bf16.msra.mxu0 %v11347_v32  ;;  %v11373_v50 = vld [vmem:[#allocation8 + $0x7a4] ss:$16 sps:$4 sm:$0xff]   ;;  %v11328_v60 = vld [vmem:[#allocation8 + $0x5ac] ss:$16 sps:$4 sm:$0xff]  }
 0x36d   :  { %v10217_v5 = vadd.f32 %v4569_v39, %v12829_v24  ;;  %v4571_v14 = vpop.f32.mrb[58].mxu0  ;;  %7403 = vmatprep.subr.bf16.mxu0 %v11355_v25  ;;  %v11320_v25 = vld [vmem:[#allocation8 + $0x588] ss:$16 sps:$4 sm:$0xff]   ;;  %v11371_v23 = vld [vmem:[#allocation8 + $0x7a0] ss:$16 sps:$4 sm:$0xff]  }
 0x36e   :  { %v5266_v54 = vmul.f32 0.2, %v10216_v19  ;;  %v10218_v28 = vadd.f32 %v4571_v14, %v12825_v35  ;;  %v4573_v62 = vpop.f32.mrb[59].mxu0  ;;  %7352 = vmatprep.mubr.bf16.mxu0 %v12911_v11  ;;  %vm5138_vm8 = vcmp.gt.f32.partialorder %v10216_v19, 0.0  ;;  %v11379_v26 = vld [vmem:[#allocation8 + $0x7c4] ss:$16 sps:$4 sm:$0xff]  }
 0x36f   :  { %v5267_v44 = vmul.f32 0.2, %v10217_v5  ;;  %7741 = vmatpush1.bf16.msra.mxu1 %v11302_v36  ;;  %v10219_v47 = vadd.f32 %v4573_v62, %v12829_v24  ;;  %7353 = vmatmul.mubr.bf16.gmra.mrb[84].mxu0 %v12908_v55  ;;  %vm5139_vm9 = vcmp.gt.f32.partialorder %v10217_v5, 0.0  ;;  %v11383_v62 = vld [vmem:[#allocation8 + $0x7e0] ss:$16 sps:$4 sm:$0xff]  }
 0x370   :  { %vm5146_vm10 = vcmp.gt.f32.partialorder %v10218_v28, 0.0  ;;  %v5274_v61 = vmul.f32 0.2, %v10218_v28  ;;  %7742 = vmatprep.subr.bf16.mxu1 %v11310_v20  ;;  %7404 = vmatpush1.bf16.msra.mxu0 %v11353_v41  ;;  %v5394_v6 = vsel %vm5138_vm8, %v10216_v19, %v5266_v54  ;;  %v11377_v54 = vld [vmem:[#allocation8 + $0x7c0] ss:$16 sps:$4 sm:$0xff]  }
 0x371   :  { %vm5147_vm11 = vcmp.gt.f32.partialorder %v10219_v47, 0.0  ;;  %v5275_v31 = vmul.f32 0.2, %v10219_v47  ;;  %7405 = vmatprep.subr.bf16.mxu0 %v11361_v51  ;;  %v5395_v58 = vsel %vm5139_vm9, %v10217_v5, %v5267_v44  ;;  %v11334_v51 = vld [vmem:[#allocation8 + $0x5cc] ss:$16 sps:$4 sm:$0xff]  }
 0x372   :  { %7692 = vmatmul.mubr.bf16.gmra.mrb[116].mxu1 %v12749_v16  ;;  %v5402_v30 = vsel %vm5146_vm10, %v10218_v28, %v5274_v61  ;;  %v11322_v16 = vld [vmem:[#allocation8 + $0x58c] ss:$16 sps:$4 sm:$0xff]   ;;  %v11338_v44 = vld [vmem:[#allocation8 + $0x5e8] ss:$16 sps:$4 sm:$0xff]  }
 0x373   :  { %7701 = vmatprep.mubr.bf16.mxu1 %v12766_v17  ;;  %7743 = vmatpush1.bf16.msra.mxu1 %v11308_v22  ;;  %v4577_v63 = vpop.f32.mrb[60].mxu0  ;;  %v5403_v1 = vsel %vm5147_vm11, %v10219_v47, %v5275_v31  ;;  %v12922_v48 = vpack.c.bf16 %v5402_v30, %v5394_v6  ;;  %v11340_v28 = vld [vmem:[#allocation8 + $0x5ec] ss:$16 sps:$4 sm:$0xff]   ;;  %v11415_v22 = vld [vmem:[#allocation11 + $0x4] ss:$8 sps:$4 sm:$0xff]  }
 0x374   :  { %v10220_v21 = vadd.f32 %v4577_v63, %v12825_v35  ;;  %v4579_v42 = vpop.f32.mrb[61].mxu0  ;;  %7744 = vmatprep.subr.bf16.mxu1 %v11316_v29  ;;  %v12925_v37 = vpack.c.bf16 %v5403_v1, %v5395_v58  ;;  %7406 = vmatpush1.bf16.msra.mxu0 %v11359_v18  ;;  %v11346_v47 = vld [vmem:[#allocation8 + $0x60c] ss:$16 sps:$4 sm:$0xff]   ;;  %v11344_v29 = vld [vmem:[#allocation8 + $0x608] ss:$16 sps:$4 sm:$0xff]  }
 0x375   :  { %v10221_v27 = vadd.f32 %v4579_v42, %v12829_v24  ;;  %v4581_v17 = vpop.f32.mrb[62].mxu0  ;;  %7407 = vmatprep.subr.bf16.mxu0 %v11367_v12  ;;  %v11352_v61 = vld [vmem:[#allocation8 + $0x62c] ss:$16 sps:$4 sm:$0xff]   ;;  %v11350_v18 = vld [vmem:[#allocation8 + $0x628] ss:$16 sps:$4 sm:$0xff]  }
 0x376   :  { %v5282_v4 = vmul.f32 0.2, %v10220_v21  ;;  %v10222_v32 = vadd.f32 %v4581_v17, %v12825_v35  ;;  %v4583_v57 = vpop.f32.mrb[63].mxu0  ;;  %7362 = vmatprep.mubr.bf16.mxu0 %v12925_v37  ;;  %vm5154_vm12 = vcmp.gt.f32.partialorder %v10220_v21, 0.0  ;;  %v11356_v31 = vld [vmem:[#allocation8 + $0x648] ss:$16 sps:$4 sm:$0xff]  }
 0x377   :  { %v5283_v52 = vmul.f32 0.2, %v10221_v27  ;;  %7745 = vmatpush1.bf16.msra.mxu1 %v11314_v33  ;;  %v10223_v46 = vadd.f32 %v4583_v57, %v12829_v24  ;;  %7363 = vmatmul.mubr.bf16.gmra.mrb[88].mxu0 %v12922_v48  ;;  %vm5155_vm13 = vcmp.gt.f32.partialorder %v10221_v27, 0.0  ;;  %v11326_v24 = vld [vmem:[#allocation8 + $0x5a8] ss:$16 sps:$4 sm:$0xff]  }
 0x378   :  { %vm5162_vm14 = vcmp.gt.f32.partialorder %v10222_v32, 0.0  ;;  %v5290_v36 = vmul.f32 0.2, %v10222_v32  ;;  %7746 = vmatprep.subr.bf16.mxu1 %v11322_v16  ;;  %7408 = vmatpush1.bf16.msra.mxu0 %v11365_v34  ;;  %v5410_v19 = vsel %vm5154_vm12, %v10220_v21, %v5282_v4  ;;  %v11362_v12 = vld [vmem:[#allocation8 + $0x668] ss:$16 sps:$4 sm:$0xff]  }
 0x379   :  { %vm5163_vm15 = vcmp.gt.f32.partialorder %v10223_v46, 0.0  ;;  %v5291_v35 = vmul.f32 0.2, %v10223_v46  ;;  %7409 = vmatprep.subr.bf16.mxu0 %v11373_v50  ;;  %v5411_v20 = vsel %vm5155_vm13, %v10221_v27, %v5283_v52  ;;  %v11370_v6 = vld [vmem:[#allocation8 + $0x68c] ss:$16 sps:$4 sm:$0xff]  }
 0x37a   :  { %7702 = vmatmul.mubr.bf16.gmra.mrb[120].mxu1 %v12763_v15  ;;  %v5418_v39 = vsel %vm5162_vm14, %v10222_v32, %v5290_v36  ;;  %v11385_v15 = vld [vmem:[#allocation8 + $0x7e4] ss:$16 sps:$4 sm:$0xff]   ;;  %v11368_v30 = vld [vmem:[#allocation8 + $0x688] ss:$16 sps:$4 sm:$0xff]   ;;  %v11376_v63 = vld [vmem:[#allocation8 + $0x6ac] ss:$16 sps:$4 sm:$0xff]  }
 0x37b   :  { %7711 = vmatprep.mubr.bf16.mxu1 %v12779_v2  ;;  %7747 = vmatpush1.bf16.msra.mxu1 %v11320_v25  ;;  %v5419_v41 = vsel %vm5163_vm15, %v10223_v46, %v5291_v35  ;;  %v12936_v5 = vpack.c.bf16 %v5418_v39, %v5410_v19  ;;  %v11332_v2 = vld [vmem:[#allocation8 + $0x5c8] ss:$16 sps:$4 sm:$0xff]   ;;  %v11382_v1 = vld [vmem:[#allocation8 + $0x6cc] ss:$16 sps:$4 sm:$0xff]  }
 0x37c   :  { %7748 = vmatprep.subr.bf16.mxu1 %v11328_v60  ;;  %v12938_v14 = vpack.c.bf16 %v5419_v41, %v5411_v20  ;;  %7410 = vmatpush1.bf16.msra.mxu0 %v11371_v23  ;;  %v11388_v4 = vld [vmem:[#allocation8 + $0x6ec] ss:$16 sps:$4 sm:$0xff]   ;;  %v11386_v46 = vld [vmem:[#allocation8 + $0x6e8] ss:$16 sps:$4 sm:$0xff]  }
 0x37d   :  { %7411 = vmatprep.subr.bf16.mxu0 %v11379_v26  ;;  %v11391_v26 = vld [vmem:[#allocation8 + $0x70c] ss:$16 sps:$4 sm:$0xff]  }
 0x37e   :  { %7372 = vmatprep.mubr.bf16.mxu0 %v12938_v14  ;;  %v11413_v20 = vld [vmem:[#allocation11] ss:$8 sps:$4 sm:$0xff]  }
 0x37f   :  { %7749 = vmatpush1.bf16.msra.mxu1 %v11326_v24  ;;  %7373 = vmatmul.mubr.bf16.gmra.mrb[92].mxu0 %v12936_v5 }
 0x380   :  { %7750 = vmatprep.subr.bf16.mxu1 %v11334_v51  ;;  %7412 = vmatpush1.bf16.msra.mxu0 %v11377_v54  ;;  %v11418_v51 = vld [vmem:[#allocation11 + $0x14] ss:$8 sps:$4 sm:$0xff]  }
 0x381   :  { %7413 = vmatprep.subr.bf16.mxu0 %v11385_v15 }
 0x382   :  { %7712 = vmatmul.mubr.bf16.gmra.mrb[124].mxu1 %v12777_v7  ;;  %v11358_v7 = vld [vmem:[#allocation8 + $0x64c] ss:$16 sps:$4 sm:$0xff]  }
 0x383   :  { %7751 = vmatpush1.bf16.msra.mxu1 %v11332_v2  ;;  %7754 = vmatprep.mubr.bf16.mxu1 %v12841_v59  ;;  %v11364_v59 = vld [vmem:[#allocation8 + $0x66c] ss:$16 sps:$4 sm:$0xff]   ;;  %v11389_v2 = vld [vmem:[#allocation8 + $0x708] ss:$16 sps:$4 sm:$0xff]  }
 0x384   :  { %7752 = vmatprep.subr.bf16.mxu1 %v11340_v28  ;;  %7414 = vmatpush1.bf16.msra.mxu0 %v11383_v62 }
 0x385   :  { %8568 = vmatprep.subr.bf16.mxu0 %v11415_v22  ;;  %v11394_v22 = vld [vmem:[#allocation8 + $0x72c] ss:$16 sps:$4 sm:$0xff]  }
 0x387   :  { %7753 = vmatpush1.bf16.msra.mxu1 %v11338_v44 }
 0x388   :  { %7835 = vmatprep.subr.bf16.mxu1 %v11346_v47  ;;  %v11416_v47 = vld [vmem:[#allocation11 + $0x10] ss:$8 sps:$4 sm:$0xff]  }
 0x38a   :  { %7755 = vmatmul.mubr.bf16.vlgmr.msra.gmra.mrb[96].mxu1 %v12838_v49  ;;  %v688_v49 = vsub.s32 6, %v13523_v53 }
 0x38b   :  { %7764 = vmatprep.mubr.bf16.mxu1 %v12855_v3  ;;  %7836 = vmatpush1.bf16.msra.mxu1 %v11344_v29  ;;  %v692_v3 = vsub.s32 7, %v13523_v53 }
 0x38c   :  { %7837 = vmatprep.subr.bf16.mxu1 %v11352_v61  ;;  %v12951_v33 = vrot.slane %v12822_v56, %v688_v49  ;;  %v11421_v61 = vld [vmem:[#allocation11 + $0x24] ss:$8 sps:$4 sm:$0xff]  }
 0x38f   :  { %7838 = vmatpush1.bf16.msra.mxu1 %v11350_v18  ;;  %v11392_v18 = vld [vmem:[#allocation8 + $0x728] ss:$16 sps:$4 sm:$0xff]  }
 0x390   :  { %7839 = vmatprep.subr.bf16.mxu1 %v11358_v7 }
 0x392   :  { %7765 = vmatmul.mubr.bf16.gmra.mrb[100].mxu1 %v12852_v8  ;;  %v12955_v8 = vrot.slane %v12822_v56, %v692_v3  ;;  %v11380_v56 = vld [vmem:[#allocation8 + $0x6c8] ss:$16 sps:$4 sm:$0xff]   ;;  %v11397_v3 = vld [vmem:[#allocation8 + $0x74c] ss:$16 sps:$4 sm:$0xff]  }
 0x393   :  { %7774 = vmatprep.mubr.bf16.mxu1 %v12869_v13  ;;  %7840 = vmatpush1.bf16.msra.mxu1 %v11356_v31  ;;  %v11374_v13 = vld [vmem:[#allocation8 + $0x6a8] ss:$16 sps:$4 sm:$0xff]  }
 0x394   :  { %7841 = vmatprep.subr.bf16.mxu1 %v11364_v59 }
 0x397   :  { %7842 = vmatpush1.bf16.msra.mxu1 %v11362_v12 }
 0x398   :  { %7843 = vmatprep.subr.bf16.mxu1 %v11370_v6 }
 0x39a   :  { %7775 = vmatmul.mubr.bf16.gmra.mrb[104].mxu1 %v12866_v43 }
 0x39b   :  { %7784 = vmatprep.mubr.bf16.mxu1 %v12883_v40  ;;  %7844 = vmatpush1.bf16.msra.mxu1 %v11368_v30 }
 0x39c   :  { %7845 = vmatprep.subr.bf16.mxu1 %v11376_v63 }
 0x39d   :  { %v4959_v58 = vpop.f32.mrb[64].mxu1 }
 0x39e   :  { %v10224_v21 = vadd.f32 %v4959_v58, %v12951_v33  ;;  %v4961_v42 = vpop.f32.mrb[65].mxu1 }
 0x39f   :  { %v10225_v16 = vadd.f32 %v4961_v42, %v12955_v8  ;;  %v4963_v34 = vpop.f32.mrb[66].mxu1  ;;  %7846 = vmatpush1.bf16.msra.mxu1 %v11374_v13 }
 0x3a0   :  { %v5172_v27 = vmul.f32 0.2, %v10224_v21  ;;  %v10226_v17 = vadd.f32 %v4963_v34, %v12951_v33  ;;  %v4965_v43 = vpop.f32.mrb[67].mxu1  ;;  %vm5044_vm0 = vcmp.gt.f32.partialorder %v10224_v21, 0.0  ;;  %7847 = vmatprep.subr.bf16.mxu1 %v11382_v1  ;;  %v11424_v1 = vld [vmem:[#allocation11 + $0x34] ss:$8 sps:$4 sm:$0xff]  }
 0x3a1   :  { %v5173_v50 = vmul.f32 0.2, %v10225_v16  ;;  %v10227_v40 = vadd.f32 %v4965_v43, %v12955_v8  ;;  %vm5045_vm1 = vcmp.gt.f32.partialorder %v10225_v16, 0.0  ;;  %v11395_v34 = vld [vmem:[#allocation8 + $0x748] ss:$16 sps:$4 sm:$0xff]  }
 0x3a2   :  { %vm5052_vm2 = vcmp.gt.f32.partialorder %v10226_v17, 0.0  ;;  %v5180_v32 = vmul.f32 0.2, %v10226_v17  ;;  %7785 = vmatmul.mubr.bf16.gmra.mrb[108].mxu1 %v12880_v45  ;;  %v5300_v25 = vsel %vm5044_vm0, %v10224_v21, %v5172_v27  ;;  %v11400_v43 = vld [vmem:[#allocation8 + $0x76c] ss:$16 sps:$4 sm:$0xff]  }
 0x3a3   :  { %vm5053_vm3 = vcmp.gt.f32.partialorder %v10227_v40, 0.0  ;;  %v5181_v57 = vmul.f32 0.2, %v10227_v40  ;;  %7794 = vmatprep.mubr.bf16.mxu1 %v12897_v10  ;;  %7848 = vmatpush1.bf16.msra.mxu1 %v11380_v56  ;;  %v5301_v23 = vsel %vm5045_vm1, %v10225_v16, %v5173_v50  ;;  %v11422_v50 = vld [vmem:[#allocation11 + $0x30] ss:$8 sps:$4 sm:$0xff]  }
 0x3a4   :  { %v5308_v52 = vsel %vm5052_vm2, %v10226_v17, %v5180_v32  ;;  %7849 = vmatprep.subr.bf16.mxu1 %v11388_v4  ;;  %v11427_v4 = vld [vmem:[#allocation11 + $0x44] ss:$8 sps:$4 sm:$0xff]  }
 0x3a5   :  { %v12964_v60 = vpack.c.bf16 %v5308_v52, %v5300_v25  ;;  %v4969_v36 = vpop.f32.mrb[68].mxu1  ;;  %v5309_v35 = vsel %vm5053_vm3, %v10227_v40, %v5181_v57  ;;  %v11398_v32 = vld [vmem:[#allocation8 + $0x768] ss:$16 sps:$4 sm:$0xff]  }
 0x3a6   :  { %v10228_v19 = vadd.f32 %v4969_v36, %v12951_v33  ;;  %v4971_v39 = vpop.f32.mrb[69].mxu1  ;;  %v12967_v24 = vpack.c.bf16 %v5309_v35, %v5301_v23  ;;  %v11403_v35 = vld [vmem:[#allocation8 + $0x78c] ss:$16 sps:$4 sm:$0xff]  }
 0x3a7   :  { %v10229_v45 = vadd.f32 %v4971_v39, %v12955_v8  ;;  %v4973_v41 = vpop.f32.mrb[70].mxu1  ;;  %7850 = vmatpush1.bf16.msra.mxu1 %v11386_v46 }
 0x3a8   :  { %v5188_v10 = vmul.f32 0.2, %v10228_v19  ;;  %v10230_v54 = vadd.f32 %v4973_v41, %v12951_v33  ;;  %v4975_v15 = vpop.f32.mrb[71].mxu1  ;;  %7415 = vmatprep.mubr.bf16.mxu0 %v12967_v24  ;;  %vm5060_vm4 = vcmp.gt.f32.partialorder %v10228_v19, 0.0  ;;  %7851 = vmatprep.subr.bf16.mxu1 %v11391_v26 }
 0x3a9   :  { %v5189_v28 = vmul.f32 0.2, %v10229_v45  ;;  %v10231_v62 = vadd.f32 %v4975_v15, %v12955_v8  ;;  %7416 = vmatmul.mubr.bf16.vlgmr.msra.gmra.mrb[64].mxu0 %v12964_v60  ;;  %vm5061_vm5 = vcmp.gt.f32.partialorder %v10229_v45, 0.0 }
 0x3aa   :  { %vm5068_vm6 = vcmp.gt.f32.partialorder %v10230_v54, 0.0  ;;  %v5196_v44 = vmul.f32 0.2, %v10230_v54  ;;  %8569 = vmatpush1.bf16.msra.mxu0 %v11413_v20  ;;  %7795 = vmatmul.mubr.bf16.gmra.mrb[112].mxu1 %v12894_v9  ;;  %v5316_v7 = vsel %vm5060_vm4, %v10228_v19, %v5188_v10 }
 0x3ab   :  { %vm5069_vm7 = vcmp.gt.f32.partialorder %v10231_v62, 0.0  ;;  %v5197_v29 = vmul.f32 0.2, %v10231_v62  ;;  %8570 = vmatprep.subr.bf16.mxu0 %v11418_v51  ;;  %7804 = vmatprep.mubr.bf16.mxu1 %v12911_v11  ;;  %v5317_v12 = vsel %vm5061_vm5, %v10229_v45, %v5189_v28  ;;  %v11419_v11 = vld [vmem:[#allocation11 + $0x20] ss:$8 sps:$4 sm:$0xff]  }
 0x3ac   :  { %7852 = vmatpush1.bf16.msra.mxu1 %v11389_v2  ;;  %v5324_v31 = vsel %vm5068_vm6, %v10230_v54, %v5196_v44  ;;  %v11430_v45 = vld [vmem:[#allocation11 + $0x54] ss:$8 sps:$4 sm:$0xff]   ;;  %v11406_v28 = vld [vmem:[#allocation8 + $0x7ac] ss:$16 sps:$4 sm:$0xff]  }
 0x3ad   :  { %v4979_v59 = vpop.f32.mrb[72].mxu1  ;;  %7853 = vmatprep.subr.bf16.mxu1 %v11394_v22  ;;  %v5325_v6 = vsel %vm5069_vm7, %v10231_v62, %v5197_v29  ;;  %v12978_v49 = vpack.c.bf16 %v5324_v31, %v5316_v7  ;;  %v11401_v54 = vld [vmem:[#allocation8 + $0x788] ss:$16 sps:$4 sm:$0xff]   ;;  %v11428_v22 = vld [vmem:[#allocation11 + $0x50] ss:$8 sps:$4 sm:$0xff]  }
 0x3ae   :  { %v10232_v30 = vadd.f32 %v4979_v59, %v12951_v33  ;;  %v4981_v9 = vpop.f32.mrb[73].mxu1  ;;  %v12981_v63 = vpack.c.bf16 %v5325_v6, %v5317_v12  ;;  %8571 = vmatpush1.bf16.msra.mxu0 %v11416_v47  ;;  %v11433_v47 = vld [vmem:[#allocation11 + $0x64] ss:$8 sps:$4 sm:$0xff]   ;;  %v11409_v6 = vld [vmem:[#allocation8 + $0x7cc] ss:$16 sps:$4 sm:$0xff]  }
 0x3af   :  { %v10233_v13 = vadd.f32 %v4981_v9, %v12955_v8  ;;  %v4983_v58 = vpop.f32.mrb[74].mxu1  ;;  %8572 = vmatprep.subr.bf16.mxu0 %v11421_v61  ;;  %v11404_v29 = vld [vmem:[#allocation8 + $0x7a8] ss:$16 sps:$4 sm:$0xff]  }
 0x3b0   :  { %v5204_v21 = vmul.f32 0.2, %v10232_v30  ;;  %v10234_v42 = vadd.f32 %v4983_v58, %v12951_v33  ;;  %7854 = vmatpush1.bf16.msra.mxu1 %v11392_v18  ;;  %v4985_v16 = vpop.f32.mrb[75].mxu1  ;;  %7425 = vmatprep.mubr.bf16.mxu0 %v12981_v63  ;;  %vm5076_vm8 = vcmp.gt.f32.partialorder %v10232_v30, 0.0 }
 0x3b1   :  { %v5205_v27 = vmul.f32 0.2, %v10233_v13  ;;  %v10235_v17 = vadd.f32 %v4985_v16, %v12955_v8  ;;  %7426 = vmatmul.mubr.bf16.gmra.mrb[68].mxu0 %v12978_v49  ;;  %7855 = vmatprep.subr.bf16.mxu1 %v11397_v3  ;;  %vm5077_vm9 = vcmp.gt.f32.partialorder %v10233_v13, 0.0 }
 0x3b2   :  { %vm5084_vm10 = vcmp.gt.f32.partialorder %v10234_v42, 0.0  ;;  %v5212_v56 = vmul.f32 0.2, %v10234_v42  ;;  %8573 = vmatpush1.bf16.msra.mxu0 %v11419_v11  ;;  %7805 = vmatmul.mubr.bf16.gmra.mrb[116].mxu1 %v12908_v55  ;;  %v5332_v57 = vsel %vm5076_vm8, %v10232_v30, %v5204_v21 }
 0x3b3   :  { %vm5085_vm11 = vcmp.gt.f32.partialorder %v10235_v17, 0.0  ;;  %v5213_v40 = vmul.f32 0.2, %v10235_v17  ;;  %8574 = vmatprep.subr.bf16.mxu0 %v11424_v1  ;;  %7814 = vmatprep.mubr.bf16.mxu1 %v12925_v37  ;;  %v5333_v46 = vsel %vm5077_vm9, %v10233_v13, %v5205_v27  ;;  %v11425_v37 = vld [vmem:[#allocation11 + $0x40] ss:$8 sps:$4 sm:$0xff]  }
 0x3b4   :  { %7856 = vmatpush1.bf16.msra.mxu1 %v11395_v34  ;;  %v5340_v25 = vsel %vm5084_vm10, %v10234_v42, %v5212_v56  ;;  %v11436_v13 = vld [vmem:[#allocation11 + $0x74] ss:$8 sps:$4 sm:$0xff]   ;;  %v11412_v27 = vld [vmem:[#allocation8 + $0x7ec] ss:$16 sps:$4 sm:$0xff]  }
 0x3b5   :  { %v4989_v52 = vpop.f32.mrb[76].mxu1  ;;  %7857 = vmatprep.subr.bf16.mxu1 %v11400_v43  ;;  %v5341_v36 = vsel %vm5085_vm11, %v10235_v17, %v5213_v40  ;;  %v12992_v23 = vpack.c.bf16 %v5340_v25, %v5332_v57  ;;  %v11407_v42 = vld [vmem:[#allocation8 + $0x7c8] ss:$16 sps:$4 sm:$0xff]   ;;  %v11434_v43 = vld [vmem:[#allocation11 + $0x70] ss:$8 sps:$4 sm:$0xff]  }
 0x3b6   :  { %v10236_v26 = vadd.f32 %v4989_v52, %v12951_v33  ;;  %v4991_v55 = vpop.f32.mrb[77].mxu1  ;;  %v12995_v19 = vpack.c.bf16 %v5341_v36, %v5333_v46  ;;  %8575 = vmatpush1.bf16.msra.mxu0 %v11422_v50  ;;  %v11439_v50 = vld [vmem:[#allocation11 + $0x84] ss:$8 sps:$4 sm:$0xff]  }
 0x3b7   :  { %v10237_v39 = vadd.f32 %v4991_v55, %v12955_v8  ;;  %v4993_v20 = vpop.f32.mrb[78].mxu1  ;;  %8576 = vmatprep.subr.bf16.mxu0 %v11427_v4  ;;  %v11410_v40 = vld [vmem:[#allocation8 + $0x7e8] ss:$16 sps:$4 sm:$0xff]  }
 0x3b8   :  { %v5220_v41 = vmul.f32 0.2, %v10236_v26  ;;  %v10238_v51 = vadd.f32 %v4993_v20, %v12951_v33  ;;  %7858 = vmatpush1.bf16.msra.mxu1 %v11398_v32  ;;  %v4995_v10 = vpop.f32.mrb[79].mxu1  ;;  %7435 = vmatprep.mubr.bf16.mxu0 %v12995_v19  ;;  %vm5092_vm12 = vcmp.gt.f32.partialorder %v10236_v26, 0.0 }
 0x3b9   :  { %v5221_v15 = vmul.f32 0.2, %v10237_v39  ;;  %v10239_v2 = vadd.f32 %v4995_v10, %v12955_v8  ;;  %7436 = vmatmul.mubr.bf16.gmra.mrb[72].mxu0 %v12992_v23  ;;  %7859 = vmatprep.subr.bf16.mxu1 %v11403_v35  ;;  %vm5093_vm13 = vcmp.gt.f32.partialorder %v10237_v39, 0.0 }
 0x3ba   :  { %vm5100_vm14 = vcmp.gt.f32.partialorder %v10238_v51, 0.0  ;;  %v5228_v62 = vmul.f32 0.2, %v10238_v51  ;;  %8577 = vmatpush1.bf16.msra.mxu0 %v11425_v37  ;;  %7815 = vmatmul.mubr.bf16.gmra.mrb[120].mxu1 %v12922_v48  ;;  %v5348_v61 = vsel %vm5092_vm12, %v10236_v26, %v5220_v41  ;;  %v11437_v26 = vld [vmem:[#allocation11 + $0x80] ss:$8 sps:$4 sm:$0xff]  }
 0x3bb   :  { %vm5101_vm15 = vcmp.gt.f32.partialorder %v10239_v2, 0.0  ;;  %v5229_v44 = vmul.f32 0.2, %v10239_v2  ;;  %8578 = vmatprep.subr.bf16.mxu0 %v11430_v45  ;;  %7824 = vmatprep.mubr.bf16.mxu1 %v12938_v14  ;;  %v5349_v31 = vsel %vm5093_vm13, %v10237_v39, %v5221_v15  ;;  %v11431_v14 = vld [vmem:[#allocation11 + $0x60] ss:$8 sps:$4 sm:$0xff]  }
 0x3bc   :  { %7860 = vmatpush1.bf16.msra.mxu1 %v11401_v54  ;;  %v5356_v18 = vsel %vm5100_vm14, %v10238_v51, %v5228_v62  ;;  %v11442_v37 = vld [vmem:[#allocation11 + $0x94] ss:$8 sps:$4 sm:$0xff]   ;;  %v11440_v54 = vld [vmem:[#allocation11 + $0x90] ss:$8 sps:$4 sm:$0xff]  }
 0x3bd   :  { %v4999_v7 = vpop.f32.mrb[80].mxu1  ;;  %7861 = vmatprep.subr.bf16.mxu1 %v11406_v28  ;;  %v5357_v59 = vsel %vm5101_vm15, %v10239_v2, %v5229_v44  ;;  %v13006_v12 = vpack.c.bf16 %v5356_v18, %v5348_v61  ;;  %v11445_v2 = vld [vmem:[#allocation11 + $0xa4] ss:$8 sps:$4 sm:$0xff]  }
 0x3be   :  { %v10240_v3 = vadd.f32 %v4999_v7, %v12951_v33  ;;  %v5001_v48 = vpop.f32.mrb[81].mxu1  ;;  %v13009_v30 = vpack.c.bf16 %v5357_v59, %v5349_v31  ;;  %8579 = vmatpush1.bf16.msra.mxu0 %v11428_v22  ;;  %v11443_v31 = vld [vmem:[#allocation11 + $0xa0] ss:$8 sps:$4 sm:$0xff]  }
 0x3bf   :  { %v10241_v9 = vadd.f32 %v5001_v48, %v12955_v8  ;;  %v5003_v11 = vpop.f32.mrb[82].mxu1  ;;  %8580 = vmatprep.subr.bf16.mxu0 %v11433_v47 }
 0x3c0   :  { %v5236_v58 = vmul.f32 0.2, %v10240_v3  ;;  %v10242_v1 = vadd.f32 %v5003_v11, %v12951_v33  ;;  %7862 = vmatpush1.bf16.msra.mxu1 %v11404_v29  ;;  %v5005_v21 = vpop.f32.mrb[83].mxu1  ;;  %7445 = vmatprep.mubr.bf16.mxu0 %v13009_v30  ;;  %vm5108_vm0 = vcmp.gt.f32.partialorder %v10240_v3, 0.0 }
 0x3c1   :  { %v5237_v16 = vmul.f32 0.2, %v10241_v9  ;;  %v10243_v34 = vadd.f32 %v5005_v21, %v12955_v8  ;;  %7446 = vmatmul.mubr.bf16.gmra.mrb[76].mxu0 %v13006_v12  ;;  %7863 = vmatprep.subr.bf16.mxu1 %v11409_v6  ;;  %vm5109_vm1 = vcmp.gt.f32.partialorder %v10241_v9, 0.0  ;;  %v11448_v6 = vld [vmem:[#allocation11 + $0xb4] ss:$8 sps:$4 sm:$0xff]  }
 0x3c2   :  { %vm5116_vm2 = vcmp.gt.f32.partialorder %v10242_v1, 0.0  ;;  %v5244_v17 = vmul.f32 0.2, %v10242_v1  ;;  %8581 = vmatpush1.bf16.msra.mxu0 %v11431_v14  ;;  %7825 = vmatmul.mubr.bf16.gmra.mrb[124].mxu1 %v12936_v5  ;;  %v5364_v4 = vsel %vm5108_vm0, %v10240_v3, %v5236_v58 }
 0x3c3   :  { %vm5117_vm3 = vcmp.gt.f32.partialorder %v10243_v34, 0.0  ;;  %v5245_v56 = vmul.f32 0.2, %v10243_v34  ;;  %8582 = vmatprep.subr.bf16.mxu0 %v11436_v13  ;;  %7867 = vmatprep.mubr.bf16.mxu1 %v12967_v24  ;;  %v5365_v25 = vsel %vm5109_vm1, %v10241_v9, %v5237_v16  ;;  %v11446_v13 = vld [vmem:[#allocation11 + $0xb0] ss:$8 sps:$4 sm:$0xff]  }
 0x3c4   :  { %7864 = vmatpush1.bf16.msra.mxu1 %v11407_v42  ;;  %v5372_v32 = vsel %vm5116_vm2, %v10242_v1, %v5244_v17  ;;  %v11451_v1 = vld [vmem:[#allocation11 + $0xc4] ss:$8 sps:$4 sm:$0xff]  }
 0x3c5   :  { %v5009_v57 = vpop.f32.mrb[84].mxu1  ;;  %7865 = vmatprep.subr.bf16.mxu1 %v11412_v27  ;;  %v5373_v52 = vsel %vm5117_vm3, %v10243_v34, %v5245_v56  ;;  %v13020_v46 = vpack.c.bf16 %v5372_v32, %v5364_v4 }
 0x3c6   :  { %v10244_v36 = vadd.f32 %v5009_v57, %v12951_v33  ;;  %v5011_v35 = vpop.f32.mrb[85].mxu1  ;;  %v13023_v5 = vpack.c.bf16 %v5373_v52, %v5365_v25  ;;  %8583 = vmatpush1.bf16.msra.mxu0 %v11434_v43 }
 0x3c7   :  { %v10245_v24 = vadd.f32 %v5011_v35, %v12955_v8  ;;  %v5013_v55 = vpop.f32.mrb[86].mxu1  ;;  %8584 = vmatprep.subr.bf16.mxu0 %v11439_v50 }
 0x3c8   :  { %v5252_v39 = vmul.f32 0.2, %v10244_v36  ;;  %v10246_v20 = vadd.f32 %v5013_v55, %v12951_v33  ;;  %7866 = vmatpush1.bf16.msra.mxu1 %v11410_v40  ;;  %v5015_v45 = vpop.f32.mrb[87].mxu1  ;;  %7455 = vmatprep.mubr.bf16.mxu0 %v13023_v5  ;;  %vm5124_vm4 = vcmp.gt.f32.partialorder %v10244_v36, 0.0  ;;  %v11449_v40 = vld [vmem:[#allocation11 + $0xc0] ss:$8 sps:$4 sm:$0xff]  }
 0x3c9   :  { %v5253_v41 = vmul.f32 0.2, %v10245_v24  ;;  %v10247_v51 = vadd.f32 %v5015_v45, %v12955_v8  ;;  %7456 = vmatmul.mubr.bf16.gmra.mrb[80].mxu0 %v13020_v46  ;;  %vm5125_vm5 = vcmp.gt.f32.partialorder %v10245_v24, 0.0  ;;  %v13055_v45 = vld [vmem:[#allocation10] sm:$0xf] }
 0x3ca   :  { %vm5132_vm6 = vcmp.gt.f32.partialorder %v10246_v20, 0.0  ;;  %v5260_v10 = vmul.f32 0.2, %v10246_v20  ;;  %8585 = vmatpush1.bf16.msra.mxu0 %v11437_v26  ;;  %v5380_v28 = vsel %vm5124_vm4, %v10244_v36, %v5252_v39 }
 0x3cb   :  { %vm5133_vm7 = vcmp.gt.f32.partialorder %v10247_v51, 0.0  ;;  %v5261_v15 = vmul.f32 0.2, %v10247_v51  ;;  %7868 = vmatmul.mubr.bf16.vlgmr.msra.gmra.mrb[96].mxu1 %v12964_v60  ;;  %8586 = vmatprep.subr.bf16.mxu0 %v11442_v37  ;;  %v5381_v44 = vsel %vm5125_vm5, %v10245_v24, %v5253_v41  ;;  %v13527_v41 = vld [vmem:[#allocation43_spill] sm:$0xff] }
 0x3cc   :  { %7877 = vmatprep.mubr.bf16.mxu1 %v12981_v63  ;;  %v5388_v62 = vsel %vm5132_vm6, %v10246_v20, %v5260_v10  ;;  %v11455_v20 = vld [vmem:[#allocation11 + $0xe0] ss:$8 sps:$4 sm:$0xff]   ;;  %v13528_v10 = vld [vmem:[#allocation45_spill] sm:$0xff] }
 0x3cd   :  { %v5019_v22 = vpop.f32.mrb[88].mxu1  ;;  %v5389_v47 = vsel %vm5133_vm7, %v10247_v51, %v5261_v15  ;;  %v13032_v29 = vpack.c.bf16 %v5388_v62, %v5380_v28  ;;  %v13059_v51 = vrot.slane %v13055_v45, %v13527_v41 }
 0x3ce   :  { %v10248_v61 = vadd.f32 %v5019_v22, %v12951_v33  ;;  %v5021_v18 = vpop.f32.mrb[89].mxu1  ;;  %v13035_v7 = vpack.c.bf16 %v5389_v47, %v5381_v44  ;;  %8587 = vmatpush1.bf16.msra.mxu0 %v11440_v54  ;;  %v13063_v54 = vrot.slane %v13055_v45, %v13528_v10 }
 0x3cf   :  { %v10249_v60 = vadd.f32 %v5021_v18, %v12955_v8  ;;  %v5023_v59 = vpop.f32.mrb[90].mxu1  ;;  %8588 = vmatprep.subr.bf16.mxu0 %v11445_v2 }
 0x3d0   :  { %v5268_v63 = vmul.f32 0.2, %v10248_v61  ;;  %v10250_v3 = vadd.f32 %v5023_v59, %v12951_v33  ;;  %v5025_v48 = vpop.f32.mrb[91].mxu1  ;;  %7465 = vmatprep.mubr.bf16.mxu0 %v13035_v7  ;;  %vm5140_vm8 = vcmp.gt.f32.partialorder %v10248_v61, 0.0 }
 0x3d1   :  { %v5269_v14 = vmul.f32 0.2, %v10249_v60  ;;  %v10251_v9 = vadd.f32 %v5025_v48, %v12955_v8  ;;  %7466 = vmatmul.mubr.bf16.gmra.mrb[84].mxu0 %v13032_v29  ;;  %vm5141_vm9 = vcmp.gt.f32.partialorder %v10249_v60, 0.0 }
 0x3d2   :  { %vm5148_vm10 = vcmp.gt.f32.partialorder %v10250_v3, 0.0  ;;  %v5276_v11 = vmul.f32 0.2, %v10250_v3  ;;  %8589 = vmatpush1.bf16.msra.mxu0 %v11443_v31  ;;  %v5396_v21 = vsel %vm5140_vm8, %v10248_v61, %v5268_v63 }
 0x3d3   :  { %vm5149_vm11 = vcmp.gt.f32.partialorder %v10251_v9, 0.0  ;;  %v5277_v58 = vmul.f32 0.2, %v10251_v9  ;;  %7878 = vmatmul.mubr.bf16.gmra.mrb[100].mxu1 %v12978_v49  ;;  %8590 = vmatprep.subr.bf16.mxu0 %v11448_v6  ;;  %v5397_v34 = vsel %vm5141_vm9, %v10249_v60, %v5269_v14 }
 0x3d4   :  { %7887 = vmatprep.mubr.bf16.mxu1 %v12995_v19  ;;  %v5404_v42 = vsel %vm5148_vm10, %v10250_v3, %v5276_v11 }
 0x3d5   :  { %v5029_v16 = vpop.f32.mrb[92].mxu1  ;;  %v5405_v27 = vsel %vm5149_vm11, %v10251_v9, %v5277_v58  ;;  %v5476_v17 = vpack.c.bf16 %v5404_v42, %v5396_v21  ;;  %v11466_v21 = vld [vmem:[#allocation11 + $0x114] ss:$8 sps:$4 sm:$0xff]   ;;  %v13071_v42 = vld [vmem:[#allocation14 + $0x40] sm:$0xff]  }
 0x3d6   :  { %v10252_v43 = vadd.f32 %v5029_v16, %v12951_v33  ;;  %v5031_v56 = vpop.f32.mrb[93].mxu1  ;;  %v5477_v50 = vpack.c.bf16 %v5405_v27, %v5397_v34  ;;  %8591 = vmatpush1.bf16.msra.mxu0 %v11446_v13  ;;  %v11461_v13 = vld [vmem:[#allocation11 + $0x100] ss:$8 sps:$4 sm:$0xff]   ;;  %10080 = vmatprep.subr.bf16.mxu1 %v13071_v42 }
 0x3d7   :  { %v10253_v4 = vadd.f32 %v5031_v56, %v12955_v8  ;;  %v5033_v32 = vpop.f32.mrb[94].mxu1  ;;  %8592 = vmatprep.subr.bf16.mxu0 %v11451_v1 }
 0x3d8   :  { %v5284_v49 = vmul.f32 0.2, %v10252_v43  ;;  %v10254_v57 = vadd.f32 %v5033_v32, %v12951_v33  ;;  %v5035_v19 = vpop.f32.mrb[95].mxu1  ;;  %7475 = vmatprep.mubr.bf16.mxu0 %v5477_v50  ;;  %vm5156_vm12 = vcmp.gt.f32.partialorder %v10252_v43, 0.0 }
 0x3d9   :  { %v5285_v25 = vmul.f32 0.2, %v10253_v4  ;;  %v10255_v52 = vadd.f32 %v5035_v19, %v12955_v8  ;;  %7476 = vmatmul.mubr.bf16.gmra.mrb[88].mxu0 %v5476_v17  ;;  %vm5157_vm13 = vcmp.gt.f32.partialorder %v10253_v4, 0.0  ;;  %v11454_v8 = vld [vmem:[#allocation11 + $0xd4] ss:$8 sps:$4 sm:$0xff]  }
 0x3da   :  { %vm5164_vm14 = vcmp.gt.f32.partialorder %v10254_v57, 0.0  ;;  %v5292_v36 = vmul.f32 0.2, %v10254_v57  ;;  %8593 = vmatpush1.bf16.msra.mxu0 %v11449_v40  ;;  %v5412_v26 = vsel %vm5156_vm12, %v10252_v43, %v5284_v49  ;;  %v11469_v49 = vld [vmem:[#allocation11 + $0x124] ss:$8 sps:$4 sm:$0xff]  }
 0x3db   :  { %vm5165_vm15 = vcmp.gt.f32.partialorder %v10255_v52, 0.0  ;;  %v5293_v35 = vmul.f32 0.2, %v10255_v52  ;;  %7888 = vmatmul.mubr.bf16.gmra.mrb[104].mxu1 %v12992_v23  ;;  %v5413_v33 = vsel %vm5157_vm13, %v10253_v4, %v5285_v25  ;;  %v11452_v23 = vld [vmem:[#allocation11 + $0xd0] ss:$8 sps:$4 sm:$0xff]   ;;  %8594 = vmatprep.subr.bf16.mxu0 %v11454_v8 }
 0x3dc   :  { %7897 = vmatprep.mubr.bf16.mxu1 %v13009_v30  ;;  %v5420_v24 = vsel %vm5164_vm14, %v10254_v57, %v5292_v36  ;;  %v11457_v30 = vld [vmem:[#allocation11 + $0xe4] ss:$8 sps:$4 sm:$0xff]   ;;  %v11464_v4 = vld [vmem:[#allocation11 + $0x110] ss:$8 sps:$4 sm:$0xff]  }
 0x3dd   :  { %v5421_v55 = vsel %vm5165_vm15, %v10255_v52, %v5293_v35  ;;  %v5484_v37 = vpack.c.bf16 %v5420_v24, %v5412_v26  ;;  %v13083_v25 = vld [vmem:[#allocation14 + $0x8] sm:$0xff]   ;;  %v13085_v24 = vld [vmem:[#allocation14 + $0x50] sm:$0xff]  }
 0x3de   :  { %v5485_v39 = vpack.c.bf16 %v5421_v55, %v5413_v33  ;;  %8595 = vmatpush1.bf16.msra.mxu0 %v11452_v23 }
 0x3df   :  { %8596 = vmatprep.subr.bf16.mxu0 %v11457_v30  ;;  %v11472_v30 = vld [vmem:[#allocation11 + $0x134] ss:$8 sps:$4 sm:$0xff]  }
 0x3e0   :  { %7485 = vmatprep.mubr.bf16.mxu0 %v5485_v39 }
 0x3e1   :  { %7486 = vmatmul.mubr.bf16.gmra.mrb[92].mxu0 %v5484_v37 }
 0x3e2   :  { %8597 = vmatpush1.bf16.msra.mxu0 %v11455_v20 }
 0x3e3   :  { %7898 = vmatmul.mubr.bf16.gmra.mrb[108].mxu1 %v13006_v12  ;;  %v11460_v12 = vld [vmem:[#allocation11 + $0xf4] ss:$8 sps:$4 sm:$0xff]  }
 0x3e4   :  { %7907 = vmatprep.mubr.bf16.mxu1 %v13023_v5  ;;  %v11458_v5 = vld [vmem:[#allocation11 + $0xf0] ss:$8 sps:$4 sm:$0xff]   ;;  %8598 = vmatprep.subr.bf16.mxu0 %v11460_v12 }
 0x3e6   :  { %8599 = vmatpush1.bf16.msra.mxu0 %v11458_v5 }
 0x3eb   :  { %7908 = vmatmul.mubr.bf16.gmra.mrb[112].mxu1 %v13020_v46  ;;  %v11463_v46 = vld [vmem:[#allocation11 + $0x104] ss:$8 sps:$4 sm:$0xff]  }
 0x3ec   :  { %7917 = vmatprep.mubr.bf16.mxu1 %v13035_v7  ;;  %8681 = vmatprep.subr.bf16.mxu0 %v11463_v46  ;;  %v13092_v46 = vld [vmem:[#allocation14 + $0x10] sm:$0xff]  }
 0x3f3   :  { %7918 = vmatmul.mubr.bf16.gmra.mrb[116].mxu1 %v13032_v29 }
 0x3f4   :  { %7927 = vmatprep.mubr.bf16.mxu1 %v5477_v50  ;;  %v13078_v50 = vld [vmem:[#allocation14 + $0x48] sm:$0xff]  }
 0x3fb   :  { %7928 = vmatmul.mubr.bf16.gmra.mrb[120].mxu1 %v5476_v17  ;;  %v13074_v17 = vld [vmem:[#allocation14] sm:$0xff]  }
 0x3fc   :  { %7937 = vmatprep.mubr.bf16.mxu1 %v5485_v39  ;;  %10088 = vmatpush3.bf16.msra.mxu1 %v13074_v17  ;;  %v11467_v39 = vld [vmem:[#allocation11 + $0x120] ss:$8 sps:$4 sm:$0xff]  }
 0x3fd   :  { %10081 = vmatprep.subr.bf16.mxu1 %v13078_v50 }
 0x400   :  { %10089 = vmatpush3.bf16.msra.mxu1 %v13083_v25 }
 0x401   :  { %10082 = vmatprep.subr.bf16.mxu1 %v13085_v24 }
 0x403   :  { %7938 = vmatmul.mubr.bf16.gmra.mrb[124].mxu1 %v5484_v37 }
 0x404   :  { %10090 = vmatpush3.bf16.msra.mxu1 %v13092_v46 }
 0x47c   :  { %v7417_v15 = vpop.f32.mrb[64].mxu0 }
 0x47d   :  { %v10256_v2 = vadd.f32 %v7417_v15, %v13059_v51  ;;  %v7419_v28 = vpop.f32.mrb[65].mxu0 }
 0x47e   :  { %v10257_v62 = vadd.f32 %v7419_v28, %v13063_v54  ;;  %v7421_v22 = vpop.f32.mrb[66].mxu0  ;;  %v13095_v28 = vld [vmem:[#allocation14 + $0x58] sm:$0xff]  }
 0x47f   :  { %v8012_v44 = vmul.f32 0.2, %v10256_v2  ;;  %v10258_v47 = vadd.f32 %v7421_v22, %v13059_v51  ;;  %v7423_v29 = vpop.f32.mrb[67].mxu0  ;;  %vm7948_vm0 = vcmp.gt.f32.partialorder %v10256_v2, 0.0  ;;  %v11470_v22 = vld [vmem:[#allocation11 + $0x130] ss:$8 sps:$4 sm:$0xff]   ;;  %10083 = vmatprep.subr.bf16.mxu1 %v13095_v28 }
 0x480   :  { %v8013_v61 = vmul.f32 0.2, %v10257_v62  ;;  %v10259_v18 = vadd.f32 %v7423_v29, %v13063_v54  ;;  %vm7949_vm1 = vcmp.gt.f32.partialorder %v10257_v62, 0.0 }
 0x481   :  { %vm7952_vm2 = vcmp.gt.f32.partialorder %v10258_v47, 0.0  ;;  %v8016_v7 = vmul.f32 0.2, %v10258_v47  ;;  %v8076_v60 = vsel %vm7948_vm0, %v10256_v2, %v8012_v44 }
 0x482   :  { %vm7953_vm3 = vcmp.gt.f32.partialorder %v10259_v18, 0.0  ;;  %v8017_v31 = vmul.f32 0.2, %v10259_v18  ;;  %v8077_v3 = vsel %vm7949_vm1, %v10257_v62, %v8013_v61 }
 0x483   :  { %v8080_v59 = vsel %vm7952_vm2, %v10258_v47, %v8016_v7  ;;  %v11475_v47 = vld [vmem:[#allocation11 + $0x144] ss:$8 sps:$4 sm:$0xff]  }
 0x484   :  { %v8140_v6 = vpack.c.bf16 %v8080_v59, %v8076_v60  ;;  %v7427_v63 = vpop.f32.mrb[68].mxu0  ;;  %v8081_v48 = vsel %vm7953_vm3, %v10259_v18, %v8017_v31  ;;  %v13100_v18 = vld [vmem:[#allocation14 + $0x18] sm:$0xff]  }
 0x485   :  { %v10260_v14 = vadd.f32 %v7427_v63, %v13059_v51  ;;  %v7429_v9 = vpop.f32.mrb[69].mxu0  ;;  %v8141_v11 = vpack.c.bf16 %v8081_v48, %v8077_v3  ;;  %10091 = vmatpush3.bf16.msra.mxu1 %v13100_v18 }
 0x486   :  { %v10261_v58 = vadd.f32 %v7429_v9, %v13063_v54  ;;  %v7431_v1 = vpop.f32.mrb[70].mxu0 }
 0x487   :  { %v8020_v16 = vmul.f32 0.2, %v10260_v14  ;;  %v10262_v34 = vadd.f32 %v7431_v1, %v13059_v51  ;;  %v7433_v27 = vpop.f32.mrb[71].mxu0  ;;  %8600 = vmatprep.mubr.bf16.mxu0 %v8141_v11  ;;  %vm7956_vm4 = vcmp.gt.f32.partialorder %v10260_v14, 0.0 }
 0x488   :  { %v8021_v43 = vmul.f32 0.2, %v10261_v58  ;;  %v10263_v56 = vadd.f32 %v7433_v27, %v13063_v54  ;;  %8601 = vmatmul.mubr.bf16.vlgmr.msra.gmra.mrb[96].mxu0 %v8140_v6  ;;  %vm7957_vm5 = vcmp.gt.f32.partialorder %v10261_v58, 0.0  ;;  %v13102_v6 = vld [vmem:[#allocation14 + $0x60] sm:$0xff]  }
 0x489   :  { %vm7960_vm6 = vcmp.gt.f32.partialorder %v10262_v34, 0.0  ;;  %v8024_v40 = vmul.f32 0.2, %v10262_v34  ;;  %8682 = vmatpush1.bf16.msra.mxu0 %v11461_v13  ;;  %v8084_v57 = vsel %vm7956_vm4, %v10260_v14, %v8020_v16  ;;  %v11473_v14 = vld [vmem:[#allocation11 + $0x140] ss:$8 sps:$4 sm:$0xff]   ;;  %10084 = vmatprep.subr.bf16.mxu1 %v13102_v6 }
 0x48a   :  { %vm7961_vm7 = vcmp.gt.f32.partialorder %v10263_v56, 0.0  ;;  %v8025_v32 = vmul.f32 0.2, %v10263_v56  ;;  %8683 = vmatprep.subr.bf16.mxu0 %v11466_v21  ;;  %v8085_v36 = vsel %vm7957_vm5, %v10261_v58, %v8021_v43  ;;  %v11478_v13 = vld [vmem:[#allocation11 + $0x154] ss:$8 sps:$4 sm:$0xff]   ;;  %v13109_v16 = vld [vmem:[#allocation14 + $0x20] sm:$0xff]  }
 0x48b   :  { %v8088_v19 = vsel %vm7960_vm6, %v10262_v34, %v8024_v40  ;;  %10092 = vmatpush3.bf16.msra.mxu1 %v13109_v16 }
 0x48c   :  { %v7437_v52 = vpop.f32.mrb[72].mxu0  ;;  %v8089_v35 = vsel %vm7961_vm7, %v10263_v56, %v8025_v32  ;;  %v8144_v26 = vpack.c.bf16 %v8088_v19, %v8084_v57  ;;  %v11476_v56 = vld [vmem:[#allocation11 + $0x150] ss:$8 sps:$4 sm:$0xff]   ;;  %v13116_v32 = vrot.slane %v13055_v45, %v672_v38 }
 0x48d   :  { %v10264_v33 = vadd.f32 %v7437_v52, %v13059_v51  ;;  %v7439_v55 = vpop.f32.mrb[73].mxu0  ;;  %8684 = vmatpush1.bf16.msra.mxu0 %v11464_v4  ;;  %v8145_v37 = vpack.c.bf16 %v8089_v35, %v8085_v36  ;;  %v11481_v4 = vld [vmem:[#allocation11 + $0x164] ss:$8 sps:$4 sm:$0xff]   ;;  %v13121_v52 = vrot.slane %v13055_v45, %v676_v0 }
 0x48e   :  { %v10265_v8 = vadd.f32 %v7439_v55, %v13063_v54  ;;  %v7441_v23 = vpop.f32.mrb[74].mxu0  ;;  %8685 = vmatprep.subr.bf16.mxu0 %v11469_v49 }
 0x48f   :  { %v8028_v20 = vmul.f32 0.2, %v10264_v33  ;;  %v10266_v12 = vadd.f32 %v7441_v23, %v13059_v51  ;;  %v7443_v5 = vpop.f32.mrb[75].mxu0  ;;  %8610 = vmatprep.mubr.bf16.mxu0 %v8145_v37  ;;  %vm7964_vm8 = vcmp.gt.f32.partialorder %v10264_v33, 0.0 }
 0x490   :  { %v8029_v15 = vmul.f32 0.2, %v10265_v8  ;;  %v10267_v2 = vadd.f32 %v7443_v5, %v13063_v54  ;;  %8611 = vmatmul.mubr.bf16.gmra.mrb[100].mxu0 %v8144_v26  ;;  %vm7965_vm9 = vcmp.gt.f32.partialorder %v10265_v8, 0.0 }
 0x491   :  { %vm7968_vm10 = vcmp.gt.f32.partialorder %v10266_v12, 0.0  ;;  %v8032_v62 = vmul.f32 0.2, %v10266_v12  ;;  %8686 = vmatpush1.bf16.msra.mxu0 %v11467_v39  ;;  %v8092_v29 = vsel %vm7964_vm8, %v10264_v33, %v8028_v20  ;;  %v11479_v39 = vld [vmem:[#allocation11 + $0x160] ss:$8 sps:$4 sm:$0xff]  }
 0x492   :  { %vm7969_vm11 = vcmp.gt.f32.partialorder %v10267_v2, 0.0  ;;  %v8033_v44 = vmul.f32 0.2, %v10267_v2  ;;  %8687 = vmatprep.subr.bf16.mxu0 %v11472_v30  ;;  %v8093_v31 = vsel %vm7965_vm9, %v10265_v8, %v8029_v15  ;;  %v11484_v30 = vld [vmem:[#allocation11 + $0x174] ss:$8 sps:$4 sm:$0xff]  }
 0x493   :  { %v8096_v61 = vsel %vm7968_vm10, %v10266_v12, %v8032_v62 }
 0x494   :  { %v7447_v7 = vpop.f32.mrb[76].mxu0  ;;  %v8097_v60 = vsel %vm7969_vm11, %v10267_v2, %v8033_v44  ;;  %v8148_v59 = vpack.c.bf16 %v8096_v61, %v8092_v29 }
 0x495   :  { %v10268_v63 = vadd.f32 %v7447_v7, %v13059_v51  ;;  %v7449_v3 = vpop.f32.mrb[77].mxu0  ;;  %8688 = vmatpush1.bf16.msra.mxu0 %v11470_v22  ;;  %v8149_v48 = vpack.c.bf16 %v8097_v60, %v8093_v31  ;;  %v11482_v22 = vld [vmem:[#allocation11 + $0x170] ss:$8 sps:$4 sm:$0xff]  }
 0x496   :  { %v10269_v9 = vadd.f32 %v7449_v3, %v13063_v54  ;;  %v7451_v11 = vpop.f32.mrb[78].mxu0  ;;  %8689 = vmatprep.subr.bf16.mxu0 %v11475_v47  ;;  %v11487_v47 = vld [vmem:[#allocation11 + $0x184] ss:$8 sps:$4 sm:$0xff]  }
 0x497   :  { %v8036_v58 = vmul.f32 0.2, %v10268_v63  ;;  %v10270_v1 = vadd.f32 %v7451_v11, %v13059_v51  ;;  %v7453_v21 = vpop.f32.mrb[79].mxu0  ;;  %8620 = vmatprep.mubr.bf16.mxu0 %v8149_v48  ;;  %vm7972_vm12 = vcmp.gt.f32.partialorder %v10268_v63, 0.0 }
 0x498   :  { %v8037_v34 = vmul.f32 0.2, %v10269_v9  ;;  %v10271_v27 = vadd.f32 %v7453_v21, %v13063_v54  ;;  %8621 = vmatmul.mubr.bf16.gmra.mrb[104].mxu0 %v8148_v59  ;;  %vm7973_vm13 = vcmp.gt.f32.partialorder %v10269_v9, 0.0  ;;  %v11485_v21 = vld [vmem:[#allocation11 + $0x180] ss:$8 sps:$4 sm:$0xff]  }
 0x499   :  { %vm7976_vm14 = vcmp.gt.f32.partialorder %v10270_v1, 0.0  ;;  %v8040_v43 = vmul.f32 0.2, %v10270_v1  ;;  %8690 = vmatpush1.bf16.msra.mxu0 %v11473_v14  ;;  %v8100_v49 = vsel %vm7972_vm12, %v10268_v63, %v8036_v58 }
 0x49a   :  { %vm7977_vm15 = vcmp.gt.f32.partialorder %v10271_v27, 0.0  ;;  %v8041_v40 = vmul.f32 0.2, %v10271_v27  ;;  %8691 = vmatprep.subr.bf16.mxu0 %v11478_v13  ;;  %v8101_v36 = vsel %vm7973_vm13, %v10269_v9, %v8037_v34 }
 0x49b   :  { %v8104_v57 = vsel %vm7976_vm14, %v10270_v1, %v8040_v43 }
 0x49c   :  { %v7457_v19 = vpop.f32.mrb[80].mxu0  ;;  %v8105_v35 = vsel %vm7977_vm15, %v10271_v27, %v8041_v40  ;;  %v8152_v26 = vpack.c.bf16 %v8104_v57, %v8100_v49  ;;  %v11490_v40 = vld [vmem:[#allocation11 + $0x194] ss:$8 sps:$4 sm:$0xff]  }
 0x49d   :  { %v10272_v33 = vadd.f32 %v7457_v19, %v13059_v51  ;;  %v7459_v55 = vpop.f32.mrb[81].mxu0  ;;  %8692 = vmatpush1.bf16.msra.mxu0 %v11476_v56  ;;  %v8153_v37 = vpack.c.bf16 %v8105_v35, %v8101_v36  ;;  %v11488_v35 = vld [vmem:[#allocation11 + $0x190] ss:$8 sps:$4 sm:$0xff]  }
 0x49e   :  { %v10273_v38 = vadd.f32 %v7459_v55, %v13063_v54  ;;  %v7869_v8 = vpop.f32.mrb[96].mxu1  ;;  %v7461_v23 = vpop.f32.mrb[82].mxu0  ;;  %8693 = vmatprep.subr.bf16.mxu0 %v11481_v4 }
 0x49f   :  { %v8044_v20 = vmul.f32 0.2, %v10272_v33  ;;  %v10288_v53 = vadd.f32 %v7869_v8, %v13116_v32  ;;  %v10274_v0 = vadd.f32 %v7461_v23, %v13059_v51  ;;  %v7871_v45 = vpop.f32.mrb[97].mxu1  ;;  %v7463_v12 = vpop.f32.mrb[83].mxu0  ;;  %8630 = vmatprep.mubr.bf16.mxu0 %v8153_v37  ;;  %vm7980_vm1 = vcmp.gt.f32.partialorder %v10272_v33, 0.0 }
 0x4a0   :  { %vm7981_vm0 = vcmp.gt.f32.partialorder %v10273_v38, 0.0  ;;  %v8045_v5 = vmul.f32 0.2, %v10273_v38  ;;  %v10289_v15 = vadd.f32 %v7871_v45, %v13121_v52  ;;  %v10275_v2 = vadd.f32 %v7463_v12, %v13063_v54  ;;  %v7873_v62 = vpop.f32.mrb[98].mxu1  ;;  %8631 = vmatmul.mubr.bf16.gmra.mrb[108].mxu0 %v8152_v26 }
 0x4a1   :  { %vm7984_vm2 = vcmp.gt.f32.partialorder %v10274_v0, 0.0  ;;  %v8048_v44 = vmul.f32 0.2, %v10274_v0  ;;  %8694 = vmatpush1.bf16.msra.mxu0 %v11479_v39  ;;  %vm7950_vm3 = vcmp.gt.f32.partialorder %v10288_v53, 0.0  ;;  %v8014_v29 = vmul.f32 0.2, %v10288_v53 }
 0x4a2   :  { %vm7985_vm4 = vcmp.gt.f32.partialorder %v10275_v2, 0.0  ;;  %v8049_v61 = vmul.f32 0.2, %v10275_v2  ;;  %8695 = vmatprep.subr.bf16.mxu0 %v11484_v30  ;;  %vm7951_vm5 = vcmp.gt.f32.partialorder %v10289_v15, 0.0  ;;  %v8015_v7 = vmul.f32 0.2, %v10289_v15 }
 0x4a3   :  { %v10290_v31 = vadd.f32 %v7873_v62, %v13116_v32  ;;  %v7875_v60 = vpop.f32.mrb[99].mxu1  ;;  %v8109_v59 = vsel %vm7981_vm0, %v10273_v38, %v8045_v5  ;;  %v8108_v14 = vsel %vm7980_vm1, %v10272_v33, %v8044_v20  ;;  %v8112_v9 = vsel %vm7984_vm2, %v10274_v0, %v8048_v44  ;;  %v11493_v39 = vld [vmem:[#allocation11 + $0x1a4] ss:$8 sps:$4 sm:$0xff]  }
 0x4a4   :  { %v13132_v63 = vadd.f32 %v7875_v60, %v13121_v52  ;;  %v7467_v3 = vpop.f32.mrb[84].mxu0  ;;  %v8113_v48 = vsel %vm7985_vm4, %v10275_v2, %v8049_v61  ;;  %v8156_v56 = vpack.c.bf16 %v8112_v9, %v8108_v14  ;;  %v13139_v4 = vsel %vm7950_vm3, %v10288_v53, %v8014_v29 }
 0x4a5   :  { %vm7954_vm6 = vcmp.gt.f32.partialorder %v10290_v31, 0.0  ;;  %v8018_v11 = vmul.f32 0.2, %v10290_v31  ;;  %v10276_v13 = vadd.f32 %v7467_v3, %v13059_v51  ;;  %v7469_v58 = vpop.f32.mrb[85].mxu0  ;;  %8696 = vmatpush1.bf16.msra.mxu0 %v11482_v22  ;;  %v8157_v1 = vpack.c.bf16 %v8113_v48, %v8109_v59  ;;  %v11491_v3 = vld [vmem:[#allocation11 + $0x1a0] ss:$8 sps:$4 sm:$0xff]  }
 0x4a6   :  { %v10277_v34 = vadd.f32 %v7469_v58, %v13063_v54  ;;  %v7879_v27 = vpop.f32.mrb[100].mxu1  ;;  %v7471_v43 = vpop.f32.mrb[86].mxu0  ;;  %8697 = vmatprep.subr.bf16.mxu0 %v11487_v47  ;;  %v8019_v33 = vmul.f32 0.2, %v13132_v63  ;;  %v13151_v38 = vsel %vm7951_vm5, %v10289_v15, %v8015_v7  ;;  %vm7955_vm10 = vcmp.gt.f32.partialorder %v13132_v63, 0.0 }
 0x4a7   :  { %v13141_v49 = vsel %vm7954_vm6, %v10290_v31, %v8018_v11  ;;  %v13144_v57 = vadd.f32 %v7879_v27, %v13116_v32  ;;  %v7881_v19 = vpop.f32.mrb[101].mxu1  ;;  %v7473_v36 = vpop.f32.mrb[87].mxu0  ;;  %8640 = vmatprep.mubr.bf16.mxu0 %v8157_v1  ;;  %v10278_v55 = vadd.f32 %v7471_v43, %v13059_v51  ;;  %v8052_v8 = vmul.f32 0.2, %v10276_v13  ;;  %v11496_v58 = vld [vmem:[#allocation11 + $0x1b4] ss:$8 sps:$4 sm:$0xff]  }
 0x4a8   :  { %v8142_v26 = vpack.c.bf16 %v13141_v49, %v13139_v4  ;;  %v7883_v37 = vpop.f32.mrb[102].mxu1  ;;  %8641 = vmatmul.mubr.bf16.gmra.mrb[112].mxu0 %v8156_v56  ;;  %v8053_v23 = vmul.f32 0.2, %v10277_v34  ;;  %v10293_v30 = vadd.f32 %v7881_v19, %v13121_v52  ;;  %v10279_v20 = vadd.f32 %v7473_v36, %v13063_v54 }
 0x4a9   :  { %v7885_v53 = vpop.f32.mrb[103].mxu1  ;;  %8698 = vmatpush1.bf16.msra.mxu0 %v11485_v21  ;;  %vm7988_vm7 = vcmp.gt.f32.partialorder %v10276_v13, 0.0  ;;  %vm7989_vm8 = vcmp.gt.f32.partialorder %v10277_v34, 0.0  ;;  %vm7992_vm9 = vcmp.gt.f32.partialorder %v10278_v55, 0.0  ;;  %v8056_v0 = vmul.f32 0.2, %v10278_v55 }
 0x4aa   :  { %8699 = vmatprep.subr.bf16.mxu0 %v11490_v40  ;;  %vm7958_vm11 = vcmp.gt.f32.partialorder %v13144_v57, 0.0  ;;  %vm7993_vm12 = vcmp.gt.f32.partialorder %v10279_v20, 0.0  ;;  %v8057_v45 = vmul.f32 0.2, %v10279_v20  ;;  %v13158_v12 = vmul.f32 0.2, %v13144_v57 }
 0x4ab   :  { %v8023_v5 = vmul.f32 0.2, %v10293_v30  ;;  %v13161_v15 = vadd.f32 %v7883_v37, %v13116_v32  ;;  %v10295_v2 = vadd.f32 %v7885_v53, %v13121_v52  ;;  %v8117_v22 = vsel %vm7989_vm8, %v10277_v34, %v8053_v23  ;;  %v11494_v40 = vld [vmem:[#allocation11 + $0x1b0] ss:$8 sps:$4 sm:$0xff]  }
 0x4ac   :  { %v7477_v62 = vpop.f32.mrb[88].mxu0  ;;  %v8121_v44 = vsel %vm7993_vm12, %v10279_v20, %v8057_v45  ;;  %v8116_v47 = vsel %vm7988_vm7, %v10276_v13, %v8052_v8  ;;  %v8120_v29 = vsel %vm7992_vm9, %v10278_v55, %v8056_v0  ;;  %v13170_v48 = vsel %vm7955_vm10, %v13132_v63, %v8019_v33  ;;  %v11499_v33 = vld [vmem:[#allocation11 + $0x1c4] ss:$8 sps:$4 sm:$0xff]  }
 0x4ad   :  { %8700 = vmatpush1.bf16.msra.mxu0 %v11488_v35  ;;  %v10280_v61 = vadd.f32 %v7477_v62, %v13059_v51  ;;  %v7479_v7 = vpop.f32.mrb[89].mxu0  ;;  %v8161_v60 = vpack.c.bf16 %v8121_v44, %v8117_v22  ;;  %v8160_v59 = vpack.c.bf16 %v8120_v29, %v8116_v47  ;;  %vm7959_vm13 = vcmp.gt.f32.partialorder %v10293_v30, 0.0  ;;  %v11497_v44 = vld [vmem:[#allocation11 + $0x1c0] ss:$8 sps:$4 sm:$0xff]  }
 0x4ae   :  { %v7889_v31 = vpop.f32.mrb[104].mxu1  ;;  %8701 = vmatprep.subr.bf16.mxu0 %v11493_v39  ;;  %v10281_v14 = vadd.f32 %v7479_v7, %v13063_v54  ;;  %v7481_v11 = vpop.f32.mrb[90].mxu0  ;;  %v8143_v1 = vpack.c.bf16 %v13170_v48, %v13151_v38  ;;  %v13179_v21 = vmul.f32 0.2, %v13161_v15  ;;  %v8027_v34 = vmul.f32 0.2, %v10295_v2 }
 0x4af   :  { %v13174_v9 = vadd.f32 %v7889_v31, %v13116_v32  ;;  %v7891_v13 = vpop.f32.mrb[105].mxu1  ;;  %v10282_v27 = vadd.f32 %v7481_v11, %v13059_v51  ;;  %v7483_v43 = vpop.f32.mrb[91].mxu0  ;;  %8650 = vmatprep.mubr.bf16.mxu0 %v8161_v60  ;;  %vm7962_vm14 = vcmp.gt.f32.partialorder %v13161_v15, 0.0  ;;  %vm7963_vm15 = vcmp.gt.f32.partialorder %v10295_v2, 0.0 }
 0x4b0   :  { %v13183_v63 = vadd.f32 %v7891_v13, %v13121_v52  ;;  %v7893_v56 = vpop.f32.mrb[106].mxu1  ;;  %v8060_v19 = vmul.f32 0.2, %v10280_v61  ;;  %vm7997_vm0 = vcmp.gt.f32.partialorder %v10281_v14, 0.0  ;;  %v8061_v36 = vmul.f32 0.2, %v10281_v14  ;;  %8651 = vmatmul.mubr.bf16.gmra.mrb[116].mxu0 %v8160_v59 }
 0x4b1   :  { %vm7996_vm1 = vcmp.gt.f32.partialorder %v10280_v61, 0.0  ;;  %vm8000_vm2 = vcmp.gt.f32.partialorder %v10282_v27, 0.0  ;;  %v8064_v35 = vmul.f32 0.2, %v10282_v27  ;;  %8702 = vmatpush1.bf16.msra.mxu0 %v11491_v3  ;;  %v13187_v55 = vsel %vm7959_vm13, %v10293_v30, %v8023_v5  ;;  %v7895_v20 = vpop.f32.mrb[107].mxu1 }
 0x4b2   :  { %v13190_v37 = vmul.f32 0.2, %v13174_v9  ;;  %v13193_v39 = vmul.f32 0.2, %v13183_v63  ;;  %v10283_v8 = vadd.f32 %v7483_v43, %v13063_v54  ;;  %v13197_v23 = vadd.f32 %v7893_v56, %v13116_v32  ;;  %8703 = vmatprep.subr.bf16.mxu0 %v11496_v58 }
 0x4b3   :  { %vm7967_vm3 = vcmp.gt.f32.partialorder %v13183_v63, 0.0  ;;  %v13201_v53 = vadd.f32 %v7895_v20, %v13121_v52  ;;  %v8125_v0 = vsel %vm7997_vm0, %v10281_v14, %v8061_v36  ;;  %v8128_v45 = vsel %vm8000_vm2, %v10282_v27, %v8064_v35  ;;  %v11502_v14 = vld [vmem:[#allocation11 + $0x1d4] ss:$8 sps:$4 sm:$0xff]  }
 0x4b4   :  { %v7487_v30 = vpop.f32.mrb[92].mxu0  ;;  %v13205_v5 = vsel %vm7963_vm15, %v10295_v2, %v8027_v34  ;;  %vm7966_vm4 = vcmp.gt.f32.partialorder %v13174_v9, 0.0  ;;  %vm8001_vm5 = vcmp.gt.f32.partialorder %v10283_v8, 0.0  ;;  %v8065_v62 = vmul.f32 0.2, %v10283_v8 }
 0x4b5   :  { %v8124_v22 = vsel %vm7996_vm1, %v10280_v61, %v8060_v19  ;;  %v13213_v47 = vsel %vm7958_vm11, %v13144_v57, %v13158_v12  ;;  %vm7970_vm6 = vcmp.gt.f32.partialorder %v13197_v23, 0.0  ;;  %v13217_v29 = vmul.f32 0.2, %v13197_v23  ;;  %v7489_v7 = vpop.f32.mrb[93].mxu0  ;;  %8704 = vmatpush1.bf16.msra.mxu0 %v11494_v40 }
 0x4b6   :  { %vm7971_vm7 = vcmp.gt.f32.partialorder %v13201_v53, 0.0  ;;  %v10284_v2 = vadd.f32 %v7487_v30, %v13059_v51  ;;  %v7899_v31 = vpop.f32.mrb[108].mxu1  ;;  %v8164_v61 = vpack.c.bf16 %v8128_v45, %v8124_v22  ;;  %v8035_v60 = vmul.f32 0.2, %v13201_v53  ;;  %v7491_v12 = vpop.f32.mrb[94].mxu0  ;;  %8705 = vmatprep.subr.bf16.mxu0 %v11499_v33 }
 0x4b7   :  { %v10285_v59 = vadd.f32 %v7489_v7, %v13063_v54  ;;  %v13224_v57 = vadd.f32 %v7899_v31, %v13116_v32  ;;  %v7901_v3 = vpop.f32.mrb[109].mxu1  ;;  %v8147_v11 = vpack.c.bf16 %v13205_v5, %v13187_v55  ;;  %v10286_v58 = vadd.f32 %v7491_v12, %v13059_v51  ;;  %v7493_v27 = vpop.f32.mrb[95].mxu0  ;;  %v11500_v30 = vld [vmem:[#allocation11 + $0x1d0] ss:$8 sps:$4 sm:$0xff]   ;;  %v11505_v31 = vld [vmem:[#allocation11 + $0x1e4] ss:$8 sps:$4 sm:$0xff]  }
 0x4b8   :  { %v8068_v13 = vmul.f32 0.2, %v10284_v2  ;;  %v13230_v34 = vadd.f32 %v7901_v3, %v13121_v52  ;;  %v7903_v43 = vpop.f32.mrb[110].mxu1  ;;  %v8129_v56 = vsel %vm8001_vm5, %v10283_v8, %v8065_v62  ;;  %vm8004_vm8 = vcmp.gt.f32.partialorder %v10284_v2, 0.0 }
 0x4b9   :  { %vm8005_vm9 = vcmp.gt.f32.partialorder %v10285_v59, 0.0  ;;  %v8069_v40 = vmul.f32 0.2, %v10285_v59  ;;  %v13234_v19 = vmul.f32 0.2, %v13224_v57  ;;  %vm7974_vm10 = vcmp.gt.f32.partialorder %v13224_v57, 0.0  ;;  %8706 = vmatpush1.bf16.msra.mxu0 %v11497_v44 }
 0x4ba   :  { %vm8008_vm11 = vcmp.gt.f32.partialorder %v10286_v58, 0.0  ;;  %v8072_v36 = vmul.f32 0.2, %v10286_v58  ;;  %vm7975_vm12 = vcmp.gt.f32.partialorder %v13230_v34, 0.0  ;;  %v8039_v51 = vmul.f32 0.2, %v13230_v34  ;;  %8707 = vmatprep.subr.bf16.mxu0 %v11502_v14 }
 0x4bb   :  { %v10287_v35 = vadd.f32 %v7493_v27, %v13063_v54  ;;  %v10302_v33 = vadd.f32 %v7903_v43, %v13116_v32  ;;  %v8165_v8 = vpack.c.bf16 %v8129_v56, %v8125_v0  ;;  %v7905_v20 = vpop.f32.mrb[111].mxu1  ;;  %v8133_v45 = vsel %vm8005_vm9, %v10285_v59, %v8069_v40  ;;  %v11508_v40 = vld [vmem:[#allocation11 + $0x1f4] ss:$8 sps:$4 sm:$0xff]  }
 0x4bc   :  { %v10303_v62 = vadd.f32 %v7905_v20, %v13121_v52  ;;  %v8132_v22 = vsel %vm8004_vm8, %v10284_v2, %v8068_v13  ;;  %v8136_v7 = vsel %vm8008_vm11, %v10286_v58, %v8072_v36  ;;  %v13247_v44 = vsel %vm7962_vm14, %v13161_v15, %v13179_v21  ;;  %v11503_v15 = vld [vmem:[#allocation11 + $0x1e0] ss:$8 sps:$4 sm:$0xff]  }
 0x4bd   :  { %vm8009_vm13 = vcmp.gt.f32.partialorder %v10287_v35, 0.0  ;;  %v8073_v54 = vmul.f32 0.2, %v10287_v35  ;;  %vm7978_vm15 = vcmp.gt.f32.partialorder %v10302_v33, 0.0  ;;  %v8042_v0 = vmul.f32 0.2, %v10302_v33  ;;  %8660 = vmatprep.mubr.bf16.mxu0 %v8165_v8  ;;  %8708 = vmatpush1.bf16.msra.mxu0 %v11500_v30 }
 0x4be   :  { %vm7979_vm0 = vcmp.gt.f32.partialorder %v10303_v62, 0.0  ;;  %v8043_v12 = vmul.f32 0.2, %v10303_v62  ;;  %8661 = vmatmul.mubr.bf16.gmra.mrb[120].mxu0 %v8164_v61  ;;  %v7909_v59 = vpop.f32.mrb[112].mxu1  ;;  %v8168_v3 = vpack.c.bf16 %v8136_v7, %v8132_v22  ;;  %v8146_v2 = vpack.c.bf16 %v13247_v44, %v13213_v47  ;;  %8709 = vmatprep.subr.bf16.mxu0 %v11505_v31  ;;  %v11506_v30 = vld [vmem:[#allocation11 + $0x1f0] ss:$8 sps:$4 sm:$0xff]  }
 0x4bf   :  { %v10304_v14 = vadd.f32 %v7909_v59, %v13116_v32  ;;  %v7911_v13 = vpop.f32.mrb[113].mxu1  ;;  %v8137_v58 = vsel %vm8009_vm13, %v10287_v35, %v8073_v54  ;;  %v13256_v21 = vsel %vm7967_vm3, %v13183_v63, %v13193_v39  ;;  %v13261_v61 = vsel %vm7971_vm7, %v13201_v53, %v8035_v60 }
 0x4c0   :  { %v10305_v27 = vadd.f32 %v7911_v13, %v13121_v52  ;;  %v7913_v43 = vpop.f32.mrb[114].mxu1  ;;  %v8169_v56 = vpack.c.bf16 %v8137_v58, %v8133_v45  ;;  %v8151_v36 = vpack.c.bf16 %v13261_v61, %v13256_v21  ;;  %v13270_v63 = vsel %vm7966_vm4, %v13174_v9, %v13190_v37 }
 0x4c1   :  { %vm7982_vm14 = vcmp.gt.f32.partialorder %v10304_v14, 0.0  ;;  %v8046_v39 = vmul.f32 0.2, %v10304_v14  ;;  %v10306_v53 = vadd.f32 %v7913_v43, %v13116_v32  ;;  %v7915_v60 = vpop.f32.mrb[115].mxu1  ;;  %v13277_v35 = vsel %vm7970_vm6, %v13197_v23, %v13217_v29  ;;  %8710 = vmatpush1.bf16.msra.mxu0 %v11503_v15 }
 0x4c2   :  { %vm7983_vm1 = vcmp.gt.f32.partialorder %v10305_v27, 0.0  ;;  %v8047_v8 = vmul.f32 0.2, %v10305_v27  ;;  %8670 = vmatprep.mubr.bf16.mxu0 %v8169_v56  ;;  %v10307_v20 = vadd.f32 %v7915_v60, %v13121_v52  ;;  %v8150_v9 = vpack.c.bf16 %v13277_v35, %v13270_v63  ;;  %8711 = vmatprep.subr.bf16.mxu0 %v11508_v40  ;;  %v11522_v63 = vld [vmem:[#allocation14 + $0x30] sm:$0xff]   ;;  %v11523_v35 = vld [vmem:[#allocation14 + $0x78] sm:$0xff]  }
 0x4c3   :  { %vm7986_vm2 = vcmp.gt.f32.partialorder %v10306_v53, 0.0  ;;  %v8050_v37 = vmul.f32 0.2, %v10306_v53  ;;  %v13285_v45 = vsel %vm7975_vm12, %v13230_v34, %v8039_v51  ;;  %v13288_v23 = vsel %vm7979_vm0, %v10303_v62, %v8043_v12 }
 0x4c4   :  { %vm7987_vm3 = vcmp.gt.f32.partialorder %v10307_v20, 0.0  ;;  %v8051_v29 = vmul.f32 0.2, %v10307_v20  ;;  %v8155_v22 = vpack.c.bf16 %v13288_v23, %v13285_v45  ;;  %v13296_v7 = vsel %vm7974_vm10, %v13224_v57, %v13234_v19  ;;  %v8236_v45 = vld [vmem:[#allocation13] sm:$0x3] }
 0x4c5   :  { %v13299_v31 = vsel %vm7978_vm15, %v10302_v33, %v8042_v0  ;;  %v13302_v34 = vsel %vm7982_vm14, %v10304_v14, %v8046_v39  ;;  %v13304_v51 = vsel %vm7986_vm2, %v10306_v53, %v8050_v37  ;;  %v13309_v12 = vsel %vm7983_vm1, %v10305_v27, %v8047_v8  ;;  %8712 = vmatpush1.bf16.msra.mxu0 %v11506_v30 }
 0x4c6   :  { %8671 = vmatmul.mubr.bf16.gmra.mrb[124].mxu0 %v8168_v3  ;;  %v7919_v62 = vpop.f32.mrb[116].mxu1  ;;  %v8154_v54 = vpack.c.bf16 %v13299_v31, %v13296_v7  ;;  %v13311_v59 = vsel %vm7987_vm3, %v10307_v20, %v8051_v29  ;;  %v8158_v57 = vpack.c.bf16 %v13304_v51, %v13302_v34  ;;  %10016 = vmatprep.subr.bf16.mxu0 %v13071_v42 }
 0x4c7   :  { %8713 = vmatprep.mubr.bf16.mxu0 %v8143_v1  ;;  %v10308_v19 = vadd.f32 %v7919_v62, %v13116_v32  ;;  %v7921_v33 = vpop.f32.mrb[117].mxu1  ;;  %v8159_v0 = vpack.c.bf16 %v13311_v59, %v13309_v12  ;;  %v13382_v23 = vrot.slane %v8236_v45, %v13527_v41 }
 0x4c8   :  { %v10309_v3 = vadd.f32 %v7921_v33, %v13121_v52  ;;  %v7923_v14 = vpop.f32.mrb[118].mxu1 }
 0x4c9   :  { %v8054_v13 = vmul.f32 0.2, %v10308_v19  ;;  %v10310_v58 = vadd.f32 %v7923_v14, %v13116_v32  ;;  %v7925_v15 = vpop.f32.mrb[119].mxu1  ;;  %vm7990_vm4 = vcmp.gt.f32.partialorder %v10308_v19, 0.0 }
 0x4ca   :  { %v8055_v27 = vmul.f32 0.2, %v10309_v3  ;;  %v10311_v38 = vadd.f32 %v7925_v15, %v13121_v52  ;;  %vm7991_vm5 = vcmp.gt.f32.partialorder %v10309_v3, 0.0 }
 0x4cb   :  { %vm7994_vm6 = vcmp.gt.f32.partialorder %v10310_v58, 0.0  ;;  %v8058_v48 = vmul.f32 0.2, %v10310_v58  ;;  %v13325_v43 = vsel %vm7990_vm4, %v10308_v19, %v8054_v13 }
 0x4cc   :  { %vm7995_vm7 = vcmp.gt.f32.partialorder %v10311_v38, 0.0  ;;  %v8059_v1 = vmul.f32 0.2, %v10311_v38  ;;  %v13332_v40 = vsel %vm7991_vm5, %v10309_v3, %v8055_v27 }
 0x4cd   :  { %v13327_v56 = vsel %vm7994_vm6, %v10310_v58, %v8058_v48 }
 0x4ce   :  { %8714 = vmatmul.mubr.bf16.vlgmr.msra.gmra.mrb[96].mxu0 %v8142_v26  ;;  %v7929_v42 = vpop.f32.mrb[120].mxu1  ;;  %v13334_v39 = vsel %vm7995_vm7, %v10311_v38, %v8059_v1  ;;  %v8162_v53 = vpack.c.bf16 %v13327_v56, %v13325_v43 }
 0x4cf   :  { %8723 = vmatprep.mubr.bf16.mxu0 %v8147_v11  ;;  %v10312_v60 = vadd.f32 %v7929_v42, %v13116_v32  ;;  %v7931_v8 = vpop.f32.mrb[121].mxu1  ;;  %v8163_v20 = vpack.c.bf16 %v13334_v39, %v13332_v40  ;;  %10017 = vmatpush3.bf16.msra.mxu0 %v13074_v17 }
 0x4d0   :  { %v10313_v4 = vadd.f32 %v7931_v8, %v13121_v52  ;;  %v7933_v49 = vpop.f32.mrb[122].mxu1  ;;  %10018 = vmatprep.subr.bf16.mxu0 %v13078_v50 }
 0x4d1   :  { %v8062_v26 = vmul.f32 0.2, %v10312_v60  ;;  %v10314_v37 = vadd.f32 %v7933_v49, %v13116_v32  ;;  %v7935_v30 = vpop.f32.mrb[123].mxu1  ;;  %vm7998_vm8 = vcmp.gt.f32.partialorder %v10312_v60, 0.0 }
 0x4d2   :  { %v8063_v55 = vmul.f32 0.2, %v10313_v4  ;;  %v10315_v5 = vadd.f32 %v7935_v30, %v13121_v52  ;;  %vm7999_vm9 = vcmp.gt.f32.partialorder %v10313_v4, 0.0 }
 0x4d3   :  { %vm8002_vm10 = vcmp.gt.f32.partialorder %v10314_v37, 0.0  ;;  %v8066_v11 = vmul.f32 0.2, %v10314_v37  ;;  %10019 = vmatpush3.bf16.msra.mxu0 %v13083_v25  ;;  %v8126_v29 = vsel %vm7998_vm8, %v10312_v60, %v8062_v26 }
 0x4d4   :  { %vm8003_vm11 = vcmp.gt.f32.partialorder %v10315_v5, 0.0  ;;  %v8067_v17 = vmul.f32 0.2, %v10315_v5  ;;  %10020 = vmatprep.subr.bf16.mxu0 %v13085_v24  ;;  %v8127_v19 = vsel %vm7999_vm9, %v10313_v4, %v8063_v55 }
 0x4d5   :  { %v8130_v62 = vsel %vm8002_vm10, %v10314_v37, %v8066_v11 }
 0x4d6   :  { %8724 = vmatmul.mubr.bf16.gmra.mrb[100].mxu0 %v8146_v2  ;;  %v7939_v50 = vpop.f32.mrb[124].mxu1  ;;  %v8131_v33 = vsel %vm8003_vm11, %v10315_v5, %v8067_v17  ;;  %v8166_v3 = vpack.c.bf16 %v8130_v62, %v8126_v29 }
 0x4d7   :  { %8733 = vmatprep.mubr.bf16.mxu0 %v8151_v36  ;;  %v10316_v25 = vadd.f32 %v7939_v50, %v13116_v32  ;;  %v7941_v14 = vpop.f32.mrb[125].mxu1  ;;  %v8167_v13 = vpack.c.bf16 %v8131_v33, %v8127_v19  ;;  %10021 = vmatpush3.bf16.msra.mxu0 %v13092_v46 }
 0x4d8   :  { %v10317_v24 = vadd.f32 %v7941_v14, %v13121_v52  ;;  %v7943_v58 = vpop.f32.mrb[126].mxu1  ;;  %10022 = vmatprep.subr.bf16.mxu0 %v13095_v28 }
 0x4d9   :  { %v8070_v47 = vmul.f32 0.2, %v10316_v25  ;;  %v10318_v44 = vadd.f32 %v7943_v58, %v13116_v32  ;;  %v7945_v2 = vpop.f32.mrb[127].mxu1  ;;  %vm8006_vm12 = vcmp.gt.f32.partialorder %v10316_v25, 0.0 }
 0x4da   :  { %v8071_v15 = vmul.f32 0.2, %v10317_v24  ;;  %v10319_v21 = vadd.f32 %v7945_v2, %v13121_v52  ;;  %vm8007_vm13 = vcmp.gt.f32.partialorder %v10317_v24, 0.0 }
 0x4db   :  { %vm8010_vm15 = vcmp.gt.f32.partialorder %v10318_v44, 0.0  ;;  %v8074_v61 = vmul.f32 0.2, %v10318_v44  ;;  %10023 = vmatpush3.bf16.msra.mxu0 %v13100_v18  ;;  %v8134_v36 = vsel %vm8006_vm12, %v10316_v25, %v8070_v47  ;;  %v11519_v18 = vld [vmem:[#allocation14 + $0x68] sm:$0xff]  }
 0x4dc   :  { %vm8011_vm0 = vcmp.gt.f32.partialorder %v10319_v21, 0.0  ;;  %v8075_v46 = vmul.f32 0.2, %v10319_v21  ;;  %10024 = vmatprep.subr.bf16.mxu0 %v13102_v6  ;;  %v8135_v28 = vsel %vm8007_vm13, %v10317_v24, %v8071_v15  ;;  %v11520_v6 = vld [vmem:[#allocation14 + $0x28] sm:$0xff]   ;;  %10085 = vmatprep.subr.bf16.mxu1 %v11519_v18 }
 0x4dd   :  { %v8138_v27 = vsel %vm8010_vm15, %v10318_v44, %v8074_v61  ;;  %10093 = vmatpush3.bf16.msra.mxu1 %v11520_v6 }
 0x4de   :  { %8734 = vmatmul.mubr.bf16.gmra.mrb[104].mxu0 %v8150_v9  ;;  %v8139_v32 = vsel %vm8011_vm0, %v10319_v21, %v8075_v46  ;;  %v8170_v38 = vpack.c.bf16 %v8138_v27, %v8134_v36  ;;  %v11524_v9 = vld [vmem:[#allocation14 + $0x38] sm:$0xff]  }
 0x4df   :  { %8743 = vmatprep.mubr.bf16.mxu0 %v8155_v22  ;;  %v8171_v52 = vpack.c.bf16 %v8139_v32, %v8135_v28  ;;  %10025 = vmatpush3.bf16.msra.mxu0 %v13109_v16  ;;  %v11521_v16 = vld [vmem:[#allocation14 + $0x70] sm:$0xff]   ;;  %v13385_v22 = vrot.slane %v8236_v45, %v13528_v10 }
 0x4e0   :  { %10026 = vmatprep.subr.bf16.mxu0 %v11519_v18  ;;  %10086 = vmatprep.subr.bf16.mxu1 %v11521_v16 }
 0x4e1   :  { %10094 = vmatpush3.bf16.msra.mxu1 %v11522_v63 }
 0x4e2   :  { %10087 = vmatprep.subr.bf16.mxu1 %v11523_v35 }
 0x4e3   :  { %10027 = vmatpush3.bf16.msra.mxu0 %v11520_v6 }
 0x4e4   :  { %10028 = vmatprep.subr.bf16.mxu0 %v11521_v16 }
 0x4e5   :  { %10095 = vmatpush3.bf16.msra.mxu1 %v11524_v9 }
 0x4e6   :  { %8744 = vmatmul.mubr.bf16.gmra.mrb[108].mxu0 %v8154_v54 }
 0x4e7   :  { %8753 = vmatprep.mubr.bf16.mxu0 %v8159_v0  ;;  %10029 = vmatpush3.bf16.msra.mxu0 %v11522_v63 }
 0x4e8   :  { %10030 = vmatprep.subr.bf16.mxu0 %v11523_v35 }
 0x4eb   :  { %10031 = vmatpush3.bf16.msra.mxu0 %v11524_v9 }
 0x4ee   :  { %8754 = vmatmul.mubr.bf16.gmra.mrb[112].mxu0 %v8158_v57 }
 0x4ef   :  { %8763 = vmatprep.mubr.bf16.mxu0 %v8163_v20 }
 0x4f6   :  { %8764 = vmatmul.mubr.bf16.gmra.mrb[116].mxu0 %v8162_v53 }
 0x4f7   :  { %8773 = vmatprep.mubr.bf16.mxu0 %v8167_v13 }
 0x4fe   :  { %8774 = vmatmul.mubr.bf16.gmra.mrb[120].mxu0 %v8166_v3 }
 0x4ff   :  { %8783 = vmatprep.mubr.bf16.mxu0 %v8171_v52 }
 0x506   :  { %8784 = vmatmul.mubr.bf16.gmra.mrb[124].mxu0 %v8170_v38 }
 0x5a1   :  { %v8715_v7 = vpop.f32.mrb[96].mxu0 }
 0x5a2   :  { %v10320_v31 = vadd.f32 %v8715_v7, %v13382_v23  ;;  %v8717_v34 = vpop.f32.mrb[97].mxu0 }
 0x5a3   :  { %v10321_v51 = vadd.f32 %v8717_v34, %v13385_v22  ;;  %v8719_v54 = vpop.f32.mrb[98].mxu0 }
 0x5a4   :  { %v8826_v12 = vmul.f32 0.2, %v10320_v31  ;;  %v10322_v59 = vadd.f32 %v8719_v54, %v13382_v23  ;;  %v8721_v57 = vpop.f32.mrb[99].mxu0  ;;  %vm8794_vm14 = vcmp.gt.f32.partialorder %v10320_v31, 0.0 }
 0x5a5   :  { %v8827_v0 = vmul.f32 0.2, %v10321_v51  ;;  %v10323_v48 = vadd.f32 %v8721_v57, %v13385_v22  ;;  %vm8795_vm1 = vcmp.gt.f32.partialorder %v10321_v51, 0.0 }
 0x5a6   :  { %vm8796_vm2 = vcmp.gt.f32.partialorder %v10322_v59, 0.0  ;;  %v8828_v41 = vmul.f32 0.2, %v10322_v59  ;;  %v8858_v1 = vsel %vm8794_vm14, %v10320_v31, %v8826_v12 }
 0x5a7   :  { %vm8797_vm3 = vcmp.gt.f32.partialorder %v10323_v48, 0.0  ;;  %v8829_v10 = vmul.f32 0.2, %v10323_v48  ;;  %v8859_v40 = vsel %vm8795_vm1, %v10321_v51, %v8827_v0 }
 0x5a8   :  { %v8860_v43 = vsel %vm8796_vm2, %v10322_v59, %v8828_v41 }
 0x5a9   :  { %v8890_v56 = vpack.c.bf16 %v8860_v43, %v8858_v1  ;;  %v8725_v42 = vpop.f32.mrb[100].mxu0  ;;  %v8861_v39 = vsel %vm8797_vm3, %v10323_v48, %v8829_v10 }
 0x5aa   :  { %v10324_v53 = vadd.f32 %v8725_v42, %v13382_v23  ;;  %v8727_v60 = vpop.f32.mrb[101].mxu0  ;;  %v8891_v8 = vpack.c.bf16 %v8861_v39, %v8859_v40 }
 0x5ab   :  { %v10325_v20 = vadd.f32 %v8727_v60, %v13385_v22  ;;  %v8729_v4 = vpop.f32.mrb[102].mxu0 }
 0x5ac   :  { %v8830_v49 = vmul.f32 0.2, %v10324_v53  ;;  %v10326_v26 = vadd.f32 %v8729_v4, %v13382_v23  ;;  %v8731_v37 = vpop.f32.mrb[103].mxu0  ;;  %9073 = vmatprep.mubr.bf16.mxu0 %v8891_v8  ;;  %vm8798_vm4 = vcmp.gt.f32.partialorder %v10324_v53, 0.0 }
 0x5ad   :  { %v8831_v30 = vmul.f32 0.2, %v10325_v20  ;;  %v10327_v55 = vadd.f32 %v8731_v37, %v13385_v22  ;;  %9074 = vmatmul.mubr.bf16.vlgmr.msra.gmra.mrb[128].mxu0 %v8890_v56  ;;  %vm8799_vm5 = vcmp.gt.f32.partialorder %v10325_v20, 0.0 }
 0x5ae   :  { %vm8800_vm6 = vcmp.gt.f32.partialorder %v10326_v26, 0.0  ;;  %v8832_v5 = vmul.f32 0.2, %v10326_v26  ;;  %v8862_v17 = vsel %vm8798_vm4, %v10324_v53, %v8830_v49 }
 0x5af   :  { %vm8801_vm7 = vcmp.gt.f32.partialorder %v10327_v55, 0.0  ;;  %v8833_v11 = vmul.f32 0.2, %v10327_v55  ;;  %v8863_v50 = vsel %vm8799_vm5, %v10325_v20, %v8831_v30 }
 0x5b0   :  { %v8864_v29 = vsel %vm8800_vm6, %v10326_v26, %v8832_v5 }
 0x5b1   :  { %v8735_v62 = vpop.f32.mrb[104].mxu0  ;;  %v8865_v19 = vsel %vm8801_vm7, %v10327_v55, %v8833_v11  ;;  %v8892_v33 = vpack.c.bf16 %v8864_v29, %v8862_v17 }
 0x5b2   :  { %v10328_v3 = vadd.f32 %v8735_v62, %v13382_v23  ;;  %v8737_v25 = vpop.f32.mrb[105].mxu0  ;;  %v8893_v14 = vpack.c.bf16 %v8865_v19, %v8863_v50 }
 0x5b3   :  { %v10329_v13 = vadd.f32 %v8737_v25, %v13385_v22  ;;  %v8739_v24 = vpop.f32.mrb[106].mxu0 }
 0x5b4   :  { %v8834_v58 = vmul.f32 0.2, %v10328_v3  ;;  %v10330_v47 = vadd.f32 %v8739_v24, %v13382_v23  ;;  %v8741_v44 = vpop.f32.mrb[107].mxu0  ;;  %9081 = vmatprep.mubr.bf16.mxu0 %v8893_v14  ;;  %vm8802_vm8 = vcmp.gt.f32.partialorder %v10328_v3, 0.0 }
 0x5b5   :  { %v8835_v2 = vmul.f32 0.2, %v10329_v13  ;;  %v10331_v15 = vadd.f32 %v8741_v44, %v13385_v22  ;;  %9082 = vmatmul.mubr.bf16.gmra.mrb[132].mxu0 %v8892_v33  ;;  %vm8803_vm9 = vcmp.gt.f32.partialorder %v10329_v13, 0.0 }
 0x5b6   :  { %vm8804_vm10 = vcmp.gt.f32.partialorder %v10330_v47, 0.0  ;;  %v8836_v21 = vmul.f32 0.2, %v10330_v47  ;;  %v8866_v46 = vsel %vm8802_vm8, %v10328_v3, %v8834_v58 }
 0x5b7   :  { %vm8805_vm11 = vcmp.gt.f32.partialorder %v10331_v15, 0.0  ;;  %v8837_v61 = vmul.f32 0.2, %v10331_v15  ;;  %v8867_v32 = vsel %vm8803_vm9, %v10329_v13, %v8835_v2 }
 0x5b8   :  { %v8868_v36 = vsel %vm8804_vm10, %v10330_v47, %v8836_v21 }
 0x5b9   :  { %v8894_v27 = vpack.c.bf16 %v8868_v36, %v8866_v46  ;;  %v8745_v28 = vpop.f32.mrb[108].mxu0  ;;  %v8869_v38 = vsel %vm8805_vm11, %v10331_v15, %v8837_v61 }
 0x5ba   :  { %v10332_v52 = vadd.f32 %v8745_v28, %v13382_v23  ;;  %v8747_v18 = vpop.f32.mrb[109].mxu0  ;;  %v8895_v6 = vpack.c.bf16 %v8869_v38, %v8867_v32 }
 0x5bb   :  { %v10333_v16 = vadd.f32 %v8747_v18, %v13385_v22  ;;  %v8749_v63 = vpop.f32.mrb[110].mxu0 }
 0x5bc   :  { %v8838_v35 = vmul.f32 0.2, %v10332_v52  ;;  %v10334_v9 = vadd.f32 %v8749_v63, %v13382_v23  ;;  %v8751_v45 = vpop.f32.mrb[111].mxu0  ;;  %9089 = vmatprep.mubr.bf16.mxu1 %v8895_v6  ;;  %vm8806_vm12 = vcmp.gt.f32.partialorder %v10332_v52, 0.0 }
 0x5bd   :  { %v8839_v7 = vmul.f32 0.2, %v10333_v16  ;;  %v10335_v31 = vadd.f32 %v8751_v45, %v13385_v22  ;;  %9090 = vmatmul.mubr.bf16.vlgmr.msra.gmra.mrb[128].mxu1 %v8894_v27  ;;  %vm8807_vm13 = vcmp.gt.f32.partialorder %v10333_v16, 0.0 }
 0x5be   :  { %vm8808_vm15 = vcmp.gt.f32.partialorder %v10334_v9, 0.0  ;;  %v8840_v34 = vmul.f32 0.2, %v10334_v9  ;;  %v8870_v54 = vsel %vm8806_vm12, %v10332_v52, %v8838_v35 }
 0x5bf   :  { %vm8809_vm0 = vcmp.gt.f32.partialorder %v10335_v31, 0.0  ;;  %v8841_v51 = vmul.f32 0.2, %v10335_v31  ;;  %v8871_v57 = vsel %vm8807_vm13, %v10333_v16, %v8839_v7 }
 0x5c0   :  { %v8872_v12 = vsel %vm8808_vm15, %v10334_v9, %v8840_v34 }
 0x5c1   :  { %v8755_v59 = vpop.f32.mrb[112].mxu0  ;;  %v8873_v0 = vsel %vm8809_vm0, %v10335_v31, %v8841_v51  ;;  %v8896_v48 = vpack.c.bf16 %v8872_v12, %v8870_v54 }
 0x5c2   :  { %v10336_v41 = vadd.f32 %v8755_v59, %v13382_v23  ;;  %v8757_v10 = vpop.f32.mrb[113].mxu0  ;;  %v8897_v1 = vpack.c.bf16 %v8873_v0, %v8871_v57 }
 0x5c3   :  { %v10337_v43 = vadd.f32 %v8757_v10, %v13385_v22  ;;  %v8759_v56 = vpop.f32.mrb[114].mxu0 }
 0x5c4   :  { %v8842_v42 = vmul.f32 0.2, %v10336_v41  ;;  %v10338_v40 = vadd.f32 %v8759_v56, %v13382_v23  ;;  %v8761_v39 = vpop.f32.mrb[115].mxu0  ;;  %9097 = vmatprep.mubr.bf16.mxu1 %v8897_v1  ;;  %vm8810_vm14 = vcmp.gt.f32.partialorder %v10336_v41, 0.0 }
 0x5c5   :  { %v8843_v53 = vmul.f32 0.2, %v10337_v43  ;;  %v10339_v60 = vadd.f32 %v8761_v39, %v13385_v22  ;;  %9098 = vmatmul.mubr.bf16.gmra.mrb[132].mxu1 %v8896_v48  ;;  %vm8811_vm1 = vcmp.gt.f32.partialorder %v10337_v43, 0.0 }
 0x5c6   :  { %vm8812_vm2 = vcmp.gt.f32.partialorder %v10338_v40, 0.0  ;;  %v8844_v8 = vmul.f32 0.2, %v10338_v40  ;;  %v8874_v4 = vsel %vm8810_vm14, %v10336_v41, %v8842_v42 }
 0x5c7   :  { %vm8813_vm3 = vcmp.gt.f32.partialorder %v10339_v60, 0.0  ;;  %v8845_v20 = vmul.f32 0.2, %v10339_v60  ;;  %v8875_v37 = vsel %vm8811_vm1, %v10337_v43, %v8843_v53 }
 0x5c8   :  { %v8876_v49 = vsel %vm8812_vm2, %v10338_v40, %v8844_v8  ;;  %v13419_v8 = vld [vmem:[#allocation16] ss:$0 sm:$0xff] }
 0x5c9   :  { %v8765_v26 = vpop.f32.mrb[116].mxu0  ;;  %v8877_v30 = vsel %vm8813_vm3, %v10339_v60, %v8845_v20  ;;  %v8898_v55 = vpack.c.bf16 %v8876_v49, %v8874_v4 }
 0x5ca   :  { %v10340_v5 = vadd.f32 %v8765_v26, %v13382_v23  ;;  %v8767_v11 = vpop.f32.mrb[117].mxu0  ;;  %v8899_v17 = vpack.c.bf16 %v8877_v30, %v8875_v37 }
 0x5cb   :  { %v10341_v29 = vadd.f32 %v8767_v11, %v13385_v22  ;;  %v8769_v62 = vpop.f32.mrb[118].mxu0 }
 0x5cc   :  { %v8846_v50 = vmul.f32 0.2, %v10340_v5  ;;  %v10342_v19 = vadd.f32 %v8769_v62, %v13382_v23  ;;  %v8771_v33 = vpop.f32.mrb[119].mxu0  ;;  %9105 = vmatprep.mubr.bf16.mxu1 %v8899_v17  ;;  %vm8814_vm4 = vcmp.gt.f32.partialorder %v10340_v5, 0.0 }
 0x5cd   :  { %v8847_v3 = vmul.f32 0.2, %v10341_v29  ;;  %v10343_v25 = vadd.f32 %v8771_v33, %v13385_v22  ;;  %9106 = vmatmul.mubr.bf16.gmra.mrb[136].mxu1 %v8898_v55  ;;  %vm8815_vm5 = vcmp.gt.f32.partialorder %v10341_v29, 0.0 }
 0x5ce   :  { %vm8816_vm6 = vcmp.gt.f32.partialorder %v10342_v19, 0.0  ;;  %v8848_v14 = vmul.f32 0.2, %v10342_v19  ;;  %v8878_v24 = vsel %vm8814_vm4, %v10340_v5, %v8846_v50 }
 0x5cf   :  { %vm8817_vm7 = vcmp.gt.f32.partialorder %v10343_v25, 0.0  ;;  %v8849_v13 = vmul.f32 0.2, %v10343_v25  ;;  %v8879_v44 = vsel %vm8815_vm5, %v10341_v29, %v8847_v3 }
 0x5d0   :  { %v8880_v58 = vsel %vm8816_vm6, %v10342_v19, %v8848_v14 }
 0x5d1   :  { %v8775_v47 = vpop.f32.mrb[120].mxu0  ;;  %v8881_v2 = vsel %vm8817_vm7, %v10343_v25, %v8849_v13  ;;  %v8900_v15 = vpack.c.bf16 %v8880_v58, %v8878_v24 }
 0x5d2   :  { %v10344_v21 = vadd.f32 %v8775_v47, %v13382_v23  ;;  %v8777_v61 = vpop.f32.mrb[121].mxu0  ;;  %v8901_v46 = vpack.c.bf16 %v8881_v2, %v8879_v44 }
 0x5d3   :  { %v10345_v36 = vadd.f32 %v8777_v61, %v13385_v22  ;;  %v8779_v27 = vpop.f32.mrb[122].mxu0 }
 0x5d4   :  { %v8850_v28 = vmul.f32 0.2, %v10344_v21  ;;  %v10346_v32 = vadd.f32 %v8779_v27, %v13382_v23  ;;  %v8781_v38 = vpop.f32.mrb[123].mxu0  ;;  %9113 = vmatprep.mubr.bf16.mxu1 %v8901_v46  ;;  %vm8818_vm8 = vcmp.gt.f32.partialorder %v10344_v21, 0.0 }
 0x5d5   :  { %v8851_v52 = vmul.f32 0.2, %v10345_v36  ;;  %v10347_v18 = vadd.f32 %v8781_v38, %v13385_v22  ;;  %9114 = vmatmul.mubr.bf16.gmra.mrb[140].mxu1 %v8900_v15  ;;  %vm8819_vm9 = vcmp.gt.f32.partialorder %v10345_v36, 0.0 }
 0x5d6   :  { %vm8820_vm10 = vcmp.gt.f32.partialorder %v10346_v32, 0.0  ;;  %v8852_v6 = vmul.f32 0.2, %v10346_v32  ;;  %v8882_v63 = vsel %vm8818_vm8, %v10344_v21, %v8850_v28 }
 0x5d7   :  { %vm8821_vm11 = vcmp.gt.f32.partialorder %v10347_v18, 0.0  ;;  %v8853_v16 = vmul.f32 0.2, %v10347_v18  ;;  %v8883_v45 = vsel %vm8819_vm9, %v10345_v36, %v8851_v52 }
 0x5d8   :  { %v8884_v35 = vsel %vm8820_vm10, %v10346_v32, %v8852_v6 }
 0x5d9   :  { %v8785_v9 = vpop.f32.mrb[124].mxu0  ;;  %v8885_v7 = vsel %vm8821_vm11, %v10347_v18, %v8853_v16  ;;  %v8902_v31 = vpack.c.bf16 %v8884_v35, %v8882_v63 }
 0x5da   :  { %v10348_v34 = vadd.f32 %v8785_v9, %v13382_v23  ;;  %v8787_v51 = vpop.f32.mrb[125].mxu0  ;;  %v8903_v54 = vpack.c.bf16 %v8885_v7, %v8883_v45 }
 0x5db   :  { %v10349_v12 = vadd.f32 %v8787_v51, %v13385_v22  ;;  %v8789_v59 = vpop.f32.mrb[126].mxu0 }
 0x5dc   :  { %v8854_v57 = vmul.f32 0.2, %v10348_v34  ;;  %v10350_v0 = vadd.f32 %v8789_v59, %v13382_v23  ;;  %v8791_v48 = vpop.f32.mrb[127].mxu0  ;;  %9121 = vmatprep.mubr.bf16.mxu1 %v8903_v54  ;;  %vm8822_vm12 = vcmp.gt.f32.partialorder %v10348_v34, 0.0 }
 0x5dd   :  { %v8855_v41 = vmul.f32 0.2, %v10349_v12  ;;  %v10351_v10 = vadd.f32 %v8791_v48, %v13385_v22  ;;  %9122 = vmatmul.mubr.bf16.gmra.mrb[144].mxu1 %v8902_v31  ;;  %vm8823_vm13 = vcmp.gt.f32.partialorder %v10349_v12, 0.0 }
 0x5de   :  { %vm8824_vm15 = vcmp.gt.f32.partialorder %v10350_v0, 0.0  ;;  %v8856_v1 = vmul.f32 0.2, %v10350_v0  ;;  %v8886_v56 = vsel %vm8822_vm12, %v10348_v34, %v8854_v57 }
 0x5df   :  { %vm8825_vm0 = vcmp.gt.f32.partialorder %v10351_v10, 0.0  ;;  %v8857_v43 = vmul.f32 0.2, %v10351_v10  ;;  %v8887_v40 = vsel %vm8823_vm13, %v10349_v12, %v8855_v41 }
 0x5e0   :  { %v8888_v42 = vsel %vm8824_vm15, %v10350_v0, %v8856_v1 }
 0x5e1   :  { %v8889_v39 = vsel %vm8825_vm0, %v10351_v10, %v8857_v43  ;;  %v8904_v53 = vpack.c.bf16 %v8888_v42, %v8886_v56 }
 0x5e2   :  { %v8905_v60 = vpack.c.bf16 %v8889_v39, %v8887_v40 }
 0x5e4   :  { %9129 = vmatprep.mubr.bf16.mxu1 %v8905_v60 }
 0x5e5   :  { %9130 = vmatmul.mubr.bf16.gmra.mrb[148].mxu1 %v8904_v53 }
 0x680   :  { %v10032_v23 = vpop.f32.mrb[128].mxu0 }
 0x681   :  { %v10033_v20 = vpop.f32.mrb[129].mxu0 }
 0x682   :  { %v10034_v4 = vadd.f32 %v10033_v20, %v10032_v23  ;;  %v10035_v22 = vpop.f32.mrb[130].mxu0 }
 0x683   :  { %v10036_v49 = vpop.f32.mrb[131].mxu0 }
 0x684   :  { %v9076_v26 = vadd.f32 %v10034_v4, %v13419_v8  ;;  %v10037_v37 = vadd.f32 %v10036_v49, %v10035_v22 }
 0x686   :  { %9138 = vst [vmem:[#allocation17] sm:$0xff] %v9076_v26  ;;  %v9079_v30 = vadd.f32 %v10037_v37, %v13419_v8 }
 0x688   :  { %9139 = vst [vmem:[#allocation17 + $0x8] sm:$0xff] %v9079_v30  ;;  %v10038_v55 = vpop.f32.mrb[132].mxu0 }
 0x689   :  { %v10039_v5 = vpop.f32.mrb[133].mxu0 }
 0x68a   :  { %v10040_v11 = vadd.f32 %v10039_v5, %v10038_v55  ;;  %v10041_v17 = vpop.f32.mrb[134].mxu0 }
 0x68b   :  { %v10042_v29 = vpop.f32.mrb[135].mxu0 }
 0x68c   :  { %v9084_v62 = vadd.f32 %v10040_v11, %v13419_v8  ;;  %v10043_v50 = vadd.f32 %v10042_v29, %v10041_v17 }
 0x68e   :  { %9140 = vst [vmem:[#allocation17 + $0x10] sm:$0xff] %v9084_v62  ;;  %v9087_v19 = vadd.f32 %v10043_v50, %v13419_v8 }
 0x690   :  { %9141 = vst [vmem:[#allocation17 + $0x18] sm:$0xff] %v9087_v19  ;;  %v10044_v33 = vpop.f32.mrb[128].mxu1 }
 0x691   :  { %v10045_v3 = vpop.f32.mrb[129].mxu1 }
 0x692   :  { %v10046_v25 = vadd.f32 %v10045_v3, %v10044_v33  ;;  %v10047_v14 = vpop.f32.mrb[130].mxu1 }
 0x693   :  { %v10048_v13 = vpop.f32.mrb[131].mxu1 }
 0x694   :  { %v9092_v24 = vadd.f32 %v10046_v25, %v13419_v8  ;;  %v10049_v58 = vadd.f32 %v10048_v13, %v10047_v14 }
 0x696   :  { %9142 = vst [vmem:[#allocation17 + $0x20] sm:$0xff] %v9092_v24  ;;  %v9095_v47 = vadd.f32 %v10049_v58, %v13419_v8 }
 0x698   :  { %9143 = vst [vmem:[#allocation17 + $0x28] sm:$0xff] %v9095_v47  ;;  %v10050_v44 = vpop.f32.mrb[132].mxu1 }
 0x699   :  { %v10051_v2 = vpop.f32.mrb[133].mxu1 }
 0x69a   :  { %v10052_v15 = vadd.f32 %v10051_v2, %v10050_v44  ;;  %v10053_v21 = vpop.f32.mrb[134].mxu1 }
 0x69b   :  { %v10054_v61 = vpop.f32.mrb[135].mxu1 }
 0x69c   :  { %v9100_v46 = vadd.f32 %v10052_v15, %v13419_v8  ;;  %v10055_v36 = vadd.f32 %v10054_v61, %v10053_v21 }
 0x69e   :  { %9144 = vst [vmem:[#allocation17 + $0x30] sm:$0xff] %v9100_v46  ;;  %v9103_v27 = vadd.f32 %v10055_v36, %v13419_v8 }
 0x6a0   :  { %9145 = vst [vmem:[#allocation17 + $0x38] sm:$0xff] %v9103_v27  ;;  %v10056_v28 = vpop.f32.mrb[136].mxu1 }
 0x6a1   :  { %v10057_v32 = vpop.f32.mrb[137].mxu1 }
 0x6a2   :  { %v10058_v38 = vadd.f32 %v10057_v32, %v10056_v28  ;;  %v10059_v52 = vpop.f32.mrb[138].mxu1 }
 0x6a3   :  { %v10060_v18 = vpop.f32.mrb[139].mxu1 }
 0x6a4   :  { %v9108_v6 = vadd.f32 %v10058_v38, %v13419_v8  ;;  %v10061_v16 = vadd.f32 %v10060_v18, %v10059_v52 }
 0x6a6   :  { %9146 = vst [vmem:[#allocation17 + $0x40] sm:$0xff] %v9108_v6  ;;  %v9111_v63 = vadd.f32 %v10061_v16, %v13419_v8 }
 0x6a8   :  { %9147 = vst [vmem:[#allocation17 + $0x48] sm:$0xff] %v9111_v63  ;;  %v10062_v35 = vpop.f32.mrb[140].mxu1 }
 0x6a9   :  { %v10063_v9 = vpop.f32.mrb[141].mxu1 }
 0x6aa   :  { %v10064_v45 = vadd.f32 %v10063_v9, %v10062_v35  ;;  %v10065_v7 = vpop.f32.mrb[142].mxu1 }
 0x6ab   :  { %v10066_v31 = vpop.f32.mrb[143].mxu1 }
 0x6ac   :  { %v9116_v34 = vadd.f32 %v10064_v45, %v13419_v8  ;;  %v10067_v51 = vadd.f32 %v10066_v31, %v10065_v7 }
 0x6ae   :  { %9148 = vst [vmem:[#allocation17 + $0x50] sm:$0xff] %v9116_v34  ;;  %v9119_v54 = vadd.f32 %v10067_v51, %v13419_v8 }
 0x6b0   :  { %9149 = vst [vmem:[#allocation17 + $0x58] sm:$0xff] %v9119_v54  ;;  %v10068_v12 = vpop.f32.mrb[144].mxu1 }
 0x6b1   :  { %v10069_v59 = vpop.f32.mrb[145].mxu1 }
 0x6b2   :  { %v10070_v57 = vadd.f32 %v10069_v59, %v10068_v12  ;;  %v10071_v0 = vpop.f32.mrb[146].mxu1 }
 0x6b3   :  { %v10072_v48 = vpop.f32.mrb[147].mxu1 }
 0x6b4   :  { %v9124_v41 = vadd.f32 %v10070_v57, %v13419_v8  ;;  %v10073_v10 = vadd.f32 %v10072_v48, %v10071_v0 }
 0x6b6   :  { %9150 = vst [vmem:[#allocation17 + $0x60] sm:$0xff] %v9124_v41  ;;  %v9127_v1 = vadd.f32 %v10073_v10, %v13419_v8 }
 0x6b8   :  { %9151 = vst [vmem:[#allocation17 + $0x68] sm:$0xff] %v9127_v1  ;;  %v10074_v43 = vpop.f32.mrb[148].mxu1 }
 0x6b9   :  { %v10075_v56 = vpop.f32.mrb[149].mxu1 }
 0x6ba   :  { %v10076_v42 = vadd.f32 %v10075_v56, %v10074_v43  ;;  %v10077_v40 = vpop.f32.mrb[150].mxu1 }
 0x6bb   :  { %v10078_v39 = vpop.f32.mrb[151].mxu1 }
 0x6bc   :  { %v9132_v53 = vadd.f32 %v10076_v42, %v13419_v8  ;;  %v10079_v60 = vadd.f32 %v10078_v39, %v10077_v40 }
 0x6be   :  { %9152 = vst [vmem:[#allocation17 + $0x70] sm:$0xff] %v9132_v53  ;;  %v9135_v23 = vadd.f32 %v10079_v60, %v13419_v8 }
 0x6c0   :  { %9153 = vst [vmem:[#allocation17 + $0x78] sm:$0xff] %v9135_v23 }
 0x6c1   :  { %11799 = shalt.err (!%p11796_p6)
}
 0x6c2   :  { %s11800_s10 = scalar_lea.hbm %s13461_s9, 2048 }
 0x6c3   :  { %p11801_p7 = scmp.ne.s32.totalorder %s13461_s9, %s11800_s10  ;;  %p11804_p8 = scmp.lt.u32.totalorder %s11800_s10, %s13461_s9 }
 0x6c5   :  { %p11806_p9 = pnand %p11804_p8, %p11801_p7 }
 0x6c7   :  { %11809 = shalt.err (!%p11806_p9)
}
 0x6c8   :  { %9165 = dma.vmem_to_hbm [thread:$0]  %s9160_s2, 2048, %s13461_s9, [#allocation4], %s11829_s3, %s11829_s3, %s11830_s24  }
 0x6c9   :  { %11820 = dma.done.wait [#allocation4], 2048  }
 0x6ca   :  { %11821 = vsyncadd [#allocation4], 4294965248 }
 0x6cb   :  { %9169 = vsyncpa [#allocation3], 1 }
 0x6cc   :  { %9170 = vsyncpa [#allocation6], 1 }
 0x6cd   :  { %9171 = vsyncpa [#allocation9], 1 }
 0x6ce   :  { %9172 = vsyncpa [#allocation12], 1 }
 0x6cf   :  { %9173 = vsyncpa [#allocation15], 1 }
 0x6d0   :  { %9174 = vsyncpa [#allocation4], 1 }

</bundles_post_ra>
